<compile_context>
chip_gen: v7x
topology: tpu7x:2x2x1
jax: 0.10.0
libtpu: 0.0.40
codegen_flags: <defaults>
</compile_context>

<pallas_src>
import functools
import math

import jax
import jax.numpy as jnp
from jax.experimental import pallas as pl
from jax.experimental.pallas import tpu as pltpu


# ----------------------------------------------------------------------------
# Pallas matmul kernels (the conv hot path)
# ----------------------------------------------------------------------------
_LANE_MIN = 128     # below this pixel count, pallas_call overhead > compute


def _round_up(v, m):
    return (v + m - 1) // m * m


def _pad_tile_lane(p):
    """Padded lane (pixel) extent and lane tile."""
    pp = _round_up(p, 128)
    if pp >= 512 and pp % 256 == 0:
        return pp, 256          # full-width MXU pushes on v6e/v7x
    if pp >= 256:
        return pp, 128          # >=2 parallel grid blocks (v7x dual-TC)
    return pp, pp


def _apply_act(x, act):
    if act == "relu":
        return jnp.maximum(x, 0.0)
    if act == "sigmoid":
        return 1.0 / (1.0 + jnp.exp(-x))
    if act == "softplus":
        return jnp.maximum(x, 0.0) + jnp.log(1.0 + jnp.exp(-jnp.abs(x)))
    return x


def _mm_kernel(*refs, act, has_bias, has_res):
    i = 0
    a_ref = refs[i]; i += 1
    b_ref = refs[i]; i += 1
    bias_ref = res_ref = None
    if has_bias:
        bias_ref = refs[i]; i += 1
    if has_res:
        res_ref = refs[i]; i += 1
    o_ref = refs[i]
    acc = jnp.dot(a_ref[...], b_ref[...], preferred_element_type=jnp.float32)
    if has_bias:
        acc = acc + bias_ref[...]          # (R, 1) broadcasts over lanes
    acc = _apply_act(acc, act)
    if has_res:
        acc = acc + res_ref[...]           # fused residual add (f32)
    o_ref[...] = acc.astype(o_ref.dtype)


@functools.lru_cache(maxsize=None)
def _build_matmul(rp, kp, pp, tn, act, has_bias, has_res):
    grid = (pp // tn,)
    in_specs = [pl.BlockSpec((rp, kp), lambda j: (0, 0)),
                pl.BlockSpec((kp, tn), lambda j: (0, j))]
    if has_bias:
        in_specs.append(pl.BlockSpec((rp, 1), lambda j: (0, 0)))
    if has_res:
        in_specs.append(pl.BlockSpec((rp, tn), lambda j: (0, j)))
    kern = functools.partial(_mm_kernel, act=act,
                             has_bias=has_bias, has_res=has_res)
    flops = 2 * rp * kp * pp
    trans = rp * pp if act in ("sigmoid", "softplus") else 0
    bytes_acc = (rp * kp + kp * pp) * 2 + rp * pp * 4
    if has_bias:
        bytes_acc += rp * 4
    if has_res:
        bytes_acc += rp * pp * 4
    return pl.pallas_call(
        kern,
        out_shape=jax.ShapeDtypeStruct((rp, pp), jnp.float32),
        grid=grid,
        in_specs=in_specs,
        out_specs=pl.BlockSpec((rp, tn), lambda j: (0, j)),
        compiler_params=pltpu.CompilerParams(
            dimension_semantics=("parallel",)),
        cost_estimate=pl.CostEstimate(flops=flops, transcendentals=trans,
                                      bytes_accessed=bytes_acc),
    )


def pallas_matmul(A, B, bias=None, residual=None, act=None):
    """Lane-dense conv matmul.

    A: (R=C_out, K) weights, B: (K, P=pixels) patches, bias: (R,),
    residual: (R, P).  Returns (R, P) f32.  Single pass (full-K block),
    bf16 operands, f32 MXU accumulation, fused bias + activation + residual
    epilogue.  Pixels sit on the output lane axis -> unmasked vst stores.
    """
    R, K = A.shape
    K2, P = B.shape
    assert K == K2
    if P < _LANE_MIN:
        # Degenerate sizes: pallas_call dispatch overhead dwarfs the compute.
        out = jnp.dot(A.astype(jnp.float32), B.astype(jnp.float32))
        if bias is not None:
            out = out + bias.astype(jnp.float32)[:, None]
        out = _apply_act(out, act)
        if residual is not None:
            out = out + residual
        return out
    Rp = _round_up(max(R, 8), 8)
    Kp = _round_up(K, 128)
    Pp, TN = _pad_tile_lane(P)
    Ap = A.astype(jnp.bfloat16)
    if (Rp, Kp) != (R, K):
        Ap = jnp.pad(Ap, ((0, Rp - R), (0, Kp - K)))
    Bp = B.astype(jnp.bfloat16)
    if (Kp, Pp) != (K, P):
        Bp = jnp.pad(Bp, ((0, Kp - K), (0, Pp - P)))
    args = [Ap, Bp]
    if bias is not None:
        bq = bias.astype(jnp.float32)
        if Rp != R:
            bq = jnp.pad(bq, (0, Rp - R))
        args.append(bq[:, None])
    if residual is not None:
        rq = residual.astype(jnp.float32)
        if (Rp, Pp) != (R, P):
            rq = jnp.pad(rq, ((0, Rp - R), (0, Pp - P)))
        args.append(rq)
    out = _build_matmul(Rp, Kp, Pp, TN, act, bias is not None,
                        residual is not None)(*args)
    if (Rp, Pp) != (R, P):
        out = out[:R, :P]
    return out


def _bmm_kernel(a_ref, b_ref, o_ref):
    o_ref[...] = jnp.dot(a_ref[...], b_ref[...],
                         preferred_element_type=jnp.float32).astype(o_ref.dtype)


@functools.lru_cache(maxsize=None)
def _build_bmm(nb, rp, kp, pp, tn):
    grid = (nb, pp // tn)
    return pl.pallas_call(
        _bmm_kernel,
        out_shape=jax.ShapeDtypeStruct((nb, rp, pp), jnp.float32),
        grid=grid,
        in_specs=[pl.BlockSpec((None, rp, kp), lambda n, j: (n, 0, 0)),
                  pl.BlockSpec((None, kp, tn), lambda n, j: (n, 0, j))],
        out_specs=pl.BlockSpec((None, rp, tn), lambda n, j: (n, 0, j)),
        compiler_params=pltpu.CompilerParams(
            dimension_semantics=("parallel", "parallel")),
        cost_estimate=pl.CostEstimate(
            flops=2 * nb * rp * kp * pp, transcendentals=0,
            bytes_accessed=nb * ((rp * kp + kp * pp) * 2 + rp * pp * 4)),
    )


def pallas_batched_matmul(A, B):
    """Per-sample weights: A (NB, R, K) x B (NB, K, P) -> (NB, R, P) f32.
    One launch; batch and lane blocks are parallel grid axes; pixels (P) on
    the lane axis of the output (lane-dense stores for the TailNet)."""
    NB, R, K = A.shape
    _, K2, P = B.shape
    assert K == K2
    if P < _LANE_MIN:
        return jnp.einsum('nrk,nkp->nrp',
                          A.astype(jnp.float32), B.astype(jnp.float32))
    Rp = _round_up(max(R, 8), 8)
    Kp = _round_up(K, 128)
    Pp, TN = _pad_tile_lane(P)
    Ap = A.astype(jnp.bfloat16)
    if (Rp, Kp) != (R, K):
        Ap = jnp.pad(Ap, ((0, 0), (0, Rp - R), (0, Kp - K)))
    Bp = B.astype(jnp.bfloat16)
    if (Kp, Pp) != (K, P):
        Bp = jnp.pad(Bp, ((0, 0), (0, Kp - K), (0, Pp - P)))
    out = _build_bmm(NB, Rp, Kp, Pp, TN)(Ap, Bp)
    if (Rp, Pp) != (R, P):
        out = out[:, :R, :P]
    return out


# ----------------------------------------------------------------------------
# Conv primitives (internal layout: channels-leading CNHW -> zero transposes
# between im2col, the matmul, and the next conv)
# ----------------------------------------------------------------------------
def _im2col_cnhw(x, kh, kw, stride=1):
    """x: (C, N, H, W) already spatially padded -> (C*kh*kw, N*Ho*Wo).
    K order is (c, kh, kw) so the weight operand is a plain reshape of the
    PyTorch (C_out, C_in, kh, kw) layout."""
    C, N, H, W = x.shape
    Ho = (H - kh) // stride + 1
    Wo = (W - kw) // stride + 1
    if kh == 1 and kw == 1 and stride == 1:
        return x.reshape(C, N * H * W), Ho, Wo
    cols = []
    for i in range(kh):
        for j in range(kw):
            cols.append(x[:, :, i:i + stride * Ho:stride, j:j + stride * Wo:stride])
    p = jnp.stack(cols, axis=1)                    # (C, kh*kw, N, Ho, Wo)
    return p.reshape(C * kh * kw, N * Ho * Wo), Ho, Wo


def conv2d_cnhw(x, w, b=None, residual=None, stride=1, pad=0, act=None):
    """PyTorch-semantics Conv2d on a (C, N, H, W) tensor with fused
    bias / activation / residual epilogue.  w: (C_out, C_in, kh, kw);
    residual: (C_out, N, Ho, Wo) or None.  Returns (C_out, N, Ho, Wo)."""
    if pad > 0:
        x = jnp.pad(x, ((0, 0), (0, 0), (pad, pad), (pad, pad)))
    C_in, N, _, _ = x.shape
    C_out, _, kh, kw = w.shape
    patches, Ho, Wo = _im2col_cnhw(x, kh, kw, stride)
    A = w.reshape(C_out, C_in * kh * kw)           # no weight transpose needed
    res2d = None if residual is None else residual.reshape(C_out, N * Ho * Wo)
    out = pallas_matmul(A, patches, bias=b, residual=res2d, act=act)
    return out.reshape(C_out, N, Ho, Wo)


def conv_transpose2x2_cnhw(x, w):
    """ConvTranspose2d, kernel=stride=2, no bias, on (C_in, N, H, W).
    w: (C_in, C_out, 2, 2) -> (C_out, N, 2H, 2W)."""
    C_in, N, H, W = x.shape
    C_out = w.shape[1]
    A = jnp.transpose(w, (1, 2, 3, 0)).reshape(C_out * 4, C_in)
    out = pallas_matmul(A, x.reshape(C_in, N * H * W))   # (C_out*4, N*H*W)
    out = out.reshape(C_out, 2, 2, N, H, W)
    out = jnp.transpose(out, (0, 3, 4, 1, 5, 2)).reshape(C_out, N, 2 * H, 2 * W)
    return out


def conv2d_samplewise(x, d):
    """Per-sample conv (TailNet).  x: (N, C_in, H, W) already padded;
    d: (N, C_out, C_in, k, k) -> (N, C_out, Ho, Wo)."""
    N, C, H, W = x.shape
    C_out, k = d.shape[1], d.shape[-1]
    Ho, Wo = H - k + 1, W - k + 1
    cols = [x[:, :, i:i + Ho, j:j + Wo] for i in range(k) for j in range(k)]
    p = jnp.stack(cols, axis=2)                    # (N, C, k*k, Ho, Wo)
    patches = p.reshape(N, C * k * k, Ho * Wo)
    A = d.reshape(N, C_out, C * k * k)             # K order matches patches
    out = pallas_batched_matmul(A, patches)        # (N, C_out, Ho*Wo)
    return out.reshape(N, C_out, Ho, Wo)


def _to_cnhw(x):
    return jnp.transpose(x, (1, 0, 2, 3))


def _to_nchw(x):
    return jnp.transpose(x, (1, 0, 2, 3))


# ----------------------------------------------------------------------------
# FFT / complex helpers (plain JAX glue)
# ----------------------------------------------------------------------------
def p2o(psf, shape):
    """psf: (N, C_out, C_in, k, k) real -> OTF (N, C_out, C_in, H, Wr) complex."""
    H, W = shape
    k1, k2 = psf.shape[-2:]
    otf = jnp.zeros(psf.shape[:-2] + (H, W), psf.dtype)
    otf = otf.at[..., :k1, :k2].set(psf)
    otf = jnp.roll(otf, -int(k1 / 2), axis=-2)
    otf = jnp.roll(otf, -int(k2 / 2), axis=-1)
    return jnp.fft.rfft2(otf)


def solve_fft(X, D, Y, alpha, x_size):
    """X: (N,1,C_in,H,Wr), D: (N,C_out,C_in,H,Wr), Y: (N,C_out,1,H,Wr) complex;
       alpha: (N,1,1,1) real.  Returns real (N, C_in, H, W)."""
    C_in = X.shape[2]
    al = (alpha / C_in)[..., None]                 # (N,1,1,1,1) real
    Dc = jnp.conj(D)
    Z = Y * D + al * X
    factor1 = Z / al
    numerator = (Dc * Z).sum(axis=2, keepdims=True)
    denominator = al * (Dc * D).sum(axis=2, keepdims=True) + al ** 2
    factor2 = D * (numerator / denominator)
    Xo = (factor1 - factor2).mean(axis=1)
    return jnp.fft.irfft2(Xo, s=tuple(x_size))


# ----------------------------------------------------------------------------
# SolveLS (least-squares dictionary update) -- small glue in JAX
# ----------------------------------------------------------------------------
def _cal_xtx(x, ds):
    """x: (N, C, H, W) -> (N, C, C, 2ds-1, 2ds-1)."""
    pad = ds - 1
    N, C, H, W = x.shape
    xp = jnp.pad(x, ((0, 0), (0, 0), (pad, pad), (pad, pad)))
    rows = []
    for dh in range(2 * ds - 1):
        row = []
        for dw in range(2 * ds - 1):
            shifted = xp[:, :, dh:dh + H, dw:dw + W]
            row.append(jnp.einsum('nihw,njhw->nij', x, shifted))
        rows.append(jnp.stack(row, axis=-1))
    return jnp.stack(rows, axis=-2)


def _cal_xty(x, y, ds):
    """x: (N,C_in,H,W), y: (N,C_out,H,W) -> (N, C_out, C_in, ds, ds)."""
    pad = (ds - 1) // 2
    N, C, H, W = x.shape
    xp = jnp.pad(x, ((0, 0), (0, 0), (pad, pad), (pad, pad)))
    rows = []
    for oh in range(ds):
        row = []
        for ow in range(ds):
            shifted = xp[:, :, oh:oh + H, ow:ow + W]
            row.append(jnp.einsum('nohw,nchw->noc', y, shifted))
        rows.append(jnp.stack(row, axis=-1))
    return jnp.stack(rows, axis=-2)


def _unfold(x, k):
    """torch.nn.functional.unfold, stride 1, no pad.  x: (B,C,H,W) -> (B, C*k*k, L)."""
    B, C, H, W = x.shape
    Ho, Wo = H - k + 1, W - k + 1
    patches = []
    for kh in range(k):
        for kw in range(k):
            patches.append(x[:, :, kh:kh + Ho, kw:kw + Wo])
    p = jnp.stack(patches, axis=2)                 # (B, C, k*k, Ho, Wo)
    return p.reshape(B, C * k * k, Ho * Wo)


def solve_ls(x, d, y, alpha, reg):
    """x: (N,1,C_in,H,W), d: (N,C_out,C_in,ds,ds), y: (N,C_out,1,H,W), alpha: (N,1,1,1)."""
    N, _, C_in, H, W = x.shape
    C_out = d.shape[1]
    ds = d.shape[-1]
    xs = x[:, 0]                                   # (N, C_in, H, W)
    ys = y[:, :, 0]                                # (N, C_out, H, W)

    xtx_raw = _cal_xtx(xs, ds)                     # (N, C_in, C_in, 2ds-1, 2ds-1)
    xtx_unf = _unfold(xtx_raw.reshape(N * C_in, C_in, 2 * ds - 1, 2 * ds - 1), ds)
    xtx = xtx_unf.reshape(N, C_in, C_in, ds * ds, ds * ds)
    xtx = xtx[:, :, :, ::-1, :]
    xtx = xtx.reshape(N, -1, ds * ds)
    index = jnp.arange((C_in * ds) ** 2).reshape(C_in, C_in, ds, ds)
    index = index.transpose(0, 2, 3, 1).reshape(-1)
    xtx = xtx[:, index, :]
    M = ds * ds * C_in
    xtx = xtx.reshape(N, M, M)

    xty = _cal_xty(xs, ys, ds)                     # (N, C_out, C_in, ds, ds)
    xty = xty.reshape(N, C_out, -1).transpose(0, 2, 1)  # (N, M, C_out)

    alpha2 = alpha * H * W * reg / (ds * ds * C_in)      # (N,1,1,1)
    xtx = xtx + alpha2.reshape(N, 1, 1) * jnp.eye(M, dtype=xtx.dtype)[None]
    xty = xty + alpha2.reshape(N, 1, 1) * d.reshape(N, C_out, -1).transpose(0, 2, 1)

    # TODO(synk): torch.cholesky + cholesky_solve replaced by a batched linear
    # solve (semantically identical for SPD systems); no Pallas equivalent.
    D = jnp.linalg.solve(xtx, xty)                 # (N, M, C_out)
    d_new = D.reshape(N, C_in, ds, ds, C_out).transpose(0, 4, 1, 2, 3)
    return d_new


# ----------------------------------------------------------------------------
# Sub-networks
# ----------------------------------------------------------------------------
def hypanet_f(p, x):
    """HyPaNet: two 1x1 convs at 1x1 spatial -> plain XLA dot (pallas bypass)."""
    x = (x - 0.098) / 0.0566
    v = x[:, :, 0, 0]                              # (N, in_nc)
    v = v @ p['w1'][:, :, 0, 0].T + p['b1']        # (N, 256)
    v = jax.nn.sigmoid(v)
    v = v @ p['w2'][:, :, 0, 0].T + p['b2']        # (N, 4)
    v = jax.nn.softplus(v)
    return v[:, :, None, None] + 1e-6


def resblock_f(p, x):
    """ResBlock CRC: residual add fused into the second conv's epilogue."""
    r = conv2d_cnhw(x, p['w1'], pad=1, act='relu')
    return conv2d_cnhw(r, p['w2'], pad=1, residual=x)


def netx_f(p, x_nchw):
    x = _to_cnhw(x_nchw)
    x1 = x
    t = x1
    for rb in p['down1_res']:
        t = resblock_f(rb, t)
    x2 = conv2d_cnhw(t, p['down1_conv'], stride=2)
    t = x2
    for rb in p['down2_res']:
        t = resblock_f(rb, t)
    x3 = conv2d_cnhw(t, p['down2_conv'], stride=2)
    t = x3
    for rb in p['down3_res']:
        t = resblock_f(rb, t)
    x4 = conv2d_cnhw(t, p['down3_conv'], stride=2)
    t = x4
    for rb in p['body_res']:
        t = resblock_f(rb, t)
    t = conv_transpose2x2_cnhw(t + x4, p['up3_convT'])
    for rb in p['up3_res']:
        t = resblock_f(rb, t)
    t = conv_transpose2x2_cnhw(t + x3, p['up2_convT'])
    for rb in p['up2_res']:
        t = resblock_f(rb, t)
    t = conv_transpose2x2_cnhw(t + x2, p['up1_convT'])
    for rb in p['up1_res']:
        t = resblock_f(rb, t)
    t = conv2d_cnhw(t + x1[:-1], p['tail'], pad=1)
    return _to_nchw(t)


def netd_f(p, x_nchw):
    x = _to_cnhw(x_nchw)
    x1 = x
    t = conv2d_cnhw(x, p['m1_w1'], b=p['m1_b1'], pad=1, act='relu')
    t = conv2d_cnhw(t, p['m1_w2'], b=p['m1_b2'], pad=1, act='relu')   # fused relu
    t = conv2d_cnhw(t, p['m2_w1'], b=p['m2_b1'], pad=1, act='relu')
    t = conv2d_cnhw(t, p['m2_w2'], b=p['m2_b2'], pad=1, act='relu')   # fused relu
    t = conv2d_cnhw(t, p['m3_w1'], b=p['m3_b1'], pad=1, act='relu')
    t = conv2d_cnhw(t, p['m3_w2'], b=p['m3_b2'], pad=1, residual=x1[:-1])
    return _to_nchw(t)


def two_conv_f(p, x_nchw):
    x = _to_cnhw(x_nchw)
    t = conv2d_cnhw(x, p['w1'], pad=1, act='relu')
    t = conv2d_cnhw(t, p['w2'], pad=1)
    return _to_nchw(t)


def tailnet_f(x, d):
    p = (d.shape[-1] - 1) // 2
    xp = jnp.pad(x, ((0, 0), (0, 0), (p, p), (p, p)), mode='wrap')  # circular
    return conv2d_samplewise(xp, d)


def stage_f(p, x, d, y, Y, alpha_x, beta_x, alpha_d, beta_d, reg):
    H, W = x.shape[-2:]
    Xf = jnp.fft.rfft2(x)[:, None]                 # (N,1,C_in,H,Wr)
    Df = p2o(d, (H, W))                            # (N,C_out,C_in,H,Wr)
    x = solve_fft(Xf, Df, Y, alpha_x, (H, W))      # (N, C_in, H, W)
    bx = jnp.tile(1.0 / jnp.sqrt(beta_x), (1, 1, H, W))
    x = netx_f(p['netx'], jnp.concatenate([x, bx], axis=1))
    d = solve_ls(x[:, None], d, y[:, :, None], alpha_d, reg)
    bd = jnp.tile(1.0 / jnp.sqrt(beta_d), (1, 1, d.shape[3], d.shape[4]))
    N, s0, s1 = d.shape[0], d.shape[1], d.shape[2]
    dflat = d.reshape(N, s0 * s1, d.shape[3], d.shape[4])
    dflat = netd_f(p['netd'], jnp.concatenate([dflat, bd], axis=1))
    d = dflat.reshape(N, s0, s1, dflat.shape[2], dflat.shape[3])
    return x, d


def dcd_f(p, x, X, a, d, sigma, n_iter):
    for i in range(n_iter):
        hypas = hypanet_f(p['hypa'][i], sigma)     # (N,4,1,1)
        alpha_x = hypas[:, 0][..., None]
        beta_x = hypas[:, 1][..., None]
        alpha_d = hypas[:, 2][..., None]
        beta_d = hypas[:, 3][..., None]
        a, d = stage_f(p['body'], a, d, x, X, alpha_x, beta_x, alpha_d, beta_d, 0.001)
    return a, d


def msdcd_f(p, x, X, a_list, d_list, sigma, n_iter, c_iter):
    h, w = x.shape[-2:]
    a_out, d_out = [], []
    for i in range(c_iter):
        out_a, out_d = dcd_f(p['scale'][i], x, X, a_list[i], d_list[i], sigma, n_iter)
        a_out.append(out_a)
        d_out.append(out_d)
        x = x - tailnet_f(out_a, out_d)[..., :h, :w]
        X = jnp.fft.rfft2(x)[:, :, None]
    return a_out, d_out


def fb_f(p, u, v, dx, dy):
    a = jnp.concatenate([u, v], axis=1)
    f = two_conv_f(p['ufx'], a)
    g = two_conv_f(p['ufy'], a)
    N = dx.shape[0]
    sb = (dx.shape[1], dx.shape[2])
    se = (dy.shape[1], dy.shape[2])
    dxf = dx.reshape(N, dx.shape[1] * dx.shape[2], dx.shape[3], dx.shape[4])
    dyf = dy.reshape(N, dy.shape[1] * dy.shape[2], dy.shape[3], dy.shape[4])
    dcat = jnp.concatenate([dxf, dyf], axis=1)
    b = two_conv_f(p['udx'], dcat)
    e = two_conv_f(p['udy'], dcat)
    b = b.reshape(N, sb[0], sb[1], b.shape[2], b.shape[3])
    e = e.reshape(N, se[0], se[1], e.shape[2], e.shape[3])
    return f, g, b, e


def msfb_f(p_list, u, v, dx, dy):
    f_list, g_list, b_list, e_list = [], [], [], []
    for i, p in enumerate(p_list):
        f, g, b, e = fb_f(p, u[i], v[i], dx[i], dy[i])
        f_list.append(f); g_list.append(g); b_list.append(b); e_list.append(e)
    return f_list, g_list, b_list, e_list


def ms_headnet_f(p_list, d_sizes, y, sigma, cfg):
    """d_sizes comes from the STATIC cfg (fixes the TracerBoolConversionError:
    the kernel size must stay a Python int, not a traced param leaf)."""
    N, _, H, W = y.shape
    xs, ds = [], []
    for p, dsz in zip(p_list, d_sizes):
        sg = jnp.tile(sigma, (1, 1, H, W))
        inp = _to_cnhw(jnp.concatenate([y, sg], axis=1))
        h1 = conv2d_cnhw(inp, p['w1'], pad=(dsz - 1) // 2, act='relu')
        x = conv2d_cnhw(h1, p['w2'], pad=1)
        d = jnp.zeros((N, cfg['out_nc'], cfg['nc_x'][0], dsz, dsz), jnp.float32)
        xs.append(_to_nchw(x))
        ds.append(d)
    return xs, ds


# ----------------------------------------------------------------------------
# DCDicL top-level forward
# ----------------------------------------------------------------------------
def _circ_pad_rb(x, pr, pb):
    if pr == 0 and pb == 0:
        return x
    return jnp.pad(x, ((0, 0), (0, 0), (0, pb), (0, pr)), mode='wrap')


def dcdicl_forward(params, x, y, sigma, sigmay, cfg):
    del sigmay  # unused by the reference forward (it calls heady with sigma)
    h, w = y.shape[-2:]
    pb = int(math.ceil(h / 8) * 8 - h)
    pr = int(math.ceil(w / 8) * 8 - w)
    x = _circ_pad_rb(x, pr, pb)
    y = _circ_pad_rb(y, pr, pb)
    X = jnp.fft.rfft2(x)[:, :, None]
    Y = jnp.fft.rfft2(y)[:, :, None]

    ax, dx = ms_headnet_f(params['headx'], cfg['d_size'], x, sigma, cfg)
    ay, dy = ms_headnet_f(params['heady'], cfg['d_size'], y, sigma, cfg)

    predsx, predsy, predsh = [], [], []
    for i in range(cfg['rnn_iter']):
        ax, dx = msdcd_f(params['bodyx'][i], x, X, ax, dx, sigma,
                         cfg['n_iter_x'], cfg['c_iter'])
        ay, dy = msdcd_f(params['bodyy'][i], y, Y, ay, dy, sigma,
                         cfg['n_iter_y'], cfg['c_iter'])
        fax, fay, b, e = msfb_f(params['fb'][i], ax, ay, dx, dy)
        ax, ay, dx, dy = fax, fay, b, e
        rx = ry = None
        for j in range(len(ax)):
            tx = tailnet_f(ax[j], dx[j])
            ty = tailnet_f(ay[j], dy[j])
            rx = tx if rx is None else rx + tx
            ry = ty if ry is None else ry + ty
        predx = rx[..., :h, :w]
        predy = ry[..., :h, :w]
        predsx.append(predx)
        predsy.append(predy)
        predsh.append(0.5 * predx + 0.5 * predy)
        x = rx
        X = jnp.fft.rfft2(x)[:, :, None]
        y = ry
        Y = jnp.fft.rfft2(y)[:, :, None]
    return predsh, predsx, predsy


# ----------------------------------------------------------------------------
# Deterministic parameter initialization
# ----------------------------------------------------------------------------
class KeyGen:
    def __init__(self, seed):
        self.key = jax.random.PRNGKey(seed)

    def __call__(self):
        self.key, sub = jax.random.split(self.key)
        return sub


def _conv_w(kg, cout, cin, k):
    std = 0.5 / math.sqrt(cin * k * k)
    return std * jax.random.normal(kg(), (cout, cin, k, k), jnp.float32)


def _convT_w(kg, cin, cout, k):
    std = 0.5 / math.sqrt(cin * k * k)
    return std * jax.random.normal(kg(), (cin, cout, k, k), jnp.float32)


def _conv_b(kg, cout):
    return 0.01 * jax.random.normal(kg(), (cout,), jnp.float32)


def init_params(kg, cfg):
    nc_x, in_nc, out_nc = cfg['nc_x'], cfg['in_nc'], cfg['out_nc']
    nb, d_size, c_iter, rnn_iter = cfg['nb'], cfg['d_size'], cfg['c_iter'], cfg['rnn_iter']

    def headnet(ds):
        # NOTE: 'ds' is intentionally NOT stored in params (it would become a
        # tracer under jit); static kernel sizes come from cfg['d_size'].
        return dict(w1=_conv_w(kg, nc_x[0], in_nc + 1, ds),
                    w2=_conv_w(kg, nc_x[0], nc_x[0], 3))

    def ms_head():
        return [headnet(d_size[i]) for i in range(c_iter)]

    def hypanet_p():
        return dict(w1=_conv_w(kg, 256, 1, 1), b1=_conv_b(kg, 256),
                    w2=_conv_w(kg, 4, 256, 1), b2=_conv_b(kg, 4))

    def resblock_p(c):
        return dict(w1=_conv_w(kg, c, c, 3), w2=_conv_w(kg, c, c, 3))

    def netx_p():
        innc = nc_x[0] + 1
        return dict(
            down1_res=[resblock_p(innc) for _ in range(nb)],
            down1_conv=_conv_w(kg, nc_x[1], innc, 2),
            down2_res=[resblock_p(nc_x[1]) for _ in range(nb)],
            down2_conv=_conv_w(kg, nc_x[2], nc_x[1], 2),
            down3_res=[resblock_p(nc_x[2]) for _ in range(nb)],
            down3_conv=_conv_w(kg, nc_x[3], nc_x[2], 2),
            body_res=[resblock_p(nc_x[3]) for _ in range(nb)],
            up3_convT=_convT_w(kg, nc_x[3], nc_x[2], 2),
            up3_res=[resblock_p(nc_x[2]) for _ in range(nb)],
            up2_convT=_convT_w(kg, nc_x[2], nc_x[1], 2),
            up2_res=[resblock_p(nc_x[1]) for _ in range(nb)],
            up1_convT=_convT_w(kg, nc_x[1], nc_x[0], 2),
            up1_res=[resblock_p(nc_x[0]) for _ in range(nb)],
            tail=_conv_w(kg, nc_x[0], nc_x[0], 3))

    def netd_p():
        c = out_nc * nc_x[0]
        return dict(
            m1_w1=_conv_w(kg, c, c + 1, 3), m1_b1=_conv_b(kg, c),
            m1_w2=_conv_w(kg, c, c, 3), m1_b2=_conv_b(kg, c),
            m2_w1=_conv_w(kg, c, c, 3), m2_b1=_conv_b(kg, c),
            m2_w2=_conv_w(kg, c, c, 3), m2_b2=_conv_b(kg, c),
            m3_w1=_conv_w(kg, c, c, 3), m3_b1=_conv_b(kg, c),
            m3_w2=_conv_w(kg, c, c, 3), m3_b2=_conv_b(kg, c))

    def dcd_p(n_iter):
        return dict(hypa=[hypanet_p() for _ in range(n_iter)],
                    body=dict(netx=netx_p(), netd=netd_p()))

    def msdcd_p(n_iter):
        return dict(scale=[dcd_p(n_iter) for _ in range(c_iter)])

    def ufb_p():
        return dict(w1=_conv_w(kg, nc_x[0], nc_x[0] * 2, 3),
                    w2=_conv_w(kg, nc_x[0], nc_x[0], 3))

    def udb_p():
        c = out_nc * nc_x[0]
        return dict(w1=_conv_w(kg, c, c * 2, 3), w2=_conv_w(kg, c, c, 3))

    def fb_p():
        return dict(ufx=ufb_p(), ufy=ufb_p(), udx=udb_p(), udy=udb_p())

    return dict(
        headx=ms_head(), heady=ms_head(),
        bodyx=[msdcd_p(cfg['n_iter_x']) for _ in range(rnn_iter)],
        bodyy=[msdcd_p(cfg['n_iter_y']) for _ in range(rnn_iter)],
        fb=[[fb_p() for _ in range(c_iter)] for _ in range(rnn_iter)])


# ----------------------------------------------------------------------------
# Main
# ----------------------------------------------------------------------------
CFG = dict(n_iter_x=1, n_iter_y=1, rnn_iter=1, c_iter=1, in_nc=1,
           nc_x=[8, 16, 32, 64], out_nc=1, nb=1, d_size=[3])

if __name__ == "__main__":
    key = jax.random.PRNGKey(0)
    k1, k2 = jax.random.split(key)
    x = jax.random.uniform(k1, (2, 1, 16, 16), jnp.float32)
    y = jax.random.uniform(k2, (2, 1, 16, 16), jnp.float32)
    sigma = jnp.full((2, 1, 1, 1), 0.1, jnp.float32)
    sigmay = jnp.full((2, 1, 1, 1), 0.1, jnp.float32)

    params = init_params(KeyGen(1), CFG)

    # Whole forward under jit: one XLA program, no per-op host dispatch.
    fwd = jax.jit(lambda p, xx, yy, s, sy: dcdicl_forward(p, xx, yy, s, sy, CFG))
    predsh, predsx, predsy = fwd(params, x, y, sigma, sigmay)
    jax.block_until_ready(predsh[0])
    assert predsh[0].shape == (2, 1, 16, 16)
    print("KERNEL_OK")
</pallas_src>

<mosaic_0001>
module attributes {stable_mosaic.version = 11 : i64} {
  func.func @_mm_kernel(%arg0: i32, %arg1: memref<8x128xbf16, #tpu.memory_space<vmem>>, %arg2: memref<128x256xbf16, #tpu.memory_space<vmem>>, %arg3: memref<8x256xf32, #tpu.memory_space<vmem>>) attributes {dimension_semantics = [#tpu.dimension_semantics<parallel>], iteration_bounds = array<i64: 2>, scalar_prefetch = 0 : i64, scratch_operands = 0 : i64, tpu.core_type = #tpu.core_type<tc>, window_params = [{pipeline_mode = #tpu.pipeline_mode<synchronous>, transform_indices = @transform_0, window_bounds = array<i64: 8, 128>}, {transform_indices = @transform_1, window_bounds = array<i64: 128, 256>}, {transform_indices = @transform_2, window_bounds = array<i64: 8, 256>}]} {
    %c0 = arith.constant 0 : index
    %c0_0 = arith.constant 0 : index
    %0 = vector.load %arg1[%c0, %c0_0] : memref<8x128xbf16, #tpu.memory_space<vmem>>, vector<8x128xbf16>
    %c0_1 = arith.constant 0 : index
    %c0_2 = arith.constant 0 : index
    %1 = vector.load %arg2[%c0_1, %c0_2] : memref<128x256xbf16, #tpu.memory_space<vmem>>, vector<128x256xbf16>
    %cst = arith.constant dense<0.000000e+00> : vector<8x256xf32>
    %2 = tpu.matmul %0, %1, %cst {dimension_numbers = #tpu.dot_dimension_numbers<[1], [0], [0], [1], [0, 0, 1, 1], [], []>} : vector<8x128xbf16>, vector<128x256xbf16>, vector<8x256xf32> -> vector<8x256xf32>
    %cst_3 = arith.constant 0.000000e+00 : f32
    %3 = vector.broadcast %cst_3 : f32 to vector<8x256xf32>
    %4 = arith.maximumf %2, %3 : vector<8x256xf32>
    %c0_4 = arith.constant 0 : index
    %c0_5 = arith.constant 0 : index
    %5 = vector.load %arg3[%c0_4, %c0_5] : memref<8x256xf32, #tpu.memory_space<vmem>>, vector<8x256xf32>
    tpu.vector_store %arg3[%c0_4, %c0_5], %4 {strides = array<i32>} : memref<8x256xf32, #tpu.memory_space<vmem>>, vector<8x256xf32>,
    return
  }
  func.func @transform_0(%arg0: i32) -> (i32, i32) {
    %c0_i32 = arith.constant 0 : i32
    %c0_i32_0 = arith.constant 0 : i32
    %c0_i32_1 = arith.constant 0 : i32
    return %c0_i32, %c0_i32_0 : i32, i32
  }
  func.func @transform_1(%arg0: i32) -> (i32, i32) {
    %c0_i32 = arith.constant 0 : i32
    %c0_i32_0 = arith.constant 0 : i32
    return %c0_i32, %arg0 : i32, i32
  }
  func.func @transform_2(%arg0: i32) -> (i32, i32) {
    %c0_i32 = arith.constant 0 : i32
    %c0_i32_0 = arith.constant 0 : i32
    return %c0_i32, %arg0 : i32, i32
  }
}

module attributes {stable_mosaic.version = 11 : i64} {
  func.func @_mm_kernel(%arg0: i32, %arg1: memref<8x128xbf16, #tpu.memory_space<vmem>>, %arg2: memref<128x256xbf16, #tpu.memory_space<vmem>>, %arg3: memref<8x256xf32, #tpu.memory_space<vmem>>) attributes {dimension_semantics = [#tpu.dimension_semantics<parallel>], iteration_bounds = array<i64: 2>, scalar_prefetch = 0 : i64, scratch_operands = 0 : i64, tpu.core_type = #tpu.core_type<tc>, window_params = [{pipeline_mode = #tpu.pipeline_mode<synchronous>, transform_indices = @transform_0, window_bounds = array<i64: 8, 128>}, {transform_indices = @transform_1, window_bounds = array<i64: 128, 256>}, {transform_indices = @transform_2, window_bounds = array<i64: 8, 256>}]} {
    %c0 = arith.constant 0 : index
    %c0_0 = arith.constant 0 : index
    %0 = vector.load %arg1[%c0, %c0_0] : memref<8x128xbf16, #tpu.memory_space<vmem>>, vector<8x128xbf16>
    %c0_1 = arith.constant 0 : index
    %c0_2 = arith.constant 0 : index
    %1 = vector.load %arg2[%c0_1, %c0_2] : memref<128x256xbf16, #tpu.memory_space<vmem>>, vector<128x256xbf16>
    %cst = arith.constant dense<0.000000e+00> : vector<8x256xf32>
    %2 = tpu.matmul %0, %1, %cst {dimension_numbers = #tpu.dot_dimension_numbers<[1], [0], [0], [1], [0, 0, 1, 1], [], []>} : vector<8x128xbf16>, vector<128x256xbf16>, vector<8x256xf32> -> vector<8x256xf32>
    %c0_3 = arith.constant 0 : index
    %c0_4 = arith.constant 0 : index
    %3 = vector.load %arg3[%c0_3, %c0_4] : memref<8x256xf32, #tpu.memory_space<vmem>>, vector<8x256xf32>
    tpu.vector_store %arg3[%c0_3, %c0_4], %2 {strides = array<i32>} : memref<8x256xf32, #tpu.memory_space<vmem>>, vector<8x256xf32>,
    return
  }
  func.func @transform_0(%arg0: i32) -> (i32, i32) {
    %c0_i32 = arith.constant 0 : i32
    %c0_i32_0 = arith.constant 0 : i32
    %c0_i32_1 = arith.constant 0 : i32
    return %c0_i32, %c0_i32_0 : i32, i32
  }
  func.func @transform_1(%arg0: i32) -> (i32, i32) {
    %c0_i32 = arith.constant 0 : i32
    %c0_i32_0 = arith.constant 0 : i32
    return %c0_i32, %arg0 : i32, i32
  }
  func.func @transform_2(%arg0: i32) -> (i32, i32) {
    %c0_i32 = arith.constant 0 : i32
    %c0_i32_0 = arith.constant 0 : i32
    return %c0_i32, %arg0 : i32, i32
  }
}

module attributes {stable_mosaic.version = 11 : i64} {
  func.func @_mm_kernel(%arg0: i32, %arg1: memref<16x128xbf16, #tpu.memory_space<vmem>>, %arg2: memref<128x256xbf16, #tpu.memory_space<vmem>>, %arg3: memref<16x256xf32, #tpu.memory_space<vmem>>) attributes {dimension_semantics = [#tpu.dimension_semantics<parallel>], iteration_bounds = array<i64: 2>, scalar_prefetch = 0 : i64, scratch_operands = 0 : i64, tpu.core_type = #tpu.core_type<tc>, window_params = [{pipeline_mode = #tpu.pipeline_mode<synchronous>, transform_indices = @transform_0, window_bounds = array<i64: 16, 128>}, {transform_indices = @transform_1, window_bounds = array<i64: 128, 256>}, {transform_indices = @transform_2, window_bounds = array<i64: 16, 256>}]} {
    %c0 = arith.constant 0 : index
    %c0_0 = arith.constant 0 : index
    %0 = vector.load %arg1[%c0, %c0_0] : memref<16x128xbf16, #tpu.memory_space<vmem>>, vector<16x128xbf16>
    %c0_1 = arith.constant 0 : index
    %c0_2 = arith.constant 0 : index
    %1 = vector.load %arg2[%c0_1, %c0_2] : memref<128x256xbf16, #tpu.memory_space<vmem>>, vector<128x256xbf16>
    %cst = arith.constant dense<0.000000e+00> : vector<16x256xf32>
    %2 = tpu.matmul %0, %1, %cst {dimension_numbers = #tpu.dot_dimension_numbers<[1], [0], [0], [1], [0, 0, 1, 1], [], []>} : vector<16x128xbf16>, vector<128x256xbf16>, vector<16x256xf32> -> vector<16x256xf32>
    %cst_3 = arith.constant 0.000000e+00 : f32
    %3 = vector.broadcast %cst_3 : f32 to vector<16x256xf32>
    %4 = arith.maximumf %2, %3 : vector<16x256xf32>
    %c0_4 = arith.constant 0 : index
    %c0_5 = arith.constant 0 : index
    %5 = vector.load %arg3[%c0_4, %c0_5] : memref<16x256xf32, #tpu.memory_space<vmem>>, vector<16x256xf32>
    tpu.vector_store %arg3[%c0_4, %c0_5], %4 {strides = array<i32>} : memref<16x256xf32, #tpu.memory_space<vmem>>, vector<16x256xf32>,
    return
  }
  func.func @transform_0(%arg0: i32) -> (i32, i32) {
    %c0_i32 = arith.constant 0 : i32
    %c0_i32_0 = arith.constant 0 : i32
    %c0_i32_1 = arith.constant 0 : i32
    return %c0_i32, %c0_i32_0 : i32, i32
  }
  func.func @transform_1(%arg0: i32) -> (i32, i32) {
    %c0_i32 = arith.constant 0 : i32
    %c0_i32_0 = arith.constant 0 : i32
    return %c0_i32, %arg0 : i32, i32
  }
  func.func @transform_2(%arg0: i32) -> (i32, i32) {
    %c0_i32 = arith.constant 0 : i32
    %c0_i32_0 = arith.constant 0 : i32
    return %c0_i32, %arg0 : i32, i32
  }
}

module attributes {stable_mosaic.version = 11 : i64} {
  func.func @_mm_kernel(%arg0: i32, %arg1: memref<16x128xbf16, #tpu.memory_space<vmem>>, %arg2: memref<128x256xbf16, #tpu.memory_space<vmem>>, %arg3: memref<16x256xf32, #tpu.memory_space<vmem>>, %arg4: memref<16x256xf32, #tpu.memory_space<vmem>>) attributes {dimension_semantics = [#tpu.dimension_semantics<parallel>], iteration_bounds = array<i64: 2>, scalar_prefetch = 0 : i64, scratch_operands = 0 : i64, tpu.core_type = #tpu.core_type<tc>, window_params = [{pipeline_mode = #tpu.pipeline_mode<synchronous>, transform_indices = @transform_0, window_bounds = array<i64: 16, 128>}, {transform_indices = @transform_1, window_bounds = array<i64: 128, 256>}, {transform_indices = @transform_2, window_bounds = array<i64: 16, 256>}, {transform_indices = @transform_3, window_bounds = array<i64: 16, 256>}]} {
    %c0 = arith.constant 0 : index
    %c0_0 = arith.constant 0 : index
    %0 = vector.load %arg1[%c0, %c0_0] : memref<16x128xbf16, #tpu.memory_space<vmem>>, vector<16x128xbf16>
    %c0_1 = arith.constant 0 : index
    %c0_2 = arith.constant 0 : index
    %1 = vector.load %arg2[%c0_1, %c0_2] : memref<128x256xbf16, #tpu.memory_space<vmem>>, vector<128x256xbf16>
    %cst = arith.constant dense<0.000000e+00> : vector<16x256xf32>
    %2 = tpu.matmul %0, %1, %cst {dimension_numbers = #tpu.dot_dimension_numbers<[1], [0], [0], [1], [0, 0, 1, 1], [], []>} : vector<16x128xbf16>, vector<128x256xbf16>, vector<16x256xf32> -> vector<16x256xf32>
    %c0_3 = arith.constant 0 : index
    %c0_4 = arith.constant 0 : index
    %3 = vector.load %arg3[%c0_3, %c0_4] : memref<16x256xf32, #tpu.memory_space<vmem>>, vector<16x256xf32>
    %4 = arith.addf %2, %3 : vector<16x256xf32>
    %c0_5 = arith.constant 0 : index
    %c0_6 = arith.constant 0 : index
    %5 = vector.load %arg4[%c0_5, %c0_6] : memref<16x256xf32, #tpu.memory_space<vmem>>, vector<16x256xf32>
    tpu.vector_store %arg4[%c0_5, %c0_6], %4 {strides = array<i32>} : memref<16x256xf32, #tpu.memory_space<vmem>>, vector<16x256xf32>,
    return
  }
  func.func @transform_0(%arg0: i32) -> (i32, i32) {
    %c0_i32 = arith.constant 0 : i32
    %c0_i32_0 = arith.constant 0 : i32
    %c0_i32_1 = arith.constant 0 : i32
    return %c0_i32, %c0_i32_0 : i32, i32
  }
  func.func @transform_1(%arg0: i32) -> (i32, i32) {
    %c0_i32 = arith.constant 0 : i32
    %c0_i32_0 = arith.constant 0 : i32
    return %c0_i32, %arg0 : i32, i32
  }
  func.func @transform_2(%arg0: i32) -> (i32, i32) {
    %c0_i32 = arith.constant 0 : i32
    %c0_i32_0 = arith.constant 0 : i32
    return %c0_i32, %arg0 : i32, i32
  }
  func.func @transform_3(%arg0: i32) -> (i32, i32) {
    %c0_i32 = arith.constant 0 : i32
    %c0_i32_0 = arith.constant 0 : i32
    return %c0_i32, %arg0 : i32, i32
  }
}

module attributes {stable_mosaic.version = 11 : i64} {
  func.func @_mm_kernel(%arg0: i32, %arg1: memref<16x128xbf16, #tpu.memory_space<vmem>>, %arg2: memref<128x128xbf16, #tpu.memory_space<vmem>>, %arg3: memref<16x128xf32, #tpu.memory_space<vmem>>) attributes {dimension_semantics = [#tpu.dimension_semantics<parallel>], iteration_bounds = array<i64: 1>, scalar_prefetch = 0 : i64, scratch_operands = 0 : i64, tpu.core_type = #tpu.core_type<tc>, window_params = [{pipeline_mode = #tpu.pipeline_mode<synchronous>, transform_indices = @transform_0, window_bounds = array<i64: 16, 128>}, {transform_indices = @transform_1, window_bounds = array<i64: 128, 128>}, {transform_indices = @transform_2, window_bounds = array<i64: 16, 128>}]} {
    %c0 = arith.constant 0 : index
    %c0_0 = arith.constant 0 : index
    %0 = vector.load %arg1[%c0, %c0_0] : memref<16x128xbf16, #tpu.memory_space<vmem>>, vector<16x128xbf16>
    %c0_1 = arith.constant 0 : index
    %c0_2 = arith.constant 0 : index
    %1 = vector.load %arg2[%c0_1, %c0_2] : memref<128x128xbf16, #tpu.memory_space<vmem>>, vector<128x128xbf16>
    %cst = arith.constant dense<0.000000e+00> : vector<16x128xf32>
    %2 = tpu.matmul %0, %1, %cst {dimension_numbers = #tpu.dot_dimension_numbers<[1], [0], [0], [1], [0, 0, 1, 1], [], []>} : vector<16x128xbf16>, vector<128x128xbf16>, vector<16x128xf32> -> vector<16x128xf32>
    %c0_3 = arith.constant 0 : index
    %c0_4 = arith.constant 0 : index
    %3 = vector.load %arg3[%c0_3, %c0_4] : memref<16x128xf32, #tpu.memory_space<vmem>>, vector<16x128xf32>
    tpu.vector_store %arg3[%c0_3, %c0_4], %2 {strides = array<i32>} : memref<16x128xf32, #tpu.memory_space<vmem>>, vector<16x128xf32>,
    return
  }
  func.func @transform_0(%arg0: i32) -> (i32, i32) {
    %c0_i32 = arith.constant 0 : i32
    %c0_i32_0 = arith.constant 0 : i32
    %c0_i32_1 = arith.constant 0 : i32
    return %c0_i32, %c0_i32_0 : i32, i32
  }
  func.func @transform_1(%arg0: i32) -> (i32, i32) {
    %c0_i32 = arith.constant 0 : i32
    %c0_i32_0 = arith.constant 0 : i32
    return %c0_i32, %arg0 : i32, i32
  }
  func.func @transform_2(%arg0: i32) -> (i32, i32) {
    %c0_i32 = arith.constant 0 : i32
    %c0_i32_0 = arith.constant 0 : i32
    return %c0_i32, %arg0 : i32, i32
  }
}

module attributes {stable_mosaic.version = 11 : i64} {
  func.func @_mm_kernel(%arg0: i32, %arg1: memref<16x256xbf16, #tpu.memory_space<vmem>>, %arg2: memref<256x128xbf16, #tpu.memory_space<vmem>>, %arg3: memref<16x128xf32, #tpu.memory_space<vmem>>) attributes {dimension_semantics = [#tpu.dimension_semantics<parallel>], iteration_bounds = array<i64: 1>, scalar_prefetch = 0 : i64, scratch_operands = 0 : i64, tpu.core_type = #tpu.core_type<tc>, window_params = [{pipeline_mode = #tpu.pipeline_mode<synchronous>, transform_indices = @transform_0, window_bounds = array<i64: 16, 256>}, {transform_indices = @transform_1, window_bounds = array<i64: 256, 128>}, {transform_indices = @transform_2, window_bounds = array<i64: 16, 128>}]} {
    %c0 = arith.constant 0 : index
    %c0_0 = arith.constant 0 : index
    %0 = vector.load %arg1[%c0, %c0_0] : memref<16x256xbf16, #tpu.memory_space<vmem>>, vector<16x256xbf16>
    %c0_1 = arith.constant 0 : index
    %c0_2 = arith.constant 0 : index
    %1 = vector.load %arg2[%c0_1, %c0_2] : memref<256x128xbf16, #tpu.memory_space<vmem>>, vector<256x128xbf16>
    %cst = arith.constant dense<0.000000e+00> : vector<16x128xf32>
    %2 = tpu.matmul %0, %1, %cst {dimension_numbers = #tpu.dot_dimension_numbers<[1], [0], [0], [1], [0, 0, 1, 1], [], []>} : vector<16x256xbf16>, vector<256x128xbf16>, vector<16x128xf32> -> vector<16x128xf32>
    %cst_3 = arith.constant 0.000000e+00 : f32
    %3 = vector.broadcast %cst_3 : f32 to vector<16x128xf32>
    %4 = arith.maximumf %2, %3 : vector<16x128xf32>
    %c0_4 = arith.constant 0 : index
    %c0_5 = arith.constant 0 : index
    %5 = vector.load %arg3[%c0_4, %c0_5] : memref<16x128xf32, #tpu.memory_space<vmem>>, vector<16x128xf32>
    tpu.vector_store %arg3[%c0_4, %c0_5], %4 {strides = array<i32>} : memref<16x128xf32, #tpu.memory_space<vmem>>, vector<16x128xf32>,
    return
  }
  func.func @transform_0(%arg0: i32) -> (i32, i32) {
    %c0_i32 = arith.constant 0 : i32
    %c0_i32_0 = arith.constant 0 : i32
    %c0_i32_1 = arith.constant 0 : i32
    return %c0_i32, %c0_i32_0 : i32, i32
  }
  func.func @transform_1(%arg0: i32) -> (i32, i32) {
    %c0_i32 = arith.constant 0 : i32
    %c0_i32_0 = arith.constant 0 : i32
    return %c0_i32, %arg0 : i32, i32
  }
  func.func @transform_2(%arg0: i32) -> (i32, i32) {
    %c0_i32 = arith.constant 0 : i32
    %c0_i32_0 = arith.constant 0 : i32
    return %c0_i32, %arg0 : i32, i32
  }
}

module attributes {stable_mosaic.version = 11 : i64} {
  func.func @_mm_kernel(%arg0: i32, %arg1: memref<16x256xbf16, #tpu.memory_space<vmem>>, %arg2: memref<256x128xbf16, #tpu.memory_space<vmem>>, %arg3: memref<16x128xf32, #tpu.memory_space<vmem>>, %arg4: memref<16x128xf32, #tpu.memory_space<vmem>>) attributes {dimension_semantics = [#tpu.dimension_semantics<parallel>], iteration_bounds = array<i64: 1>, scalar_prefetch = 0 : i64, scratch_operands = 0 : i64, tpu.core_type = #tpu.core_type<tc>, window_params = [{pipeline_mode = #tpu.pipeline_mode<synchronous>, transform_indices = @transform_0, window_bounds = array<i64: 16, 256>}, {transform_indices = @transform_1, window_bounds = array<i64: 256, 128>}, {transform_indices = @transform_2, window_bounds = array<i64: 16, 128>}, {transform_indices = @transform_3, window_bounds = array<i64: 16, 128>}]} {
    %c0 = arith.constant 0 : index
    %c0_0 = arith.constant 0 : index
    %0 = vector.load %arg1[%c0, %c0_0] : memref<16x256xbf16, #tpu.memory_space<vmem>>, vector<16x256xbf16>
    %c0_1 = arith.constant 0 : index
    %c0_2 = arith.constant 0 : index
    %1 = vector.load %arg2[%c0_1, %c0_2] : memref<256x128xbf16, #tpu.memory_space<vmem>>, vector<256x128xbf16>
    %cst = arith.constant dense<0.000000e+00> : vector<16x128xf32>
    %2 = tpu.matmul %0, %1, %cst {dimension_numbers = #tpu.dot_dimension_numbers<[1], [0], [0], [1], [0, 0, 1, 1], [], []>} : vector<16x256xbf16>, vector<256x128xbf16>, vector<16x128xf32> -> vector<16x128xf32>
    %c0_3 = arith.constant 0 : index
    %c0_4 = arith.constant 0 : index
    %3 = vector.load %arg3[%c0_3, %c0_4] : memref<16x128xf32, #tpu.memory_space<vmem>>, vector<16x128xf32>
    %4 = arith.addf %2, %3 : vector<16x128xf32>
    %c0_5 = arith.constant 0 : index
    %c0_6 = arith.constant 0 : index
    %5 = vector.load %arg4[%c0_5, %c0_6] : memref<16x128xf32, #tpu.memory_space<vmem>>, vector<16x128xf32>
    tpu.vector_store %arg4[%c0_5, %c0_6], %4 {strides = array<i32>} : memref<16x128xf32, #tpu.memory_space<vmem>>, vector<16x128xf32>,
    return
  }
  func.func @transform_0(%arg0: i32) -> (i32, i32) {
    %c0_i32 = arith.constant 0 : i32
    %c0_i32_0 = arith.constant 0 : i32
    %c0_i32_1 = arith.constant 0 : i32
    return %c0_i32, %c0_i32_0 : i32, i32
  }
  func.func @transform_1(%arg0: i32) -> (i32, i32) {
    %c0_i32 = arith.constant 0 : i32
    %c0_i32_0 = arith.constant 0 : i32
    return %c0_i32, %arg0 : i32, i32
  }
  func.func @transform_2(%arg0: i32) -> (i32, i32) {
    %c0_i32 = arith.constant 0 : i32
    %c0_i32_0 = arith.constant 0 : i32
    return %c0_i32, %arg0 : i32, i32
  }
  func.func @transform_3(%arg0: i32) -> (i32, i32) {
    %c0_i32 = arith.constant 0 : i32
    %c0_i32_0 = arith.constant 0 : i32
    return %c0_i32, %arg0 : i32, i32
  }
}

module attributes {stable_mosaic.version = 11 : i64} {
  func.func @_mm_kernel(%arg0: i32, %arg1: memref<32x128xbf16, #tpu.memory_space<vmem>>, %arg2: memref<128x128xbf16, #tpu.memory_space<vmem>>, %arg3: memref<32x128xf32, #tpu.memory_space<vmem>>) attributes {dimension_semantics = [#tpu.dimension_semantics<parallel>], iteration_bounds = array<i64: 1>, scalar_prefetch = 0 : i64, scratch_operands = 0 : i64, tpu.core_type = #tpu.core_type<tc>, window_params = [{pipeline_mode = #tpu.pipeline_mode<synchronous>, transform_indices = @transform_0, window_bounds = array<i64: 32, 128>}, {transform_indices = @transform_1, window_bounds = array<i64: 128, 128>}, {transform_indices = @transform_2, window_bounds = array<i64: 32, 128>}]} {
    %c0 = arith.constant 0 : index
    %c0_0 = arith.constant 0 : index
    %0 = vector.load %arg1[%c0, %c0_0] : memref<32x128xbf16, #tpu.memory_space<vmem>>, vector<32x128xbf16>
    %c0_1 = arith.constant 0 : index
    %c0_2 = arith.constant 0 : index
    %1 = vector.load %arg2[%c0_1, %c0_2] : memref<128x128xbf16, #tpu.memory_space<vmem>>, vector<128x128xbf16>
    %cst = arith.constant dense<0.000000e+00> : vector<32x128xf32>
    %2 = tpu.matmul %0, %1, %cst {dimension_numbers = #tpu.dot_dimension_numbers<[1], [0], [0], [1], [0, 0, 1, 1], [], []>} : vector<32x128xbf16>, vector<128x128xbf16>, vector<32x128xf32> -> vector<32x128xf32>
    %c0_3 = arith.constant 0 : index
    %c0_4 = arith.constant 0 : index
    %3 = vector.load %arg3[%c0_3, %c0_4] : memref<32x128xf32, #tpu.memory_space<vmem>>, vector<32x128xf32>
    tpu.vector_store %arg3[%c0_3, %c0_4], %2 {strides = array<i32>} : memref<32x128xf32, #tpu.memory_space<vmem>>, vector<32x128xf32>,
    return
  }
  func.func @transform_0(%arg0: i32) -> (i32, i32) {
    %c0_i32 = arith.constant 0 : i32
    %c0_i32_0 = arith.constant 0 : i32
    %c0_i32_1 = arith.constant 0 : i32
    return %c0_i32, %c0_i32_0 : i32, i32
  }
  func.func @transform_1(%arg0: i32) -> (i32, i32) {
    %c0_i32 = arith.constant 0 : i32
    %c0_i32_0 = arith.constant 0 : i32
    return %c0_i32, %arg0 : i32, i32
  }
  func.func @transform_2(%arg0: i32) -> (i32, i32) {
    %c0_i32 = arith.constant 0 : i32
    %c0_i32_0 = arith.constant 0 : i32
    return %c0_i32, %arg0 : i32, i32
  }
}

module attributes {stable_mosaic.version = 11 : i64} {
  func.func @_mm_kernel(%arg0: i32, %arg1: memref<8x128xbf16, #tpu.memory_space<vmem>>, %arg2: memref<128x256xbf16, #tpu.memory_space<vmem>>, %arg3: memref<8x256xf32, #tpu.memory_space<vmem>>, %arg4: memref<8x256xf32, #tpu.memory_space<vmem>>) attributes {dimension_semantics = [#tpu.dimension_semantics<parallel>], iteration_bounds = array<i64: 2>, scalar_prefetch = 0 : i64, scratch_operands = 0 : i64, tpu.core_type = #tpu.core_type<tc>, window_params = [{pipeline_mode = #tpu.pipeline_mode<synchronous>, transform_indices = @transform_0, window_bounds = array<i64: 8, 128>}, {transform_indices = @transform_1, window_bounds = array<i64: 128, 256>}, {transform_indices = @transform_2, window_bounds = array<i64: 8, 256>}, {transform_indices = @transform_3, window_bounds = array<i64: 8, 256>}]} {
    %c0 = arith.constant 0 : index
    %c0_0 = arith.constant 0 : index
    %0 = vector.load %arg1[%c0, %c0_0] : memref<8x128xbf16, #tpu.memory_space<vmem>>, vector<8x128xbf16>
    %c0_1 = arith.constant 0 : index
    %c0_2 = arith.constant 0 : index
    %1 = vector.load %arg2[%c0_1, %c0_2] : memref<128x256xbf16, #tpu.memory_space<vmem>>, vector<128x256xbf16>
    %cst = arith.constant dense<0.000000e+00> : vector<8x256xf32>
    %2 = tpu.matmul %0, %1, %cst {dimension_numbers = #tpu.dot_dimension_numbers<[1], [0], [0], [1], [0, 0, 1, 1], [], []>} : vector<8x128xbf16>, vector<128x256xbf16>, vector<8x256xf32> -> vector<8x256xf32>
    %c0_3 = arith.constant 0 : index
    %c0_4 = arith.constant 0 : index
    %3 = vector.load %arg3[%c0_3, %c0_4] : memref<8x256xf32, #tpu.memory_space<vmem>>, vector<8x256xf32>
    %4 = arith.addf %2, %3 : vector<8x256xf32>
    %c0_5 = arith.constant 0 : index
    %c0_6 = arith.constant 0 : index
    %5 = vector.load %arg4[%c0_5, %c0_6] : memref<8x256xf32, #tpu.memory_space<vmem>>, vector<8x256xf32>
    tpu.vector_store %arg4[%c0_5, %c0_6], %4 {strides = array<i32>} : memref<8x256xf32, #tpu.memory_space<vmem>>, vector<8x256xf32>,
    return
  }
  func.func @transform_0(%arg0: i32) -> (i32, i32) {
    %c0_i32 = arith.constant 0 : i32
    %c0_i32_0 = arith.constant 0 : i32
    %c0_i32_1 = arith.constant 0 : i32
    return %c0_i32, %c0_i32_0 : i32, i32
  }
  func.func @transform_1(%arg0: i32) -> (i32, i32) {
    %c0_i32 = arith.constant 0 : i32
    %c0_i32_0 = arith.constant 0 : i32
    return %c0_i32, %arg0 : i32, i32
  }
  func.func @transform_2(%arg0: i32) -> (i32, i32) {
    %c0_i32 = arith.constant 0 : i32
    %c0_i32_0 = arith.constant 0 : i32
    return %c0_i32, %arg0 : i32, i32
  }
  func.func @transform_3(%arg0: i32) -> (i32, i32) {
    %c0_i32 = arith.constant 0 : i32
    %c0_i32_0 = arith.constant 0 : i32
    return %c0_i32, %arg0 : i32, i32
  }
}

module attributes {stable_mosaic.version = 11 : i64} {
  func.func @_mm_kernel(%arg0: i32, %arg1: memref<8x256xbf16, #tpu.memory_space<vmem>>, %arg2: memref<256x256xbf16, #tpu.memory_space<vmem>>, %arg3: memref<8x256xf32, #tpu.memory_space<vmem>>) attributes {dimension_semantics = [#tpu.dimension_semantics<parallel>], iteration_bounds = array<i64: 2>, scalar_prefetch = 0 : i64, scratch_operands = 0 : i64, tpu.core_type = #tpu.core_type<tc>, window_params = [{pipeline_mode = #tpu.pipeline_mode<synchronous>, transform_indices = @transform_0, window_bounds = array<i64: 8, 256>}, {transform_indices = @transform_1, window_bounds = array<i64: 256, 256>}, {transform_indices = @transform_2, window_bounds = array<i64: 8, 256>}]} {
    %c0 = arith.constant 0 : index
    %c0_0 = arith.constant 0 : index
    %0 = vector.load %arg1[%c0, %c0_0] : memref<8x256xbf16, #tpu.memory_space<vmem>>, vector<8x256xbf16>
    %c0_1 = arith.constant 0 : index
    %c0_2 = arith.constant 0 : index
    %1 = vector.load %arg2[%c0_1, %c0_2] : memref<256x256xbf16, #tpu.memory_space<vmem>>, vector<256x256xbf16>
    %cst = arith.constant dense<0.000000e+00> : vector<8x256xf32>
    %2 = tpu.matmul %0, %1, %cst {dimension_numbers = #tpu.dot_dimension_numbers<[1], [0], [0], [1], [0, 0, 1, 1], [], []>} : vector<8x256xbf16>, vector<256x256xbf16>, vector<8x256xf32> -> vector<8x256xf32>
    %cst_3 = arith.constant 0.000000e+00 : f32
    %3 = vector.broadcast %cst_3 : f32 to vector<8x256xf32>
    %4 = arith.maximumf %2, %3 : vector<8x256xf32>
    %c0_4 = arith.constant 0 : index
    %c0_5 = arith.constant 0 : index
    %5 = vector.load %arg3[%c0_4, %c0_5] : memref<8x256xf32, #tpu.memory_space<vmem>>, vector<8x256xf32>
    tpu.vector_store %arg3[%c0_4, %c0_5], %4 {strides = array<i32>} : memref<8x256xf32, #tpu.memory_space<vmem>>, vector<8x256xf32>,
    return
  }
  func.func @transform_0(%arg0: i32) -> (i32, i32) {
    %c0_i32 = arith.constant 0 : i32
    %c0_i32_0 = arith.constant 0 : i32
    %c0_i32_1 = arith.constant 0 : i32
    return %c0_i32, %c0_i32_0 : i32, i32
  }
  func.func @transform_1(%arg0: i32) -> (i32, i32) {
    %c0_i32 = arith.constant 0 : i32
    %c0_i32_0 = arith.constant 0 : i32
    return %c0_i32, %arg0 : i32, i32
  }
  func.func @transform_2(%arg0: i32) -> (i32, i32) {
    %c0_i32 = arith.constant 0 : i32
    %c0_i32_0 = arith.constant 0 : i32
    return %c0_i32, %arg0 : i32, i32
  }
}

module attributes {stable_mosaic.version = 11 : i64} {
  func.func @_bmm_kernel(%arg0: i32, %arg1: i32, %arg2: memref<1x8x128xbf16, #tpu.memory_space<vmem>>, %arg3: memref<1x128x128xbf16, #tpu.memory_space<vmem>>, %arg4: memref<1x8x128xf32, #tpu.memory_space<vmem>>) attributes {dimension_semantics = [#tpu.dimension_semantics<parallel>, #tpu.dimension_semantics<parallel>], iteration_bounds = array<i64: 2, 2>, scalar_prefetch = 0 : i64, scratch_operands = 0 : i64, tpu.core_type = #tpu.core_type<tc>, window_params = [{transform_indices = @transform_0, window_bounds = array<i64: 1, 8, 128>}, {transform_indices = @transform_1, window_bounds = array<i64: 1, 128, 128>}, {transform_indices = @transform_2, window_bounds = array<i64: 1, 8, 128>}]} {
    %c0 = arith.constant 0 : index
    %c0_0 = arith.constant 0 : index
    %c0_1 = arith.constant 0 : index
    %0 = vector.load %arg2[%c0, %c0_0, %c0_1] : memref<1x8x128xbf16, #tpu.memory_space<vmem>>, vector<1x8x128xbf16>
    %1 = vector.shape_cast %0 : vector<1x8x128xbf16> to vector<8x128xbf16>
    %c0_2 = arith.constant 0 : index
    %c0_3 = arith.constant 0 : index
    %c0_4 = arith.constant 0 : index
    %2 = vector.load %arg3[%c0_2, %c0_3, %c0_4] : memref<1x128x128xbf16, #tpu.memory_space<vmem>>, vector<1x128x128xbf16>
    %3 = vector.shape_cast %2 : vector<1x128x128xbf16> to vector<128x128xbf16>
    %cst = arith.constant dense<0.000000e+00> : vector<8x128xf32>
    %4 = tpu.matmul %1, %3, %cst {dimension_numbers = #tpu.dot_dimension_numbers<[1], [0], [0], [1], [0, 0, 1, 1], [], []>} : vector<8x128xbf16>, vector<128x128xbf16>, vector<8x128xf32> -> vector<8x128xf32>
    %c0_5 = arith.constant 0 : index
    %c0_6 = arith.constant 0 : index
    %c0_7 = arith.constant 0 : index
    %5 = vector.load %arg4[%c0_5, %c0_6, %c0_7] : memref<1x8x128xf32, #tpu.memory_space<vmem>>, vector<1x8x128xf32>
    %6 = vector.shape_cast %5 : vector<1x8x128xf32> to vector<8x128xf32>
    %7 = vector.shape_cast %4 : vector<8x128xf32> to vector<1x8x128xf32>
    tpu.vector_store %arg4[%c0_5, %c0_6, %c0_7], %7 {strides = array<i32>} : memref<1x8x128xf32, #tpu.memory_space<vmem>>, vector<1x8x128xf32>,
    return
  }
  func.func @transform_0(%arg0: i32, %arg1: i32) -> (i32, i32, i32) {
    %c0_i32 = arith.constant 0 : i32
    %c0_i32_0 = arith.constant 0 : i32
    %c0_i32_1 = arith.constant 0 : i32
    return %arg0, %c0_i32, %c0_i32_0 : i32, i32, i32
  }
  func.func @transform_1(%arg0: i32, %arg1: i32) -> (i32, i32, i32) {
    %c0_i32 = arith.constant 0 : i32
    %c0_i32_0 = arith.constant 0 : i32
    return %arg0, %c0_i32, %arg1 : i32, i32, i32
  }
  func.func @transform_2(%arg0: i32, %arg1: i32) -> (i32, i32, i32) {
    %c0_i32 = arith.constant 0 : i32
    %c0_i32_0 = arith.constant 0 : i32
    return %arg0, %c0_i32, %arg1 : i32, i32, i32
  }
}

</mosaic_0001>

<bundles_post_ra>
// kernel: _lambda_.45
= control target key start
LH: loop header
LB: loop body
LE: loop exit
PB: predicated region body
PF: predicated region fallthrough
CT: control target
= control target key end

     0   :  { %s565_s9 = smov 0   ;;  %s567_s10 = smov 0   ;;  %s638_s0 = inlined_call_operand.vmem [shape: bf16[8,128], index: 0, kind: input, shape index: {}]   ;;  %s639_s1 = inlined_call_operand.vmem [shape: bf16[128,512], index: 1, kind: input, shape index: {}]   ;;  %s640_s2 = inlined_call_operand.vmem [shape: f32[8,512], index: 2, kind: output, shape index: {}]  }
   0x1   :  { %s569_s11 = smov 0  }
   0x2 LB: > { %s446_s12 = sadd.s32 4294967295, %s547_s11   ;;  %s582_s13 = sadd.s32 1, %s547_s11   ;;  %s547_s11 = sphi %s569_s11, %s643_s11   ;;  %s543_s10 = sphi %s567_s10, %s642_s10   ;;  %s539_s9 = sphi %s565_s9, %s641_s9  }
   0x3   : > { %s37_s14 = ssub.s32 %s547_s11, %s582_s13  ;;  %s40_s15 = sadd.s32 1, %s543_s10 }
   0x4   : > { %p38_p0 = scmp.eq.s32.totalorder %s37_s14, 0  ;;  %p47_p1 = scmp.ne.s32.totalorder %s543_s10, %s539_s9 }
   0x5   : > { %p48_p2 = scmp.eq.s32.totalorder %s547_s11, 0  ;;  %p449_p4 = scmp.ge.s32.totalorder %s547_s11, 2 }
   0x6   : > { %s591_s16 = scalar_select %p38_p0, %s543_s10, %s40_s15  }
   0x7   : > { %p49_p3 = por %p48_p2, %p47_p1  ;;  %102 = sbr.rel (%p449_p4) target bundleno = 26 (0x1a), region = 20 }
   0xe   : > { %105 = sbr.rel (!%p49_p3) target bundleno = 26 (0x1a), region = 24  ;;  %s107_s17 = sand.u32 (%p49_p3), 1, %s543_s10  }
   0xf   : > { %s475_s18 = sshll.u32 (%p49_p3), %s547_s11, 3  ;;  %s450_s19 = sshll.u32 (%p49_p3), %s107_s17, 7 }
  0x10   : > { %s599_s22 = scalar_lea.vmem (%p49_p3), %s639_s1, %s475_s18  ;;  %s109_s23 = scalar_lea.vmem (%p49_p3), [#allocation2], %s450_s19 }
  0x11   : > { %v170_v0 = vld [vmem:[%s599_s22] sm:$0xff] (%p49_p3)  ;;  %v172_v1 = vld [vmem:[%s599_s22 + $0x10] sm:$0xff] (%p49_p3) }
  0x12   : > { %v174_v2 = vld [vmem:[%s599_s22 + $0x20] sm:$0xff] (%p49_p3)  ;;  %171 = vst [vmem:[%s109_s23] sm:$0xff] (%p49_p3), %v170_v0  ;;  %173 = vst [vmem:[%s109_s23 + $0x8] sm:$0xff] (%p49_p3), %v172_v1  ;;  %v176_v3 = vld [vmem:[%s599_s22 + $0x30] sm:$0xff] (%p49_p3) }
  0x13   : > { %175 = vst [vmem:[%s109_s23 + $0x10] sm:$0xff] (%p49_p3), %v174_v2  ;;  %v178_v4 = vld [vmem:[%s599_s22 + $0x40] sm:$0xff] (%p49_p3)  ;;  %v180_v5 = vld [vmem:[%s599_s22 + $0x50] sm:$0xff] (%p49_p3)  ;;  %177 = vst [vmem:[%s109_s23 + $0x18] sm:$0xff] (%p49_p3), %v176_v3 }
  0x14   : > { %179 = vst [vmem:[%s109_s23 + $0x20] sm:$0xff] (%p49_p3), %v178_v4  ;;  %181 = vst [vmem:[%s109_s23 + $0x28] sm:$0xff] (%p49_p3), %v180_v5  ;;  %v182_v6 = vld [vmem:[%s599_s22 + $0x60] sm:$0xff] (%p49_p3)  ;;  %v184_v7 = vld [vmem:[%s599_s22 + $0x70] sm:$0xff] (%p49_p3) }
  0x15   : > { %v186_v8 = vld [vmem:[%s599_s22 + $0x80] sm:$0xff]  ;;  %183 = vst [vmem:[%s109_s23 + $0x30] sm:$0xff] %v182_v6  ;;  %185 = vst [vmem:[%s109_s23 + $0x38] sm:$0xff] %v184_v7  ;;  %v188_v9 = vld [vmem:[%s599_s22 + $0x90] sm:$0xff] }
  0x16   : > { %187 = vst [vmem:[%s109_s23 + $0x40] sm:$0xff] %v186_v8  ;;  %v190_v10 = vld [vmem:[%s599_s22 + $0xa0] sm:$0xff]  ;;  %v192_v11 = vld [vmem:[%s599_s22 + $0xb0] sm:$0xff]  ;;  %189 = vst [vmem:[%s109_s23 + $0x48] sm:$0xff] %v188_v9 }
  0x17   : > { %191 = vst [vmem:[%s109_s23 + $0x50] sm:$0xff] %v190_v10  ;;  %193 = vst [vmem:[%s109_s23 + $0x58] sm:$0xff] %v192_v11  ;;  %v194_v12 = vld [vmem:[%s599_s22 + $0xc0] sm:$0xff]  ;;  %v196_v13 = vld [vmem:[%s599_s22 + $0xd0] sm:$0xff] }
  0x18   : > { %v198_v14 = vld [vmem:[%s599_s22 + $0xe0] sm:$0xff]  ;;  %195 = vst [vmem:[%s109_s23 + $0x60] sm:$0xff] %v194_v12  ;;  %197 = vst [vmem:[%s109_s23 + $0x68] sm:$0xff] %v196_v13  ;;  %v200_v15 = vld [vmem:[%s599_s22 + $0xf0] sm:$0xff] }
  0x19   : > { %199 = vst [vmem:[%s109_s23 + $0x70] sm:$0xff] %v198_v14  ;;  %201 = vst [vmem:[%s109_s23 + $0x78] sm:$0xff] %v200_v15 }
  0x1a PF: > { %p453_p5 = scmp.ge.s32.totalorder %s547_s11, 1  ;;  %p206_p6 = scmp.lt.s32.totalorder %s547_s11, 3 }
  0x1c   : > { %p207_p7 = pnand %p453_p5, %p206_p6 }
  0x1d   : > { %s213_s24 = sand.u32 (!%p207_p7), 1, %s539_s9   ;;  %v549_v16 = vmov (!%p207_p7), 0   ;;  %v242_v33 = vld [vmem:[%s638_s0] sm:$0xf] (!%p207_p7)  ;;  %s455_s29 = sshll.u32 (!%p207_p7), %s446_s12, 1 }
  0x1e   : > { %210 = sbr.rel (%p207_p7) target bundleno = 281 (0x119), region = 62  ;;  %s454_s25 = sshll.u32 (!%p207_p7), %s213_s24, 7  ;;  %371 = vmatprep.mubr.bf16.mxu0 (!%p207_p7), %v549_v16 }
  0x1f   : > { %s215_s26 = scalar_lea.vmem (!%p207_p7), [#allocation2], %s454_s25  ;;  %p236_p8 = scmp.lt.s32.totalorder (!%p207_p7), %s455_s29, 3 }
  0x20   : > { %v501_v17 = vld [vmem:[%s215_s26 + $0x4] ss:$8 sps:$4 sm:$0xff] (!%p207_p7)   ;;  %v503_v18 = vld [vmem:[%s215_s26] ss:$8 sps:$4 sm:$0xff] (!%p207_p7)   ;;  %v504_v19 = vld [vmem:[%s215_s26 + $0x14] ss:$8 sps:$4 sm:$0xff] (!%p207_p7)  }
  0x21   : > { %339 = vmatprep.subr.bf16.mxu0 (!%p207_p7), %v501_v17  ;;  %v506_v20 = vld [vmem:[%s215_s26 + $0x10] ss:$8 sps:$4 sm:$0xff] (!%p207_p7)   ;;  %v507_v21 = vld [vmem:[%s215_s26 + $0x24] ss:$8 sps:$4 sm:$0xff] (!%p207_p7)   ;;  %v509_v22 = vld [vmem:[%s215_s26 + $0x20] ss:$8 sps:$4 sm:$0xff] (!%p207_p7)  }
  0x22   : > { %340 = vmatpush1.bf16.msra.mxu0 (!%p207_p7), %v503_v18  ;;  %v510_v23 = vld [vmem:[%s215_s26 + $0x34] ss:$8 sps:$4 sm:$0xff] (!%p207_p7)   ;;  %v512_v24 = vld [vmem:[%s215_s26 + $0x30] ss:$8 sps:$4 sm:$0xff] (!%p207_p7)   ;;  %v513_v25 = vld [vmem:[%s215_s26 + $0x44] ss:$8 sps:$4 sm:$0xff] (!%p207_p7)  }
  0x23   : > { %341 = vmatprep.subr.bf16.mxu0 (!%p207_p7), %v504_v19  ;;  %v515_v26 = vld [vmem:[%s215_s26 + $0x40] ss:$8 sps:$4 sm:$0xff] (!%p207_p7)   ;;  %v516_v27 = vld [vmem:[%s215_s26 + $0x54] ss:$8 sps:$4 sm:$0xff] (!%p207_p7)   ;;  %v518_v28 = vld [vmem:[%s215_s26 + $0x50] ss:$8 sps:$4 sm:$0xff] (!%p207_p7)  }
  0x24   : > { %v519_v29 = vld [vmem:[%s215_s26 + $0x64] ss:$8 sps:$4 sm:$0xff] (!%p207_p7)   ;;  %v521_v30 = vld [vmem:[%s215_s26 + $0x60] ss:$8 sps:$4 sm:$0xff] (!%p207_p7)   ;;  %v522_v31 = vld [vmem:[%s215_s26 + $0x74] ss:$8 sps:$4 sm:$0xff] (!%p207_p7)  }
  0x25   : > { %v524_v32 = vld [vmem:[%s215_s26 + $0x70] ss:$8 sps:$4 sm:$0xff]   ;;  %s645_s29 = smov (!%p236_p8, %s455_s29), 3 }
  0x26   : > { %342 = vmatpush1.bf16.msra.mxu0 %v506_v20  ;;  %s456_s30 = sshll.u32 %s645_s29, 3 }
  0x27   : > { %343 = vmatprep.subr.bf16.mxu0 %v507_v21  ;;  %s239_s5 = scalar_lea.vmem %s640_s2, %s456_s30 }
  0x2a   : > { %344 = vmatpush1.bf16.msra.mxu0 %v509_v22 }
  0x2b   : > { %345 = vmatprep.subr.bf16.mxu0 %v510_v23 }
  0x2e   : > { %346 = vmatpush1.bf16.msra.mxu0 %v512_v24 }
  0x2f   : > { %347 = vmatprep.subr.bf16.mxu0 %v513_v25 }
  0x32   : > { %348 = vmatpush1.bf16.msra.mxu0 %v515_v26 }
  0x33   : > { %349 = vmatprep.subr.bf16.mxu0 %v516_v27 }
  0x36   : > { %350 = vmatpush1.bf16.msra.mxu0 %v518_v28 }
  0x37   : > { %351 = vmatprep.subr.bf16.mxu0 %v519_v29 }
  0x3a   : > { %352 = vmatpush1.bf16.msra.mxu0 %v521_v30 }
  0x3b   : > { %353 = vmatprep.subr.bf16.mxu0 %v522_v31 }
  0x3e   : > { %354 = vmatpush1.bf16.msra.mxu0 %v524_v32 }
  0x41   : > { %372 = vmatmul.mubr.bf16.vlgmr.msra.gmra.mrb[0].mxu0 %v242_v33 }
 0x114   : > { %v373_v34 = vpop.f32.mrb[0].mxu0 }
 0x115   : > { %v380_v35 = vmax.f32 %v373_v34, 0.0  ;;  %v375_v36 = vpop.f32.mrb[1].mxu0 }
 0x116   : > { %v381_v37 = vmax.f32 %v375_v36, 0.0  ;;  %v377_v38 = vpop.f32.mrb[2].mxu0 }
 0x117   : > { %382 = vst [vmem:[%s239_s5] sm:$0xff] %v380_v35  ;;  %v378_v39 = vpop.f32.mrb[3].mxu0 }
 0x118   : > { %383 = vst [vmem:[%s239_s5 + $0x8] sm:$0xff] %v381_v37 }
 0x119 PF: > { %p9_p9 = scmp.ge.s32.totalorder %s582_s13, 4   ;;  %s641_s9 = smov %s543_s10 }
 0x11a   : > { %s642_s10 = smov %s591_s16  ;;  %s643_s11 = smov %s582_s13 }
 0x11b   :  { %11 = sbr.rel (!%p9_p9) target bundleno = 2 (0x2), region = 101 }

// kernel: _lambda_.46
= control target key start
LH: loop header
LB: loop body
LE: loop exit
PB: predicated region body
PF: predicated region fallthrough
CT: control target
= control target key end

     0   :  { %s563_s9 = smov 0   ;;  %s565_s10 = smov 0   ;;  %s636_s0 = inlined_call_operand.vmem [shape: bf16[8,128], index: 0, kind: input, shape index: {}]   ;;  %s637_s1 = inlined_call_operand.vmem [shape: bf16[128,512], index: 1, kind: input, shape index: {}]   ;;  %s638_s2 = inlined_call_operand.vmem [shape: f32[8,512], index: 2, kind: output, shape index: {}]  }
   0x1   :  { %s567_s11 = smov 0  }
   0x2 LB: > { %s444_s12 = sadd.s32 4294967295, %s545_s11   ;;  %s580_s13 = sadd.s32 1, %s545_s11   ;;  %s545_s11 = sphi %s567_s11, %s641_s11   ;;  %s541_s10 = sphi %s565_s10, %s640_s10   ;;  %s537_s9 = sphi %s563_s9, %s639_s9  }
   0x3   : > { %s37_s14 = ssub.s32 %s545_s11, %s580_s13  ;;  %s40_s15 = sadd.s32 1, %s541_s10 }
   0x4   : > { %p38_p0 = scmp.eq.s32.totalorder %s37_s14, 0  ;;  %p47_p1 = scmp.ne.s32.totalorder %s541_s10, %s537_s9 }
   0x5   : > { %p48_p2 = scmp.eq.s32.totalorder %s545_s11, 0  ;;  %p447_p4 = scmp.ge.s32.totalorder %s545_s11, 2 }
   0x6   : > { %s589_s16 = scalar_select %p38_p0, %s541_s10, %s40_s15  }
   0x7   : > { %p49_p3 = por %p48_p2, %p47_p1  ;;  %102 = sbr.rel (%p447_p4) target bundleno = 26 (0x1a), region = 20 }
   0xe   : > { %105 = sbr.rel (!%p49_p3) target bundleno = 26 (0x1a), region = 24  ;;  %s107_s17 = sand.u32 (%p49_p3), 1, %s541_s10  }
   0xf   : > { %s473_s18 = sshll.u32 (%p49_p3), %s545_s11, 3  ;;  %s448_s19 = sshll.u32 (%p49_p3), %s107_s17, 7 }
  0x10   : > { %s597_s22 = scalar_lea.vmem (%p49_p3), %s637_s1, %s473_s18  ;;  %s109_s23 = scalar_lea.vmem (%p49_p3), [#allocation2], %s448_s19 }
  0x11   : > { %v170_v0 = vld [vmem:[%s597_s22] sm:$0xff] (%p49_p3)  ;;  %v172_v1 = vld [vmem:[%s597_s22 + $0x10] sm:$0xff] (%p49_p3) }
  0x12   : > { %v174_v2 = vld [vmem:[%s597_s22 + $0x20] sm:$0xff] (%p49_p3)  ;;  %171 = vst [vmem:[%s109_s23] sm:$0xff] (%p49_p3), %v170_v0  ;;  %173 = vst [vmem:[%s109_s23 + $0x8] sm:$0xff] (%p49_p3), %v172_v1  ;;  %v176_v3 = vld [vmem:[%s597_s22 + $0x30] sm:$0xff] (%p49_p3) }
  0x13   : > { %175 = vst [vmem:[%s109_s23 + $0x10] sm:$0xff] (%p49_p3), %v174_v2  ;;  %v178_v4 = vld [vmem:[%s597_s22 + $0x40] sm:$0xff] (%p49_p3)  ;;  %v180_v5 = vld [vmem:[%s597_s22 + $0x50] sm:$0xff] (%p49_p3)  ;;  %177 = vst [vmem:[%s109_s23 + $0x18] sm:$0xff] (%p49_p3), %v176_v3 }
  0x14   : > { %179 = vst [vmem:[%s109_s23 + $0x20] sm:$0xff] (%p49_p3), %v178_v4  ;;  %181 = vst [vmem:[%s109_s23 + $0x28] sm:$0xff] (%p49_p3), %v180_v5  ;;  %v182_v6 = vld [vmem:[%s597_s22 + $0x60] sm:$0xff] (%p49_p3)  ;;  %v184_v7 = vld [vmem:[%s597_s22 + $0x70] sm:$0xff] (%p49_p3) }
  0x15   : > { %v186_v8 = vld [vmem:[%s597_s22 + $0x80] sm:$0xff]  ;;  %183 = vst [vmem:[%s109_s23 + $0x30] sm:$0xff] %v182_v6  ;;  %185 = vst [vmem:[%s109_s23 + $0x38] sm:$0xff] %v184_v7  ;;  %v188_v9 = vld [vmem:[%s597_s22 + $0x90] sm:$0xff] }
  0x16   : > { %187 = vst [vmem:[%s109_s23 + $0x40] sm:$0xff] %v186_v8  ;;  %v190_v10 = vld [vmem:[%s597_s22 + $0xa0] sm:$0xff]  ;;  %v192_v11 = vld [vmem:[%s597_s22 + $0xb0] sm:$0xff]  ;;  %189 = vst [vmem:[%s109_s23 + $0x48] sm:$0xff] %v188_v9 }
  0x17   : > { %191 = vst [vmem:[%s109_s23 + $0x50] sm:$0xff] %v190_v10  ;;  %193 = vst [vmem:[%s109_s23 + $0x58] sm:$0xff] %v192_v11  ;;  %v194_v12 = vld [vmem:[%s597_s22 + $0xc0] sm:$0xff]  ;;  %v196_v13 = vld [vmem:[%s597_s22 + $0xd0] sm:$0xff] }
  0x18   : > { %v198_v14 = vld [vmem:[%s597_s22 + $0xe0] sm:$0xff]  ;;  %195 = vst [vmem:[%s109_s23 + $0x60] sm:$0xff] %v194_v12  ;;  %197 = vst [vmem:[%s109_s23 + $0x68] sm:$0xff] %v196_v13  ;;  %v200_v15 = vld [vmem:[%s597_s22 + $0xf0] sm:$0xff] }
  0x19   : > { %199 = vst [vmem:[%s109_s23 + $0x70] sm:$0xff] %v198_v14  ;;  %201 = vst [vmem:[%s109_s23 + $0x78] sm:$0xff] %v200_v15 }
  0x1a PF: > { %p451_p5 = scmp.ge.s32.totalorder %s545_s11, 1  ;;  %p206_p6 = scmp.lt.s32.totalorder %s545_s11, 3 }
  0x1c   : > { %p207_p7 = pnand %p451_p5, %p206_p6 }
  0x1d   : > { %s213_s24 = sand.u32 (!%p207_p7), 1, %s537_s9   ;;  %v547_v16 = vmov (!%p207_p7), 0   ;;  %v242_v33 = vld [vmem:[%s636_s0] sm:$0xf] (!%p207_p7)  ;;  %s453_s29 = sshll.u32 (!%p207_p7), %s444_s12, 1 }
  0x1e   : > { %210 = sbr.rel (%p207_p7) target bundleno = 280 (0x118), region = 62  ;;  %s452_s25 = sshll.u32 (!%p207_p7), %s213_s24, 7  ;;  %371 = vmatprep.mubr.bf16.mxu0 (!%p207_p7), %v547_v16 }
  0x1f   : > { %s215_s26 = scalar_lea.vmem (!%p207_p7), [#allocation2], %s452_s25  ;;  %p236_p8 = scmp.lt.s32.totalorder (!%p207_p7), %s453_s29, 3 }
  0x20   : > { %v499_v17 = vld [vmem:[%s215_s26 + $0x4] ss:$8 sps:$4 sm:$0xff] (!%p207_p7)   ;;  %v501_v18 = vld [vmem:[%s215_s26] ss:$8 sps:$4 sm:$0xff] (!%p207_p7)   ;;  %v502_v19 = vld [vmem:[%s215_s26 + $0x14] ss:$8 sps:$4 sm:$0xff] (!%p207_p7)  }
  0x21   : > { %339 = vmatprep.subr.bf16.mxu0 (!%p207_p7), %v499_v17  ;;  %v504_v20 = vld [vmem:[%s215_s26 + $0x10] ss:$8 sps:$4 sm:$0xff] (!%p207_p7)   ;;  %v505_v21 = vld [vmem:[%s215_s26 + $0x24] ss:$8 sps:$4 sm:$0xff] (!%p207_p7)   ;;  %v507_v22 = vld [vmem:[%s215_s26 + $0x20] ss:$8 sps:$4 sm:$0xff] (!%p207_p7)  }
  0x22   : > { %340 = vmatpush1.bf16.msra.mxu0 (!%p207_p7), %v501_v18  ;;  %v508_v23 = vld [vmem:[%s215_s26 + $0x34] ss:$8 sps:$4 sm:$0xff] (!%p207_p7)   ;;  %v510_v24 = vld [vmem:[%s215_s26 + $0x30] ss:$8 sps:$4 sm:$0xff] (!%p207_p7)   ;;  %v511_v25 = vld [vmem:[%s215_s26 + $0x44] ss:$8 sps:$4 sm:$0xff] (!%p207_p7)  }
  0x23   : > { %341 = vmatprep.subr.bf16.mxu0 (!%p207_p7), %v502_v19  ;;  %v513_v26 = vld [vmem:[%s215_s26 + $0x40] ss:$8 sps:$4 sm:$0xff] (!%p207_p7)   ;;  %v514_v27 = vld [vmem:[%s215_s26 + $0x54] ss:$8 sps:$4 sm:$0xff] (!%p207_p7)   ;;  %v516_v28 = vld [vmem:[%s215_s26 + $0x50] ss:$8 sps:$4 sm:$0xff] (!%p207_p7)  }
  0x24   : > { %v517_v29 = vld [vmem:[%s215_s26 + $0x64] ss:$8 sps:$4 sm:$0xff] (!%p207_p7)   ;;  %v519_v30 = vld [vmem:[%s215_s26 + $0x60] ss:$8 sps:$4 sm:$0xff] (!%p207_p7)   ;;  %v520_v31 = vld [vmem:[%s215_s26 + $0x74] ss:$8 sps:$4 sm:$0xff] (!%p207_p7)  }
  0x25   : > { %v522_v32 = vld [vmem:[%s215_s26 + $0x70] ss:$8 sps:$4 sm:$0xff]   ;;  %s643_s29 = smov (!%p236_p8, %s453_s29), 3 }
  0x26   : > { %342 = vmatpush1.bf16.msra.mxu0 %v504_v20  ;;  %s454_s30 = sshll.u32 %s643_s29, 3 }
  0x27   : > { %343 = vmatprep.subr.bf16.mxu0 %v505_v21  ;;  %s239_s5 = scalar_lea.vmem %s638_s2, %s454_s30 }
  0x2a   : > { %344 = vmatpush1.bf16.msra.mxu0 %v507_v22 }
  0x2b   : > { %345 = vmatprep.subr.bf16.mxu0 %v508_v23 }
  0x2e   : > { %346 = vmatpush1.bf16.msra.mxu0 %v510_v24 }
  0x2f   : > { %347 = vmatprep.subr.bf16.mxu0 %v511_v25 }
  0x32   : > { %348 = vmatpush1.bf16.msra.mxu0 %v513_v26 }
  0x33   : > { %349 = vmatprep.subr.bf16.mxu0 %v514_v27 }
  0x36   : > { %350 = vmatpush1.bf16.msra.mxu0 %v516_v28 }
  0x37   : > { %351 = vmatprep.subr.bf16.mxu0 %v517_v29 }
  0x3a   : > { %352 = vmatpush1.bf16.msra.mxu0 %v519_v30 }
  0x3b   : > { %353 = vmatprep.subr.bf16.mxu0 %v520_v31 }
  0x3e   : > { %354 = vmatpush1.bf16.msra.mxu0 %v522_v32 }
  0x41   : > { %372 = vmatmul.mubr.bf16.vlgmr.msra.gmra.mrb[0].mxu0 %v242_v33 }
 0x114   : > { %v373_v34 = vpop.f32.mrb[0].mxu0 }
 0x115   : > { %380 = vst [vmem:[%s239_s5] sm:$0xff] %v373_v34  ;;  %v375_v35 = vpop.f32.mrb[1].mxu0 }
 0x116   : > { %381 = vst [vmem:[%s239_s5 + $0x8] sm:$0xff] %v375_v35  ;;  %v377_v36 = vpop.f32.mrb[2].mxu0 }
 0x117   : > { %v378_v37 = vpop.f32.mrb[3].mxu0 }
 0x118 PF: > { %p9_p9 = scmp.ge.s32.totalorder %s580_s13, 4   ;;  %s639_s9 = smov %s541_s10 }
 0x119   : > { %s640_s10 = smov %s589_s16  ;;  %s641_s11 = smov %s580_s13 }
 0x11a   :  { %11 = sbr.rel (!%p9_p9) target bundleno = 2 (0x2), region = 101 }

// kernel: reverse.7
= control target key start
LH: loop header
LB: loop body
LE: loop exit
PB: predicated region body
PF: predicated region fallthrough
CT: control target
= control target key end

     0   :  { %v103_v3 = vlaneseq  ;;  %v96_v18 = vld [vmem:[#allocation0 + $0x7] ss:$-1 sm:$0xff]  ;;  %v110_v19 = vld [vmem:[#allocation0 + $0x17] ss:$-1 sm:$0xff]  ;;  %s604_s0 = inlined_call_operand.vmem [shape: f32[2,8,16,7], index: 0, kind: input, shape index: {}]   ;;  %s605_s1 = inlined_call_operand.vmem [shape: f32[2,8,16,7], index: 1, kind: output, shape index: {}]  }
   0x1   :  { %v60_v0 = vld [vmem:[%s604_s0] sm:$0xff]  ;;  %v62_v1 = vld [vmem:[%s604_s0 + $0x8] sm:$0xff]  ;;  %v64_v2 = vld [vmem:[%s604_s0 + $0x10] sm:$0xff]  ;;  %v97_v20 = vrot.slane %v96_v18, 1  ;;  %v111_v21 = vrot.slane %v110_v19, 1 }
   0x2   :  { %61 = vst [vmem:[#allocation0 + $0x8] sm:$0xff] %v60_v0  ;;  %63 = vst [vmem:[#allocation0 + $0x18] sm:$0xff] %v62_v1  ;;  %v66_v4 = vld [vmem:[%s604_s0 + $0x18] sm:$0xff]  ;;  %v68_v5 = vld [vmem:[%s604_s0 + $0x20] sm:$0xff]  ;;  %v500_v10 = vshrl.u32 %v103_v3, 7 }
   0x3   :  { %65 = vst [vmem:[#allocation0 + $0x28] sm:$0xff] %v64_v2  ;;  %v70_v6 = vld [vmem:[%s604_s0 + $0x28] sm:$0xff]  ;;  %67 = vst [vmem:[#allocation0 + $0x38] sm:$0xff] %v66_v4  ;;  %v72_v7 = vld [vmem:[%s604_s0 + $0x30] sm:$0xff] }
   0x4   :  { %69 = vst [vmem:[#allocation0 + $0x48] sm:$0xff] %v68_v5  ;;  %71 = vst [vmem:[#allocation0 + $0x58] sm:$0xff] %v70_v6  ;;  %v74_v8 = vld [vmem:[%s604_s0 + $0x38] sm:$0xff]  ;;  %v76_v9 = vld [vmem:[%s604_s0 + $0x40] sm:$0xff]  ;;  %vm105_vm0 = vcmp.lt.s32.totalorder %v500_v10, 7 }
   0x5   :  { %73 = vst [vmem:[#allocation0 + $0x68] sm:$0xff] %v72_v7  ;;  %75 = vst [vmem:[#allocation0 + $0x78] sm:$0xff] %v74_v8  ;;  %v78_v11 = vld [vmem:[%s604_s0 + $0x48] sm:$0xff]  ;;  %v80_v12 = vld [vmem:[%s604_s0 + $0x50] sm:$0xff] }
   0x6   :  { %77 = vst [vmem:[#allocation0 + $0x88] sm:$0xff] %v76_v9  ;;  %v82_v13 = vld [vmem:[%s604_s0 + $0x58] sm:$0xff]  ;;  %79 = vst [vmem:[#allocation0 + $0x98] sm:$0xff] %v78_v11  ;;  %v84_v14 = vld [vmem:[%s604_s0 + $0x60] sm:$0xff] }
   0x7   :  { %81 = vst [vmem:[#allocation0 + $0xa8] sm:$0xff] %v80_v12  ;;  %83 = vst [vmem:[#allocation0 + $0xb8] sm:$0xff] %v82_v13  ;;  %v86_v15 = vld [vmem:[%s604_s0 + $0x68] sm:$0xff]  ;;  %v88_v16 = vld [vmem:[%s604_s0 + $0x70] sm:$0xff] }
   0x8   :  { %85 = vst [vmem:[#allocation0 + $0xc8] sm:$0xff] %v84_v14  ;;  %87 = vst [vmem:[#allocation0 + $0xd8] sm:$0xff] %v86_v15  ;;  %v90_v17 = vld [vmem:[%s604_s0 + $0x78] sm:$0xff]  ;;  %v124_v22 = vld [vmem:[#allocation0 + $0x27] ss:$-1 sm:$0xff] }
   0x9   :  { %89 = vst [vmem:[#allocation0 + $0xe8] sm:$0xff] %v88_v16  ;;  %91 = vst [vmem:[#allocation0 + $0xf8] sm:$0xff] %v90_v17  ;;  %v138_v23 = vld [vmem:[#allocation0 + $0x37] ss:$-1 sm:$0xff]  ;;  %v125_v24 = vrot.slane %v124_v22, 1 }
   0xa   :  { %v139_v25 = vrot.slane %v138_v23, 1  ;;  %v152_v26 = vld [vmem:[#allocation0 + $0x47] ss:$-1 sm:$0xff]  ;;  %v166_v27 = vld [vmem:[#allocation0 + $0x57] ss:$-1 sm:$0xff]  ;;  %98 = vst [vmem:[#allocation1] sm:$0xff] %v97_v20 }
   0xb   :  { %v101_v28 = vld [vmem:[#allocation0 + $0xf] ss:$-1 sm:$0xff]  ;;  %112 = vst [vmem:[#allocation1 + $0x8] sm:$0xff] %v111_v21  ;;  %v115_v29 = vld [vmem:[#allocation0 + $0x1f] ss:$-1 sm:$0xff]  ;;  %126 = vst [vmem:[#allocation1 + $0x10] sm:$0xff] %v125_v24 }
   0xc   :  { %v129_v30 = vld [vmem:[#allocation0 + $0x2f] ss:$-1 sm:$0xff]  ;;  %v102_v31 = vrot.slane %v101_v28, 1  ;;  %v116_v32 = vrot.slane %v115_v29, 1  ;;  %140 = vst [vmem:[#allocation1 + $0x18] sm:$0xff] %v139_v25  ;;  %v153_v35 = vrot.slane %v152_v26, 1 }
   0xd   :  { %v130_v33 = vrot.slane %v129_v30, 1  ;;  %v143_v34 = vld [vmem:[#allocation0 + $0x3f] ss:$-1 sm:$0xff]  ;;  %v157_v37 = vld [vmem:[#allocation0 + $0x4f] ss:$-1 sm:$0xff]  ;;  %v167_v38 = vrot.slane %v166_v27, 1 }
   0xe   :  { %v144_v36 = vrot.slane %v143_v34, 1  ;;  %v171_v39 = vld [vmem:[#allocation0 + $0x5f] ss:$-1 sm:$0xff]  ;;  %106 = vst.msk [vmem:[#allocation1] sm:$0xff] %vm105_vm0, %v102_v31  ;;  %120 = vst.msk [vmem:[#allocation1 + $0x8] sm:$0xff] %vm105_vm0, %v116_v32  ;;  %v158_v40 = vrot.slane %v157_v37, 1 }
   0xf   :  { %134 = vst.msk [vmem:[#allocation1 + $0x10] sm:$0xff] %vm105_vm0, %v130_v33  ;;  %154 = vst [vmem:[#allocation1 + $0x20] sm:$0xff] %v153_v35  ;;  %v172_v41 = vrot.slane %v171_v39, 1  ;;  %v180_v42 = vld [vmem:[#allocation0 + $0x67] ss:$-1 sm:$0xff] }
  0x10   :  { %v185_v43 = vld [vmem:[#allocation0 + $0x6f] ss:$-1 sm:$0xff]  ;;  %148 = vst.msk [vmem:[#allocation1 + $0x18] sm:$0xff] %vm105_vm0, %v144_v36  ;;  %168 = vst [vmem:[#allocation1 + $0x28] sm:$0xff] %v167_v38  ;;  %v181_v44 = vrot.slane %v180_v42, 1 }
  0x11   :  { %v186_v45 = vrot.slane %v185_v43, 1  ;;  %v194_v46 = vld [vmem:[#allocation0 + $0x77] ss:$-1 sm:$0xff]  ;;  %v199_v47 = vld [vmem:[#allocation0 + $0x7f] ss:$-1 sm:$0xff]  ;;  %162 = vst.msk [vmem:[#allocation1 + $0x20] sm:$0xff] %vm105_vm0, %v158_v40 }
  0x12   :  { %176 = vst.msk [vmem:[#allocation1 + $0x28] sm:$0xff] %vm105_vm0, %v172_v41  ;;  %v195_v48 = vrot.slane %v194_v46, 1  ;;  %v200_v49 = vrot.slane %v199_v47, 1  ;;  %v208_v50 = vld [vmem:[#allocation0 + $0x87] ss:$-1 sm:$0xff]  ;;  %182 = vst [vmem:[#allocation1 + $0x30] sm:$0xff] %v181_v44 }
  0x13   :  { %v213_v51 = vld [vmem:[#allocation0 + $0x8f] ss:$-1 sm:$0xff]  ;;  %v209_v52 = vrot.slane %v208_v50, 1  ;;  %v222_v54 = vld [vmem:[#allocation0 + $0x97] ss:$-1 sm:$0xff]  ;;  %190 = vst.msk [vmem:[#allocation1 + $0x30] sm:$0xff] %vm105_vm0, %v186_v45 }
  0x14   :  { %v214_v53 = vrot.slane %v213_v51, 1  ;;  %v227_v55 = vld [vmem:[#allocation0 + $0x9f] ss:$-1 sm:$0xff]  ;;  %196 = vst [vmem:[#allocation1 + $0x38] sm:$0xff] %v195_v48  ;;  %v223_v56 = vrot.slane %v222_v54, 1 }
  0x15   :  { %v228_v57 = vrot.slane %v227_v55, 1  ;;  %v236_v58 = vld [vmem:[#allocation0 + $0xa7] ss:$-1 sm:$0xff]  ;;  %v241_v59 = vld [vmem:[#allocation0 + $0xaf] ss:$-1 sm:$0xff]  ;;  %204 = vst.msk [vmem:[#allocation1 + $0x38] sm:$0xff] %vm105_vm0, %v200_v49 }
  0x16   :  { %210 = vst [vmem:[#allocation1 + $0x40] sm:$0xff] %v209_v52  ;;  %v237_v60 = vrot.slane %v236_v58, 1  ;;  %v242_v61 = vrot.slane %v241_v59, 1  ;;  %v250_v62 = vld [vmem:[#allocation0 + $0xb7] ss:$-1 sm:$0xff]  ;;  %224 = vst [vmem:[#allocation1 + $0x48] sm:$0xff] %v223_v56 }
  0x17   :  { %v255_v63 = vld [vmem:[#allocation0 + $0xbf] ss:$-1 sm:$0xff]  ;;  %218 = vst.msk [vmem:[#allocation1 + $0x40] sm:$0xff] %vm105_vm0, %v214_v53  ;;  %v251_v0 = vrot.slane %v250_v62, 1  ;;  %v264_v2 = vld [vmem:[#allocation0 + $0xc7] ss:$-1 sm:$0xff] }
  0x18   :  { %v256_v1 = vrot.slane %v255_v63, 1  ;;  %v269_v3 = vld [vmem:[#allocation0 + $0xcf] ss:$-1 sm:$0xff]  ;;  %232 = vst.msk [vmem:[#allocation1 + $0x48] sm:$0xff] %vm105_vm0, %v228_v57  ;;  %238 = vst [vmem:[#allocation1 + $0x50] sm:$0xff] %v237_v60  ;;  %v265_v4 = vrot.slane %v264_v2, 1 }
  0x19   :  { %v270_v5 = vrot.slane %v269_v3, 1  ;;  %v278_v6 = vld [vmem:[#allocation0 + $0xd7] ss:$-1 sm:$0xff]  ;;  %v283_v7 = vld [vmem:[#allocation0 + $0xdf] ss:$-1 sm:$0xff]  ;;  %246 = vst.msk [vmem:[#allocation1 + $0x50] sm:$0xff] %vm105_vm0, %v242_v61 }
  0x1a   :  { %252 = vst [vmem:[#allocation1 + $0x58] sm:$0xff] %v251_v0  ;;  %v279_v8 = vrot.slane %v278_v6, 1  ;;  %v284_v9 = vrot.slane %v283_v7, 1  ;;  %v292_v11 = vld [vmem:[#allocation0 + $0xe7] ss:$-1 sm:$0xff]  ;;  %266 = vst [vmem:[#allocation1 + $0x60] sm:$0xff] %v265_v4 }
  0x1b   :  { %v297_v12 = vld [vmem:[#allocation0 + $0xef] ss:$-1 sm:$0xff]  ;;  %260 = vst.msk [vmem:[#allocation1 + $0x58] sm:$0xff] %vm105_vm0, %v256_v1  ;;  %v293_v13 = vrot.slane %v292_v11, 1  ;;  %v306_v15 = vld [vmem:[#allocation0 + $0xf7] ss:$-1 sm:$0xff] }
  0x1c   :  { %v298_v14 = vrot.slane %v297_v12, 1  ;;  %v311_v16 = vld [vmem:[#allocation0 + $0xff] ss:$-1 sm:$0xff]  ;;  %274 = vst.msk [vmem:[#allocation1 + $0x60] sm:$0xff] %vm105_vm0, %v270_v5  ;;  %280 = vst [vmem:[#allocation1 + $0x68] sm:$0xff] %v279_v8  ;;  %v307_v17 = vrot.slane %v306_v15, 1 }
  0x1d   :  { %v312_v18 = vrot.slane %v311_v16, 1  ;;  %v374_v19 = vld [vmem:[#allocation1] sm:$0xff]  ;;  %v376_v20 = vld [vmem:[#allocation1 + $0x8] sm:$0xff]  ;;  %v378_v21 = vld [vmem:[#allocation1 + $0x10] sm:$0xff]  ;;  %288 = vst.msk [vmem:[#allocation1 + $0x68] sm:$0xff] %vm105_vm0, %v284_v9 }
  0x1e   :  { %294 = vst [vmem:[#allocation1 + $0x70] sm:$0xff] %v293_v13  ;;  %375 = vst [vmem:[%s605_s1] sm:$0xff] %v374_v19  ;;  %v380_v22 = vld [vmem:[#allocation1 + $0x18] sm:$0xff]  ;;  %v382_v23 = vld [vmem:[#allocation1 + $0x20] sm:$0xff] }
  0x1f   :  { %377 = vst [vmem:[%s605_s1 + $0x8] sm:$0xff] %v376_v20  ;;  %379 = vst [vmem:[%s605_s1 + $0x10] sm:$0xff] %v378_v21  ;;  %v384_v24 = vld [vmem:[#allocation1 + $0x28] sm:$0xff]  ;;  %v386_v25 = vld [vmem:[#allocation1 + $0x30] sm:$0xff] }
  0x20   :  { %302 = vst.msk [vmem:[#allocation1 + $0x70] sm:$0xff] %vm105_vm0, %v298_v14  ;;  %308 = vst [vmem:[#allocation1 + $0x78] sm:$0xff] %v307_v17  ;;  %v388_v26 = vld [vmem:[#allocation1 + $0x38] sm:$0xff]  ;;  %v390_v10 = vld [vmem:[#allocation1 + $0x40] sm:$0xff] }
  0x21   :  { %381 = vst [vmem:[%s605_s1 + $0x18] sm:$0xff] %v380_v22  ;;  %383 = vst [vmem:[%s605_s1 + $0x20] sm:$0xff] %v382_v23  ;;  %v392_v27 = vld [vmem:[#allocation1 + $0x48] sm:$0xff]  ;;  %v394_v28 = vld [vmem:[#allocation1 + $0x50] sm:$0xff] }
  0x22   :  { %385 = vst [vmem:[%s605_s1 + $0x28] sm:$0xff] %v384_v24  ;;  %316 = vst.msk [vmem:[#allocation1 + $0x78] sm:$0xff] %vm105_vm0, %v312_v18  ;;  %v396_v29 = vld [vmem:[#allocation1 + $0x58] sm:$0xff] }
  0x23   :  { %387 = vst [vmem:[%s605_s1 + $0x30] sm:$0xff] %v386_v25  ;;  %389 = vst [vmem:[%s605_s1 + $0x38] sm:$0xff] %v388_v26  ;;  %v398_v30 = vld [vmem:[#allocation1 + $0x60] sm:$0xff] }
  0x24   :  { %391 = vst [vmem:[%s605_s1 + $0x40] sm:$0xff] %v390_v10  ;;  %393 = vst [vmem:[%s605_s1 + $0x48] sm:$0xff] %v392_v27  ;;  %v400_v31 = vld [vmem:[#allocation1 + $0x68] sm:$0xff] }
  0x25   :  { %395 = vst [vmem:[%s605_s1 + $0x50] sm:$0xff] %v394_v28  ;;  %397 = vst [vmem:[%s605_s1 + $0x58] sm:$0xff] %v396_v29 }
  0x26   :  { %399 = vst [vmem:[%s605_s1 + $0x60] sm:$0xff] %v398_v30  ;;  %401 = vst [vmem:[%s605_s1 + $0x68] sm:$0xff] %v400_v31 }
  0x27   :  { %v402_v32 = vld [vmem:[#allocation1 + $0x70] sm:$0xff] }
  0x28   :  { %403 = vst [vmem:[%s605_s1 + $0x70] sm:$0xff] %v402_v32 }
  0x29   :  { %v404_v33 = vld [vmem:[#allocation1 + $0x78] sm:$0xff] }
  0x2a   :  { %405 = vst [vmem:[%s605_s1 + $0x78] sm:$0xff] %v404_v33 }

// kernel: _lambda_.47
= control target key start
LH: loop header
LB: loop body
LE: loop exit
PB: predicated region body
PF: predicated region fallthrough
CT: control target
= control target key end

     0   :  { %s604_s9 = smov 0   ;;  %s606_s10 = smov 0   ;;  %s689_s0 = inlined_call_operand.vmem [shape: bf16[16,128], index: 0, kind: input, shape index: {}]   ;;  %s690_s1 = inlined_call_operand.vmem [shape: bf16[128,512], index: 1, kind: input, shape index: {}]   ;;  %s691_s2 = inlined_call_operand.vmem [shape: f32[16,512], index: 2, kind: output, shape index: {}]  }
   0x1   :  { %s608_s11 = smov 0  }
   0x2 LB: > { %s480_s12 = sadd.s32 4294967295, %s586_s11   ;;  %s621_s13 = sadd.s32 1, %s586_s11   ;;  %s586_s11 = sphi %s608_s11, %s695_s11   ;;  %s582_s10 = sphi %s606_s10, %s694_s10   ;;  %s578_s9 = sphi %s604_s9, %s693_s9  }
   0x3   : > { %s37_s14 = ssub.s32 %s586_s11, %s621_s13  ;;  %s40_s15 = sadd.s32 1, %s582_s10 }
   0x4   : > { %p38_p0 = scmp.eq.s32.totalorder %s37_s14, 0  ;;  %p47_p1 = scmp.ne.s32.totalorder %s582_s10, %s578_s9 }
   0x5   : > { %p48_p2 = scmp.eq.s32.totalorder %s586_s11, 0  ;;  %p77_p3 = scmp.eq.s32.totalorder %s480_s12, 1 }
   0x6   : > { %s632_s16 = scalar_select %p38_p0, %s582_s10, %s40_s15  }
   0x7   : > { %p49_p4 = por %p48_p2, %p47_p1  ;;  %p634_p5 = por %p77_p3, %p47_p1 }
   0x8   : > { %p483_p6 = scmp.ge.s32.totalorder %s586_s11, 2 }
   0xa   : > { %102 = sbr.rel (%p483_p6) target bundleno = 29 (0x1d), region = 20 }
  0x11   : > { %105 = sbr.rel (!%p49_p4) target bundleno = 29 (0x1d), region = 24  ;;  %s107_s18 = sand.u32 (%p49_p4), 1, %s582_s10  }
  0x12   : > { %s512_s19 = sshll.u32 (%p49_p4), %s586_s11, 3  ;;  %s484_s20 = sshll.u32 (%p49_p4), %s107_s18, 7 }
  0x13   : > { %s644_s23 = scalar_lea.vmem (%p49_p4), %s690_s1, %s512_s19  ;;  %s109_s24 = scalar_lea.vmem (%p49_p4), [#allocation2], %s484_s20 }
  0x14   : > { %v170_v0 = vld [vmem:[%s644_s23] sm:$0xff] (%p49_p4)  ;;  %v172_v1 = vld [vmem:[%s644_s23 + $0x10] sm:$0xff] (%p49_p4) }
  0x15   : > { %v174_v2 = vld [vmem:[%s644_s23 + $0x20] sm:$0xff] (%p49_p4)  ;;  %171 = vst [vmem:[%s109_s24] sm:$0xff] (%p49_p4), %v170_v0  ;;  %173 = vst [vmem:[%s109_s24 + $0x8] sm:$0xff] (%p49_p4), %v172_v1  ;;  %v176_v3 = vld [vmem:[%s644_s23 + $0x30] sm:$0xff] (%p49_p4) }
  0x16   : > { %175 = vst [vmem:[%s109_s24 + $0x10] sm:$0xff] (%p49_p4), %v174_v2  ;;  %v178_v4 = vld [vmem:[%s644_s23 + $0x40] sm:$0xff] (%p49_p4)  ;;  %v180_v5 = vld [vmem:[%s644_s23 + $0x50] sm:$0xff] (%p49_p4)  ;;  %177 = vst [vmem:[%s109_s24 + $0x18] sm:$0xff] (%p49_p4), %v176_v3 }
  0x17   : > { %179 = vst [vmem:[%s109_s24 + $0x20] sm:$0xff] (%p49_p4), %v178_v4  ;;  %181 = vst [vmem:[%s109_s24 + $0x28] sm:$0xff] (%p49_p4), %v180_v5  ;;  %v182_v6 = vld [vmem:[%s644_s23 + $0x60] sm:$0xff] (%p49_p4)  ;;  %v184_v7 = vld [vmem:[%s644_s23 + $0x70] sm:$0xff] (%p49_p4) }
  0x18   : > { %v186_v8 = vld [vmem:[%s644_s23 + $0x80] sm:$0xff]  ;;  %183 = vst [vmem:[%s109_s24 + $0x30] sm:$0xff] %v182_v6  ;;  %185 = vst [vmem:[%s109_s24 + $0x38] sm:$0xff] %v184_v7  ;;  %v188_v9 = vld [vmem:[%s644_s23 + $0x90] sm:$0xff] }
  0x19   : > { %187 = vst [vmem:[%s109_s24 + $0x40] sm:$0xff] %v186_v8  ;;  %v190_v10 = vld [vmem:[%s644_s23 + $0xa0] sm:$0xff]  ;;  %v192_v11 = vld [vmem:[%s644_s23 + $0xb0] sm:$0xff]  ;;  %189 = vst [vmem:[%s109_s24 + $0x48] sm:$0xff] %v188_v9 }
  0x1a   : > { %191 = vst [vmem:[%s109_s24 + $0x50] sm:$0xff] %v190_v10  ;;  %193 = vst [vmem:[%s109_s24 + $0x58] sm:$0xff] %v192_v11  ;;  %v194_v12 = vld [vmem:[%s644_s23 + $0xc0] sm:$0xff]  ;;  %v196_v13 = vld [vmem:[%s644_s23 + $0xd0] sm:$0xff] }
  0x1b   : > { %v198_v14 = vld [vmem:[%s644_s23 + $0xe0] sm:$0xff]  ;;  %195 = vst [vmem:[%s109_s24 + $0x60] sm:$0xff] %v194_v12  ;;  %197 = vst [vmem:[%s109_s24 + $0x68] sm:$0xff] %v196_v13  ;;  %v200_v15 = vld [vmem:[%s644_s23 + $0xf0] sm:$0xff] }
  0x1c   : > { %199 = vst [vmem:[%s109_s24 + $0x70] sm:$0xff] %v198_v14  ;;  %201 = vst [vmem:[%s109_s24 + $0x78] sm:$0xff] %v200_v15 }
  0x1d PF: > { %p487_p7 = scmp.ge.s32.totalorder %s586_s11, 1  ;;  %p206_p8 = scmp.lt.s32.totalorder %s586_s11, 3 }
  0x1f   : > { %p207_p9 = pnand %p487_p7, %p206_p8 }
  0x20   : > { %s213_s25 = sand.u32 (!%p207_p9), 1, %s578_s9   ;;  %v588_v16 = vmov (!%p207_p9), 0   ;;  %v563_v33 = vld [vmem:[%s689_s0] sm:$0xff] (!%p207_p9)  }
  0x21   : > { %210 = sbr.rel (%p207_p9) target bundleno = 294 (0x126), region = 62  ;;  %s488_s26 = sshll.u32 (!%p207_p9), %s213_s25, 7  ;;  %372 = vmatprep.mubr.bf16.mxu0 (!%p207_p9), %v588_v16 }
  0x22   : > { %s215_s27 = scalar_lea.vmem (!%p207_p9), [#allocation2], %s488_s26  ;;  %s489_s30 = sshll.u32 (!%p207_p9), %s213_s25, 5 }
  0x23   : > { %v539_v17 = vld [vmem:[%s215_s27 + $0x4] ss:$8 sps:$4 sm:$0xff] (!%p207_p9)   ;;  %v541_v18 = vld [vmem:[%s215_s27] ss:$8 sps:$4 sm:$0xff] (!%p207_p9)   ;;  %v542_v19 = vld [vmem:[%s215_s27 + $0x14] ss:$8 sps:$4 sm:$0xff] (!%p207_p9)  }
  0x24   : > { %340 = vmatprep.subr.bf16.mxu0 (!%p207_p9), %v539_v17  ;;  %v544_v20 = vld [vmem:[%s215_s27 + $0x10] ss:$8 sps:$4 sm:$0xff] (!%p207_p9)   ;;  %v545_v21 = vld [vmem:[%s215_s27 + $0x24] ss:$8 sps:$4 sm:$0xff] (!%p207_p9)   ;;  %v547_v22 = vld [vmem:[%s215_s27 + $0x20] ss:$8 sps:$4 sm:$0xff] (!%p207_p9)  }
  0x25   : > { %341 = vmatpush1.bf16.msra.mxu0 (!%p207_p9), %v541_v18  ;;  %v548_v23 = vld [vmem:[%s215_s27 + $0x34] ss:$8 sps:$4 sm:$0xff] (!%p207_p9)   ;;  %v550_v24 = vld [vmem:[%s215_s27 + $0x30] ss:$8 sps:$4 sm:$0xff] (!%p207_p9)   ;;  %v551_v25 = vld [vmem:[%s215_s27 + $0x44] ss:$8 sps:$4 sm:$0xff] (!%p207_p9)  }
  0x26   : > { %342 = vmatprep.subr.bf16.mxu0 (!%p207_p9), %v542_v19  ;;  %v553_v26 = vld [vmem:[%s215_s27 + $0x40] ss:$8 sps:$4 sm:$0xff] (!%p207_p9)   ;;  %v554_v27 = vld [vmem:[%s215_s27 + $0x54] ss:$8 sps:$4 sm:$0xff] (!%p207_p9)   ;;  %v556_v28 = vld [vmem:[%s215_s27 + $0x50] ss:$8 sps:$4 sm:$0xff] (!%p207_p9)  }
  0x27   : > { %v557_v29 = vld [vmem:[%s215_s27 + $0x64] ss:$8 sps:$4 sm:$0xff] (!%p207_p9)   ;;  %v559_v30 = vld [vmem:[%s215_s27 + $0x60] ss:$8 sps:$4 sm:$0xff] (!%p207_p9)   ;;  %v560_v31 = vld [vmem:[%s215_s27 + $0x74] ss:$8 sps:$4 sm:$0xff] (!%p207_p9)  }
  0x28   : > { %v562_v32 = vld [vmem:[%s215_s27 + $0x70] ss:$8 sps:$4 sm:$0xff]   ;;  %s232_s3 = scalar_lea.vmem [#allocation3], %s489_s30  ;;  %s513_s4 = sshll.u32 (%p634_p5), %s480_s12, 4 }
  0x29   : > { %343 = vmatpush1.bf16.msra.mxu0 %v544_v20  ;;  %s400_s7 = scalar_lea.vmem (%p634_p5), %s691_s2, %s513_s4 }
  0x2a   : > { %344 = vmatprep.subr.bf16.mxu0 %v545_v21 }
  0x2d   : > { %345 = vmatpush1.bf16.msra.mxu0 %v547_v22 }
  0x2e   : > { %346 = vmatprep.subr.bf16.mxu0 %v548_v23 }
  0x31   : > { %347 = vmatpush1.bf16.msra.mxu0 %v550_v24 }
  0x32   : > { %348 = vmatprep.subr.bf16.mxu0 %v551_v25 }
  0x35   : > { %349 = vmatpush1.bf16.msra.mxu0 %v553_v26 }
  0x36   : > { %350 = vmatprep.subr.bf16.mxu0 %v554_v27 }
  0x39   : > { %351 = vmatpush1.bf16.msra.mxu0 %v556_v28 }
  0x3a   : > { %352 = vmatprep.subr.bf16.mxu0 %v557_v29 }
  0x3d   : > { %353 = vmatpush1.bf16.msra.mxu0 %v559_v30 }
  0x3e   : > { %354 = vmatprep.subr.bf16.mxu0 %v560_v31 }
  0x41   : > { %355 = vmatpush1.bf16.msra.mxu0 %v562_v32 }
  0x44   : > { %373 = vmatmul.mubr.bf16.vlgmr.msra.gmra.mrb[0].mxu0 %v563_v33 }
 0x117   : > { %v374_v34 = vpop.f32.mrb[0].mxu0  ;;  %397 = sbr.rel (!%p634_p5) target bundleno = 294 (0x126), region = 70 }
 0x118   : > { %v383_v35 = vmax.f32 %v374_v34, 0.0  ;;  %v376_v36 = vpop.f32.mrb[1].mxu0 }
 0x119   : > { %v384_v37 = vmax.f32 %v376_v36, 0.0  ;;  %v378_v38 = vpop.f32.mrb[2].mxu0 }
 0x11a   : > { %387 = vst [vmem:[%s232_s3] sm:$0xff] %v383_v35  ;;  %v385_v39 = vmax.f32 %v378_v38, 0.0  ;;  %v380_v40 = vpop.f32.mrb[3].mxu0 }
 0x11b   : > { %388 = vst [vmem:[%s232_s3 + $0x8] sm:$0xff] %v384_v37  ;;  %v386_v41 = vmax.f32 %v380_v40, 0.0 }
 0x11c   : > { %389 = vst [vmem:[%s232_s3 + $0x10] sm:$0xff] %v385_v39 }
 0x11d   : > { %390 = vst [vmem:[%s232_s3 + $0x18] sm:$0xff] %v386_v41 }
 0x121   : > { %v413_v42 = vld [vmem:[%s232_s3] sm:$0xff] }
 0x122   : > { %v415_v43 = vld [vmem:[%s232_s3 + $0x8] sm:$0xff]  ;;  %414 = vst [vmem:[%s400_s7] sm:$0xff] %v413_v42 }
 0x123   : > { %v417_v44 = vld [vmem:[%s232_s3 + $0x10] sm:$0xff]  ;;  %416 = vst [vmem:[%s400_s7 + $0x8] sm:$0xff] %v415_v43 }
 0x124   : > { %v419_v45 = vld [vmem:[%s232_s3 + $0x18] sm:$0xff]  ;;  %418 = vst [vmem:[%s400_s7 + $0x20] sm:$0xff] %v417_v44 }
 0x125   : > { %420 = vst [vmem:[%s400_s7 + $0x28] sm:$0xff] %v419_v45 }
 0x126 PF: > { %p9_p10 = scmp.ge.s32.totalorder %s621_s13, 4   ;;  %s693_s9 = smov %s582_s10 }
 0x127   : > { %s694_s10 = smov %s632_s16  ;;  %s695_s11 = smov %s621_s13 }
 0x128   :  { %11 = sbr.rel (!%p9_p10) target bundleno = 2 (0x2), region = 124 }

// kernel: _lambda_.48
= control target key start
LH: loop header
LB: loop body
LE: loop exit
PB: predicated region body
PF: predicated region fallthrough
CT: control target
= control target key end

     0   :  { %s706_s12 = smov 0   ;;  %s708_s13 = smov 0   ;;  %s804_s0 = inlined_call_operand.vmem [shape: bf16[16,128], index: 0, kind: input, shape index: {}]   ;;  %s805_s1 = inlined_call_operand.vmem [shape: bf16[128,512], index: 1, kind: input, shape index: {}]   ;;  %s806_s2 = inlined_call_operand.vmem [shape: f32[16,512], index: 2, kind: input, shape index: {}]   ;;  %s807_s3 = inlined_call_operand.vmem [shape: f32[16,512], index: 3, kind: output, shape index: {}]  }
   0x1   :  { %s710_s14 = smov 0  }
   0x2 LB: > { %s572_s15 = sadd.s32 4294967295, %s683_s14   ;;  %s723_s16 = sadd.s32 1, %s683_s14   ;;  %s683_s14 = sphi %s710_s14, %s812_s14   ;;  %s679_s13 = sphi %s708_s13, %s811_s13   ;;  %s675_s12 = sphi %s706_s12, %s810_s12  }
   0x3   : > { %s38_s17 = ssub.s32 %s683_s14, %s723_s16  ;;  %s41_s18 = sadd.s32 1, %s679_s13 }
   0x4   : > { %p39_p0 = scmp.eq.s32.totalorder %s38_s17, 0  ;;  %p48_p1 = scmp.ne.s32.totalorder %s679_s13, %s675_s12 }
   0x5   : > { %p49_p2 = scmp.eq.s32.totalorder %s683_s14, 0  ;;  %p104_p3 = scmp.eq.s32.totalorder %s572_s15, 1 }
   0x6   : > { %s734_s19 = scalar_select %p39_p0, %s679_s13, %s41_s18  }
   0x7   : > { %p736_p4 = por %p49_p2, %p48_p1  ;;  %p740_p5 = por %p104_p3, %p48_p1 }
   0x8   : > { %p575_p6 = scmp.ge.s32.totalorder %s683_s14, 2 }
   0xa   : > { %129 = sbr.rel (%p575_p6) target bundleno = 36 (0x24), region = 20 }
  0x11   : > { %132 = sbr.rel (!%p736_p4) target bundleno = 29 (0x1d), region = 24  ;;  %s134_s22 = sand.u32 (%p736_p4), 1, %s679_s13  }
  0x12   : > { %s608_s23 = sshll.u32 (%p736_p4), %s683_s14, 3  ;;  %s576_s24 = sshll.u32 (%p736_p4), %s134_s22, 7 }
  0x13   : > { %s752_s27 = scalar_lea.vmem (%p736_p4), %s805_s1, %s608_s23  ;;  %s136_s28 = scalar_lea.vmem (%p736_p4), [#allocation2], %s576_s24 }
  0x14   : > { %v197_v0 = vld [vmem:[%s752_s27] sm:$0xff] (%p736_p4)  ;;  %v199_v1 = vld [vmem:[%s752_s27 + $0x10] sm:$0xff] (%p736_p4) }
  0x15   : > { %v201_v2 = vld [vmem:[%s752_s27 + $0x20] sm:$0xff] (%p736_p4)  ;;  %198 = vst [vmem:[%s136_s28] sm:$0xff] (%p736_p4), %v197_v0  ;;  %200 = vst [vmem:[%s136_s28 + $0x8] sm:$0xff] (%p736_p4), %v199_v1  ;;  %v203_v3 = vld [vmem:[%s752_s27 + $0x30] sm:$0xff] (%p736_p4) }
  0x16   : > { %202 = vst [vmem:[%s136_s28 + $0x10] sm:$0xff] (%p736_p4), %v201_v2  ;;  %v205_v4 = vld [vmem:[%s752_s27 + $0x40] sm:$0xff] (%p736_p4)  ;;  %v207_v5 = vld [vmem:[%s752_s27 + $0x50] sm:$0xff] (%p736_p4)  ;;  %204 = vst [vmem:[%s136_s28 + $0x18] sm:$0xff] (%p736_p4), %v203_v3 }
  0x17   : > { %206 = vst [vmem:[%s136_s28 + $0x20] sm:$0xff] (%p736_p4), %v205_v4  ;;  %208 = vst [vmem:[%s136_s28 + $0x28] sm:$0xff] (%p736_p4), %v207_v5  ;;  %v209_v6 = vld [vmem:[%s752_s27 + $0x60] sm:$0xff] (%p736_p4)  ;;  %v211_v7 = vld [vmem:[%s752_s27 + $0x70] sm:$0xff] (%p736_p4) }
  0x18   : > { %v213_v8 = vld [vmem:[%s752_s27 + $0x80] sm:$0xff]  ;;  %210 = vst [vmem:[%s136_s28 + $0x30] sm:$0xff] %v209_v6  ;;  %212 = vst [vmem:[%s136_s28 + $0x38] sm:$0xff] %v211_v7  ;;  %v215_v9 = vld [vmem:[%s752_s27 + $0x90] sm:$0xff] }
  0x19   : > { %214 = vst [vmem:[%s136_s28 + $0x40] sm:$0xff] %v213_v8  ;;  %v217_v10 = vld [vmem:[%s752_s27 + $0xa0] sm:$0xff]  ;;  %v219_v11 = vld [vmem:[%s752_s27 + $0xb0] sm:$0xff]  ;;  %216 = vst [vmem:[%s136_s28 + $0x48] sm:$0xff] %v215_v9 }
  0x1a   : > { %218 = vst [vmem:[%s136_s28 + $0x50] sm:$0xff] %v217_v10  ;;  %220 = vst [vmem:[%s136_s28 + $0x58] sm:$0xff] %v219_v11  ;;  %v221_v12 = vld [vmem:[%s752_s27 + $0xc0] sm:$0xff]  ;;  %v223_v13 = vld [vmem:[%s752_s27 + $0xd0] sm:$0xff] }
  0x1b   : > { %v225_v14 = vld [vmem:[%s752_s27 + $0xe0] sm:$0xff]  ;;  %222 = vst [vmem:[%s136_s28 + $0x60] sm:$0xff] %v221_v12  ;;  %224 = vst [vmem:[%s136_s28 + $0x68] sm:$0xff] %v223_v13  ;;  %v227_v15 = vld [vmem:[%s752_s27 + $0xf0] sm:$0xff] }
  0x1c   : > { %226 = vst [vmem:[%s136_s28 + $0x70] sm:$0xff] %v225_v14  ;;  %228 = vst [vmem:[%s136_s28 + $0x78] sm:$0xff] %v227_v15 }
  0x1d PF: > { %234 = sbr.rel (!%p736_p4) target bundleno = 36 (0x24), region = 62  ;;  %s236_s29 = sand.u32 (%p736_p4), 1, %s679_s13  }
  0x1e   : > { %s609_s30 = sshll.u32 (%p736_p4), %s683_s14, 4  ;;  %s579_s4 = sshll.u32 (%p736_p4), %s236_s29, 5 }
  0x1f   : > { %s241_s7 = scalar_lea.vmem (%p736_p4), %s806_s2, %s609_s30  ;;  %s238_s8 = scalar_lea.vmem (%p736_p4), [#allocation3], %s579_s4 }
  0x20   : > { %v254_v16 = vld [vmem:[%s241_s7] sm:$0xff] (%p736_p4)  ;;  %v256_v17 = vld [vmem:[%s241_s7 + $0x8] sm:$0xff] (%p736_p4) }
  0x21   : > { %v258_v18 = vld [vmem:[%s241_s7 + $0x20] sm:$0xff] (%p736_p4)  ;;  %255 = vst [vmem:[%s238_s8] sm:$0xff] (%p736_p4), %v254_v16  ;;  %257 = vst [vmem:[%s238_s8 + $0x8] sm:$0xff] (%p736_p4), %v256_v17  ;;  %v260_v19 = vld [vmem:[%s241_s7 + $0x28] sm:$0xff] (%p736_p4) }
  0x22   : > { %259 = vst [vmem:[%s238_s8 + $0x10] sm:$0xff] (%p736_p4), %v258_v18  ;;  %261 = vst [vmem:[%s238_s8 + $0x18] sm:$0xff] (%p736_p4), %v260_v19 }
  0x24 PF: > { %p582_p7 = scmp.ge.s32.totalorder %s683_s14, 1  ;;  %p266_p8 = scmp.lt.s32.totalorder %s683_s14, 3 }
  0x26   : > { %p267_p9 = pnand %p582_p7, %p266_p8 }
  0x27   : > { %s273_s9 = sand.u32 (!%p267_p9), 1, %s675_s12   ;;  %v685_v20 = vmov (!%p267_p9), 0   ;;  %v660_v37 = vld [vmem:[%s804_s0] sm:$0xff] (!%p267_p9)  }
  0x28   : > { %270 = sbr.rel (%p267_p9) target bundleno = 301 (0x12d), region = 85  ;;  %s583_s10 = sshll.u32 (!%p267_p9), %s273_s9, 7  ;;  %450 = vmatprep.mubr.bf16.mxu0 (!%p267_p9), %v685_v20 }
  0x29   : > { %s275_s11 = scalar_lea.vmem (!%p267_p9), [#allocation2], %s583_s10  ;;  %s584_s20 = sshll.u32 (!%p267_p9), %s273_s9, 5 }
  0x2a   : > { %v636_v21 = vld [vmem:[%s275_s11 + $0x4] ss:$8 sps:$4 sm:$0xff] (!%p267_p9)   ;;  %v638_v22 = vld [vmem:[%s275_s11] ss:$8 sps:$4 sm:$0xff] (!%p267_p9)   ;;  %v639_v23 = vld [vmem:[%s275_s11 + $0x14] ss:$8 sps:$4 sm:$0xff] (!%p267_p9)  }
  0x2b   : > { %418 = vmatprep.subr.bf16.mxu0 (!%p267_p9), %v636_v21  ;;  %v641_v24 = vld [vmem:[%s275_s11 + $0x10] ss:$8 sps:$4 sm:$0xff] (!%p267_p9)   ;;  %v642_v25 = vld [vmem:[%s275_s11 + $0x24] ss:$8 sps:$4 sm:$0xff] (!%p267_p9)   ;;  %v644_v26 = vld [vmem:[%s275_s11 + $0x20] ss:$8 sps:$4 sm:$0xff] (!%p267_p9)  }
  0x2c   : > { %419 = vmatpush1.bf16.msra.mxu0 (!%p267_p9), %v638_v22  ;;  %v645_v27 = vld [vmem:[%s275_s11 + $0x34] ss:$8 sps:$4 sm:$0xff] (!%p267_p9)   ;;  %v647_v28 = vld [vmem:[%s275_s11 + $0x30] ss:$8 sps:$4 sm:$0xff] (!%p267_p9)   ;;  %v648_v29 = vld [vmem:[%s275_s11 + $0x44] ss:$8 sps:$4 sm:$0xff] (!%p267_p9)  }
  0x2d   : > { %420 = vmatprep.subr.bf16.mxu0 (!%p267_p9), %v639_v23  ;;  %v650_v30 = vld [vmem:[%s275_s11 + $0x40] ss:$8 sps:$4 sm:$0xff] (!%p267_p9)   ;;  %v651_v31 = vld [vmem:[%s275_s11 + $0x54] ss:$8 sps:$4 sm:$0xff] (!%p267_p9)   ;;  %v653_v32 = vld [vmem:[%s275_s11 + $0x50] ss:$8 sps:$4 sm:$0xff] (!%p267_p9)  }
  0x2e   : > { %v654_v33 = vld [vmem:[%s275_s11 + $0x64] ss:$8 sps:$4 sm:$0xff] (!%p267_p9)   ;;  %v656_v34 = vld [vmem:[%s275_s11 + $0x60] ss:$8 sps:$4 sm:$0xff] (!%p267_p9)   ;;  %v657_v35 = vld [vmem:[%s275_s11 + $0x74] ss:$8 sps:$4 sm:$0xff] (!%p267_p9)  }
  0x2f   : > { %v659_v36 = vld [vmem:[%s275_s11 + $0x70] ss:$8 sps:$4 sm:$0xff]   ;;  %s282_s22 = scalar_lea.vmem [#allocation3], %s584_s20  ;;  %s305_s23 = scalar_lea.vmem [#allocation4], %s584_s20 }
  0x30   : > { %421 = vmatpush1.bf16.msra.mxu0 %v641_v24  ;;  %v328_v38 = vld [vmem:[%s282_s22] sm:$0xff]  ;;  %v329_v39 = vld [vmem:[%s282_s22 + $0x8] sm:$0xff]  ;;  %v330_v41 = vld [vmem:[%s282_s22 + $0x10] sm:$0xff]  ;;  %s610_s12 = sshll.u32 (%p740_p5), %s572_s15, 4 }
  0x31   : > { %422 = vmatprep.subr.bf16.mxu0 %v642_v25  ;;  %v331_v44 = vld [vmem:[%s282_s22 + $0x18] sm:$0xff]  ;;  %s474_s26 = scalar_lea.vmem (%p740_p5), %s807_s3, %s610_s12 }
  0x34   : > { %423 = vmatpush1.bf16.msra.mxu0 %v644_v26 }
  0x35   : > { %424 = vmatprep.subr.bf16.mxu0 %v645_v27 }
  0x38   : > { %425 = vmatpush1.bf16.msra.mxu0 %v647_v28 }
  0x39   : > { %426 = vmatprep.subr.bf16.mxu0 %v648_v29 }
  0x3c   : > { %427 = vmatpush1.bf16.msra.mxu0 %v650_v30 }
  0x3d   : > { %428 = vmatprep.subr.bf16.mxu0 %v651_v31 }
  0x40   : > { %429 = vmatpush1.bf16.msra.mxu0 %v653_v32 }
  0x41   : > { %430 = vmatprep.subr.bf16.mxu0 %v654_v33 }
  0x44   : > { %431 = vmatpush1.bf16.msra.mxu0 %v656_v34 }
  0x45   : > { %432 = vmatprep.subr.bf16.mxu0 %v657_v35 }
  0x48   : > { %433 = vmatpush1.bf16.msra.mxu0 %v659_v36 }
  0x4b   : > { %451 = vmatmul.mubr.bf16.vlgmr.msra.gmra.mrb[0].mxu0 %v660_v37 }
 0x11e   : > { %v452_v40 = vpop.f32.mrb[0].mxu0  ;;  %471 = sbr.rel (!%p740_p5) target bundleno = 301 (0x12d), region = 97 }
 0x11f   : > { %v453_v42 = vadd.f32 %v452_v40, %v328_v38  ;;  %v454_v43 = vpop.f32.mrb[1].mxu0 }
 0x120   : > { %v455_v45 = vadd.f32 %v454_v43, %v329_v39  ;;  %v456_v46 = vpop.f32.mrb[2].mxu0 }
 0x121   : > { %461 = vst [vmem:[%s305_s23] sm:$0xff] %v453_v42  ;;  %v457_v47 = vadd.f32 %v456_v46, %v330_v41  ;;  %v458_v48 = vpop.f32.mrb[3].mxu0 }
 0x122   : > { %462 = vst [vmem:[%s305_s23 + $0x8] sm:$0xff] %v455_v45  ;;  %v459_v49 = vadd.f32 %v458_v48, %v331_v44 }
 0x123   : > { %463 = vst [vmem:[%s305_s23 + $0x10] sm:$0xff] %v457_v47 }
 0x124   : > { %464 = vst [vmem:[%s305_s23 + $0x18] sm:$0xff] %v459_v49 }
 0x128   : > { %v487_v50 = vld [vmem:[%s305_s23] sm:$0xff] }
 0x129   : > { %v489_v51 = vld [vmem:[%s305_s23 + $0x8] sm:$0xff]  ;;  %488 = vst [vmem:[%s474_s26] sm:$0xff] %v487_v50 }
 0x12a   : > { %v491_v52 = vld [vmem:[%s305_s23 + $0x10] sm:$0xff]  ;;  %490 = vst [vmem:[%s474_s26 + $0x8] sm:$0xff] %v489_v51 }
 0x12b   : > { %v493_v53 = vld [vmem:[%s305_s23 + $0x18] sm:$0xff]  ;;  %492 = vst [vmem:[%s474_s26 + $0x20] sm:$0xff] %v491_v52 }
 0x12c   : > { %494 = vst [vmem:[%s474_s26 + $0x28] sm:$0xff] %v493_v53 }
 0x12d PF: > { %p10_p10 = scmp.ge.s32.totalorder %s723_s16, 4   ;;  %s810_s12 = smov %s679_s13 }
 0x12e   : > { %s811_s13 = smov %s734_s19  ;;  %s812_s14 = smov %s723_s16 }
 0x12f   :  { %12 = sbr.rel (!%p10_p10) target bundleno = 2 (0x2), region = 159 }

// kernel: _lambda_.49
= control target key start
LH: loop header
LB: loop body
LE: loop exit
PB: predicated region body
PF: predicated region fallthrough
CT: control target
= control target key end

     0   :  { %v180_v0 = vmov 0.0   ;;  %vm181_vm0 = vmmov 0   ;;  %s230_s1 = inlined_call_operand.vmem [shape: bf16[128,128], index: 1, kind: input, shape index: {}]   ;;  %s231_s0 = inlined_call_operand.vmem [shape: bf16[16,128], index: 0, kind: input, shape index: {}]   ;;  %s232_s2 = inlined_call_operand.vmem [shape: f32[16,128], index: 2, kind: output, shape index: {}]  }
   0x1   :  { %149 = vmatprep.subr.bf16.mxu0 %v180_v0  ;;  %v171_v1 = vld [vmem:[%s230_s1] sm:$0xff]   ;;  %165 = vmatprep.mubr.msk.bf16.mxu0 %vm181_vm0, %v180_v0  ;;  %v172_v2 = vld [vmem:[%s230_s1 + $0x8] sm:$0xff]   ;;  %v173_v3 = vld [vmem:[%s230_s1 + $0x10] sm:$0xff]  }
   0x2   :  { %150 = vmatpush3.bf16.msra.mxu0 %v171_v1  ;;  %v174_v4 = vld [vmem:[%s230_s1 + $0x18] sm:$0xff]   ;;  %v175_v5 = vld [vmem:[%s230_s1 + $0x20] sm:$0xff]   ;;  %v176_v6 = vld [vmem:[%s230_s1 + $0x28] sm:$0xff]  }
   0x3   :  { %151 = vmatprep.subr.bf16.mxu0 %v180_v0  ;;  %v177_v7 = vld [vmem:[%s230_s1 + $0x30] sm:$0xff]   ;;  %v178_v8 = vld [vmem:[%s230_s1 + $0x38] sm:$0xff]   ;;  %v179_v9 = vld [vmem:[%s231_s0] sm:$0xff]  }
   0x6   :  { %152 = vmatpush3.bf16.msra.mxu0 %v172_v2 }
   0x7   :  { %153 = vmatprep.subr.bf16.mxu0 %v180_v0 }
   0xa   :  { %154 = vmatpush3.bf16.msra.mxu0 %v173_v3 }
   0xb   :  { %155 = vmatprep.subr.bf16.mxu0 %v180_v0 }
   0xe   :  { %156 = vmatpush3.bf16.msra.mxu0 %v174_v4 }
   0xf   :  { %157 = vmatprep.subr.bf16.mxu0 %v180_v0 }
  0x12   :  { %158 = vmatpush3.bf16.msra.mxu0 %v175_v5 }
  0x13   :  { %159 = vmatprep.subr.bf16.mxu0 %v180_v0 }
  0x16   :  { %160 = vmatpush3.bf16.msra.mxu0 %v176_v6 }
  0x17   :  { %161 = vmatprep.subr.bf16.mxu0 %v180_v0 }
  0x1a   :  { %162 = vmatpush3.bf16.msra.mxu0 %v177_v7 }
  0x1b   :  { %163 = vmatprep.subr.bf16.mxu0 %v180_v0 }
  0x1e   :  { %164 = vmatpush3.bf16.msra.mxu0 %v178_v8 }
  0x21   :  { %166 = vmatmul.mubr.bf16.vlgmr.msra.gmra.mrb[0].mxu0 %v179_v9 }
  0xf4   :  { %v118_v10 = vpop.f32.mrb[0].mxu0 }
  0xf5   :  { %125 = vst [vmem:[%s232_s2] sm:$0xff] %v118_v10  ;;  %v167_v11 = vpop.f32.mrb[1].mxu0 }
  0xf6   :  { %v121_v12 = vpop.f32.mrb[2].mxu0 }
  0xf7   :  { %126 = vst [vmem:[%s232_s2 + $0x8] sm:$0xff] %v121_v12  ;;  %v168_v13 = vpop.f32.mrb[3].mxu0 }

// kernel: _lambda_.50
= control target key start
LH: loop header
LB: loop body
LE: loop exit
PB: predicated region body
PF: predicated region fallthrough
CT: control target
= control target key end

     0   :  { %s335_s1 = inlined_call_operand.vmem [shape: bf16[256,128], index: 1, kind: input, shape index: {}]   ;;  %s336_s0 = inlined_call_operand.vmem [shape: bf16[16,256], index: 0, kind: input, shape index: {}]   ;;  %s337_s2 = inlined_call_operand.vmem [shape: f32[16,128], index: 2, kind: output, shape index: {}]  }
   0x1   :  { %v241_v0 = vld [vmem:[%s335_s1 + $0x40] sm:$0xff]   ;;  %v243_v2 = vld [vmem:[%s335_s1 + $0x48] sm:$0xff]   ;;  %v245_v4 = vld [vmem:[%s335_s1 + $0x50] sm:$0xff]  }
   0x2   :  { %v242_v1 = vld [vmem:[%s335_s1] sm:$0xff]   ;;  %219 = vmatprep.subr.bf16.mxu0 %v241_v0  ;;  %v244_v3 = vld [vmem:[%s335_s1 + $0x8] sm:$0xff]   ;;  %v246_v5 = vld [vmem:[%s335_s1 + $0x10] sm:$0xff]  }
   0x3   :  { %220 = vmatpush3.bf16.msra.mxu0 %v242_v1  ;;  %v247_v6 = vld [vmem:[%s335_s1 + $0x58] sm:$0xff]   ;;  %v249_v8 = vld [vmem:[%s335_s1 + $0x60] sm:$0xff]   ;;  %v251_v10 = vld [vmem:[%s335_s1 + $0x68] sm:$0xff]  }
   0x4   :  { %221 = vmatprep.subr.bf16.mxu0 %v243_v2  ;;  %v248_v7 = vld [vmem:[%s335_s1 + $0x18] sm:$0xff]   ;;  %v250_v9 = vld [vmem:[%s335_s1 + $0x20] sm:$0xff]   ;;  %v252_v12 = vld [vmem:[%s335_s1 + $0x28] sm:$0xff]  }
   0x5   :  { %v259_v11 = vld [vmem:[%s336_s0 + $0x4] ss:$8 sps:$4 sm:$0xff]   ;;  %v253_v13 = vld [vmem:[%s335_s1 + $0x70] sm:$0xff]   ;;  %v255_v15 = vld [vmem:[%s335_s1 + $0x78] sm:$0xff]  }
   0x6   :  { %184 = vmatprep.mubr.bf16.mxu0 %v259_v11  ;;  %v254_v14 = vld [vmem:[%s335_s1 + $0x30] sm:$0xff]   ;;  %v256_v16 = vld [vmem:[%s335_s1 + $0x38] sm:$0xff]   ;;  %v257_v17 = vld [vmem:[%s336_s0] ss:$8 sps:$4 sm:$0xff]  }
   0x7   :  { %222 = vmatpush3.bf16.msra.mxu0 %v244_v3 }
   0x8   :  { %223 = vmatprep.subr.bf16.mxu0 %v245_v4 }
   0xb   :  { %224 = vmatpush3.bf16.msra.mxu0 %v246_v5 }
   0xc   :  { %225 = vmatprep.subr.bf16.mxu0 %v247_v6 }
   0xf   :  { %226 = vmatpush3.bf16.msra.mxu0 %v248_v7 }
  0x10   :  { %227 = vmatprep.subr.bf16.mxu0 %v249_v8 }
  0x13   :  { %228 = vmatpush3.bf16.msra.mxu0 %v250_v9 }
  0x14   :  { %229 = vmatprep.subr.bf16.mxu0 %v251_v10 }
  0x17   :  { %230 = vmatpush3.bf16.msra.mxu0 %v252_v12 }
  0x18   :  { %231 = vmatprep.subr.bf16.mxu0 %v253_v13 }
  0x1b   :  { %232 = vmatpush3.bf16.msra.mxu0 %v254_v14 }
  0x1c   :  { %233 = vmatprep.subr.bf16.mxu0 %v255_v15 }
  0x1f   :  { %234 = vmatpush3.bf16.msra.mxu0 %v256_v16 }
  0x22   :  { %185 = vmatmul.mubr.bf16.vlgmr.msra.gmra.mrb[0].mxu0 %v257_v17 }
  0xf5   :  { %v235_v18 = vpop.f32.mrb[0].mxu0 }
  0xf6   :  { %v236_v19 = vpop.f32.mrb[1].mxu0 }
  0xf7   :  { %v237_v20 = vadd.f32 %v236_v19, %v235_v18  ;;  %v238_v21 = vpop.f32.mrb[2].mxu0 }
  0xf8   :  { %v239_v22 = vpop.f32.mrb[3].mxu0 }
  0xf9   :  { %v193_v23 = vmax.f32 %v237_v20, 0.0  ;;  %v240_v24 = vadd.f32 %v239_v22, %v238_v21 }
  0xfb   :  { %195 = vst [vmem:[%s337_s2] sm:$0xff] %v193_v23  ;;  %v194_v25 = vmax.f32 %v240_v24, 0.0 }
  0xfd   :  { %196 = vst [vmem:[%s337_s2 + $0x8] sm:$0xff] %v194_v25 }

// kernel: _lambda_.51
= control target key start
LH: loop header
LB: loop body
LE: loop exit
PB: predicated region body
PF: predicated region fallthrough
CT: control target
= control target key end

     0   :  { %s349_s1 = inlined_call_operand.vmem [shape: bf16[256,128], index: 1, kind: input, shape index: {}]   ;;  %s350_s0 = inlined_call_operand.vmem [shape: bf16[16,256], index: 0, kind: input, shape index: {}]   ;;  %s351_s2 = inlined_call_operand.vmem [shape: f32[16,128], index: 2, kind: input, shape index: {}]   ;;  %s352_s3 = inlined_call_operand.vmem [shape: f32[16,128], index: 3, kind: output, shape index: {}]  }
   0x1   :  { %v244_v0 = vld [vmem:[%s349_s1 + $0x40] sm:$0xff]   ;;  %v246_v2 = vld [vmem:[%s349_s1 + $0x48] sm:$0xff]   ;;  %v248_v4 = vld [vmem:[%s349_s1 + $0x50] sm:$0xff]  }
   0x2   :  { %v245_v1 = vld [vmem:[%s349_s1] sm:$0xff]   ;;  %222 = vmatprep.subr.bf16.mxu0 %v244_v0  ;;  %v247_v3 = vld [vmem:[%s349_s1 + $0x8] sm:$0xff]   ;;  %v249_v5 = vld [vmem:[%s349_s1 + $0x10] sm:$0xff]  }
   0x3   :  { %223 = vmatpush3.bf16.msra.mxu0 %v245_v1  ;;  %v250_v6 = vld [vmem:[%s349_s1 + $0x58] sm:$0xff]   ;;  %v252_v8 = vld [vmem:[%s349_s1 + $0x60] sm:$0xff]   ;;  %v254_v10 = vld [vmem:[%s349_s1 + $0x68] sm:$0xff]  }
   0x4   :  { %224 = vmatprep.subr.bf16.mxu0 %v246_v2  ;;  %v251_v7 = vld [vmem:[%s349_s1 + $0x18] sm:$0xff]   ;;  %v253_v9 = vld [vmem:[%s349_s1 + $0x20] sm:$0xff]   ;;  %v255_v12 = vld [vmem:[%s349_s1 + $0x28] sm:$0xff]  }
   0x5   :  { %v262_v11 = vld [vmem:[%s350_s0 + $0x4] ss:$8 sps:$4 sm:$0xff]   ;;  %v256_v13 = vld [vmem:[%s349_s1 + $0x70] sm:$0xff]   ;;  %v258_v15 = vld [vmem:[%s349_s1 + $0x78] sm:$0xff]  }
   0x6   :  { %189 = vmatprep.mubr.bf16.mxu0 %v262_v11  ;;  %v257_v14 = vld [vmem:[%s349_s1 + $0x30] sm:$0xff]   ;;  %v259_v16 = vld [vmem:[%s349_s1 + $0x38] sm:$0xff]   ;;  %v260_v17 = vld [vmem:[%s350_s0] ss:$8 sps:$4 sm:$0xff]  }
   0x7   :  { %225 = vmatpush3.bf16.msra.mxu0 %v247_v3  ;;  %v49_v19 = vld [vmem:[%s351_s2] sm:$0xff]  ;;  %v50_v23 = vld [vmem:[%s351_s2 + $0x8] sm:$0xff] }
   0x8   :  { %226 = vmatprep.subr.bf16.mxu0 %v248_v4 }
   0xb   :  { %227 = vmatpush3.bf16.msra.mxu0 %v249_v5 }
   0xc   :  { %228 = vmatprep.subr.bf16.mxu0 %v250_v6 }
   0xf   :  { %229 = vmatpush3.bf16.msra.mxu0 %v251_v7 }
  0x10   :  { %230 = vmatprep.subr.bf16.mxu0 %v252_v8 }
  0x13   :  { %231 = vmatpush3.bf16.msra.mxu0 %v253_v9 }
  0x14   :  { %232 = vmatprep.subr.bf16.mxu0 %v254_v10 }
  0x17   :  { %233 = vmatpush3.bf16.msra.mxu0 %v255_v12 }
  0x18   :  { %234 = vmatprep.subr.bf16.mxu0 %v256_v13 }
  0x1b   :  { %235 = vmatpush3.bf16.msra.mxu0 %v257_v14 }
  0x1c   :  { %236 = vmatprep.subr.bf16.mxu0 %v258_v15 }
  0x1f   :  { %237 = vmatpush3.bf16.msra.mxu0 %v259_v16 }
  0x22   :  { %190 = vmatmul.mubr.bf16.vlgmr.msra.gmra.mrb[0].mxu0 %v260_v17 }
  0xf5   :  { %v238_v18 = vpop.f32.mrb[0].mxu0 }
  0xf6   :  { %v239_v20 = vpop.f32.mrb[1].mxu0 }
  0xf7   :  { %v240_v21 = vadd.f32 %v239_v20, %v238_v18  ;;  %v241_v22 = vpop.f32.mrb[2].mxu0 }
  0xf8   :  { %v242_v24 = vpop.f32.mrb[3].mxu0 }
  0xf9   :  { %v192_v25 = vadd.f32 %v240_v21, %v49_v19  ;;  %v243_v26 = vadd.f32 %v242_v24, %v241_v22 }
  0xfb   :  { %198 = vst [vmem:[%s352_s3] sm:$0xff] %v192_v25  ;;  %v195_v27 = vadd.f32 %v243_v26, %v50_v23 }
  0xfd   :  { %199 = vst [vmem:[%s352_s3 + $0x8] sm:$0xff] %v195_v27 }

// kernel: _lambda_.54
= control target key start
LH: loop header
LB: loop body
LE: loop exit
PB: predicated region body
PF: predicated region fallthrough
CT: control target
= control target key end

     0   :  { %s256_s1 = inlined_call_operand.vmem [shape: bf16[128,128], index: 1, kind: input, shape index: {}]   ;;  %s257_s0 = inlined_call_operand.vmem [shape: bf16[32,128], index: 0, kind: input, shape index: {}]   ;;  %s258_s2 = inlined_call_operand.vmem [shape: f32[32,128], index: 2, kind: output, shape index: {}]  }
   0x1   :  { %v189_v0 = vld [vmem:[%s256_s1] sm:$0xff]   ;;  %v190_v1 = vld [vmem:[%s256_s1 + $0x8] sm:$0xff]   ;;  %v191_v2 = vld [vmem:[%s256_s1 + $0x10] sm:$0xff]  }
   0x2   :  { %169 = vmatprep.subr.bf16.mxu0 %v189_v0  ;;  %v192_v3 = vld [vmem:[%s256_s1 + $0x18] sm:$0xff]   ;;  %v197_v4 = vld [vmem:[%s257_s0] sm:$0xff]   ;;  %v194_v6 = vld [vmem:[%s256_s1 + $0x28] sm:$0xff]  }
   0x3   :  { %170 = vmatpush3.bf16.msra.mxu0 %v189_v0  ;;  %185 = vmatprep.mubr.bf16.mxu0 %v197_v4  ;;  %v193_v5 = vld [vmem:[%s256_s1 + $0x20] sm:$0xff]   ;;  %v195_v7 = vld [vmem:[%s256_s1 + $0x30] sm:$0xff]   ;;  %v196_v8 = vld [vmem:[%s256_s1 + $0x38] sm:$0xff]  }
   0x4   :  { %171 = vmatprep.subr.bf16.mxu0 %v190_v1  ;;  %v198_v9 = vld [vmem:[%s257_s0 + $0x8] sm:$0xff]  }
   0x7   :  { %172 = vmatpush3.bf16.msra.mxu0 %v190_v1 }
   0x8   :  { %173 = vmatprep.subr.bf16.mxu0 %v191_v2 }
   0xb   :  { %174 = vmatpush3.bf16.msra.mxu0 %v191_v2 }
   0xc   :  { %175 = vmatprep.subr.bf16.mxu0 %v192_v3 }
   0xf   :  { %176 = vmatpush3.bf16.msra.mxu0 %v192_v3 }
  0x10   :  { %177 = vmatprep.subr.bf16.mxu0 %v193_v5 }
  0x13   :  { %178 = vmatpush3.bf16.msra.mxu0 %v193_v5 }
  0x14   :  { %179 = vmatprep.subr.bf16.mxu0 %v194_v6 }
  0x17   :  { %180 = vmatpush3.bf16.msra.mxu0 %v194_v6 }
  0x18   :  { %181 = vmatprep.subr.bf16.mxu0 %v195_v7 }
  0x1b   :  { %182 = vmatpush3.bf16.msra.mxu0 %v195_v7 }
  0x1c   :  { %183 = vmatprep.subr.bf16.mxu0 %v196_v8 }
  0x1f   :  { %184 = vmatpush3.bf16.msra.mxu0 %v196_v8 }
  0x22   :  { %186 = vmatmul.mubr.bf16.vlgmr.msra.gmra.mrb[0].mxu0 %v198_v9 }
  0xf5   :  { %v187_v10 = vpop.f32.mrb[0].mxu0 }
  0xf6   :  { %143 = vst [vmem:[%s258_s2 + $0x10] sm:$0xff] %v187_v10  ;;  %v126_v11 = vpop.f32.mrb[1].mxu0 }
  0xf7   :  { %141 = vst [vmem:[%s258_s2] sm:$0xff] %v126_v11  ;;  %v188_v12 = vpop.f32.mrb[2].mxu0 }
  0xf8   :  { %144 = vst [vmem:[%s258_s2 + $0x18] sm:$0xff] %v188_v12  ;;  %v129_v13 = vpop.f32.mrb[3].mxu0 }
  0xf9   :  { %142 = vst [vmem:[%s258_s2 + $0x8] sm:$0xff] %v129_v13 }

// kernel: _lambda_.56
= control target key start
LH: loop header
LB: loop body
LE: loop exit
PB: predicated region body
PF: predicated region fallthrough
CT: control target
= control target key end

     0   :  { %s633_s12 = smov 0   ;;  %s635_s13 = smov 0   ;;  %s709_s0 = inlined_call_operand.vmem [shape: bf16[8,128], index: 0, kind: input, shape index: {}]   ;;  %s710_s1 = inlined_call_operand.vmem [shape: bf16[128,512], index: 1, kind: input, shape index: {}]   ;;  %s711_s2 = inlined_call_operand.vmem [shape: f32[8,512], index: 2, kind: input, shape index: {}]   ;;  %s712_s3 = inlined_call_operand.vmem [shape: f32[8,512], index: 3, kind: output, shape index: {}]  }
   0x1   :  { %s637_s14 = smov 0  }
   0x2 LB: > { %s507_s15 = sadd.s32 4294967295, %s610_s14   ;;  %s650_s16 = sadd.s32 1, %s610_s14   ;;  %s610_s14 = sphi %s637_s14, %s715_s14   ;;  %s606_s13 = sphi %s635_s13, %s714_s13   ;;  %s602_s12 = sphi %s633_s12, %s713_s12  }
   0x3   : > { %s38_s17 = ssub.s32 %s610_s14, %s650_s16  ;;  %s41_s18 = sadd.s32 1, %s606_s13 }
   0x4   : > { %p39_p0 = scmp.eq.s32.totalorder %s38_s17, 0  ;;  %p48_p1 = scmp.ne.s32.totalorder %s606_s13, %s602_s12 }
   0x5   : > { %p49_p2 = scmp.eq.s32.totalorder %s610_s14, 0  ;;  %p510_p4 = scmp.ge.s32.totalorder %s610_s14, 2 }
   0x6   : > { %s659_s19 = scalar_select %p39_p0, %s606_s13, %s41_s18  }
   0x7   : > { %p50_p3 = por %p49_p2, %p48_p1  ;;  %129 = sbr.rel (%p510_p4) target bundleno = 26 (0x1a), region = 20 }
   0xe   : > { %132 = sbr.rel (!%p50_p3) target bundleno = 26 (0x1a), region = 24  ;;  %s134_s20 = sand.u32 (%p50_p3), 1, %s606_s13  }
   0xf   : > { %s538_s21 = sshll.u32 (%p50_p3), %s610_s14, 3  ;;  %s511_s22 = sshll.u32 (%p50_p3), %s134_s20, 7 }
  0x10   : > { %s667_s25 = scalar_lea.vmem (%p50_p3), %s710_s1, %s538_s21  ;;  %s136_s26 = scalar_lea.vmem (%p50_p3), [#allocation2], %s511_s22 }
  0x11   : > { %v197_v0 = vld [vmem:[%s667_s25] sm:$0xff] (%p50_p3)  ;;  %v199_v1 = vld [vmem:[%s667_s25 + $0x10] sm:$0xff] (%p50_p3) }
  0x12   : > { %v201_v2 = vld [vmem:[%s667_s25 + $0x20] sm:$0xff] (%p50_p3)  ;;  %198 = vst [vmem:[%s136_s26] sm:$0xff] (%p50_p3), %v197_v0  ;;  %200 = vst [vmem:[%s136_s26 + $0x8] sm:$0xff] (%p50_p3), %v199_v1  ;;  %v203_v3 = vld [vmem:[%s667_s25 + $0x30] sm:$0xff] (%p50_p3) }
  0x13   : > { %202 = vst [vmem:[%s136_s26 + $0x10] sm:$0xff] (%p50_p3), %v201_v2  ;;  %v205_v4 = vld [vmem:[%s667_s25 + $0x40] sm:$0xff] (%p50_p3)  ;;  %v207_v5 = vld [vmem:[%s667_s25 + $0x50] sm:$0xff] (%p50_p3)  ;;  %204 = vst [vmem:[%s136_s26 + $0x18] sm:$0xff] (%p50_p3), %v203_v3 }
  0x14   : > { %206 = vst [vmem:[%s136_s26 + $0x20] sm:$0xff] (%p50_p3), %v205_v4  ;;  %208 = vst [vmem:[%s136_s26 + $0x28] sm:$0xff] (%p50_p3), %v207_v5  ;;  %v209_v6 = vld [vmem:[%s667_s25 + $0x60] sm:$0xff] (%p50_p3)  ;;  %v211_v7 = vld [vmem:[%s667_s25 + $0x70] sm:$0xff] (%p50_p3) }
  0x15   : > { %v213_v8 = vld [vmem:[%s667_s25 + $0x80] sm:$0xff]  ;;  %210 = vst [vmem:[%s136_s26 + $0x30] sm:$0xff] %v209_v6  ;;  %212 = vst [vmem:[%s136_s26 + $0x38] sm:$0xff] %v211_v7  ;;  %v215_v9 = vld [vmem:[%s667_s25 + $0x90] sm:$0xff] }
  0x16   : > { %214 = vst [vmem:[%s136_s26 + $0x40] sm:$0xff] %v213_v8  ;;  %v217_v10 = vld [vmem:[%s667_s25 + $0xa0] sm:$0xff]  ;;  %v219_v11 = vld [vmem:[%s667_s25 + $0xb0] sm:$0xff]  ;;  %216 = vst [vmem:[%s136_s26 + $0x48] sm:$0xff] %v215_v9 }
  0x17   : > { %218 = vst [vmem:[%s136_s26 + $0x50] sm:$0xff] %v217_v10  ;;  %220 = vst [vmem:[%s136_s26 + $0x58] sm:$0xff] %v219_v11  ;;  %v221_v12 = vld [vmem:[%s667_s25 + $0xc0] sm:$0xff]  ;;  %v223_v13 = vld [vmem:[%s667_s25 + $0xd0] sm:$0xff] }
  0x18   : > { %v225_v14 = vld [vmem:[%s667_s25 + $0xe0] sm:$0xff]  ;;  %222 = vst [vmem:[%s136_s26 + $0x60] sm:$0xff] %v221_v12  ;;  %224 = vst [vmem:[%s136_s26 + $0x68] sm:$0xff] %v223_v13  ;;  %v227_v15 = vld [vmem:[%s667_s25 + $0xf0] sm:$0xff] }
  0x19   : > { %226 = vst [vmem:[%s136_s26 + $0x70] sm:$0xff] %v225_v14  ;;  %228 = vst [vmem:[%s136_s26 + $0x78] sm:$0xff] %v227_v15 }
  0x1a PF: > { %p514_p5 = scmp.ge.s32.totalorder %s610_s14, 1  ;;  %p242_p6 = scmp.lt.s32.totalorder %s610_s14, 3 }
  0x1c   : > { %p243_p7 = pnand %p514_p5, %p242_p6 }
  0x1d   : > { %s249_s27 = sand.u32 (!%p243_p7), 1, %s602_s12   ;;  %v612_v16 = vmov (!%p243_p7), 0   ;;  %v291_v33 = vld [vmem:[%s709_s0] sm:$0xf] (!%p243_p7)  ;;  %s516_s5 = sshll.u32 (!%p243_p7), %s507_s15, 1 }
  0x1e   : > { %246 = sbr.rel (%p243_p7) target bundleno = 281 (0x119), region = 66  ;;  %s515_s28 = sshll.u32 (!%p243_p7), %s249_s27, 7  ;;  %422 = vmatprep.mubr.bf16.mxu0 (!%p243_p7), %v612_v16 }
  0x1f   : > { %s251_s29 = scalar_lea.vmem (!%p243_p7), [#allocation2], %s515_s28  ;;  %p279_p8 = scmp.lt.s32.totalorder (!%p243_p7), %s516_s5, 3 }
  0x20   : > { %v564_v17 = vld [vmem:[%s251_s29 + $0x4] ss:$8 sps:$4 sm:$0xff] (!%p243_p7)   ;;  %v566_v18 = vld [vmem:[%s251_s29] ss:$8 sps:$4 sm:$0xff] (!%p243_p7)   ;;  %v567_v19 = vld [vmem:[%s251_s29 + $0x14] ss:$8 sps:$4 sm:$0xff] (!%p243_p7)  }
  0x21   : > { %390 = vmatprep.subr.bf16.mxu0 (!%p243_p7), %v564_v17  ;;  %v569_v20 = vld [vmem:[%s251_s29 + $0x10] ss:$8 sps:$4 sm:$0xff] (!%p243_p7)   ;;  %v570_v21 = vld [vmem:[%s251_s29 + $0x24] ss:$8 sps:$4 sm:$0xff] (!%p243_p7)   ;;  %v572_v22 = vld [vmem:[%s251_s29 + $0x20] ss:$8 sps:$4 sm:$0xff] (!%p243_p7)  }
  0x22   : > { %391 = vmatpush1.bf16.msra.mxu0 (!%p243_p7), %v566_v18  ;;  %v573_v23 = vld [vmem:[%s251_s29 + $0x34] ss:$8 sps:$4 sm:$0xff] (!%p243_p7)   ;;  %v575_v24 = vld [vmem:[%s251_s29 + $0x30] ss:$8 sps:$4 sm:$0xff] (!%p243_p7)   ;;  %v576_v25 = vld [vmem:[%s251_s29 + $0x44] ss:$8 sps:$4 sm:$0xff] (!%p243_p7)  }
  0x23   : > { %392 = vmatprep.subr.bf16.mxu0 (!%p243_p7), %v567_v19  ;;  %v578_v26 = vld [vmem:[%s251_s29 + $0x40] ss:$8 sps:$4 sm:$0xff] (!%p243_p7)   ;;  %v579_v27 = vld [vmem:[%s251_s29 + $0x54] ss:$8 sps:$4 sm:$0xff] (!%p243_p7)   ;;  %v581_v28 = vld [vmem:[%s251_s29 + $0x50] ss:$8 sps:$4 sm:$0xff] (!%p243_p7)  }
  0x24   : > { %v582_v29 = vld [vmem:[%s251_s29 + $0x64] ss:$8 sps:$4 sm:$0xff] (!%p243_p7)   ;;  %v584_v30 = vld [vmem:[%s251_s29 + $0x60] ss:$8 sps:$4 sm:$0xff] (!%p243_p7)   ;;  %v585_v31 = vld [vmem:[%s251_s29 + $0x74] ss:$8 sps:$4 sm:$0xff] (!%p243_p7)  }
  0x25   : > { %v587_v32 = vld [vmem:[%s251_s29 + $0x70] ss:$8 sps:$4 sm:$0xff]   ;;  %s717_s5 = smov (!%p279_p8, %s516_s5), 3 }
  0x26   : > { %393 = vmatpush1.bf16.msra.mxu0 %v569_v20  ;;  %s517_s6 = sshll.u32 %s717_s5, 3 }
  0x27   : > { %394 = vmatprep.subr.bf16.mxu0 %v570_v21  ;;  %s282_s9 = scalar_lea.vmem %s711_s2, %s517_s6  ;;  %s288_s12 = scalar_lea.vmem %s712_s3, %s517_s6 }
  0x28   : > { %v308_v34 = vld [vmem:[%s282_s9] sm:$0xff]  ;;  %v309_v35 = vld [vmem:[%s282_s9 + $0x8] sm:$0xff] }
  0x2a   : > { %395 = vmatpush1.bf16.msra.mxu0 %v572_v22 }
  0x2b   : > { %396 = vmatprep.subr.bf16.mxu0 %v573_v23 }
  0x2e   : > { %397 = vmatpush1.bf16.msra.mxu0 %v575_v24 }
  0x2f   : > { %398 = vmatprep.subr.bf16.mxu0 %v576_v25 }
  0x32   : > { %399 = vmatpush1.bf16.msra.mxu0 %v578_v26 }
  0x33   : > { %400 = vmatprep.subr.bf16.mxu0 %v579_v27 }
  0x36   : > { %401 = vmatpush1.bf16.msra.mxu0 %v581_v28 }
  0x37   : > { %402 = vmatprep.subr.bf16.mxu0 %v582_v29 }
  0x3a   : > { %403 = vmatpush1.bf16.msra.mxu0 %v584_v30 }
  0x3b   : > { %404 = vmatprep.subr.bf16.mxu0 %v585_v31 }
  0x3e   : > { %405 = vmatpush1.bf16.msra.mxu0 %v587_v32 }
  0x41   : > { %423 = vmatmul.mubr.bf16.vlgmr.msra.gmra.mrb[0].mxu0 %v291_v33 }
 0x114   : > { %v424_v36 = vpop.f32.mrb[0].mxu0 }
 0x115   : > { %v425_v37 = vadd.f32 %v424_v36, %v308_v34  ;;  %v426_v38 = vpop.f32.mrb[1].mxu0 }
 0x116   : > { %v427_v39 = vadd.f32 %v426_v38, %v309_v35  ;;  %v428_v40 = vpop.f32.mrb[2].mxu0 }
 0x117   : > { %431 = vst [vmem:[%s288_s12] sm:$0xff] %v425_v37  ;;  %v429_v41 = vpop.f32.mrb[3].mxu0 }
 0x118   : > { %432 = vst [vmem:[%s288_s12 + $0x8] sm:$0xff] %v427_v39 }
 0x119 PF: > { %p10_p9 = scmp.ge.s32.totalorder %s650_s16, 4   ;;  %s713_s12 = smov %s606_s13 }
 0x11a   : > { %s714_s13 = smov %s659_s19  ;;  %s715_s14 = smov %s650_s16 }
 0x11b   :  { %12 = sbr.rel (!%p10_p9) target bundleno = 2 (0x2), region = 108 }

// kernel: _lambda_.58
= control target key start
LH: loop header
LB: loop body
LE: loop exit
PB: predicated region body
PF: predicated region fallthrough
CT: control target
= control target key end

     0   :  { %s773_s9 = smov 0   ;;  %s775_s10 = smov 0   ;;  %s936_s0 = inlined_call_operand.vmem [shape: bf16[8,256], index: 0, kind: input, shape index: {}]   ;;  %s937_s1 = inlined_call_operand.vmem [shape: bf16[256,512], index: 1, kind: input, shape index: {}]   ;;  %s938_s2 = inlined_call_operand.vmem [shape: f32[8,512], index: 2, kind: output, shape index: {}]  }
   0x1   :  { %s777_s11 = smov 0  }
   0x2 LB: > { %s612_s12 = sadd.s32 4294967295, %s756_s11   ;;  %s790_s13 = sadd.s32 1, %s756_s11   ;;  %s756_s11 = sphi %s777_s11, %s941_s11   ;;  %s752_s10 = sphi %s775_s10, %s940_s10   ;;  %s748_s9 = sphi %s773_s9, %s939_s9  }
   0x3   : > { %s37_s14 = ssub.s32 %s756_s11, %s790_s13  ;;  %s40_s15 = sadd.s32 1, %s752_s10 }
   0x4   : > { %p38_p0 = scmp.eq.s32.totalorder %s37_s14, 0  ;;  %p47_p1 = scmp.ne.s32.totalorder %s752_s10, %s748_s9 }
   0x5   : > { %p48_p2 = scmp.eq.s32.totalorder %s756_s11, 0  ;;  %p615_p4 = scmp.ge.s32.totalorder %s756_s11, 2 }
   0x6   : > { %s799_s16 = scalar_select %p38_p0, %s752_s10, %s40_s15  }
   0x7   : > { %p49_p3 = por %p48_p2, %p47_p1  ;;  %102 = sbr.rel (%p615_p4) target bundleno = 34 (0x22), region = 20 }
   0xe   : > { %105 = sbr.rel (!%p49_p3) target bundleno = 34 (0x22), region = 24  ;;  %s107_s17 = sand.u32 (%p49_p3), 1, %s752_s10  }
   0xf   : > { %s659_s18 = sshll.u32 (%p49_p3), %s756_s11, 3  ;;  %s616_s19 = sshll.u32 (%p49_p3), %s107_s17, 8 }
  0x10   : > { %s807_s22 = scalar_lea.vmem (%p49_p3), %s937_s1, %s659_s18  ;;  %s812_s23 = scalar_lea.vmem (%p49_p3), [#allocation2], %s616_s19 }
  0x11   : > { %v202_v0 = vld [vmem:[%s807_s22] sm:$0xff] (%p49_p3)  ;;  %v204_v1 = vld [vmem:[%s807_s22 + $0x10] sm:$0xff] (%p49_p3) }
  0x12   : > { %v206_v2 = vld [vmem:[%s807_s22 + $0x20] sm:$0xff] (%p49_p3)  ;;  %203 = vst [vmem:[%s812_s23] sm:$0xff] (%p49_p3), %v202_v0  ;;  %205 = vst [vmem:[%s812_s23 + $0x8] sm:$0xff] (%p49_p3), %v204_v1  ;;  %v208_v3 = vld [vmem:[%s807_s22 + $0x30] sm:$0xff] (%p49_p3) }
  0x13   : > { %207 = vst [vmem:[%s812_s23 + $0x10] sm:$0xff] (%p49_p3), %v206_v2  ;;  %v210_v4 = vld [vmem:[%s807_s22 + $0x40] sm:$0xff] (%p49_p3)  ;;  %v212_v5 = vld [vmem:[%s807_s22 + $0x50] sm:$0xff] (%p49_p3)  ;;  %209 = vst [vmem:[%s812_s23 + $0x18] sm:$0xff] (%p49_p3), %v208_v3 }
  0x14   : > { %211 = vst [vmem:[%s812_s23 + $0x20] sm:$0xff] (%p49_p3), %v210_v4  ;;  %213 = vst [vmem:[%s812_s23 + $0x28] sm:$0xff] (%p49_p3), %v212_v5  ;;  %v214_v6 = vld [vmem:[%s807_s22 + $0x60] sm:$0xff] (%p49_p3)  ;;  %v216_v7 = vld [vmem:[%s807_s22 + $0x70] sm:$0xff] (%p49_p3) }
  0x15   : > { %v218_v8 = vld [vmem:[%s807_s22 + $0x80] sm:$0xff]  ;;  %215 = vst [vmem:[%s812_s23 + $0x30] sm:$0xff] %v214_v6  ;;  %217 = vst [vmem:[%s812_s23 + $0x38] sm:$0xff] %v216_v7  ;;  %v220_v9 = vld [vmem:[%s807_s22 + $0x90] sm:$0xff] }
  0x16   : > { %219 = vst [vmem:[%s812_s23 + $0x40] sm:$0xff] %v218_v8  ;;  %v222_v10 = vld [vmem:[%s807_s22 + $0xa0] sm:$0xff]  ;;  %v224_v11 = vld [vmem:[%s807_s22 + $0xb0] sm:$0xff]  ;;  %221 = vst [vmem:[%s812_s23 + $0x48] sm:$0xff] %v220_v9 }
  0x17   : > { %223 = vst [vmem:[%s812_s23 + $0x50] sm:$0xff] %v222_v10  ;;  %225 = vst [vmem:[%s812_s23 + $0x58] sm:$0xff] %v224_v11  ;;  %v226_v12 = vld [vmem:[%s807_s22 + $0xc0] sm:$0xff]  ;;  %v228_v13 = vld [vmem:[%s807_s22 + $0xd0] sm:$0xff] }
  0x18   : > { %v230_v14 = vld [vmem:[%s807_s22 + $0xe0] sm:$0xff]  ;;  %227 = vst [vmem:[%s812_s23 + $0x60] sm:$0xff] %v226_v12  ;;  %229 = vst [vmem:[%s812_s23 + $0x68] sm:$0xff] %v228_v13  ;;  %v232_v15 = vld [vmem:[%s807_s22 + $0xf0] sm:$0xff] }
  0x19   : > { %231 = vst [vmem:[%s812_s23 + $0x70] sm:$0xff] %v230_v14  ;;  %v234_v16 = vld [vmem:[%s807_s22 + $0x100] sm:$0xff]  ;;  %v236_v17 = vld [vmem:[%s807_s22 + $0x110] sm:$0xff]  ;;  %233 = vst [vmem:[%s812_s23 + $0x78] sm:$0xff] %v232_v15 }
  0x1a   : > { %235 = vst [vmem:[%s812_s23 + $0x80] sm:$0xff] %v234_v16  ;;  %237 = vst [vmem:[%s812_s23 + $0x88] sm:$0xff] %v236_v17  ;;  %v238_v18 = vld [vmem:[%s807_s22 + $0x120] sm:$0xff]  ;;  %v240_v19 = vld [vmem:[%s807_s22 + $0x130] sm:$0xff] }
  0x1b   : > { %v242_v20 = vld [vmem:[%s807_s22 + $0x140] sm:$0xff]  ;;  %239 = vst [vmem:[%s812_s23 + $0x90] sm:$0xff] %v238_v18  ;;  %241 = vst [vmem:[%s812_s23 + $0x98] sm:$0xff] %v240_v19  ;;  %v244_v21 = vld [vmem:[%s807_s22 + $0x150] sm:$0xff] }
  0x1c   : > { %243 = vst [vmem:[%s812_s23 + $0xa0] sm:$0xff] %v242_v20  ;;  %v246_v22 = vld [vmem:[%s807_s22 + $0x160] sm:$0xff]  ;;  %v248_v23 = vld [vmem:[%s807_s22 + $0x170] sm:$0xff]  ;;  %245 = vst [vmem:[%s812_s23 + $0xa8] sm:$0xff] %v244_v21 }
  0x1d   : > { %247 = vst [vmem:[%s812_s23 + $0xb0] sm:$0xff] %v246_v22  ;;  %249 = vst [vmem:[%s812_s23 + $0xb8] sm:$0xff] %v248_v23  ;;  %v250_v24 = vld [vmem:[%s807_s22 + $0x180] sm:$0xff]  ;;  %v252_v25 = vld [vmem:[%s807_s22 + $0x190] sm:$0xff] }
  0x1e   : > { %v254_v26 = vld [vmem:[%s807_s22 + $0x1a0] sm:$0xff]  ;;  %251 = vst [vmem:[%s812_s23 + $0xc0] sm:$0xff] %v250_v24  ;;  %253 = vst [vmem:[%s812_s23 + $0xc8] sm:$0xff] %v252_v25  ;;  %v256_v27 = vld [vmem:[%s807_s22 + $0x1b0] sm:$0xff] }
  0x1f   : > { %255 = vst [vmem:[%s812_s23 + $0xd0] sm:$0xff] %v254_v26  ;;  %v258_v28 = vld [vmem:[%s807_s22 + $0x1c0] sm:$0xff]  ;;  %v260_v29 = vld [vmem:[%s807_s22 + $0x1d0] sm:$0xff]  ;;  %257 = vst [vmem:[%s812_s23 + $0xd8] sm:$0xff] %v256_v27 }
  0x20   : > { %259 = vst [vmem:[%s812_s23 + $0xe0] sm:$0xff] %v258_v28  ;;  %261 = vst [vmem:[%s812_s23 + $0xe8] sm:$0xff] %v260_v29  ;;  %v262_v30 = vld [vmem:[%s807_s22 + $0x1e0] sm:$0xff]  ;;  %v264_v31 = vld [vmem:[%s807_s22 + $0x1f0] sm:$0xff] }
  0x21   : > { %263 = vst [vmem:[%s812_s23 + $0xf0] sm:$0xff] %v262_v30  ;;  %265 = vst [vmem:[%s812_s23 + $0xf8] sm:$0xff] %v264_v31 }
  0x22 PF: > { %p619_p5 = scmp.ge.s32.totalorder %s756_s11, 1  ;;  %p270_p6 = scmp.lt.s32.totalorder %s756_s11, 3 }
  0x24   : > { %p271_p7 = pnand %p619_p5, %p270_p6 }
  0x25   : > { %s277_s24 = sand.u32 (!%p271_p7), 1, %s748_s9   ;;  %v881_v32 = vld [vmem:[%s936_s0] sm:$0xff] (!%p271_p7)  ;;  %s621_s29 = sshll.u32 (!%p271_p7), %s612_s12, 1 }
  0x26   : > { %274 = sbr.rel (%p271_p7) target bundleno = 321 (0x141), region = 62  ;;  %s620_s27 = sshll.u32 (!%p271_p7), %s277_s24, 8  ;;  %v624_v33 = vcombine.high (!%p271_p7), %v881_v32, %v881_v32  ;;  %v623_v2 = vcombine.low (!%p271_p7), %v881_v32, %v881_v32 }
  0x27   : > { %s885_s28 = scalar_lea.vmem (!%p271_p7), [#allocation2], %s620_s27  ;;  %p300_p8 = scmp.lt.s32.totalorder (!%p271_p7), %s621_s29, 3 }
  0x28   : > { %v684_v34 = vld [vmem:[%s885_s28 + $0x4] ss:$8 sps:$4 sm:$0xff] (!%p271_p7)   ;;  %537 = vmatprep.mubr.bf16.mxu0 (!%p271_p7), %v624_v33  ;;  %v686_v35 = vld [vmem:[%s885_s28] ss:$8 sps:$4 sm:$0xff] (!%p271_p7)   ;;  %v687_v36 = vld [vmem:[%s885_s28 + $0x14] ss:$8 sps:$4 sm:$0xff] (!%p271_p7)  }
  0x29   : > { %505 = vmatprep.subr.bf16.mxu0 (!%p271_p7), %v684_v34  ;;  %v689_v37 = vld [vmem:[%s885_s28 + $0x10] ss:$8 sps:$4 sm:$0xff] (!%p271_p7)   ;;  %v690_v38 = vld [vmem:[%s885_s28 + $0x24] ss:$8 sps:$4 sm:$0xff] (!%p271_p7)   ;;  %v692_v39 = vld [vmem:[%s885_s28 + $0x20] ss:$8 sps:$4 sm:$0xff] (!%p271_p7)  }
  0x2a   : > { %506 = vmatpush1.bf16.msra.mxu0 (!%p271_p7), %v686_v35  ;;  %v693_v40 = vld [vmem:[%s885_s28 + $0x34] ss:$8 sps:$4 sm:$0xff] (!%p271_p7)   ;;  %v695_v41 = vld [vmem:[%s885_s28 + $0x30] ss:$8 sps:$4 sm:$0xff] (!%p271_p7)   ;;  %v696_v42 = vld [vmem:[%s885_s28 + $0x44] ss:$8 sps:$4 sm:$0xff] (!%p271_p7)  }
  0x2b   : > { %507 = vmatprep.subr.bf16.mxu0 (!%p271_p7), %v687_v36  ;;  %v698_v43 = vld [vmem:[%s885_s28 + $0x40] ss:$8 sps:$4 sm:$0xff] (!%p271_p7)   ;;  %v699_v44 = vld [vmem:[%s885_s28 + $0x54] ss:$8 sps:$4 sm:$0xff] (!%p271_p7)   ;;  %v701_v45 = vld [vmem:[%s885_s28 + $0x50] ss:$8 sps:$4 sm:$0xff] (!%p271_p7)  }
  0x2c   : > { %v702_v46 = vld [vmem:[%s885_s28 + $0x64] ss:$8 sps:$4 sm:$0xff] (!%p271_p7)   ;;  %v704_v47 = vld [vmem:[%s885_s28 + $0x60] ss:$8 sps:$4 sm:$0xff] (!%p271_p7)   ;;  %v705_v48 = vld [vmem:[%s885_s28 + $0x74] ss:$8 sps:$4 sm:$0xff] (!%p271_p7)  }
  0x2d   : > { %v707_v49 = vld [vmem:[%s885_s28 + $0x70] ss:$8 sps:$4 sm:$0xff]   ;;  %v708_v50 = vld [vmem:[%s885_s28 + $0x84] ss:$8 sps:$4 sm:$0xff]   ;;  %v710_v51 = vld [vmem:[%s885_s28 + $0x80] ss:$8 sps:$4 sm:$0xff]  }
  0x2e   : > { %508 = vmatpush1.bf16.msra.mxu0 %v689_v37  ;;  %v711_v52 = vld [vmem:[%s885_s28 + $0x94] ss:$8 sps:$4 sm:$0xff]   ;;  %v713_v53 = vld [vmem:[%s885_s28 + $0x90] ss:$8 sps:$4 sm:$0xff]   ;;  %v714_v54 = vld [vmem:[%s885_s28 + $0xa4] ss:$8 sps:$4 sm:$0xff]  }
  0x2f   : > { %509 = vmatprep.subr.bf16.mxu0 %v690_v38  ;;  %v716_v55 = vld [vmem:[%s885_s28 + $0xa0] ss:$8 sps:$4 sm:$0xff]   ;;  %v717_v56 = vld [vmem:[%s885_s28 + $0xb4] ss:$8 sps:$4 sm:$0xff]   ;;  %v719_v57 = vld [vmem:[%s885_s28 + $0xb0] ss:$8 sps:$4 sm:$0xff]  }
  0x30   : > { %v720_v58 = vld [vmem:[%s885_s28 + $0xc4] ss:$8 sps:$4 sm:$0xff]   ;;  %v722_v59 = vld [vmem:[%s885_s28 + $0xc0] ss:$8 sps:$4 sm:$0xff]   ;;  %v723_v60 = vld [vmem:[%s885_s28 + $0xd4] ss:$8 sps:$4 sm:$0xff]  }
  0x31   : > { %v725_v61 = vld [vmem:[%s885_s28 + $0xd0] ss:$8 sps:$4 sm:$0xff]   ;;  %v726_v62 = vld [vmem:[%s885_s28 + $0xe4] ss:$8 sps:$4 sm:$0xff]   ;;  %v728_v63 = vld [vmem:[%s885_s28 + $0xe0] ss:$8 sps:$4 sm:$0xff]  }
  0x32   : > { %510 = vmatpush1.bf16.msra.mxu0 %v692_v39  ;;  %v729_v0 = vld [vmem:[%s885_s28 + $0xf4] ss:$8 sps:$4 sm:$0xff]   ;;  %v731_v1 = vld [vmem:[%s885_s28 + $0xf0] ss:$8 sps:$4 sm:$0xff]   ;;  %s943_s29 = smov (!%p300_p8, %s621_s29), 3 }
  0x33   : > { %511 = vmatprep.subr.bf16.mxu0 %v693_v40  ;;  %s622_s30 = sshll.u32 %s943_s29, 3 }
  0x34   : > { %s303_s5 = scalar_lea.vmem %s938_s2, %s622_s30 }
  0x36   : > { %512 = vmatpush1.bf16.msra.mxu0 %v695_v41 }
  0x37   : > { %513 = vmatprep.subr.bf16.mxu0 %v696_v42 }
  0x3a   : > { %514 = vmatpush1.bf16.msra.mxu0 %v698_v43 }
  0x3b   : > { %515 = vmatprep.subr.bf16.mxu0 %v699_v44 }
  0x3e   : > { %516 = vmatpush1.bf16.msra.mxu0 %v701_v45 }
  0x3f   : > { %517 = vmatprep.subr.bf16.mxu0 %v702_v46 }
  0x42   : > { %518 = vmatpush1.bf16.msra.mxu0 %v704_v47 }
  0x43   : > { %519 = vmatprep.subr.bf16.mxu0 %v705_v48 }
  0x46   : > { %520 = vmatpush1.bf16.msra.mxu0 %v707_v49 }
  0x47   : > { %521 = vmatprep.subr.bf16.mxu0 %v708_v50 }
  0x4a   : > { %522 = vmatpush1.bf16.msra.mxu0 %v710_v51 }
  0x4b   : > { %523 = vmatprep.subr.bf16.mxu0 %v711_v52 }
  0x4e   : > { %524 = vmatpush1.bf16.msra.mxu0 %v713_v53 }
  0x4f   : > { %525 = vmatprep.subr.bf16.mxu0 %v714_v54 }
  0x52   : > { %526 = vmatpush1.bf16.msra.mxu0 %v716_v55 }
  0x53   : > { %527 = vmatprep.subr.bf16.mxu0 %v717_v56 }
  0x56   : > { %528 = vmatpush1.bf16.msra.mxu0 %v719_v57 }
  0x57   : > { %529 = vmatprep.subr.bf16.mxu0 %v720_v58 }
  0x5a   : > { %530 = vmatpush1.bf16.msra.mxu0 %v722_v59 }
  0x5b   : > { %531 = vmatprep.subr.bf16.mxu0 %v723_v60 }
  0x5e   : > { %532 = vmatpush1.bf16.msra.mxu0 %v725_v61 }
  0x5f   : > { %533 = vmatprep.subr.bf16.mxu0 %v726_v62 }
  0x62   : > { %534 = vmatpush1.bf16.msra.mxu0 %v728_v63 }
  0x63   : > { %535 = vmatprep.subr.bf16.mxu0 %v729_v0 }
  0x66   : > { %536 = vmatpush1.bf16.msra.mxu0 %v731_v1 }
  0x69   : > { %538 = vmatmul.mubr.bf16.vlgmr.msra.gmra.mrb[0].mxu0 %v623_v2 }
 0x13c   : > { %v539_v3 = vpop.f32.mrb[0].mxu0 }
 0x13d   : > { %v546_v4 = vmax.f32 %v539_v3, 0.0  ;;  %v541_v5 = vpop.f32.mrb[1].mxu0 }
 0x13e   : > { %v547_v6 = vmax.f32 %v541_v5, 0.0  ;;  %v543_v7 = vpop.f32.mrb[2].mxu0 }
 0x13f   : > { %548 = vst [vmem:[%s303_s5] sm:$0xff] %v546_v4  ;;  %v544_v8 = vpop.f32.mrb[3].mxu0 }
 0x140   : > { %549 = vst [vmem:[%s303_s5 + $0x8] sm:$0xff] %v547_v6 }
 0x141 PF: > { %p9_p9 = scmp.ge.s32.totalorder %s790_s13, 4   ;;  %s939_s9 = smov %s752_s10 }
 0x142   : > { %s940_s10 = smov %s799_s16  ;;  %s941_s11 = smov %s790_s13 }
 0x143   :  { %11 = sbr.rel (!%p9_p9) target bundleno = 2 (0x2), region = 101 }

// kernel: custom-call.14
= control target key start
LH: loop header
LB: loop body
LE: loop exit
PB: predicated region body
PF: predicated region fallthrough
CT: control target
= control target key end

     0   :  { %5 = vsyncpa [#allocation4], 0  ;;  %s1450_s0 = inlined_call_operand.vmem [shape: f32[2,72,72], index: 0, kind: input, shape index: {}]   ;;  %s1451_s1 = inlined_call_operand.vmem [shape: f32[2,72,72], index: 1, kind: output, shape index: {0}]   ;;  %s1452_s2 = inlined_call_operand.hbm [shape: s32[2,72], index: 2, kind: output, shape index: {1}]   ;;  %s1453_s3 = inlined_call_operand.vmem [shape: s32[2,72], index: 3, kind: output, shape index: {2}]  }
   0x1   :  { %7 = vsyncpa [#allocation4 + $0x1], 0  ;;  %s1054_s12 = smov 0   ;;  %s1056_s13 = smov 0  }
   0x2   :  { %s1058_s14 = smov 0   ;;  %s1060_s15 = smov 0  }
   0x3 LB: > { %s1075_s16 = sadd.s32 4294967295, %s1022_s15   ;;  %s817_s17 = sadd.s32 4294967294, %s1022_s15   ;;  %s1022_s15 = sphi %s1060_s15, %s1461_s15   ;;  %s1018_s14 = sphi %s1058_s14, %s1460_s14   ;;  %s1014_s13 = sphi %s1056_s13, %s1459_s13   ;;  %s1010_s12 = sphi %s1054_s12, %s1458_s12  }
   0x4   : > { %s1079_s18 = sadd.s32 1, %s1022_s15   ;;  %s17_s19 = sshrl.u32 %s1022_s15, 3 }
   0x5   : > { %s18_s20 = sshrl.u32 %s1079_s18, 3  ;;  %s22_s21 = sadd.s32 1, %s1018_s14 }
   0x6   : > { %s19_s22 = ssub.s32 %s17_s19, %s18_s20  ;;  %p32_p0 = scmp.ne.s32.totalorder %s1018_s14, %s1014_s13 }
   0x7   : > { %p20_p1 = scmp.eq.s32.totalorder %s19_s22, 0  ;;  %p33_p2 = scmp.eq.s32.totalorder %s1075_s16, 1 }
   0x8   : > { %p38_p3 = scmp.ne.s32.totalorder %s1014_s13, %s1010_s12  ;;  %p39_p4 = scmp.eq.s32.totalorder %s817_s17, 1 }
   0x9   : > { %s1090_s23 = scalar_select %p20_p1, %s1018_s14, %s22_s21  }
   0xa   : > { %p1092_p5 = por %p33_p2, %p32_p0  ;;  %p1096_p6 = por %p39_p4, %p38_p3 }
   0xb   : > { %p819_p7 = scmp.ge.s32.totalorder %s1022_s15, 2 }
   0xc   : > { %s85_s26 = sand.u32 (!%p819_p7), 1, %s1022_s15   ;;  %s873_s27 = smul.u32 (!%p819_p7), 72, %s1022_s15 }
   0xd   : > { %83 = sbr.rel (%p819_p7) target bundleno = 22 (0x16), region = 16 }
   0xe   : > { %s872_s28 = smul.u32 (!%p819_p7), 72, %s85_s26  ;;  %s89_s4 = scalar_lea.vmem (!%p819_p7), %s1450_s0, %s873_s27 }
   0xf   : > { %v102_v0 = vld [vmem:[%s89_s4] sm:$0xff] (!%p819_p7)  ;;  %v104_v1 = vld [vmem:[%s89_s4 + $0x8] sm:$0xff] (!%p819_p7)  ;;  %v106_v2 = vld [vmem:[%s89_s4 + $0x10] sm:$0xff] (!%p819_p7) }
  0x10   : > { %s87_s5 = scalar_lea.vmem (!%p819_p7), [#allocation0], %s872_s28  ;;  %v108_v3 = vld [vmem:[%s89_s4 + $0x18] sm:$0xff] (!%p819_p7)  ;;  %v110_v4 = vld [vmem:[%s89_s4 + $0x20] sm:$0xff] (!%p819_p7)  ;;  %v112_v5 = vld [vmem:[%s89_s4 + $0x28] sm:$0xff] (!%p819_p7) }
  0x11   : > { %103 = vst [vmem:[%s87_s5] sm:$0xff] (!%p819_p7), %v102_v0  ;;  %105 = vst [vmem:[%s87_s5 + $0x8] sm:$0xff] (!%p819_p7), %v104_v1  ;;  %v114_v6 = vld [vmem:[%s89_s4 + $0x30] sm:$0xff] (!%p819_p7)  ;;  %v116_v7 = vld [vmem:[%s89_s4 + $0x38] sm:$0xff] (!%p819_p7) }
  0x12   : > { %107 = vst [vmem:[%s87_s5 + $0x10] sm:$0xff] (!%p819_p7), %v106_v2  ;;  %109 = vst [vmem:[%s87_s5 + $0x18] sm:$0xff] (!%p819_p7), %v108_v3  ;;  %v118_v8 = vld [vmem:[%s89_s4 + $0x40] sm:$0xff] (!%p819_p7) }
  0x13   : > { %111 = vst [vmem:[%s87_s5 + $0x20] sm:$0xff] (!%p819_p7), %v110_v4  ;;  %113 = vst [vmem:[%s87_s5 + $0x28] sm:$0xff] (!%p819_p7), %v112_v5 }
  0x14   : > { %115 = vst [vmem:[%s87_s5 + $0x30] sm:$0xff] %v114_v6  ;;  %117 = vst [vmem:[%s87_s5 + $0x38] sm:$0xff] %v116_v7 }
  0x15   : > { %119 = vst [vmem:[%s87_s5 + $0x40] sm:$0xff] %v118_v8 }
  0x16 PF: > { %p820_p8 = scmp.ge.s32.totalorder %s1022_s15, 1  ;;  %p124_p9 = scmp.lt.s32.totalorder %s1022_s15, 3 }
  0x18   : > { %p125_p10 = pnand %p820_p8, %p124_p9 }
  0x1a   : > { %128 = sbr.rel (%p125_p10) target bundleno = 613 (0x265), region = 39 }
  0x21   : > { %s131_s6 = sand.u32 1, %s1075_s16   ;;  %s146_s7 = sand.u32 1, %s1014_s13   ;;  %v196_v9 = vlaneseq  ;;  %v1032_v20 = vmov 0  }
  0x22   : > { %s874_s8 = smul.u32 72, %s131_s6  ;;  %s1114_s9 = sshll.u32 %s146_s7, 1 }
  0x23   : > { %v1117_v10 = vshrl.u32 %v196_v9, 7  ;;  %s191_s11 = sand.u32 7, %s1075_s16   ;;  %s148_s20 = scalar_lea.vmem [#allocation3], %s1114_s9 }
  0x24   : > { %s133_s10 = scalar_lea.vmem [#allocation0], %s874_s8  ;;  %s1120_s17 = scalar_lea.vmem [#allocation1], %s874_s8 }
  0x25   : > { %v157_v11 = vld [vmem:[%s133_s10] sm:$0xff]  ;;  %v823_v12 = vld [vmem:[%s133_s10 + $0x8] sm:$0xff]  ;;  %v825_v13 = vld [vmem:[%s133_s10 + $0x10] sm:$0xff]  ;;  %s1128_s19 = scalar_lea.vmem [#allocation2], %s191_s11  ;;  %s154_s21 = scalar_lea.vmem [#allocation6], %s1114_s9 }
  0x26   : > { %158 = vst [vmem:[%s1120_s17] sm:$0xff] %v157_v11  ;;  %824 = vst [vmem:[%s1120_s17 + $0x8] sm:$0xff] %v823_v12  ;;  %v827_v14 = vld [vmem:[%s133_s10 + $0x18] sm:$0xff]  ;;  %v829_v15 = vld [vmem:[%s133_s10 + $0x20] sm:$0xff]  ;;  %s1136_s22 = scalar_lea.vmem [#allocation5], %s191_s11  ;;  %s1024_s26 = smov 0  }
  0x27   : > { %826 = vst [vmem:[%s1120_s17 + $0x10] sm:$0xff] %v825_v13  ;;  %v831_v16 = vld [vmem:[%s133_s10 + $0x28] sm:$0xff]  ;;  %828 = vst [vmem:[%s1120_s17 + $0x18] sm:$0xff] %v827_v14  ;;  %v833_v17 = vld [vmem:[%s133_s10 + $0x30] sm:$0xff] }
  0x28   : > { %830 = vst [vmem:[%s1120_s17 + $0x20] sm:$0xff] %v829_v15  ;;  %832 = vst [vmem:[%s1120_s17 + $0x28] sm:$0xff] %v831_v16  ;;  %v835_v18 = vld [vmem:[%s133_s10 + $0x38] sm:$0xff]  ;;  %v837_v19 = vld [vmem:[%s133_s10 + $0x40] sm:$0xff] }
  0x29   : > { %195 = vst [vmem:[%s1128_s19] sm:$0x1] %v1032_v20  ;;  %834 = vst [vmem:[%s1120_s17 + $0x30] sm:$0xff] %v833_v17 }
  0x2a   : > { %836 = vst [vmem:[%s1120_s17 + $0x38] sm:$0xff] %v835_v18  ;;  %838 = vst [vmem:[%s1120_s17 + $0x40] sm:$0xff] %v837_v19 }
  0x2b LB: >> { %s839_s27 = sshll.u32 %s1026_s26, 3  ;;  %s204_s26 = sadd.s32 1, %s1026_s26   ;;  %s1026_s26 = sphi %s1024_s26, %s204_s26  }
  0x2c   : >> { %v208_v21 = vstv %s839_s27  ;;  %s206_s28 = scalar_lea.vmem [#allocation7], %s839_s27  ;;  %p201_p11 = scmp.ge.s32.totalorder %s204_s26, 9  }
  0x2d   : >> { %v209_v22 = vadd.s32 %v208_v21, %v1117_v10  ;;  %s1139_s29 = smov (%p201_p11), 0  }
  0x2e   : > { %203 = sbr.rel (!%p201_p11) target bundleno = 43 (0x2b), region = 219 }
  0x2f   : >> { %210 = vst [vmem:[%s206_s28] sm:$0xff] %v209_v22 }
  0x35 LB: >> { %v221_v23 = vld [vmem:[%s1120_s17] sm:$0xff]  ;;  %v842_v24 = vld [vmem:[%s1120_s17 + $0x8] sm:$0xff]  ;;  %v1147_v25 = vadd.s32 8, %v1117_v10  ;;  %v1150_v27 = vstv %s1030_s29  ;;  %v843_v29 = vld [vmem:[%s1120_s17 + $0x10] sm:$0xff]  ;;  %v1156_v30 = vadd.s32 16, %v1117_v10  ;;  %v1164_v35 = vadd.s32 24, %v1117_v10  ;;  %s375_s4 = scalar_lea.vmem %s1120_s17, %s1030_s29 [#allocation1]  ;;  %s1030_s29 = sphi %s1139_s29, %s216_s29  }
  0x36   : >> { %v222_v26 = vand.u32 2147483647, %v221_v23  ;;  %v234_v28 = vand.u32 2147483647, %v842_v24  ;;  %vm225_vm0 = vcmp.ge.s32.totalorder %v1117_v10, %v1150_v27  ;;  %v246_v33 = vand.u32 2147483647, %v843_v29 }
  0x37   : >> { %vm237_vm3 = vcmp.ge.s32.totalorder %v1147_v25, %v1150_v27  ;;  %v844_v34 = vld [vmem:[%s1120_s17 + $0x18] sm:$0xff]  ;;  %vm249_vm6 = vcmp.ge.s32.totalorder %v1156_v30, %v1150_v27  ;;  %v845_v39 = vld [vmem:[%s1120_s17 + $0x20] sm:$0xff]  ;;  %v1171_v40 = vadd.s32 32, %v1117_v10  ;;  %vm261_vm9 = vcmp.ge.s32.totalorder %v1164_v35, %v1150_v27  ;;  %v846_v44 = vld [vmem:[%s1120_s17 + $0x28] sm:$0xff]  ;;  %s363_s30 = ssub.s32 128, %s1030_s29  ;;  %s381_s6 = scalar_lea.vmem [#allocation7], %s1030_s29 }
  0x38   : >> { %vm841_vm1 = vcmp.gt.f32.partialorder %v222_v26, -inf  ;;  %v258_v38 = vand.u32 2147483647, %v844_v34  ;;  %v270_v43 = vand.u32 2147483647, %v845_v39  ;;  %v1178_v45 = vadd.s32 40, %v1117_v10 }
  0x39   : >> { %vm229_vm2 = vmand %vm225_vm0, %vm841_vm1  ;;  %vm273_vm12 = vcmp.ge.s32.totalorder %v1171_v40, %v1150_v27  ;;  %v282_v48 = vand.u32 2147483647, %v846_v44  ;;  %v847_v49 = vld [vmem:[%s1120_s17 + $0x30] sm:$0xff]  ;;  %v1185_v50 = vadd.s32 48, %v1117_v10  ;;  %v848_v54 = vld [vmem:[%s1120_s17 + $0x38] sm:$0xff]  ;;  %v1192_v55 = vadd.s32 56, %v1117_v10 }
  0x3a   : >> { %v230_v31 = vsel %vm229_vm2, %v1117_v10, %v1150_v27  ;;  %v231_v32 = vsel %vm229_vm2, %v222_v26, -inf  ;;  %vm285_vm15 = vcmp.ge.s32.totalorder %v1178_v45, %v1150_v27  ;;  %v294_v53 = vand.u32 2147483647, %v847_v49  ;;  %v849_v59 = vld [vmem:[%s1120_s17 + $0x40] sm:$0xff]  ;;  %s216_s29 = sadd.s32 1, %s1030_s29  }
  0x3b   : >> { %vm240_vm4 = vcmp.lt.f32.partialorder %v231_v32, %v234_v28  ;;  %vm297_vm2 = vcmp.ge.s32.totalorder %v1185_v50, %v1150_v27  ;;  %v306_v58 = vand.u32 2147483647, %v848_v54  ;;  %v1199_v60 = vadd.s32 64, %v1117_v10  ;;  %p213_p12 = scmp.ge.s32.totalorder %s216_s29, 72  }
  0x3c   : >> { %vm241_vm5 = vmand %vm237_vm3, %vm240_vm4  ;;  %v318_v63 = vand.u32 2147483647, %v849_v59  ;;  %s877_s11 = smul.u32 (%p213_p12), 72, %s1075_s16  ;;  %s652_s26 = sshrl.u32 (%p213_p12), %s1075_s16, 3 }
  0x3d   : >> { %v242_v36 = vsel %vm241_vm5, %v1147_v25, %v230_v31  ;;  %v243_v37 = vsel %vm241_vm5, %v234_v28, %v231_v32  ;;  %vm309_vm5 = vcmp.ge.s32.totalorder %v1192_v55, %v1150_v27  ;;  %s659_s27 = sshll.u32 (%p213_p12), %s148_s20, 4  ;;  %s1386_s27 = int_to_ptr.vmem [resolvable:$true] %s659_s27 }
  0x3e   : >> { %vm252_vm7 = vcmp.lt.f32.partialorder %v243_v37, %v246_v33 }
  0x3f   : >> { %vm253_vm8 = vmand %vm249_vm6, %vm252_vm7 }
  0x40   : >> { %v254_v41 = vsel %vm253_vm8, %v1156_v30, %v242_v36  ;;  %v255_v42 = vsel %vm253_vm8, %v246_v33, %v243_v37  ;;  %vm321_vm8 = vcmp.ge.s32.totalorder %v1199_v60, %v1150_v27 }
  0x41   : >> { %vm264_vm10 = vcmp.lt.f32.partialorder %v255_v42, %v258_v38 }
  0x42   : >> { %vm265_vm11 = vmand %vm261_vm9, %vm264_vm10 }
  0x43   : >> { %v266_v46 = vsel %vm265_vm11, %v1164_v35, %v254_v41  ;;  %v267_v47 = vsel %vm265_vm11, %v258_v38, %v255_v42  ;;  %v1210_v38 = vand.u32 127, %v196_v9  ;;  %v372_v41 = vld [vmem:[%s1128_s19] ss:$0 sm:$0xff] }
  0x44   : >> { %vm276_vm13 = vcmp.lt.f32.partialorder %v267_v47, %v270_v43  ;;  %v377_v42 = vld [vmem:[%s375_s4] ss:$0 sm:$0xff] }
  0x45   : >> { %vm277_vm14 = vmand %vm273_vm12, %vm276_vm13 }
  0x46   : >> { %v278_v51 = vsel %vm277_vm14, %v1171_v40, %v266_v46  ;;  %v279_v52 = vsel %vm277_vm14, %v270_v43, %v267_v47  ;;  %v383_v43 = vld [vmem:[%s381_s6] ss:$0 sm:$0xff] }
  0x47   : >> { %vm288_vm0 = vcmp.lt.f32.partialorder %v279_v52, %v282_v48 }
  0x48   : >> { %vm289_vm1 = vmand %vm285_vm15, %vm288_vm0 }
  0x49   : >> { %v290_v56 = vsel %vm289_vm1, %v1178_v45, %v278_v51  ;;  %v291_v57 = vsel %vm289_vm1, %v282_v48, %v279_v52 }
  0x4a   : >> { %vm300_vm3 = vcmp.lt.f32.partialorder %v291_v57, %v294_v53 }
  0x4b   : >> { %vm301_vm4 = vmand %vm297_vm2, %vm300_vm3  ;;  %vm1216_vm2 = vcmp.eq.s32.totalorder %v1210_v38, %v1150_v27 }
  0x4c   : >> { %v302_v61 = vsel %vm301_vm4, %v1185_v50, %v290_v56  ;;  %v303_v62 = vsel %vm301_vm4, %v294_v53, %v291_v57  ;;  %vm416_vm4 = vcmp.gt.s32.totalorder %v1147_v25, %v1150_v27 }
  0x4d   : >> { %vm312_vm6 = vcmp.lt.f32.partialorder %v303_v62, %v306_v58 }
  0x4e   : >> { %vm313_vm7 = vmand %vm309_vm5, %vm312_vm6  ;;  %vm401_vm5 = vcmp.gt.s32.totalorder %v1117_v10, %v1150_v27  ;;  %vm431_vm6 = vcmp.gt.s32.totalorder %v1156_v30, %v1150_v27 }
  0x4f   : >> { %v314_v0 = vsel %vm313_vm7, %v1192_v55, %v302_v61  ;;  %v315_v1 = vsel %vm313_vm7, %v306_v58, %v303_v62 }
  0x50   : >> { %vm324_vm9 = vcmp.lt.f32.partialorder %v315_v1, %v318_v63 }
  0x51   : >> { %vm325_vm10 = vmand %vm321_vm8, %vm324_vm9  ;;  %vm446_vm8 = vcmp.gt.s32.totalorder %v1164_v35, %v1150_v27  ;;  %vm461_vm9 = vcmp.gt.s32.totalorder %v1171_v40, %v1150_v27 }
  0x52   : >> { %v326_v2 = vsel %vm325_vm10, %v1199_v60, %v314_v0  ;;  %v327_v3 = vsel %vm325_vm10, %v318_v63, %v315_v1  ;;  %vm476_vm10 = vcmp.gt.s32.totalorder %v1178_v45, %v1150_v27 }
  0x53   : >> { %v328_v4 = vrot.slane %v327_v3, 1  ;;  %v329_v5 = vrot.slane %v326_v2, 1 }
  0x55   : >> { %vm330_vm11 = vcmp.ge.f32.partialorder %v328_v4, %v327_v3  ;;  %v333_v6 = vrot.slane %v328_v4, 1  ;;  %v334_v7 = vrot.slane %v329_v5, 1 }
  0x56   : >> { %v331_v8 = vsel %vm330_vm11, %v328_v4, %v327_v3  ;;  %v332_v11 = vsel %vm330_vm11, %v329_v5, %v326_v2  ;;  %vm420_vm11 = vmand %vm416_vm4, %vm1216_vm2 }
  0x57   : >> { %vm335_vm12 = vcmp.ge.f32.partialorder %v333_v6, %v331_v8  ;;  %v338_v12 = vrot.slane %v333_v6, 1  ;;  %v339_v13 = vrot.slane %v334_v7, 1 }
  0x58   : >> { %v336_v14 = vsel %vm335_vm12, %v333_v6, %v331_v8  ;;  %v337_v15 = vsel %vm335_vm12, %v334_v7, %v332_v11  ;;  %vm491_vm12 = vcmp.gt.s32.totalorder %v1185_v50, %v1150_v27 }
  0x59   : >> { %vm340_vm13 = vcmp.ge.f32.partialorder %v338_v12, %v336_v14  ;;  %v343_v16 = vrot.slane %v338_v12, 1  ;;  %v344_v17 = vrot.slane %v339_v13, 1 }
  0x5a   : >> { %v341_v18 = vsel %vm340_vm13, %v338_v12, %v336_v14  ;;  %v342_v19 = vsel %vm340_vm13, %v339_v13, %v337_v15  ;;  %vm405_vm13 = vmand %vm401_vm5, %vm1216_vm2 }
  0x5b   : >> { %vm345_vm14 = vcmp.ge.f32.partialorder %v343_v16, %v341_v18  ;;  %v348_v20 = vrot.slane %v343_v16, 1  ;;  %v349_v21 = vrot.slane %v344_v17, 1 }
  0x5c   : >> { %v346_v22 = vsel %vm345_vm14, %v343_v16, %v341_v18  ;;  %v347_v23 = vsel %vm345_vm14, %v344_v17, %v342_v19  ;;  %vm435_vm14 = vmand %vm431_vm6, %vm1216_vm2 }
  0x5d   : >> { %vm350_vm15 = vcmp.ge.f32.partialorder %v348_v20, %v346_v22  ;;  %v353_v24 = vrot.slane %v348_v20, 1  ;;  %v354_v26 = vrot.slane %v349_v21, 1 }
  0x5e   : >> { %v351_v28 = vsel %vm350_vm15, %v348_v20, %v346_v22  ;;  %v352_v29 = vsel %vm350_vm15, %v349_v21, %v347_v23  ;;  %vm506_vm15 = vcmp.gt.s32.totalorder %v1192_v55, %v1150_v27 }
  0x5f   : >> { %vm355_vm0 = vcmp.ge.f32.partialorder %v353_v24, %v351_v28  ;;  %v358_v31 = vrot.slane %v353_v24, 1  ;;  %v359_v32 = vrot.slane %v354_v26, 1 }
  0x60   : >> { %v356_v33 = vsel %vm355_vm0, %v353_v24, %v351_v28  ;;  %v357_v34 = vsel %vm355_vm0, %v354_v26, %v352_v29  ;;  %vm450_vm0 = vmand %vm446_vm8, %vm1216_vm2 }
  0x61   : >> { %vm360_vm1 = vcmp.ge.f32.partialorder %v358_v31, %v356_v33 }
  0x62   : >> { %v362_v36 = vsel %vm360_vm1, %v359_v32, %v357_v34  ;;  %vm521_vm1 = vcmp.gt.s32.totalorder %v1199_v60, %v1150_v27 }
  0x63   : >> { %364 = vrot.lane.b32.xlu0 %v362_v36, %s363_s30  ;;  %s1370_s30 = scalar_lea.vmem (%p213_p12), %s1451_s1, %s877_s11 }
  0xd5   : >> { %v365_v37 = vpop.permute.xlu0 %364 }
  0xd6   : >> { %875 = vpush %v365_v37 }
 0x107   : >> { %s876_s5 = spop %875 }
 0x108   : >> { %v371_v44 = vstv %s876_s5  ;;  %s376_s8 = scalar_lea.vmem %s1120_s17, %s876_s5 [#allocation1]  ;;  %s382_s10 = scalar_lea.vmem [#allocation7], %s876_s5 }
 0x109   : >> { %v373_v46 = vsel %vm1216_vm2, %v371_v44, %v372_v41  ;;  %v1225_v47 = vld [vmem:[%s376_s8] ss:$0 sm:$0xff] }
 0x10a   : >> { %v384_v48 = vld [vmem:[%s382_s10] ss:$0 sm:$0xff]  ;;  %374 = vst [vmem:[%s1128_s19] sm:$0x1] %v373_v46  ;;  %379 = vst [vmem:[%s376_s8] sm:$0x1] %v377_v42  ;;  %vm387_vm3 = vcmp.ne.f32.partialorder %v1225_v47, 0.0  ;;  %s868_s19 = sshll.u32 (%p213_p12), %s652_s26, 5 }
 0x10b   : >> { %385 = vst [vmem:[%s382_s10] sm:$0x1] %v383_v43  ;;  %380 = vst [vmem:[%s375_s4] sm:$0x1] %v1225_v47  ;;  %s1384_s5 = scalar_lea.hbm (%p213_p12), %s1452_s2, %s868_s19  ;;  %s952_s8 = scalar_lea.vmem (%p213_p12), %s1386_s27, 32 }
 0x10c   : >> { %386 = vst [vmem:[%s381_s6] sm:$0x1] %v384_v48  ;;  %vm388_vm7 = vmand %vm1216_vm2, %vm387_vm3  ;;  %s606_s6 = scalar_lea.sflag (%p213_p12), [#allocation4], %s146_s7  ;;  %p953_p13 = scmp.ne.s32.totalorder (%p213_p12), %s1386_s27, %s952_s8 }
 0x10d   : >> { %v389_v49 = vsel %vm388_vm7, %v1225_v47, 1.0  ;;  %vm465_vm3 = vmand %vm461_vm9, %vm1216_vm2  ;;  %s1033_s10 = smov (%p213_p12), [#allocation3]  }
 0x10e   : >> { %v417_v51 = vsel %vm416_vm4, %v389_v49, 1.0  ;;  %v402_v52 = vsel %vm401_vm5, %v389_v49, 1.0  ;;  %v432_v53 = vsel %vm431_vm6, %v389_v49, 1.0  ;;  %v447_v54 = vsel %vm446_vm8, %v389_v49, 1.0  ;;  %vm480_vm4 = vmand %vm476_vm10, %vm1216_vm2  ;;  %p954_p0 = pnand (%p213_p12), %p953_p13, %p1092_p5  ;;  %s956_s11 = sshll.u32 (%p213_p12), %s1033_s10, 4  ;;  %s957_s11 = int_to_ptr.vmem [resolvable:$false] %s956_s11 }
 0x10f   : >> { %934 = vrcp.f32 %v417_v51  ;;  %v462_v56 = vsel %vm461_vm9, %v389_v49, 1.0  ;;  %v477_v57 = vsel %vm476_vm10, %v389_v49, 1.0  ;;  %v492_v4 = vsel %vm491_vm12, %v389_v49, 1.0  ;;  %vm495_vm5 = vmand %vm491_vm12, %vm1216_vm2  ;;  %s958_s19 = scalar_lea.vmem (%p213_p12), %s957_s11, 64  ;;  %p959_p2 = scmp.lt.s32.totalorder (%p213_p12), %s1386_s27, %s957_s11 }
 0x110   : >> { %936 = vrcp.f32 %v402_v52  ;;  %v507_v12 = vsel %vm506_vm15, %v389_v49, 1.0  ;;  %v522_v16 = vsel %vm521_vm1, %v389_v49, 1.0  ;;  %vm510_vm6 = vmand %vm506_vm15, %vm1216_vm2  ;;  %vm393_vm8 = vcmp.gt.s32.totalorder %v1210_v38, %v1150_v27  ;;  %p955_p1 = pneg (%p213_p12), %p954_p0  ;;  %p960_p3 = scmp.lt.s32.totalorder (%p213_p12), %s958_s19, %s952_s8 }
 0x111   : >> { %938 = vrcp.f32 %v432_v53  ;;  %vm525_vm7 = vmand %vm521_vm1, %vm1216_vm2  ;;  %v394_v55 = vsel %vm393_vm8, %v1225_v47, 0.0 }
 0x112   : >> { %940 = vrcp.f32 %v447_v54  ;;  %v850_v59 = vld [vmem:[%s1120_s17 + $0x8] sm:$0xff]  ;;  %v398_v63 = vld [vmem:[%s1120_s17] sm:$0xff]  ;;  %v852_v2 = vld [vmem:[%s1120_s17 + $0x10] sm:$0xff]  ;;  %p961_p4 = por (%p213_p12), %p960_p3, %p959_p2 }
 0x113   : >> { %942 = vrcp.f32 %v462_v56  ;;  %v854_v7 = vld [vmem:[%s1120_s17 + $0x18] sm:$0xff]  ;;  %v856_v30 = vld [vmem:[%s1120_s17 + $0x20] sm:$0xff]  ;;  %v858_v35 = vld [vmem:[%s1120_s17 + $0x28] sm:$0xff] }
 0x114   : >> { %944 = vrcp.f32 %v477_v57  ;;  %v860_v21 = vld [vmem:[%s1120_s17 + $0x30] sm:$0xff]  ;;  %v862_v40 = vld [vmem:[%s1120_s17 + $0x38] sm:$0xff]  ;;  %v864_v45 = vld [vmem:[%s1120_s17 + $0x40] sm:$0xff]  ;;  %p962_p8 = pnand (%p213_p12), %p961_p4, %p955_p1 }
 0x115   : >> { %946 = vrcp.f32 %v492_v4 }
 0x116   : >> { %948 = vrcp.f32 %v507_v12 }
 0x117   : >> { %950 = vrcp.f32 %v522_v16 }
 0x119   : >> { %v935_v58 = vpop.eup %934 }
 0x11a   : >> { %v937_v61 = vpop.eup %936  ;;  %v1271_v62 = vmul.f32 %v935_v58, %v850_v59 }
 0x11b   : >> { %v939_v0 = vpop.eup %938  ;;  %v1279_v1 = vmul.f32 %v937_v61, %v398_v63 }
 0x11c   : >> { %v421_v25 = vsel %vm420_vm11, %v1271_v62, 0.0  ;;  %v1283_v3 = vmul.f32 %v939_v0, %v852_v2  ;;  %v941_v5 = vpop.eup %940  ;;  %v532_v0 = vld [vmem:[#allocation7] sm:$0xff] (%p213_p12)  ;;  %v536_v2 = vld [vmem:[#allocation7 + $0x10] sm:$0xff] (%p213_p12) }
 0x11d   : >> { %422 = vadd.xlane.f32.xlu1 %v421_v25  ;;  %v406_v6 = vsel %vm405_vm13, %v1279_v1, 0.0  ;;  %v449_v11 = vmul.f32 %v941_v5, %v854_v7  ;;  %v943_v13 = vpop.eup %942  ;;  %v538_v25 = vld [vmem:[#allocation7 + $0x18] sm:$0xff] (%p213_p12) }
 0x11e   : >> { %407 = vadd.xlane.f32.xlu0 %v406_v6  ;;  %v436_v8 = vsel %vm435_vm14, %v1283_v3, 0.0  ;;  %v464_v15 = vmul.f32 %v943_v13, %v856_v30  ;;  %v945_v17 = vpop.eup %944 }
 0x11f   : >> { %v451_v14 = vsel %vm450_vm0, %v449_v11, 0.0  ;;  %v479_v19 = vmul.f32 %v945_v17, %v858_v35  ;;  %v947_v20 = vpop.eup %946 }
 0x120   : >> { %v466_v18 = vsel %vm465_vm3, %v464_v15, 0.0  ;;  %v494_v23 = vmul.f32 %v947_v20, %v860_v21  ;;  %v949_v24 = vpop.eup %948 }
 0x121   : >> { %437 = vadd.xlane.f32.xlu1 %v436_v8  ;;  %v481_v22 = vsel %vm480_vm4, %v479_v19, 0.0  ;;  %v509_v28 = vmul.f32 %v949_v24, %v862_v40  ;;  %v951_v29 = vpop.eup %950 }
 0x122   : >> { %v496_v26 = vsel %vm495_vm5, %v494_v23, 0.0  ;;  %v524_v32 = vmul.f32 %v951_v29, %v864_v45 }
 0x123   : >> { %v511_v31 = vsel %vm510_vm6, %v509_v28, 0.0 }
 0x124   : >> { %v526_v50 = vsel %vm525_vm7, %v524_v32, 0.0 }
 0x125   : >> { %452 = vadd.xlane.f32.xlu1 %v451_v14 }
 0x129   : >> { %467 = vadd.xlane.f32.xlu1 %v466_v18 }
 0x12d   : >> { %482 = vadd.xlane.f32.xlu1 %v481_v22 }
 0x131   : >> { %497 = vadd.xlane.f32.xlu1 %v496_v26 }
 0x135   : >> { %512 = vadd.xlane.f32.xlu1 %v511_v31 }
 0x139   : >> { %527 = vadd.xlane.f32.xlu1 %v526_v50 }
 0x14b   : > { %556 = vxpose.xlu0.b32.start [1/9] (short) (narrow) (%p213_p12), %v532_v0, 8 }
 0x1aa   : >> { %v423_v33 = vpop.xlane.xlu1 %422 }
 0x1ab   : >> { %v424_v34 = vmul.f32 %v423_v33, %v394_v55  ;;  %v408_v36 = vpop.xlane.xlu0 %407 }
 0x1ac   : >> { %v409_v37 = vmul.f32 %v408_v36, %v394_v55 }
 0x1ad   : >> { %v425_v41 = vsub.f32 %v1271_v62, %v424_v34 }
 0x1ae   : >> { %v410_v39 = vsub.f32 %v1279_v1, %v409_v37  ;;  %v438_v60 = vpop.xlane.xlu1 %437  ;;  %v534_v1 = vld [vmem:[#allocation7 + $0x8] sm:$0xff] (%p213_p12) }
 0x1af   : >> { %851 = vst [vmem:[%s1120_s17 + $0x8] sm:$0xff] %v425_v41  ;;  %v439_v42 = vmul.f32 %v438_v60, %v394_v55  ;;  %557 = vxpose.xlu0.b32.cont [2/9] (short) (narrow) (%p213_p12), %v534_v1, 8 }
 0x1b0   : >> { %411 = vst [vmem:[%s1120_s17] sm:$0xff] %v410_v39 }
 0x1b1   : >> { %v440_v43 = vsub.f32 %v1283_v3, %v439_v42  ;;  %v592_v3 = vld [vmem:[#allocation2] sm:$0x3] (%p213_p12) }
 0x1b2   : >> { %v453_v27 = vpop.xlane.xlu1 %452  ;;  %594 = vst [vmem:[%s148_s20] sm:$0x3] (%p213_p12), %v592_v3 }
 0x1b3   : >> { %853 = vst [vmem:[%s1120_s17 + $0x10] sm:$0xff] %v440_v43  ;;  %v454_v38 = vmul.f32 %v453_v27, %v394_v55  ;;  %558 = vxpose.xlu0.b32.cont [3/9] (short) (narrow) (%p213_p12), %v536_v2, 8 }
 0x1b5   : >> { %v455_v44 = vsub.f32 %v449_v11, %v454_v38 }
 0x1b6   : >> { %v468_v46 = vpop.xlane.xlu1 %467  ;;  %v630_v10 = vld [vmem:[%s1120_s17 + $0x8] sm:$0xff] (%p213_p12) }
 0x1b7   : >> { %855 = vst [vmem:[%s1120_s17 + $0x18] sm:$0xff] %v455_v44  ;;  %v469_v47 = vmul.f32 %v468_v46, %v394_v55  ;;  %v628_v9 = vld [vmem:[%s1120_s17] sm:$0xff] (%p213_p12)  ;;  %631 = vst [vmem:[%s1370_s30 + $0x8] sm:$0xff] (%p213_p12), %v630_v10 }
 0x1b8   : > { %629 = vst [vmem:[%s1370_s30] sm:$0xff] (%p213_p12), %v628_v9 }
 0x1b9   : >> { %v470_v48 = vsub.f32 %v464_v15, %v469_v47 }
 0x1ba   : >> { %v483_v49 = vpop.xlane.xlu1 %482  ;;  %v632_v4 = vld [vmem:[%s1120_s17 + $0x10] sm:$0xff] (%p213_p12) }
 0x1bb   : >> { %857 = vst [vmem:[%s1120_s17 + $0x20] sm:$0xff] %v470_v48  ;;  %v484_v51 = vmul.f32 %v483_v49, %v394_v55  ;;  %633 = vst [vmem:[%s1370_s30 + $0x10] sm:$0xff] (%p213_p12), %v632_v4 }
 0x1bd   : >> { %v485_v52 = vsub.f32 %v479_v19, %v484_v51 }
 0x1be   : >> { %v498_v53 = vpop.xlane.xlu1 %497  ;;  %v634_v5 = vld [vmem:[%s1120_s17 + $0x18] sm:$0xff] (%p213_p12) }
 0x1bf   : >> { %859 = vst [vmem:[%s1120_s17 + $0x28] sm:$0xff] %v485_v52  ;;  %v499_v54 = vmul.f32 %v498_v53, %v394_v55  ;;  %635 = vst [vmem:[%s1370_s30 + $0x18] sm:$0xff] (%p213_p12), %v634_v5 }
 0x1c1   : >> { %v500_v56 = vsub.f32 %v494_v23, %v499_v54 }
 0x1c2   : >> { %v513_v57 = vpop.xlane.xlu1 %512  ;;  %v636_v6 = vld [vmem:[%s1120_s17 + $0x20] sm:$0xff] (%p213_p12) }
 0x1c3   : >> { %861 = vst [vmem:[%s1120_s17 + $0x30] sm:$0xff] %v500_v56  ;;  %v514_v58 = vmul.f32 %v513_v57, %v394_v55  ;;  %637 = vst [vmem:[%s1370_s30 + $0x20] sm:$0xff] (%p213_p12), %v636_v6 }
 0x1c5   : >> { %v515_v59 = vsub.f32 %v509_v28, %v514_v58  ;;  %215 = sbr.rel (!%p213_p12) target bundleno = 53 (0x35), region = 230 }
 0x1c6   : >> { %v528_v61 = vpop.xlane.xlu1 %527  ;;  %v638_v7 = vld [vmem:[%s1120_s17 + $0x28] sm:$0xff] (%p213_p12) }
 0x1c7   : >> { %863 = vst [vmem:[%s1120_s17 + $0x38] sm:$0xff] %v515_v59  ;;  %v529_v62 = vmul.f32 %v528_v61, %v394_v55  ;;  %639 = vst [vmem:[%s1370_s30 + $0x28] sm:$0xff] (%p213_p12), %v638_v7 }
 0x1c9   : >> { %v530_v63 = vsub.f32 %v524_v32, %v529_v62 }
 0x1ca   : > { %v640_v8 = vld [vmem:[%s1120_s17 + $0x30] sm:$0xff] (%p213_p12) }
 0x1cb   : >> { %865 = vst [vmem:[%s1120_s17 + $0x40] sm:$0xff] %v530_v63 }
 0x1ce   : > { %v642_v11 = vld [vmem:[%s1120_s17 + $0x38] sm:$0xff] }
 0x1d2   : > { %v644_v12 = vld [vmem:[%s1120_s17 + $0x40] sm:$0xff] }
 0x1d3   : > { %965 = shalt.err (!%p962_p8)
}
 0x1d4   : > { %s966_s7 = scalar_lea.hbm %s1384_s5, 32  ;;  %s970_s29 = scalar_lea.hbm %s1452_s2, 32 }
 0x1d5   : > { %p967_p9 = scmp.ne.s32.totalorder %s1384_s5, %s966_s7  ;;  %p971_p12 = scmp.lt.u32.totalorder %s1384_s5, %s1452_s2 }
 0x1d6   : > { %p972_p13 = scmp.lt.u32.totalorder %s970_s29, %s966_s7  ;;  %p974_p1 = scmp.lt.u32.totalorder %s966_s7, %s1384_s5 }
 0x1d7   : > { %p968_p10 = pnand %p967_p9, %p1092_p5 }
 0x1d8   : > { %p973_p0 = por %p972_p13, %p971_p12 }
 0x1d9   : > { %p969_p11 = pneg %p968_p10 }
 0x1da   : > { %p975_p2 = por %p974_p1, %p973_p0 }
 0x1dc   : > { %p976_p3 = pnand %p975_p2, %p969_p11 }
 0x1de   : > { %979 = shalt.err (!%p976_p3)
}
 0x1df   : > { %878 = dma.vmem_to_hbm [thread:$0]  (%p1092_p5), %s1386_s27, 32, %s1384_s5, %s606_s6   ;;  %641 = vst [vmem:[%s1370_s30 + $0x30] sm:$0xff] %v640_v8  ;;  %643 = vst [vmem:[%s1370_s30 + $0x38] sm:$0xff] %v642_v11  ;;  %559 = vxpose.xlu0.b32.cont [4/9] (short) (narrow) %v538_v25, 8  ;;  %v540_v13 = vld [vmem:[#allocation7 + $0x20] sm:$0xff]  ;;  %v542_v30 = vld [vmem:[#allocation7 + $0x28] sm:$0xff] }
 0x1e0   : > { %645 = vst [vmem:[%s1370_s30 + $0x40] sm:$0xff] %v644_v12  ;;  %v544_v14 = vld [vmem:[#allocation7 + $0x30] sm:$0xff]  ;;  %v546_v15 = vld [vmem:[#allocation7 + $0x38] sm:$0xff]  ;;  %v548_v16 = vld [vmem:[#allocation7 + $0x40] sm:$0xff]  ;;  %s869_s27 = sshll.u32 (%p1092_p5), %s652_s26, 1 }
 0x1e1   : > { %s668_s6 = scalar_lea.vmem (%p1092_p5), %s1453_s3, %s869_s27 }
 0x1e3   : > { %560 = vxpose.xlu0.b32.cont [5/9] (short) (narrow) %v540_v13, 8 }
 0x1e7   : > { %561 = vxpose.xlu0.b32.cont [6/9] (short) (narrow) %v542_v30, 8 }
 0x1eb   : > { %562 = vxpose.xlu0.b32.cont [7/9] (short) (narrow) %v544_v14, 8 }
 0x1ef   : > { %563 = vxpose.xlu0.b32.cont [8/9] (short) (narrow) %v546_v15, 8 }
 0x1f3   : > { %564 = vxpose.xlu0.b32.end [9/9] (short) (narrow) %v548_v16, 8 }
 0x253   : > { %v572_v17 = vpop.trf.xlu0 }
 0x254   : > { %588 = vst [vmem:[%s1136_s22] sm:$0x1] %v572_v17 }
 0x256   : > { %665 = sbr.rel (!%p1092_p5) target bundleno = 613 (0x265), region = 80 }
 0x25b   : > { %v598_v35 = vld [vmem:[#allocation5] sm:$0x3] }
 0x25c   : > { %600 = vst [vmem:[%s154_s21] sm:$0x3] %v598_v35 }
 0x263   : > { %v684_v18 = vld [vmem:[%s154_s21] sm:$0x3] }
 0x264   : > { %685 = vst [vmem:[%s668_s6] sm:$0x3] %v684_v18 }
 0x265 PF: > { %s712_s22 = sand.u32 1, %s1010_s12   ;;  %p881_p5 = pnand %p819_p7, %p1096_p6 }
 0x266   : > { %s713_s24 = scalar_lea.sflag [#allocation4], %s712_s22 }
 0x267   : > { %1005 = dma.done.wait (!%p881_p5), %s713_s24, 32  }
 0x268   : > { %1007 = vsyncadd (!%p881_p5), %s713_s24, 4294967264  ;;  %p10_p4 = scmp.ge.s32.totalorder %s1079_s18, 4   ;;  %s1458_s12 = smov %s1014_s13 }
 0x269   : > { %s1459_s13 = smov %s1018_s14  ;;  %s1460_s14 = smov %s1090_s23 }
 0x26a   : > { %s1461_s15 = smov %s1079_s18  ;;  %12 = sbr.rel (!%p10_p4) target bundleno = 3 (0x3), region = 241 }
 0x271   :  { %725 = vsyncpa [#allocation4], 1 }
 0x272   :  { %727 = vsyncpa [#allocation4 + $0x1], 1 }

// kernel: custom-call.16
= control target key start
LH: loop header
LB: loop body
LE: loop exit
PB: predicated region body
PF: predicated region fallthrough
CT: control target
= control target key end

     0   :  { %s2515_s6 = smov 0   ;;  %s2517_s7 = smov 0   ;;  %s3392_s0 = inlined_call_operand.vmem [shape: f32[2,1,72,72], index: 0, kind: input, shape index: {}]   ;;  %s3393_s1 = inlined_call_operand.vmem [shape: f32[2,1,72,72], index: 1, kind: output, shape index: {}]  }
   0x1   :  { %s2519_s8 = smov 0  }
   0x2 LB: > { %s2407_s9 = sadd.s32 4294967295, %s2501_s8   ;;  %s33_s10 = sadd.s32 1, %s2497_s7  ;;  %s2501_s8 = sphi %s2519_s8, %s7_s8   ;;  %s2497_s7 = sphi %s2517_s7, %s3395_s7   ;;  %s2493_s6 = sphi %s2515_s6, %s3394_s6  }
   0x3   : > { %p35_p0 = scmp.ge.s32.totalorder %s33_s10, 2  ;;  %p2409_p1 = scmp.ge.s32.totalorder %s2501_s8, 2 }
   0x4   : > { %s49_s11 = sand.u32 (!%p2409_p1), 1, %s2501_s8   ;;  %s2432_s12 = smul.u32 (!%p2409_p1), 72, %s2497_s7 }
   0x5   : > { %s3397_s10 = smov (%p35_p0, %s33_s10), 0  ;;  %47 = sbr.rel (%p2409_p1) target bundleno = 14 (0xe), region = 16 }
   0x6   : > { %s2431_s13 = smul.u32 (!%p2409_p1), 72, %s49_s11  ;;  %s58_s16 = scalar_lea.vmem (!%p2409_p1), %s3392_s0, %s2432_s12 }
   0x7   : > { %v102_v0 = vld [vmem:[%s58_s16] sm:$0xff] (!%p2409_p1)  ;;  %v104_v1 = vld [vmem:[%s58_s16 + $0x8] sm:$0xff] (!%p2409_p1)  ;;  %v106_v2 = vld [vmem:[%s58_s16 + $0x10] sm:$0xff] (!%p2409_p1) }
   0x8   : > { %s51_s17 = scalar_lea.vmem (!%p2409_p1), [#allocation0], %s2431_s13  ;;  %v108_v3 = vld [vmem:[%s58_s16 + $0x18] sm:$0xff] (!%p2409_p1)  ;;  %v110_v4 = vld [vmem:[%s58_s16 + $0x20] sm:$0xff] (!%p2409_p1)  ;;  %v112_v5 = vld [vmem:[%s58_s16 + $0x28] sm:$0xff] (!%p2409_p1) }
   0x9   : > { %103 = vst [vmem:[%s51_s17] sm:$0xff] (!%p2409_p1), %v102_v0  ;;  %105 = vst [vmem:[%s51_s17 + $0x8] sm:$0xff] (!%p2409_p1), %v104_v1  ;;  %v114_v6 = vld [vmem:[%s58_s16 + $0x30] sm:$0xff] (!%p2409_p1)  ;;  %v116_v7 = vld [vmem:[%s58_s16 + $0x38] sm:$0xff] (!%p2409_p1) }
   0xa   : > { %107 = vst [vmem:[%s51_s17 + $0x10] sm:$0xff] (!%p2409_p1), %v106_v2  ;;  %109 = vst [vmem:[%s51_s17 + $0x18] sm:$0xff] (!%p2409_p1), %v108_v3  ;;  %v118_v8 = vld [vmem:[%s58_s16 + $0x40] sm:$0xff] (!%p2409_p1) }
   0xb   : > { %111 = vst [vmem:[%s51_s17 + $0x20] sm:$0xff] (!%p2409_p1), %v110_v4  ;;  %113 = vst [vmem:[%s51_s17 + $0x28] sm:$0xff] (!%p2409_p1), %v112_v5 }
   0xc   : > { %115 = vst [vmem:[%s51_s17 + $0x30] sm:$0xff] %v114_v6  ;;  %117 = vst [vmem:[%s51_s17 + $0x38] sm:$0xff] %v116_v7 }
   0xd   : > { %119 = vst [vmem:[%s51_s17 + $0x40] sm:$0xff] %v118_v8 }
   0xe PF: > { %p2411_p2 = scmp.ge.s32.totalorder %s2501_s8, 1  ;;  %p124_p3 = scmp.lt.s32.totalorder %s2501_s8, 3 }
  0x10   : > { %p125_p4 = pnand %p2411_p2, %p124_p3 }
  0x12   : > { %128 = sbr.rel (%p125_p4) target bundleno = 10523 (0x291b), region = 54 }
  0x19   : > { %s131_s18 = sand.u32 1, %s2407_s9   ;;  %v142_v9 = vlaneseq  ;;  %v2503_v18 = vmov -1.0   ;;  %v2504_v62 = vmov 0.0   ;;  %s2434_s21 = smul.u32 72, %s2493_s6 }
  0x1a   : > { %s2433_s19 = smul.u32 72, %s131_s18 }
  0x1b   : > { %v2544_v10 = vand.u32 127, %v142_v9  ;;  %v2546_v11 = vshrl.u32 %v142_v9, 7  ;;  %s3338_s24 = scalar_lea.vmem %s3393_s1, %s2434_s21 }
  0x1c   : > { %s2550_s20 = scalar_lea.vmem [#allocation0], %s2433_s19 }
  0x1d   : > { %vm148_vm0 = vcmp.eq.s32.totalorder %v2546_v11, %v2544_v10  ;;  %v149_v12 = vld [vmem:[%s2550_s20] sm:$0xff]  ;;  %vm144_vm1 = vcmp.lt.s32.totalorder %v2544_v10, 72  ;;  %vm153_vm2 = vcmp.ge.s32.totalorder %v2546_v11, %v2544_v10  ;;  %vm295_vm4 = vcmp.eq.s32.totalorder %v2544_v10, 0  ;;  %v2412_v45 = vld [vmem:[%s2550_s20 + $0x8] sm:$0xff] }
  0x1e   : > { %v150_v13 = vsel %vm148_vm0, %v149_v12, 0.0  ;;  %vm154_vm3 = vmand %vm153_vm2, %vm144_vm1  ;;  %vm292_vm5 = vcmp.eq.s32.totalorder %v2544_v10, %v2546_v11  ;;  %v296_v19 = vsel %vm295_vm4, 1.0, %v2503_v18  ;;  %vm359_vm6 = vcmp.eq.s32.totalorder %v2544_v10, 1 }
  0x1f   : > { %151 = vadd.xlane.f32.xlu0 %v150_v13  ;;  %v155_v15 = vsel %vm154_vm3, %v149_v12, 0.0  ;;  %v297_v20 = vsel %vm292_vm5, %v296_v19, 0.0  ;;  %vm369_vm7 = vcmp.eq.s32.totalorder %v2544_v10, 2  ;;  %vm379_vm8 = vcmp.eq.s32.totalorder %v2544_v10, 3 }
  0x20   : > { %vm389_vm9 = vcmp.eq.s32.totalorder %v2544_v10, 4  ;;  %v163_v40 = vadd.s32 8, %v2546_v11  ;;  %vm399_vm11 = vcmp.eq.s32.totalorder %v2544_v10, 5  ;;  %vm409_vm14 = vcmp.eq.s32.totalorder %v2544_v10, 6 }
  0x21   : > { %vm419_vm0 = vcmp.eq.s32.totalorder %v2544_v10, 7  ;;  %vm429_vm2 = vcmp.eq.s32.totalorder %v2544_v10, 8  ;;  %vm443_vm3 = vcmp.eq.s32.totalorder %v2544_v10, 9  ;;  %vm457_vm4 = vcmp.eq.s32.totalorder %v2544_v10, 10 }
  0x22   : > { %vm164_vm10 = vcmp.eq.s32.totalorder %v163_v40, %v2544_v10  ;;  %vm169_vm12 = vcmp.ge.s32.totalorder %v163_v40, %v2544_v10  ;;  %vm303_vm15 = vcmp.eq.s32.totalorder %v2544_v10, %v163_v40  ;;  %vm471_vm5 = vcmp.eq.s32.totalorder %v2544_v10, 11 }
  0x23   : > { %v166_v46 = vsel %vm164_vm10, %v2412_v45, 0.0  ;;  %vm170_vm13 = vmand %vm169_vm12, %vm144_vm1  ;;  %v304_v63 = vsel %vm303_vm15, -1.0, %v2504_v62  ;;  %vm527_vm12 = vcmp.eq.s32.totalorder %v2544_v10, 15  ;;  %vm559_vm15 = vcmp.eq.s32.totalorder %v2544_v10, 17 }
  0x24   : > { %v171_v53 = vsel %vm170_vm13, %v2412_v45, 0.0 }
  0xac   : > { %v2553_v14 = vpop.xlane.xlu0 %151 }
  0xad   : > { %2461 = vrcp.f32 %v2553_v14 }
  0xb7   : > { %v2561_v16 = vpop.eup %2461 }
  0xb8   : > { %v157_v17 = vmul.f32 %v2561_v16, %v155_v15 }
  0xba   : > { %158 = vst [vmem:[#allocation2] sm:$0xff] %v157_v17 }
  0xc1   : > { %v355_v21 = vld [vmem:[#allocation2 + $0x1] ss:$0 sm:$0xff]  ;;  %v365_v24 = vld [vmem:[#allocation2 + $0x2] ss:$0 sm:$0xff]  ;;  %v375_v29 = vld [vmem:[#allocation2 + $0x3] ss:$0 sm:$0xff] }
  0xc2   : > { %v356_v22 = vxor.u32 2147483648, %v355_v21  ;;  %v366_v26 = vxor.u32 2147483648, %v365_v24  ;;  %v376_v31 = vxor.u32 2147483648, %v375_v29  ;;  %v385_v34 = vld [vmem:[#allocation2 + $0x4] ss:$0 sm:$0xff] }
  0xc3   : > { %v386_v36 = vxor.u32 2147483648, %v385_v34  ;;  %v395_v39 = vld [vmem:[#allocation2 + $0x5] ss:$0 sm:$0xff]  ;;  %v405_v47 = vld [vmem:[#allocation2 + $0x6] ss:$0 sm:$0xff] }
  0xc4   : > { %v360_v23 = vmul.f32 %v356_v22, %v297_v20  ;;  %v396_v42 = vxor.u32 2147483648, %v395_v39  ;;  %v406_v49 = vxor.u32 2147483648, %v405_v47  ;;  %v415_v56 = vld [vmem:[#allocation2 + $0x7] ss:$0 sm:$0xff] }
  0xc5   : > { %v416_v59 = vxor.u32 2147483648, %v415_v56  ;;  %v179_v56 = vadd.s32 16, %v2546_v11 }
  0xc6   : > { %361 = vadd.xlane.f32.xlu0 %v360_v23 }
  0xc7   : > { %vm185_vm10 = vcmp.ge.s32.totalorder %v179_v56, %v2544_v10  ;;  %vm310_vm13 = vcmp.eq.s32.totalorder %v2544_v10, %v179_v56 }
 0x153   : > { %v362_v25 = vpop.xlane.xlu0 %361 }
 0x154   : > { %v363_v27 = vsel %vm359_vm6, %v362_v25, %v297_v20  ;;  %vm485_vm6 = vcmp.eq.s32.totalorder %v2544_v10, 12 }
 0x155   : > { %v370_v28 = vmul.f32 %v366_v26, %v363_v27 }
 0x157   : > { %371 = vadd.xlane.f32.xlu1 %v370_v28 }
 0x1e4   : > { %v372_v30 = vpop.xlane.xlu1 %371 }
 0x1e5   : > { %v373_v32 = vsel %vm369_vm7, %v372_v30, %v363_v27  ;;  %vm499_vm7 = vcmp.eq.s32.totalorder %v2544_v10, 13 }
 0x1e6   : > { %v380_v33 = vmul.f32 %v376_v31, %v373_v32 }
 0x1e8   : > { %381 = vadd.xlane.f32.xlu1 %v380_v33 }
 0x275   : > { %v382_v35 = vpop.xlane.xlu1 %381 }
 0x276   : > { %v383_v37 = vsel %vm379_vm8, %v382_v35, %v373_v32  ;;  %vm180_vm8 = vcmp.eq.s32.totalorder %v179_v56, %v2544_v10 }
 0x277   : > { %v390_v38 = vmul.f32 %v386_v36, %v383_v37 }
 0x279   : > { %391 = vadd.xlane.f32.xlu0 %v390_v38 }
 0x306   : > { %v392_v41 = vpop.xlane.xlu0 %391 }
 0x307   : > { %v393_v43 = vsel %vm389_vm9, %v392_v41, %v383_v37  ;;  %vm513_vm9 = vcmp.eq.s32.totalorder %v2544_v10, 14 }
 0x308   : > { %v400_v44 = vmul.f32 %v396_v42, %v393_v43 }
 0x30a   : > { %401 = vadd.xlane.f32.xlu1 %v400_v44 }
 0x30e   : > { %167 = vadd.xlane.f32.xlu1 %v166_v46 }
 0x397   : > { %v402_v48 = vpop.xlane.xlu1 %401 }
 0x398   : > { %v403_v50 = vsel %vm399_vm11, %v402_v48, %v393_v43  ;;  %vm186_vm11 = vmand %vm185_vm10, %vm144_vm1 }
 0x399   : > { %v410_v51 = vmul.f32 %v406_v49, %v403_v50 }
 0x39b   : > { %411 = vadd.xlane.f32.xlu0 %v410_v51  ;;  %v2575_v52 = vpop.xlane.xlu1 %167 }
 0x39c   : > { %2463 = vrcp.f32 %v2575_v52 }
 0x3a6   : > { %v2581_v54 = vpop.eup %2463 }
 0x3a7   : > { %v173_v55 = vmul.f32 %v2581_v54, %v171_v53 }
 0x3a9   : > { %174 = vst [vmem:[#allocation2 + $0x8] sm:$0xff] %v173_v55 }
 0x3b0   : > { %v425_v57 = vld [vmem:[#allocation2 + $0x8] ss:$0 sm:$0xff]  ;;  %v439_v4 = vld [vmem:[#allocation2 + $0x9] ss:$0 sm:$0xff]  ;;  %v453_v15 = vld [vmem:[#allocation2 + $0xa] ss:$0 sm:$0xff] }
 0x3b1   : > { %v426_v60 = vxor.u32 2147483648, %v425_v57  ;;  %v440_v7 = vxor.u32 2147483648, %v439_v4  ;;  %v454_v19 = vxor.u32 2147483648, %v453_v15  ;;  %v467_v24 = vld [vmem:[#allocation2 + $0xb] ss:$0 sm:$0xff] }
 0x3b2   : > { %v468_v27 = vxor.u32 2147483648, %v467_v24  ;;  %v481_v32 = vld [vmem:[#allocation2 + $0xc] ss:$0 sm:$0xff]  ;;  %v495_v40 = vld [vmem:[#allocation2 + $0xd] ss:$0 sm:$0xff] }
 0x3b3   : > { %v434_v1 = vmul.f32 %v426_v60, %v304_v63  ;;  %v482_v35 = vxor.u32 2147483648, %v481_v32  ;;  %v496_v43 = vxor.u32 2147483648, %v495_v40  ;;  %v509_v48 = vld [vmem:[#allocation2 + $0xe] ss:$0 sm:$0xff] }
 0x3b4   : > { %v510_v51 = vxor.u32 2147483648, %v509_v48 }
 0x428   : > { %v412_v58 = vpop.xlane.xlu0 %411 }
 0x429   : > { %v413_v61 = vsel %vm409_vm14, %v412_v58, %v403_v50  ;;  %vm541_vm14 = vcmp.eq.s32.totalorder %v2544_v10, 16 }
 0x42a   : > { %v420_v0 = vmul.f32 %v416_v59, %v413_v61 }
 0x42c   : > { %421 = vadd.xlane.f32.xlu0 %v420_v0  ;;  %v523_v0 = vld [vmem:[#allocation2 + $0xf] ss:$0 sm:$0xff] }
 0x430   : > { %435 = vadd.xlane.f32.xlu0 %v434_v1 }
 0x4b9   : > { %v422_v2 = vpop.xlane.xlu0 %421 }
 0x4ba   : > { %v423_v3 = vsel %vm419_vm0, %v422_v2, %v413_v61  ;;  %v524_v2 = vxor.u32 2147483648, %v523_v0  ;;  %vm577_vm0 = vcmp.eq.s32.totalorder %v2544_v10, 18 }
 0x4bb   : > { %v430_v5 = vmul.f32 %v426_v60, %v423_v3  ;;  %v2413_v60 = vld [vmem:[%s2550_s20 + $0x10] sm:$0xff] }
 0x4bd   : > { %v436_v6 = vpop.xlane.xlu0 %435  ;;  %431 = vadd.xlane.f32.xlu1 %v430_v5 }
 0x4be   : > { %v437_v8 = vsel %vm429_vm2, %v436_v6, %v304_v63  ;;  %v182_v63 = vsel %vm180_vm8, %v2413_v60, 0.0 }
 0x4bf   : > { %v448_v9 = vmul.f32 %v440_v7, %v437_v8 }
 0x4c1   : > { %449 = vadd.xlane.f32.xlu0 %v448_v9 }
 0x54a   : > { %v432_v12 = vpop.xlane.xlu1 %431 }
 0x54b   : > { %v433_v13 = vsel %vm429_vm2, %v432_v12, %v423_v3  ;;  %vm595_vm2 = vcmp.eq.s32.totalorder %v2544_v10, 19 }
 0x54c   : > { %v444_v17 = vmul.f32 %v440_v7, %v433_v13 }
 0x54e   : > { %v450_v18 = vpop.xlane.xlu0 %449  ;;  %445 = vadd.xlane.f32.xlu1 %v444_v17 }
 0x54f   : > { %v451_v20 = vsel %vm443_vm3, %v450_v18, %v437_v8  ;;  %v187_v8 = vsel %vm186_vm11, %v2413_v60, 0.0  ;;  %vm685_vm11 = vcmp.eq.s32.totalorder %v2544_v10, 24 }
 0x550   : > { %v462_v21 = vmul.f32 %v454_v19, %v451_v20 }
 0x552   : > { %463 = vadd.xlane.f32.xlu0 %v462_v21 }
 0x5db   : > { %v446_v22 = vpop.xlane.xlu1 %445 }
 0x5dc   : > { %v447_v23 = vsel %vm443_vm3, %v446_v22, %v433_v13  ;;  %vm613_vm3 = vcmp.eq.s32.totalorder %v2544_v10, 20 }
 0x5dd   : > { %v458_v25 = vmul.f32 %v454_v19, %v447_v23 }
 0x5df   : > { %v464_v26 = vpop.xlane.xlu0 %463  ;;  %459 = vadd.xlane.f32.xlu1 %v458_v25 }
 0x5e0   : > { %v465_v28 = vsel %vm457_vm4, %v464_v26, %v451_v20 }
 0x5e1   : > { %v476_v29 = vmul.f32 %v468_v27, %v465_v28 }
 0x5e3   : > { %477 = vadd.xlane.f32.xlu0 %v476_v29 }
 0x66c   : > { %v460_v30 = vpop.xlane.xlu1 %459 }
 0x66d   : > { %v461_v31 = vsel %vm457_vm4, %v460_v30, %v447_v23  ;;  %v311_v23 = vsel %vm310_vm13, -1.0, %v2504_v62  ;;  %vm631_vm4 = vcmp.eq.s32.totalorder %v2544_v10, 21  ;;  %vm729_vm13 = vcmp.eq.s32.totalorder %v2544_v10, 26 }
 0x66e   : > { %v472_v33 = vmul.f32 %v468_v27, %v461_v31 }
 0x670   : > { %v478_v34 = vpop.xlane.xlu0 %477  ;;  %473 = vadd.xlane.f32.xlu1 %v472_v33 }
 0x671   : > { %v479_v36 = vsel %vm471_vm5, %v478_v34, %v465_v28 }
 0x672   : > { %v490_v37 = vmul.f32 %v482_v35, %v479_v36 }
 0x674   : > { %491 = vadd.xlane.f32.xlu0 %v490_v37 }
 0x6fd   : > { %v474_v38 = vpop.xlane.xlu1 %473 }
 0x6fe   : > { %v475_v39 = vsel %vm471_vm5, %v474_v38, %v461_v31 }
 0x6ff   : > { %v486_v41 = vmul.f32 %v482_v35, %v475_v39 }
 0x701   : > { %v492_v42 = vpop.xlane.xlu0 %491  ;;  %487 = vadd.xlane.f32.xlu1 %v486_v41 }
 0x702   : > { %v493_v44 = vsel %vm485_vm6, %v492_v42, %v479_v36 }
 0x703   : > { %v504_v45 = vmul.f32 %v496_v43, %v493_v44 }
 0x705   : > { %505 = vadd.xlane.f32.xlu0 %v504_v45 }
 0x78e   : > { %v488_v46 = vpop.xlane.xlu1 %487 }
 0x78f   : > { %v489_v47 = vsel %vm485_vm6, %v488_v46, %v475_v39  ;;  %vm649_vm6 = vcmp.eq.s32.totalorder %v2544_v10, 22 }
 0x790   : > { %v500_v49 = vmul.f32 %v496_v43, %v489_v47 }
 0x792   : > { %v506_v50 = vpop.xlane.xlu0 %505  ;;  %501 = vadd.xlane.f32.xlu1 %v500_v49 }
 0x793   : > { %v507_v53 = vsel %vm499_vm7, %v506_v50, %v493_v44 }
 0x794   : > { %v518_v55 = vmul.f32 %v510_v51, %v507_v53 }
 0x796   : > { %519 = vadd.xlane.f32.xlu0 %v518_v55 }
 0x81f   : > { %v502_v57 = vpop.xlane.xlu1 %501 }
 0x820   : > { %v503_v58 = vsel %vm499_vm7, %v502_v57, %v489_v47 }
 0x821   : > { %v514_v59 = vmul.f32 %v510_v51, %v503_v58 }
 0x823   : > { %v520_v61 = vpop.xlane.xlu0 %519  ;;  %515 = vadd.xlane.f32.xlu1 %v514_v59 }
 0x824   : > { %v521_v1 = vsel %vm513_vm9, %v520_v61, %v507_v53 }
 0x825   : > { %v532_v3 = vmul.f32 %v524_v2, %v521_v1 }
 0x827   : > { %183 = vadd.xlane.f32.xlu1 %v182_v63 }
 0x82b   : > { %533 = vadd.xlane.f32.xlu1 %v532_v3 }
 0x8b0   : > { %v516_v4 = vpop.xlane.xlu1 %515 }
 0x8b1   : > { %v517_v5 = vsel %vm513_vm9, %v516_v4, %v503_v58  ;;  %vm667_vm9 = vcmp.eq.s32.totalorder %v2544_v10, 23 }
 0x8b2   : > { %v528_v6 = vmul.f32 %v524_v2, %v517_v5 }
 0x8b4   : > { %529 = vadd.xlane.f32.xlu0 %v528_v6  ;;  %v2598_v7 = vpop.xlane.xlu1 %183 }
 0x8b5   : > { %2465 = vrcp.f32 %v2598_v7 }
 0x8b8   : > { %v534_v13 = vpop.xlane.xlu1 %533 }
 0x8b9   : > { %v535_v18 = vsel %vm527_vm12, %v534_v13, %v521_v1 }
 0x8bf   : > { %v2604_v9 = vpop.eup %2465 }
 0x8c0   : > { %v189_v12 = vmul.f32 %v2604_v9, %v187_v8 }
 0x8c2   : > { %190 = vst [vmem:[#allocation2 + $0x10] sm:$0xff] %v189_v12 }
 0x8c9   : > { %v537_v15 = vld [vmem:[#allocation2 + $0x10] ss:$0 sm:$0xff]  ;;  %v555_v25 = vld [vmem:[#allocation2 + $0x11] ss:$0 sm:$0xff]  ;;  %v573_v36 = vld [vmem:[#allocation2 + $0x12] ss:$0 sm:$0xff] }
 0x8ca   : > { %v538_v17 = vxor.u32 2147483648, %v537_v15  ;;  %v556_v27 = vxor.u32 2147483648, %v555_v25  ;;  %v574_v38 = vxor.u32 2147483648, %v573_v36  ;;  %v591_v47 = vld [vmem:[#allocation2 + $0x13] ss:$0 sm:$0xff] }
 0x8cb   : > { %v592_v49 = vxor.u32 2147483648, %v591_v47  ;;  %v609_v60 = vld [vmem:[#allocation2 + $0x14] ss:$0 sm:$0xff]  ;;  %v627_v12 = vld [vmem:[#allocation2 + $0x15] ss:$0 sm:$0xff] }
 0x8cc   : > { %v546_v19 = vmul.f32 %v538_v17, %v535_v18  ;;  %v550_v24 = vmul.f32 %v538_v17, %v311_v23  ;;  %v610_v63 = vxor.u32 2147483648, %v609_v60  ;;  %v628_v15 = vxor.u32 2147483648, %v627_v12  ;;  %v645_v25 = vld [vmem:[#allocation2 + $0x16] ss:$0 sm:$0xff] }
 0x8ce   : > { %547 = vadd.xlane.f32.xlu1 %v546_v19 }
 0x941   : > { %v530_v20 = vpop.xlane.xlu0 %529 }
 0x942   : > { %v531_v21 = vsel %vm527_vm12, %v530_v20, %v517_v5  ;;  %vm707_vm12 = vcmp.eq.s32.totalorder %v2544_v10, 25 }
 0x943   : > { %v542_v22 = vmul.f32 %v538_v17, %v531_v21 }
 0x945   : > { %543 = vadd.xlane.f32.xlu0 %v542_v22 }
 0x949   : > { %551 = vadd.xlane.f32.xlu0 %v550_v24 }
 0x95b   : > { %v548_v26 = vpop.xlane.xlu1 %547 }
 0x95c   : > { %v549_v28 = vsel %vm541_vm14, %v548_v26, %v535_v18  ;;  %v195_v26 = vadd.s32 24, %v2546_v11 }
 0x95d   : > { %v564_v29 = vmul.f32 %v556_v27, %v549_v28 }
 0x95e   : > { %vm196_vm5 = vcmp.eq.s32.totalorder %v195_v26, %v2544_v10  ;;  %vm201_vm7 = vcmp.ge.s32.totalorder %v195_v26, %v2544_v10  ;;  %vm317_vm10 = vcmp.eq.s32.totalorder %v2544_v10, %v195_v26 }
 0x95f   : > { %565 = vadd.xlane.f32.xlu0 %v564_v29  ;;  %vm202_vm8 = vmand %vm201_vm7, %vm144_vm1  ;;  %v318_v60 = vsel %vm317_vm10, -1.0, %v2504_v62  ;;  %vm913_vm10 = vcmp.eq.s32.totalorder %v2544_v10, 34 }
 0x9d2   : > { %v544_v30 = vpop.xlane.xlu0 %543 }
 0x9d3   : > { %v545_v31 = vsel %vm541_vm14, %v544_v30, %v531_v21 }
 0x9d4   : > { %v560_v32 = vmul.f32 %v556_v27, %v545_v31 }
 0x9d6   : > { %v552_v33 = vpop.xlane.xlu0 %551  ;;  %561 = vadd.xlane.f32.xlu1 %v560_v32 }
 0x9d7   : > { %v553_v34 = vsel %vm541_vm14, %v552_v33, %v311_v23  ;;  %vm751_vm14 = vcmp.eq.s32.totalorder %v2544_v10, 27 }
 0x9d8   : > { %v568_v35 = vmul.f32 %v556_v27, %v553_v34 }
 0x9da   : > { %569 = vadd.xlane.f32.xlu1 %v568_v35 }
 0x9ec   : > { %v566_v37 = vpop.xlane.xlu0 %565 }
 0x9ed   : > { %v567_v39 = vsel %vm559_vm15, %v566_v37, %v549_v28  ;;  %v646_v28 = vxor.u32 2147483648, %v645_v25 }
 0x9ee   : > { %v582_v40 = vmul.f32 %v574_v38, %v567_v39 }
 0x9f0   : > { %583 = vadd.xlane.f32.xlu1 %v582_v40 }
 0xa63   : > { %v562_v41 = vpop.xlane.xlu1 %561 }
 0xa64   : > { %v563_v42 = vsel %vm559_vm15, %v562_v41, %v545_v31  ;;  %v2414_v31 = vld [vmem:[%s2550_s20 + $0x18] sm:$0xff] }
 0xa65   : > { %v578_v43 = vmul.f32 %v574_v38, %v563_v42  ;;  %v198_v32 = vsel %vm196_vm5, %v2414_v31, 0.0 }
 0xa67   : > { %579 = vadd.xlane.f32.xlu0 %v578_v43  ;;  %v570_v44 = vpop.xlane.xlu1 %569 }
 0xa68   : > { %v571_v45 = vsel %vm559_vm15, %v570_v44, %v553_v34  ;;  %vm773_vm15 = vcmp.eq.s32.totalorder %v2544_v10, 28 }
 0xa69   : > { %v586_v46 = vmul.f32 %v574_v38, %v571_v45 }
 0xa6b   : > { %587 = vadd.xlane.f32.xlu0 %v586_v46 }
 0xa7d   : > { %v584_v48 = vpop.xlane.xlu1 %583 }
 0xa7e   : > { %v585_v50 = vsel %vm577_vm0, %v584_v48, %v567_v39  ;;  %v663_v39 = vld [vmem:[#allocation2 + $0x17] ss:$0 sm:$0xff] }
 0xa7f   : > { %v600_v51 = vmul.f32 %v592_v49, %v585_v50  ;;  %v664_v41 = vxor.u32 2147483648, %v663_v39 }
 0xa81   : > { %601 = vadd.xlane.f32.xlu0 %v600_v51 }
 0xaf4   : > { %v580_v53 = vpop.xlane.xlu0 %579 }
 0xaf5   : > { %v581_v55 = vsel %vm577_vm0, %v580_v53, %v563_v42 }
 0xaf6   : > { %v596_v56 = vmul.f32 %v592_v49, %v581_v55 }
 0xaf8   : > { %597 = vadd.xlane.f32.xlu1 %v596_v56  ;;  %v588_v57 = vpop.xlane.xlu0 %587 }
 0xaf9   : > { %v589_v58 = vsel %vm577_vm0, %v588_v57, %v571_v45  ;;  %v203_v45 = vsel %vm202_vm8, %v2414_v31, 0.0  ;;  %vm795_vm0 = vcmp.eq.s32.totalorder %v2544_v10, 29  ;;  %vm861_vm8 = vcmp.eq.s32.totalorder %v2544_v10, 32 }
 0xafa   : > { %v604_v59 = vmul.f32 %v592_v49, %v589_v58 }
 0xafc   : > { %605 = vadd.xlane.f32.xlu1 %v604_v59 }
 0xb0e   : > { %v602_v61 = vpop.xlane.xlu0 %601 }
 0xb0f   : > { %v603_v0 = vsel %vm595_vm2, %v602_v61, %v585_v50 }
 0xb10   : > { %v618_v1 = vmul.f32 %v610_v63, %v603_v0 }
 0xb12   : > { %619 = vadd.xlane.f32.xlu1 %v618_v1 }
 0xb85   : > { %v598_v2 = vpop.xlane.xlu1 %597 }
 0xb86   : > { %v599_v3 = vsel %vm595_vm2, %v598_v2, %v581_v55 }
 0xb87   : > { %v614_v4 = vmul.f32 %v610_v63, %v599_v3 }
 0xb89   : > { %615 = vadd.xlane.f32.xlu0 %v614_v4  ;;  %v606_v5 = vpop.xlane.xlu1 %605 }
 0xb8a   : > { %v607_v6 = vsel %vm595_vm2, %v606_v5, %v589_v58 }
 0xb8b   : > { %v622_v8 = vmul.f32 %v610_v63, %v607_v6 }
 0xb8d   : > { %623 = vadd.xlane.f32.xlu0 %v622_v8 }
 0xb9f   : > { %v620_v13 = vpop.xlane.xlu1 %619 }
 0xba0   : > { %v621_v17 = vsel %vm613_vm3, %v620_v13, %v603_v0 }
 0xba1   : > { %v636_v18 = vmul.f32 %v628_v15, %v621_v17 }
 0xba3   : > { %637 = vadd.xlane.f32.xlu0 %v636_v18 }
 0xc16   : > { %v616_v19 = vpop.xlane.xlu0 %615 }
 0xc17   : > { %v617_v20 = vsel %vm613_vm3, %v616_v19, %v599_v3 }
 0xc18   : > { %v632_v21 = vmul.f32 %v628_v15, %v617_v20 }
 0xc1a   : > { %633 = vadd.xlane.f32.xlu1 %v632_v21  ;;  %v624_v22 = vpop.xlane.xlu0 %623 }
 0xc1b   : > { %v625_v23 = vsel %vm613_vm3, %v624_v22, %v607_v6  ;;  %vm817_vm3 = vcmp.eq.s32.totalorder %v2544_v10, 30 }
 0xc1c   : > { %v640_v24 = vmul.f32 %v628_v15, %v625_v23 }
 0xc1e   : > { %641 = vadd.xlane.f32.xlu1 %v640_v24 }
 0xc30   : > { %v638_v27 = vpop.xlane.xlu0 %637 }
 0xc31   : > { %v639_v29 = vsel %vm631_vm4, %v638_v27, %v621_v17 }
 0xc32   : > { %v654_v30 = vmul.f32 %v646_v28, %v639_v29 }
 0xc34   : > { %655 = vadd.xlane.f32.xlu1 %v654_v30 }
 0xc38   : > { %199 = vadd.xlane.f32.xlu1 %v198_v32 }
 0xca7   : > { %v634_v33 = vpop.xlane.xlu1 %633 }
 0xca8   : > { %v635_v34 = vsel %vm631_vm4, %v634_v33, %v617_v20 }
 0xca9   : > { %v650_v35 = vmul.f32 %v646_v28, %v635_v34 }
 0xcab   : > { %651 = vadd.xlane.f32.xlu0 %v650_v35  ;;  %v642_v36 = vpop.xlane.xlu1 %641 }
 0xcac   : > { %v643_v37 = vsel %vm631_vm4, %v642_v36, %v625_v23 }
 0xcad   : > { %v658_v38 = vmul.f32 %v646_v28, %v643_v37 }
 0xcaf   : > { %659 = vadd.xlane.f32.xlu0 %v658_v38 }
 0xcc1   : > { %v656_v40 = vpop.xlane.xlu1 %655 }
 0xcc2   : > { %v657_v42 = vsel %vm649_vm6, %v656_v40, %v639_v29 }
 0xcc3   : > { %v672_v43 = vmul.f32 %v664_v41, %v657_v42 }
 0xcc5   : > { %673 = vadd.xlane.f32.xlu1 %v672_v43  ;;  %v2628_v44 = vpop.xlane.xlu1 %199 }
 0xcc6   : > { %2467 = vrcp.f32 %v2628_v44 }
 0xcd0   : > { %v2634_v46 = vpop.eup %2467 }
 0xcd1   : > { %v205_v47 = vmul.f32 %v2634_v46, %v203_v45 }
 0xcd3   : > { %206 = vst [vmem:[#allocation2 + $0x18] sm:$0xff] %v205_v47 }
 0xcda   : > { %v681_v56 = vld [vmem:[#allocation2 + $0x18] ss:$0 sm:$0xff]  ;;  %v703_v6 = vld [vmem:[#allocation2 + $0x19] ss:$0 sm:$0xff]  ;;  %v725_v26 = vld [vmem:[#allocation2 + $0x1a] ss:$0 sm:$0xff] }
 0xcdb   : > { %v682_v57 = vxor.u32 2147483648, %v681_v56  ;;  %v704_v12 = vxor.u32 2147483648, %v703_v6  ;;  %v726_v28 = vxor.u32 2147483648, %v725_v26  ;;  %v747_v40 = vld [vmem:[#allocation2 + $0x1b] ss:$0 sm:$0xff] }
 0xcdd   : > { %v698_v63 = vmul.f32 %v682_v57, %v318_v60 }
 0xd38   : > { %v652_v48 = vpop.xlane.xlu0 %651 }
 0xd39   : > { %v653_v49 = vsel %vm649_vm6, %v652_v48, %v635_v34 }
 0xd3a   : > { %v668_v50 = vmul.f32 %v664_v41, %v653_v49 }
 0xd3c   : > { %669 = vadd.xlane.f32.xlu0 %v668_v50  ;;  %v660_v51 = vpop.xlane.xlu0 %659 }
 0xd3d   : > { %v661_v53 = vsel %vm649_vm6, %v660_v51, %v643_v37  ;;  %vm839_vm6 = vcmp.eq.s32.totalorder %v2544_v10, 31 }
 0xd3e   : > { %v676_v55 = vmul.f32 %v664_v41, %v661_v53 }
 0xd40   : > { %677 = vadd.xlane.f32.xlu0 %v676_v55 }
 0xd52   : > { %v674_v58 = vpop.xlane.xlu1 %673 }
 0xd53   : > { %v675_v59 = vsel %vm667_vm9, %v674_v58, %v657_v42  ;;  %v748_v42 = vxor.u32 2147483648, %v747_v40  ;;  %v769_v58 = vld [vmem:[#allocation2 + $0x1c] ss:$0 sm:$0xff]  ;;  %v211_v40 = vadd.s32 32, %v2546_v11 }
 0xd54   : > { %v690_v61 = vmul.f32 %v682_v57, %v675_v59 }
 0xd55   : > { %vm212_vm2 = vcmp.eq.s32.totalorder %v211_v40, %v2544_v10  ;;  %vm217_vm4 = vcmp.ge.s32.totalorder %v211_v40, %v2544_v10  ;;  %vm324_vm7 = vcmp.eq.s32.totalorder %v2544_v10, %v211_v40 }
 0xd56   : > { %691 = vadd.xlane.f32.xlu0 %v690_v61  ;;  %vm218_vm5 = vmand %vm217_vm4, %vm144_vm1 }
 0xd5a   : > { %699 = vadd.xlane.f32.xlu0 %v698_v63 }
 0xdc9   : > { %v670_v0 = vpop.xlane.xlu0 %669 }
 0xdca   : > { %v671_v1 = vsel %vm667_vm9, %v670_v0, %v653_v49 }
 0xdcb   : > { %v686_v2 = vmul.f32 %v682_v57, %v671_v1 }
 0xdcd   : > { %v678_v3 = vpop.xlane.xlu0 %677  ;;  %687 = vadd.xlane.f32.xlu1 %v686_v2 }
 0xdce   : > { %v679_v4 = vsel %vm667_vm9, %v678_v3, %v661_v53  ;;  %vm887_vm9 = vcmp.eq.s32.totalorder %v2544_v10, 33 }
 0xdcf   : > { %v694_v5 = vmul.f32 %v682_v57, %v679_v4 }
 0xdd1   : > { %695 = vadd.xlane.f32.xlu1 %v694_v5 }
 0xde3   : > { %v692_v8 = vpop.xlane.xlu0 %691 }
 0xde4   : > { %v693_v13 = vsel %vm685_vm11, %v692_v8, %v675_v59 }
 0xde5   : > { %v712_v15 = vmul.f32 %v704_v12, %v693_v13 }
 0xde7   : > { %713 = vadd.xlane.f32.xlu0 %v712_v15  ;;  %v700_v17 = vpop.xlane.xlu0 %699 }
 0xde8   : > { %v701_v18 = vsel %vm685_vm11, %v700_v17, %v318_v60  ;;  %v770_v60 = vxor.u32 2147483648, %v769_v58 }
 0xde9   : > { %v720_v19 = vmul.f32 %v704_v12, %v701_v18 }
 0xdeb   : > { %721 = vadd.xlane.f32.xlu0 %v720_v19 }
 0xe5a   : > { %v688_v20 = vpop.xlane.xlu1 %687 }
 0xe5b   : > { %v689_v21 = vsel %vm685_vm11, %v688_v20, %v671_v1 }
 0xe5c   : > { %v708_v22 = vmul.f32 %v704_v12, %v689_v21 }
 0xe5e   : > { %709 = vadd.xlane.f32.xlu1 %v708_v22  ;;  %v696_v23 = vpop.xlane.xlu1 %695 }
 0xe5f   : > { %v697_v24 = vsel %vm685_vm11, %v696_v23, %v679_v4  ;;  %vm939_vm11 = vcmp.eq.s32.totalorder %v2544_v10, 35 }
 0xe60   : > { %v716_v25 = vmul.f32 %v704_v12, %v697_v24 }
 0xe62   : > { %717 = vadd.xlane.f32.xlu1 %v716_v25 }
 0xe74   : > { %v714_v27 = vpop.xlane.xlu0 %713 }
 0xe75   : > { %v715_v29 = vsel %vm707_vm12, %v714_v27, %v693_v13  ;;  %v791_v13 = vld [vmem:[#allocation2 + $0x1d] ss:$0 sm:$0xff] }
 0xe76   : > { %v734_v30 = vmul.f32 %v726_v28, %v715_v29  ;;  %v792_v17 = vxor.u32 2147483648, %v791_v13 }
 0xe78   : > { %735 = vadd.xlane.f32.xlu0 %v734_v30  ;;  %v722_v31 = vpop.xlane.xlu0 %721 }
 0xe79   : > { %v723_v32 = vsel %vm707_vm12, %v722_v31, %v701_v18 }
 0xe7a   : > { %v742_v33 = vmul.f32 %v726_v28, %v723_v32 }
 0xe7c   : > { %743 = vadd.xlane.f32.xlu0 %v742_v33 }
 0xeeb   : > { %v710_v34 = vpop.xlane.xlu1 %709 }
 0xeec   : > { %v711_v35 = vsel %vm707_vm12, %v710_v34, %v689_v21 }
 0xeed   : > { %v730_v36 = vmul.f32 %v726_v28, %v711_v35 }
 0xeef   : > { %731 = vadd.xlane.f32.xlu1 %v730_v36  ;;  %v718_v37 = vpop.xlane.xlu1 %717 }
 0xef0   : > { %v719_v38 = vsel %vm707_vm12, %v718_v37, %v697_v24  ;;  %vm965_vm12 = vcmp.eq.s32.totalorder %v2544_v10, 36 }
 0xef1   : > { %v738_v39 = vmul.f32 %v726_v28, %v719_v38 }
 0xef3   : > { %739 = vadd.xlane.f32.xlu1 %v738_v39 }
 0xf05   : > { %v736_v41 = vpop.xlane.xlu0 %735 }
 0xf06   : > { %v737_v43 = vsel %vm729_vm13, %v736_v41, %v715_v29  ;;  %v813_v29 = vld [vmem:[#allocation2 + $0x1e] ss:$0 sm:$0xff] }
 0xf07   : > { %v756_v45 = vmul.f32 %v748_v42, %v737_v43  ;;  %v814_v31 = vxor.u32 2147483648, %v813_v29 }
 0xf09   : > { %757 = vadd.xlane.f32.xlu0 %v756_v45  ;;  %v744_v47 = vpop.xlane.xlu0 %743  ;;  %v2415_v45 = vld [vmem:[%s2550_s20 + $0x20] sm:$0xff] }
 0xf0a   : > { %v745_v48 = vsel %vm729_vm13, %v744_v47, %v723_v32  ;;  %v214_v47 = vsel %vm212_vm2, %v2415_v45, 0.0 }
 0xf0b   : > { %v764_v49 = vmul.f32 %v748_v42, %v745_v48 }
 0xf0d   : > { %765 = vadd.xlane.f32.xlu0 %v764_v49 }
 0xf7c   : > { %v732_v50 = vpop.xlane.xlu1 %731 }
 0xf7d   : > { %v733_v51 = vsel %vm729_vm13, %v732_v50, %v711_v35 }
 0xf7e   : > { %v752_v53 = vmul.f32 %v748_v42, %v733_v51 }
 0xf80   : > { %753 = vadd.xlane.f32.xlu1 %v752_v53  ;;  %v740_v55 = vpop.xlane.xlu1 %739 }
 0xf81   : > { %v741_v56 = vsel %vm729_vm13, %v740_v55, %v719_v38  ;;  %vm991_vm13 = vcmp.eq.s32.totalorder %v2544_v10, 37 }
 0xf82   : > { %v760_v57 = vmul.f32 %v748_v42, %v741_v56 }
 0xf84   : > { %761 = vadd.xlane.f32.xlu1 %v760_v57 }
 0xf96   : > { %v758_v59 = vpop.xlane.xlu0 %757 }
 0xf97   : > { %v759_v61 = vsel %vm751_vm14, %v758_v59, %v737_v43 }
 0xf98   : > { %v778_v63 = vmul.f32 %v770_v60, %v759_v61 }
 0xf9a   : > { %779 = vadd.xlane.f32.xlu0 %v778_v63  ;;  %v766_v0 = vpop.xlane.xlu0 %765 }
 0xf9b   : > { %v767_v1 = vsel %vm751_vm14, %v766_v0, %v745_v48  ;;  %v835_v48 = vld [vmem:[#allocation2 + $0x1f] ss:$0 sm:$0xff] }
 0xf9c   : > { %v786_v2 = vmul.f32 %v770_v60, %v767_v1  ;;  %v836_v50 = vxor.u32 2147483648, %v835_v48 }
 0xf9e   : > { %787 = vadd.xlane.f32.xlu0 %v786_v2  ;;  %v219_v2 = vsel %vm218_vm5, %v2415_v45, 0.0  ;;  %vm1069_vm5 = vcmp.eq.s32.totalorder %v2544_v10, 40 }
0x100d   : > { %v754_v3 = vpop.xlane.xlu1 %753 }
0x100e   : > { %v755_v4 = vsel %vm751_vm14, %v754_v3, %v733_v51 }
0x100f   : > { %v774_v5 = vmul.f32 %v770_v60, %v755_v4 }
0x1011   : > { %775 = vadd.xlane.f32.xlu1 %v774_v5  ;;  %v762_v6 = vpop.xlane.xlu1 %761 }
0x1012   : > { %v763_v8 = vsel %vm751_vm14, %v762_v6, %v741_v56 }
0x1013   : > { %v782_v12 = vmul.f32 %v770_v60, %v763_v8 }
0x1015   : > { %783 = vadd.xlane.f32.xlu1 %v782_v12 }
0x1027   : > { %v780_v15 = vpop.xlane.xlu0 %779 }
0x1028   : > { %v781_v18 = vsel %vm773_vm15, %v780_v15, %v759_v61 }
0x1029   : > { %v800_v19 = vmul.f32 %v792_v17, %v781_v18 }
0x102b   : > { %801 = vadd.xlane.f32.xlu0 %v800_v19  ;;  %v788_v20 = vpop.xlane.xlu0 %787 }
0x102c   : > { %v789_v21 = vsel %vm773_vm15, %v788_v20, %v767_v1 }
0x102d   : > { %v808_v22 = vmul.f32 %v792_v17, %v789_v21 }
0x102f   : > { %809 = vadd.xlane.f32.xlu0 %v808_v22 }
0x109e   : > { %v776_v23 = vpop.xlane.xlu1 %775 }
0x109f   : > { %v777_v24 = vsel %vm773_vm15, %v776_v23, %v755_v4 }
0x10a0   : > { %v796_v25 = vmul.f32 %v792_v17, %v777_v24 }
0x10a2   : > { %797 = vadd.xlane.f32.xlu1 %v796_v25  ;;  %v784_v26 = vpop.xlane.xlu1 %783  ;;  %v325_v25 = vsel %vm324_vm7, -1.0, %v2504_v62  ;;  %vm1129_vm7 = vcmp.eq.s32.totalorder %v2544_v10, 42 }
0x10a3   : > { %v785_v27 = vsel %vm773_vm15, %v784_v26, %v763_v8  ;;  %vm1017_vm15 = vcmp.eq.s32.totalorder %v2544_v10, 38 }
0x10a4   : > { %v804_v28 = vmul.f32 %v792_v17, %v785_v27 }
0x10a6   : > { %805 = vadd.xlane.f32.xlu1 %v804_v28 }
0x10b8   : > { %v802_v30 = vpop.xlane.xlu0 %801 }
0x10b9   : > { %v803_v32 = vsel %vm795_vm0, %v802_v30, %v781_v18 }
0x10ba   : > { %v822_v33 = vmul.f32 %v814_v31, %v803_v32 }
0x10bc   : > { %823 = vadd.xlane.f32.xlu0 %v822_v33  ;;  %v810_v34 = vpop.xlane.xlu0 %809 }
0x10bd   : > { %v811_v35 = vsel %vm795_vm0, %v810_v34, %v789_v21 }
0x10be   : > { %v830_v36 = vmul.f32 %v814_v31, %v811_v35 }
0x10c0   : > { %831 = vadd.xlane.f32.xlu0 %v830_v36 }
0x112f   : > { %v798_v37 = vpop.xlane.xlu1 %797 }
0x1130   : > { %v799_v38 = vsel %vm795_vm0, %v798_v37, %v777_v24 }
0x1131   : > { %v818_v39 = vmul.f32 %v814_v31, %v799_v38 }
0x1133   : > { %819 = vadd.xlane.f32.xlu1 %v818_v39  ;;  %v806_v41 = vpop.xlane.xlu1 %805 }
0x1134   : > { %v807_v42 = vsel %vm795_vm0, %v806_v41, %v785_v27 }
0x1135   : > { %v826_v43 = vmul.f32 %v814_v31, %v807_v42 }
0x1137   : > { %827 = vadd.xlane.f32.xlu1 %v826_v43 }
0x113b   : > { %215 = vadd.xlane.f32.xlu1 %v214_v47 }
0x1149   : > { %v824_v49 = vpop.xlane.xlu0 %823 }
0x114a   : > { %v825_v51 = vsel %vm817_vm3, %v824_v49, %v803_v32 }
0x114b   : > { %v844_v53 = vmul.f32 %v836_v50, %v825_v51 }
0x114d   : > { %v832_v55 = vpop.xlane.xlu0 %831  ;;  %845 = vadd.xlane.f32.xlu1 %v844_v53 }
0x114e   : > { %v833_v56 = vsel %vm817_vm3, %v832_v55, %v811_v35 }
0x114f   : > { %v852_v57 = vmul.f32 %v836_v50, %v833_v56 }
0x1151   : > { %853 = vadd.xlane.f32.xlu1 %v852_v57 }
0x11c0   : > { %v820_v58 = vpop.xlane.xlu1 %819 }
0x11c1   : > { %v821_v59 = vsel %vm817_vm3, %v820_v58, %v799_v38 }
0x11c2   : > { %v840_v60 = vmul.f32 %v836_v50, %v821_v59 }
0x11c4   : > { %841 = vadd.xlane.f32.xlu0 %v840_v60  ;;  %v828_v61 = vpop.xlane.xlu1 %827 }
0x11c5   : > { %v829_v63 = vsel %vm817_vm3, %v828_v61, %v807_v42  ;;  %vm1043_vm3 = vcmp.eq.s32.totalorder %v2544_v10, 39 }
0x11c6   : > { %v848_v0 = vmul.f32 %v836_v50, %v829_v63 }
0x11c8   : > { %849 = vadd.xlane.f32.xlu0 %v848_v0  ;;  %v2662_v1 = vpop.xlane.xlu1 %215 }
0x11c9   : > { %2469 = vrcp.f32 %v2662_v1 }
0x11d3   : > { %v2668_v3 = vpop.eup %2469 }
0x11d4   : > { %v221_v4 = vmul.f32 %v2668_v3, %v219_v2 }
0x11d6   : > { %222 = vst [vmem:[#allocation2 + $0x20] sm:$0xff] %v221_v4 }
0x11da   : > { %v846_v5 = vpop.xlane.xlu1 %845 }
0x11db   : > { %v847_v13 = vsel %vm839_vm6, %v846_v5, %v825_v51 }
0x11dd   : > { %v857_v6 = vld [vmem:[#allocation2 + $0x20] ss:$0 sm:$0xff]  ;;  %v883_v27 = vld [vmem:[#allocation2 + $0x21] ss:$0 sm:$0xff]  ;;  %v909_v45 = vld [vmem:[#allocation2 + $0x22] ss:$0 sm:$0xff] }
0x11de   : > { %v854_v8 = vpop.xlane.xlu1 %853  ;;  %v858_v12 = vxor.u32 2147483648, %v857_v6  ;;  %v884_v29 = vxor.u32 2147483648, %v883_v27  ;;  %v910_v48 = vxor.u32 2147483648, %v909_v45  ;;  %v935_v4 = vld [vmem:[#allocation2 + $0x23] ss:$0 sm:$0xff] }
0x11df   : > { %v855_v17 = vsel %vm839_vm6, %v854_v8, %v833_v56  ;;  %v936_v5 = vxor.u32 2147483648, %v935_v4  ;;  %v961_v27 = vld [vmem:[#allocation2 + $0x24] ss:$0 sm:$0xff]  ;;  %v987_v45 = vld [vmem:[#allocation2 + $0x25] ss:$0 sm:$0xff] }
0x11e0   : > { %v866_v15 = vmul.f32 %v858_v12, %v847_v13  ;;  %v874_v18 = vmul.f32 %v858_v12, %v855_v17  ;;  %v878_v26 = vmul.f32 %v858_v12, %v325_v25  ;;  %v1013_v4 = vld [vmem:[#allocation2 + $0x26] ss:$0 sm:$0xff] }
0x11e2   : > { %867 = vadd.xlane.f32.xlu1 %v866_v15 }
0x11e6   : > { %875 = vadd.xlane.f32.xlu1 %v874_v18 }
0x1251   : > { %v842_v19 = vpop.xlane.xlu0 %841 }
0x1252   : > { %v843_v23 = vsel %vm839_vm6, %v842_v19, %v821_v59 }
0x1253   : > { %v862_v24 = vmul.f32 %v858_v12, %v843_v23 }
0x1255   : > { %v850_v20 = vpop.xlane.xlu0 %849 }
0x1256   : > { %v851_v21 = vsel %vm839_vm6, %v850_v20, %v829_v63  ;;  %vm1099_vm6 = vcmp.eq.s32.totalorder %v2544_v10, 41 }
0x1257   : > { %v870_v22 = vmul.f32 %v858_v12, %v851_v21 }
0x1259   : > { %871 = vadd.xlane.f32.xlu0 %v870_v22 }
0x125d   : > { %863 = vadd.xlane.f32.xlu0 %v862_v24 }
0x1261   : > { %879 = vadd.xlane.f32.xlu0 %v878_v26 }
0x126f   : > { %v868_v28 = vpop.xlane.xlu1 %867 }
0x1270   : > { %v869_v30 = vsel %vm861_vm8, %v868_v28, %v847_v13  ;;  %v962_v28 = vxor.u32 2147483648, %v961_v27 }
0x1271   : > { %v892_v31 = vmul.f32 %v884_v29, %v869_v30 }
0x1273   : > { %893 = vadd.xlane.f32.xlu0 %v892_v31  ;;  %v876_v32 = vpop.xlane.xlu1 %875 }
0x1274   : > { %v877_v33 = vsel %vm861_vm8, %v876_v32, %v855_v17 }
0x1275   : > { %v900_v34 = vmul.f32 %v884_v29, %v877_v33 }
0x1277   : > { %901 = vadd.xlane.f32.xlu0 %v900_v34 }
0x12e6   : > { %v872_v35 = vpop.xlane.xlu0 %871 }
0x12e7   : > { %v873_v36 = vsel %vm861_vm8, %v872_v35, %v851_v21 }
0x12e8   : > { %v896_v37 = vmul.f32 %v884_v29, %v873_v36 }
0x12ea   : > { %v864_v38 = vpop.xlane.xlu0 %863  ;;  %897 = vadd.xlane.f32.xlu1 %v896_v37 }
0x12eb   : > { %v865_v39 = vsel %vm861_vm8, %v864_v38, %v843_v23 }
0x12ec   : > { %v888_v40 = vmul.f32 %v884_v29, %v865_v39 }
0x12ee   : > { %v880_v41 = vpop.xlane.xlu0 %879  ;;  %889 = vadd.xlane.f32.xlu1 %v888_v40 }
0x12ef   : > { %v881_v42 = vsel %vm861_vm8, %v880_v41, %v325_v25  ;;  %vm1159_vm8 = vcmp.eq.s32.totalorder %v2544_v10, 43 }
0x12f0   : > { %v904_v43 = vmul.f32 %v884_v29, %v881_v42 }
0x12f2   : > { %905 = vadd.xlane.f32.xlu1 %v904_v43 }
0x1300   : > { %v894_v47 = vpop.xlane.xlu0 %893 }
0x1301   : > { %v895_v49 = vsel %vm887_vm9, %v894_v47, %v869_v30  ;;  %v988_v47 = vxor.u32 2147483648, %v987_v45 }
0x1302   : > { %v918_v50 = vmul.f32 %v910_v48, %v895_v49 }
0x1304   : > { %919 = vadd.xlane.f32.xlu1 %v918_v50  ;;  %v902_v51 = vpop.xlane.xlu0 %901 }
0x1305   : > { %v903_v53 = vsel %vm887_vm9, %v902_v51, %v877_v33 }
0x1306   : > { %v926_v55 = vmul.f32 %v910_v48, %v903_v53 }
0x1308   : > { %927 = vadd.xlane.f32.xlu1 %v926_v55 }
0x1377   : > { %v898_v56 = vpop.xlane.xlu1 %897 }
0x1378   : > { %v899_v57 = vsel %vm887_vm9, %v898_v56, %v873_v36 }
0x1379   : > { %v922_v58 = vmul.f32 %v910_v48, %v899_v57 }
0x137b   : > { %923 = vadd.xlane.f32.xlu0 %v922_v58  ;;  %v890_v59 = vpop.xlane.xlu1 %889 }
0x137c   : > { %v891_v60 = vsel %vm887_vm9, %v890_v59, %v865_v39 }
0x137d   : > { %v914_v61 = vmul.f32 %v910_v48, %v891_v60 }
0x137f   : > { %915 = vadd.xlane.f32.xlu0 %v914_v61  ;;  %v906_v63 = vpop.xlane.xlu1 %905 }
0x1380   : > { %v907_v0 = vsel %vm887_vm9, %v906_v63, %v881_v42  ;;  %vm1189_vm9 = vcmp.eq.s32.totalorder %v2544_v10, 44 }
0x1381   : > { %v930_v2 = vmul.f32 %v910_v48, %v907_v0 }
0x1383   : > { %931 = vadd.xlane.f32.xlu0 %v930_v2 }
0x1391   : > { %v920_v6 = vpop.xlane.xlu1 %919 }
0x1392   : > { %v921_v8 = vsel %vm913_vm10, %v920_v6, %v895_v49 }
0x1393   : > { %v944_v12 = vmul.f32 %v936_v5, %v921_v8 }
0x1395   : > { %945 = vadd.xlane.f32.xlu0 %v944_v12  ;;  %v928_v13 = vpop.xlane.xlu1 %927 }
0x1396   : > { %v929_v15 = vsel %vm913_vm10, %v928_v13, %v903_v53  ;;  %v2733_v13 = vadd.s32 40, %v2546_v11 }
0x1397   : > { %v952_v17 = vmul.f32 %v936_v5, %v929_v15 }
0x1398   : > { %vm228_vm14 = vcmp.eq.s32.totalorder %v2733_v13, %v2544_v10  ;;  %vm233_vm0 = vcmp.ge.s32.totalorder %v2733_v13, %v2544_v10  ;;  %vm331_vm4 = vcmp.eq.s32.totalorder %v2544_v10, %v2733_v13 }
0x1399   : > { %953 = vadd.xlane.f32.xlu0 %v952_v17  ;;  %vm234_vm2 = vmand %vm233_vm0, %vm144_vm1 }
0x1408   : > { %v924_v18 = vpop.xlane.xlu0 %923 }
0x1409   : > { %v925_v19 = vsel %vm913_vm10, %v924_v18, %v899_v57 }
0x140a   : > { %v948_v20 = vmul.f32 %v936_v5, %v925_v19 }
0x140c   : > { %949 = vadd.xlane.f32.xlu1 %v948_v20  ;;  %v916_v21 = vpop.xlane.xlu0 %915 }
0x140d   : > { %v917_v22 = vsel %vm913_vm10, %v916_v21, %v891_v60 }
0x140e   : > { %v940_v23 = vmul.f32 %v936_v5, %v917_v22 }
0x1410   : > { %941 = vadd.xlane.f32.xlu1 %v940_v23  ;;  %v932_v24 = vpop.xlane.xlu0 %931 }
0x1411   : > { %v933_v25 = vsel %vm913_vm10, %v932_v24, %v907_v0  ;;  %vm1219_vm10 = vcmp.eq.s32.totalorder %v2544_v10, 45 }
0x1412   : > { %v956_v26 = vmul.f32 %v936_v5, %v933_v25  ;;  %v1014_v5 = vxor.u32 2147483648, %v1013_v4 }
0x1414   : > { %957 = vadd.xlane.f32.xlu1 %v956_v26 }
0x1422   : > { %v946_v29 = vpop.xlane.xlu0 %945 }
0x1423   : > { %v947_v30 = vsel %vm939_vm11, %v946_v29, %v921_v8 }
0x1424   : > { %v970_v31 = vmul.f32 %v962_v28, %v947_v30 }
0x1426   : > { %971 = vadd.xlane.f32.xlu1 %v970_v31  ;;  %v954_v32 = vpop.xlane.xlu0 %953 }
0x1427   : > { %v955_v33 = vsel %vm939_vm11, %v954_v32, %v929_v15 }
0x1428   : > { %v978_v34 = vmul.f32 %v962_v28, %v955_v33 }
0x142a   : > { %979 = vadd.xlane.f32.xlu1 %v978_v34 }
0x1499   : > { %v950_v35 = vpop.xlane.xlu1 %949 }
0x149a   : > { %v951_v36 = vsel %vm939_vm11, %v950_v35, %v925_v19  ;;  %v2416_v19 = vld [vmem:[%s2550_s20 + $0x28] sm:$0xff] }
0x149b   : > { %v974_v37 = vmul.f32 %v962_v28, %v951_v36  ;;  %v230_v20 = vsel %vm228_vm14, %v2416_v19, 0.0 }
0x149d   : > { %975 = vadd.xlane.f32.xlu0 %v974_v37  ;;  %v942_v38 = vpop.xlane.xlu1 %941 }
0x149e   : > { %v943_v39 = vsel %vm939_vm11, %v942_v38, %v917_v22 }
0x149f   : > { %v966_v40 = vmul.f32 %v962_v28, %v943_v39 }
0x14a1   : > { %967 = vadd.xlane.f32.xlu0 %v966_v40  ;;  %v958_v41 = vpop.xlane.xlu1 %957 }
0x14a2   : > { %v959_v42 = vsel %vm939_vm11, %v958_v41, %v933_v25 }
0x14a3   : > { %v982_v43 = vmul.f32 %v962_v28, %v959_v42 }
0x14a5   : > { %983 = vadd.xlane.f32.xlu0 %v982_v43 }
0x14b3   : > { %v972_v48 = vpop.xlane.xlu1 %971 }
0x14b4   : > { %v973_v49 = vsel %vm965_vm12, %v972_v48, %v947_v30  ;;  %v1039_v30 = vld [vmem:[#allocation2 + $0x27] ss:$0 sm:$0xff] }
0x14b5   : > { %v996_v50 = vmul.f32 %v988_v47, %v973_v49  ;;  %v1040_v31 = vxor.u32 2147483648, %v1039_v30 }
0x14b7   : > { %997 = vadd.xlane.f32.xlu0 %v996_v50  ;;  %v980_v51 = vpop.xlane.xlu1 %979 }
0x14b8   : > { %v981_v53 = vsel %vm965_vm12, %v980_v51, %v955_v33 }
0x14b9   : > { %v1004_v55 = vmul.f32 %v988_v47, %v981_v53 }
0x14bb   : > { %1005 = vadd.xlane.f32.xlu0 %v1004_v55 }
0x152a   : > { %v976_v56 = vpop.xlane.xlu0 %975 }
0x152b   : > { %v977_v57 = vsel %vm965_vm12, %v976_v56, %v951_v36 }
0x152c   : > { %v1000_v58 = vmul.f32 %v988_v47, %v977_v57 }
0x152e   : > { %1001 = vadd.xlane.f32.xlu1 %v1000_v58  ;;  %v968_v59 = vpop.xlane.xlu0 %967 }
0x152f   : > { %v969_v60 = vsel %vm965_vm12, %v968_v59, %v943_v39  ;;  %v235_v39 = vsel %vm234_vm2, %v2416_v19, 0.0  ;;  %vm1309_vm2 = vcmp.eq.s32.totalorder %v2544_v10, 48 }
0x1530   : > { %v992_v61 = vmul.f32 %v988_v47, %v969_v60 }
0x1532   : > { %993 = vadd.xlane.f32.xlu1 %v992_v61  ;;  %v984_v63 = vpop.xlane.xlu0 %983 }
0x1533   : > { %v985_v0 = vsel %vm965_vm12, %v984_v63, %v959_v42  ;;  %v332_v63 = vsel %vm331_vm4, -1.0, %v2504_v62  ;;  %vm1249_vm12 = vcmp.eq.s32.totalorder %v2544_v10, 46  ;;  %vm1377_vm4 = vcmp.eq.s32.totalorder %v2544_v10, 50 }
0x1534   : > { %v1008_v2 = vmul.f32 %v988_v47, %v985_v0 }
0x1536   : > { %1009 = vadd.xlane.f32.xlu1 %v1008_v2 }
0x1544   : > { %v998_v6 = vpop.xlane.xlu0 %997 }
0x1545   : > { %v999_v8 = vsel %vm991_vm13, %v998_v6, %v973_v49 }
0x1546   : > { %v1022_v12 = vmul.f32 %v1014_v5, %v999_v8 }
0x1548   : > { %1023 = vadd.xlane.f32.xlu1 %v1022_v12  ;;  %v1006_v15 = vpop.xlane.xlu0 %1005 }
0x1549   : > { %v1007_v17 = vsel %vm991_vm13, %v1006_v15, %v981_v53 }
0x154a   : > { %v1030_v18 = vmul.f32 %v1014_v5, %v1007_v17 }
0x154c   : > { %1031 = vadd.xlane.f32.xlu1 %v1030_v18 }
0x1550   : > { %231 = vadd.xlane.f32.xlu1 %v230_v20 }
0x15bb   : > { %v1002_v21 = vpop.xlane.xlu1 %1001 }
0x15bc   : > { %v1003_v22 = vsel %vm991_vm13, %v1002_v21, %v977_v57 }
0x15bd   : > { %v1026_v23 = vmul.f32 %v1014_v5, %v1003_v22 }
0x15bf   : > { %1027 = vadd.xlane.f32.xlu0 %v1026_v23  ;;  %v994_v24 = vpop.xlane.xlu1 %993 }
0x15c0   : > { %v995_v25 = vsel %vm991_vm13, %v994_v24, %v969_v60 }
0x15c1   : > { %v1018_v26 = vmul.f32 %v1014_v5, %v995_v25 }
0x15c3   : > { %1019 = vadd.xlane.f32.xlu0 %v1018_v26  ;;  %v1010_v27 = vpop.xlane.xlu1 %1009 }
0x15c4   : > { %v1011_v28 = vsel %vm991_vm13, %v1010_v27, %v985_v0 }
0x15c5   : > { %v1034_v29 = vmul.f32 %v1014_v5, %v1011_v28 }
0x15c7   : > { %1035 = vadd.xlane.f32.xlu0 %v1034_v29 }
0x15d5   : > { %v1024_v32 = vpop.xlane.xlu1 %1023 }
0x15d6   : > { %v1025_v33 = vsel %vm1017_vm15, %v1024_v32, %v999_v8 }
0x15d7   : > { %v1048_v34 = vmul.f32 %v1040_v31, %v1025_v33 }
0x15d9   : > { %1049 = vadd.xlane.f32.xlu1 %v1048_v34  ;;  %v1032_v35 = vpop.xlane.xlu1 %1031 }
0x15da   : > { %v1033_v36 = vsel %vm1017_vm15, %v1032_v35, %v1007_v17 }
0x15db   : > { %v1056_v37 = vmul.f32 %v1040_v31, %v1033_v36 }
0x15dd   : > { %1057 = vadd.xlane.f32.xlu1 %v1056_v37  ;;  %v2751_v38 = vpop.xlane.xlu1 %231 }
0x15de   : > { %2471 = vrcp.f32 %v2751_v38 }
0x15e8   : > { %v2758_v40 = vpop.eup %2471 }
0x15e9   : > { %v237_v41 = vmul.f32 %v2758_v40, %v235_v39 }
0x15eb   : > { %238 = vst [vmem:[#allocation2 + $0x28] sm:$0xff] %v237_v41 }
0x15f2   : > { %v1065_v55 = vld [vmem:[#allocation2 + $0x28] ss:$0 sm:$0xff]  ;;  %v1095_v19 = vld [vmem:[#allocation2 + $0x29] ss:$0 sm:$0xff]  ;;  %v1125_v41 = vld [vmem:[#allocation2 + $0x2a] ss:$0 sm:$0xff] }
0x15f3   : > { %v1066_v56 = vxor.u32 2147483648, %v1065_v55  ;;  %v1096_v20 = vxor.u32 2147483648, %v1095_v19 }
0x15f5   : > { %v1090_v2 = vmul.f32 %v1066_v56, %v332_v63 }
0x164c   : > { %v1028_v42 = vpop.xlane.xlu0 %1027 }
0x164d   : > { %v1029_v43 = vsel %vm1017_vm15, %v1028_v42, %v1003_v22  ;;  %v1126_v42 = vxor.u32 2147483648, %v1125_v41 }
0x164e   : > { %v1052_v45 = vmul.f32 %v1040_v31, %v1029_v43 }
0x1650   : > { %v1020_v47 = vpop.xlane.xlu0 %1019  ;;  %1053 = vadd.xlane.f32.xlu0 %v1052_v45 }
0x1651   : > { %v1021_v48 = vsel %vm1017_vm15, %v1020_v47, %v995_v25 }
0x1652   : > { %v1044_v49 = vmul.f32 %v1040_v31, %v1021_v48 }
0x1654   : > { %1045 = vadd.xlane.f32.xlu0 %v1044_v49  ;;  %v1036_v50 = vpop.xlane.xlu0 %1035 }
0x1655   : > { %v1037_v51 = vsel %vm1017_vm15, %v1036_v50, %v1011_v28  ;;  %vm1279_vm15 = vcmp.eq.s32.totalorder %v2544_v10, 47 }
0x1656   : > { %v1060_v53 = vmul.f32 %v1040_v31, %v1037_v51 }
0x1658   : > { %1061 = vadd.xlane.f32.xlu0 %v1060_v53 }
0x1666   : > { %v1050_v57 = vpop.xlane.xlu1 %1049 }
0x1667   : > { %v1051_v58 = vsel %vm1043_vm3, %v1050_v57, %v1025_v33 }
0x1668   : > { %v1074_v59 = vmul.f32 %v1066_v56, %v1051_v58 }
0x166a   : > { %1075 = vadd.xlane.f32.xlu0 %v1074_v59  ;;  %v1058_v60 = vpop.xlane.xlu1 %1057 }
0x166b   : > { %v1059_v61 = vsel %vm1043_vm3, %v1058_v60, %v1033_v36 }
0x166c   : > { %v1082_v0 = vmul.f32 %v1066_v56, %v1059_v61 }
0x166e   : > { %1083 = vadd.xlane.f32.xlu0 %v1082_v0 }
0x1672   : > { %1091 = vadd.xlane.f32.xlu0 %v1090_v2 }
0x16dd   : > { %v1054_v4 = vpop.xlane.xlu0 %1053 }
0x16de   : > { %v1055_v5 = vsel %vm1043_vm3, %v1054_v4, %v1029_v43  ;;  %v1155_v4 = vld [vmem:[#allocation2 + $0x2b] ss:$0 sm:$0xff] }
0x16df   : > { %v1078_v6 = vmul.f32 %v1066_v56, %v1055_v5 }
0x16e1   : > { %v1046_v8 = vpop.xlane.xlu0 %1045  ;;  %1079 = vadd.xlane.f32.xlu1 %v1078_v6 }
0x16e2   : > { %v1047_v12 = vsel %vm1043_vm3, %v1046_v8, %v1021_v48 }
0x16e3   : > { %v1070_v13 = vmul.f32 %v1066_v56, %v1047_v12 }
0x16e5   : > { %v1062_v15 = vpop.xlane.xlu0 %1061  ;;  %1071 = vadd.xlane.f32.xlu1 %v1070_v13 }
0x16e6   : > { %v1063_v17 = vsel %vm1043_vm3, %v1062_v15, %v1037_v51  ;;  %vm1343_vm3 = vcmp.eq.s32.totalorder %v2544_v10, 49 }
0x16e7   : > { %v1086_v18 = vmul.f32 %v1066_v56, %v1063_v17 }
0x16e9   : > { %1087 = vadd.xlane.f32.xlu1 %v1086_v18 }
0x16f7   : > { %v1076_v21 = vpop.xlane.xlu0 %1075 }
0x16f8   : > { %v1077_v22 = vsel %vm1069_vm5, %v1076_v21, %v1051_v58 }
0x16f9   : > { %v1104_v23 = vmul.f32 %v1096_v20, %v1077_v22 }
0x16fb   : > { %1105 = vadd.xlane.f32.xlu0 %v1104_v23  ;;  %v1084_v24 = vpop.xlane.xlu0 %1083 }
0x16fc   : > { %v1085_v25 = vsel %vm1069_vm5, %v1084_v24, %v1059_v61 }
0x16fd   : > { %v1112_v26 = vmul.f32 %v1096_v20, %v1085_v25 }
0x16ff   : > { %1113 = vadd.xlane.f32.xlu0 %v1112_v26  ;;  %v1092_v27 = vpop.xlane.xlu0 %1091 }
0x1700   : > { %v1093_v28 = vsel %vm1069_vm5, %v1092_v27, %v332_v63 }
0x1701   : > { %v1120_v29 = vmul.f32 %v1096_v20, %v1093_v28 }
0x1703   : > { %1121 = vadd.xlane.f32.xlu0 %v1120_v29 }
0x176e   : > { %v1080_v30 = vpop.xlane.xlu1 %1079 }
0x176f   : > { %v1081_v31 = vsel %vm1069_vm5, %v1080_v30, %v1055_v5  ;;  %v1156_v5 = vxor.u32 2147483648, %v1155_v4  ;;  %v1185_v30 = vld [vmem:[#allocation2 + $0x2c] ss:$0 sm:$0xff] }
0x1770   : > { %v1108_v32 = vmul.f32 %v1096_v20, %v1081_v31 }
0x1772   : > { %1109 = vadd.xlane.f32.xlu1 %v1108_v32  ;;  %v1072_v33 = vpop.xlane.xlu1 %1071 }
0x1773   : > { %v1073_v34 = vsel %vm1069_vm5, %v1072_v33, %v1047_v12 }
0x1774   : > { %v1100_v35 = vmul.f32 %v1096_v20, %v1073_v34 }
0x1776   : > { %1101 = vadd.xlane.f32.xlu1 %v1100_v35  ;;  %v1088_v36 = vpop.xlane.xlu1 %1087 }
0x1777   : > { %v1089_v37 = vsel %vm1069_vm5, %v1088_v36, %v1063_v17  ;;  %vm1411_vm5 = vcmp.eq.s32.totalorder %v2544_v10, 51 }
0x1778   : > { %v1116_v39 = vmul.f32 %v1096_v20, %v1089_v37 }
0x177a   : > { %1117 = vadd.xlane.f32.xlu1 %v1116_v39 }
0x1788   : > { %v1106_v43 = vpop.xlane.xlu0 %1105 }
0x1789   : > { %v1107_v45 = vsel %vm1099_vm6, %v1106_v43, %v1077_v22 }
0x178a   : > { %v1134_v47 = vmul.f32 %v1126_v42, %v1107_v45 }
0x178c   : > { %1135 = vadd.xlane.f32.xlu0 %v1134_v47  ;;  %v1114_v48 = vpop.xlane.xlu0 %1113 }
0x178d   : > { %v1115_v49 = vsel %vm1099_vm6, %v1114_v48, %v1085_v25 }
0x178e   : > { %v1142_v50 = vmul.f32 %v1126_v42, %v1115_v49 }
0x1790   : > { %1143 = vadd.xlane.f32.xlu0 %v1142_v50  ;;  %v1122_v51 = vpop.xlane.xlu0 %1121 }
0x1791   : > { %v1123_v53 = vsel %vm1099_vm6, %v1122_v51, %v1093_v28 }
0x1792   : > { %v1150_v55 = vmul.f32 %v1126_v42, %v1123_v53 }
0x1794   : > { %1151 = vadd.xlane.f32.xlu0 %v1150_v55 }
0x17ff   : > { %v1110_v56 = vpop.xlane.xlu1 %1109 }
0x1800   : > { %v1111_v57 = vsel %vm1099_vm6, %v1110_v56, %v1081_v31  ;;  %v1186_v31 = vxor.u32 2147483648, %v1185_v30  ;;  %v1215_v56 = vld [vmem:[#allocation2 + $0x2d] ss:$0 sm:$0xff] }
0x1801   : > { %v1138_v58 = vmul.f32 %v1126_v42, %v1111_v57 }
0x1803   : > { %1139 = vadd.xlane.f32.xlu1 %v1138_v58  ;;  %v1102_v59 = vpop.xlane.xlu1 %1101 }
0x1804   : > { %v1103_v60 = vsel %vm1099_vm6, %v1102_v59, %v1073_v34 }
0x1805   : > { %v1130_v61 = vmul.f32 %v1126_v42, %v1103_v60 }
0x1807   : > { %1131 = vadd.xlane.f32.xlu1 %v1130_v61  ;;  %v1118_v63 = vpop.xlane.xlu1 %1117 }
0x1808   : > { %v1119_v0 = vsel %vm1099_vm6, %v1118_v63, %v1089_v37  ;;  %vm1445_vm6 = vcmp.eq.s32.totalorder %v2544_v10, 52 }
0x1809   : > { %v1146_v2 = vmul.f32 %v1126_v42, %v1119_v0 }
0x180b   : > { %1147 = vadd.xlane.f32.xlu1 %v1146_v2 }
0x1819   : > { %v1136_v6 = vpop.xlane.xlu0 %1135 }
0x181a   : > { %v1137_v8 = vsel %vm1129_vm7, %v1136_v6, %v1107_v45 }
0x181b   : > { %v1164_v12 = vmul.f32 %v1156_v5, %v1137_v8 }
0x181d   : > { %1165 = vadd.xlane.f32.xlu0 %v1164_v12  ;;  %v1144_v13 = vpop.xlane.xlu0 %1143 }
0x181e   : > { %v1145_v15 = vsel %vm1129_vm7, %v1144_v13, %v1115_v49 }
0x181f   : > { %v1172_v17 = vmul.f32 %v1156_v5, %v1145_v15 }
0x1821   : > { %1173 = vadd.xlane.f32.xlu0 %v1172_v17  ;;  %v1152_v18 = vpop.xlane.xlu0 %1151 }
0x1822   : > { %v1153_v19 = vsel %vm1129_vm7, %v1152_v18, %v1123_v53 }
0x1823   : > { %v1180_v20 = vmul.f32 %v1156_v5, %v1153_v19 }
0x1825   : > { %1181 = vadd.xlane.f32.xlu0 %v1180_v20 }
0x1890   : > { %v1140_v21 = vpop.xlane.xlu1 %1139 }
0x1891   : > { %v1141_v22 = vsel %vm1129_vm7, %v1140_v21, %v1111_v57  ;;  %v1216_v57 = vxor.u32 2147483648, %v1215_v56  ;;  %v1245_v21 = vld [vmem:[#allocation2 + $0x2e] ss:$0 sm:$0xff] }
0x1892   : > { %v1168_v23 = vmul.f32 %v1156_v5, %v1141_v22 }
0x1894   : > { %1169 = vadd.xlane.f32.xlu1 %v1168_v23  ;;  %v1132_v24 = vpop.xlane.xlu1 %1131 }
0x1895   : > { %v1133_v25 = vsel %vm1129_vm7, %v1132_v24, %v1103_v60 }
0x1896   : > { %v1160_v26 = vmul.f32 %v1156_v5, %v1133_v25 }
0x1898   : > { %1161 = vadd.xlane.f32.xlu1 %v1160_v26  ;;  %v1148_v27 = vpop.xlane.xlu1 %1147 }
0x1899   : > { %v1149_v28 = vsel %vm1129_vm7, %v1148_v27, %v1119_v0  ;;  %vm1479_vm7 = vcmp.eq.s32.totalorder %v2544_v10, 53 }
0x189a   : > { %v1176_v29 = vmul.f32 %v1156_v5, %v1149_v28 }
0x189c   : > { %1177 = vadd.xlane.f32.xlu1 %v1176_v29 }
0x18aa   : > { %v1166_v32 = vpop.xlane.xlu0 %1165 }
0x18ab   : > { %v1167_v33 = vsel %vm1159_vm8, %v1166_v32, %v1137_v8 }
0x18ac   : > { %v1194_v34 = vmul.f32 %v1186_v31, %v1167_v33 }
0x18ae   : > { %1195 = vadd.xlane.f32.xlu0 %v1194_v34  ;;  %v1174_v35 = vpop.xlane.xlu0 %1173 }
0x18af   : > { %v1175_v36 = vsel %vm1159_vm8, %v1174_v35, %v1145_v15 }
0x18b0   : > { %v1202_v37 = vmul.f32 %v1186_v31, %v1175_v36 }
0x18b2   : > { %1203 = vadd.xlane.f32.xlu0 %v1202_v37  ;;  %v1182_v39 = vpop.xlane.xlu0 %1181 }
0x18b3   : > { %v1183_v41 = vsel %vm1159_vm8, %v1182_v39, %v1153_v19  ;;  %v2858_v39 = vadd.s32 48, %v2546_v11 }
0x18b4   : > { %v1210_v42 = vmul.f32 %v1186_v31, %v1183_v41 }
0x18b5   : > { %vm244_vm11 = vcmp.eq.s32.totalorder %v2858_v39, %v2544_v10  ;;  %vm249_vm13 = vcmp.ge.s32.totalorder %v2858_v39, %v2544_v10  ;;  %vm338_vm0 = vcmp.eq.s32.totalorder %v2544_v10, %v2858_v39 }
0x18b6   : > { %1211 = vadd.xlane.f32.xlu0 %v1210_v42  ;;  %vm250_vm14 = vmand %vm249_vm13, %vm144_vm1 }
0x1921   : > { %v1170_v43 = vpop.xlane.xlu1 %1169 }
0x1922   : > { %v1171_v45 = vsel %vm1159_vm8, %v1170_v43, %v1141_v22  ;;  %v1246_v22 = vxor.u32 2147483648, %v1245_v21 }
0x1923   : > { %v1198_v47 = vmul.f32 %v1186_v31, %v1171_v45 }
0x1925   : > { %1199 = vadd.xlane.f32.xlu1 %v1198_v47  ;;  %v1162_v48 = vpop.xlane.xlu1 %1161 }
0x1926   : > { %v1163_v49 = vsel %vm1159_vm8, %v1162_v48, %v1133_v25  ;;  %v1275_v48 = vld [vmem:[#allocation2 + $0x2f] ss:$0 sm:$0xff] }
0x1927   : > { %v1190_v50 = vmul.f32 %v1186_v31, %v1163_v49 }
0x1929   : > { %1191 = vadd.xlane.f32.xlu1 %v1190_v50  ;;  %v1178_v51 = vpop.xlane.xlu1 %1177 }
0x192a   : > { %v1179_v53 = vsel %vm1159_vm8, %v1178_v51, %v1149_v28 }
0x192b   : > { %v1206_v55 = vmul.f32 %v1186_v31, %v1179_v53 }
0x192d   : > { %1207 = vadd.xlane.f32.xlu1 %v1206_v55 }
0x193b   : > { %v1196_v58 = vpop.xlane.xlu0 %1195 }
0x193c   : > { %v1197_v59 = vsel %vm1189_vm9, %v1196_v58, %v1167_v33 }
0x193d   : > { %v1224_v60 = vmul.f32 %v1216_v57, %v1197_v59 }
0x193f   : > { %1225 = vadd.xlane.f32.xlu0 %v1224_v60  ;;  %v1204_v61 = vpop.xlane.xlu0 %1203 }
0x1940   : > { %v1205_v63 = vsel %vm1189_vm9, %v1204_v61, %v1175_v36 }
0x1941   : > { %v1232_v0 = vmul.f32 %v1216_v57, %v1205_v63 }
0x1943   : > { %1233 = vadd.xlane.f32.xlu0 %v1232_v0  ;;  %v1212_v2 = vpop.xlane.xlu0 %1211 }
0x1944   : > { %v1213_v4 = vsel %vm1189_vm9, %v1212_v2, %v1183_v41 }
0x1945   : > { %v1240_v5 = vmul.f32 %v1216_v57, %v1213_v4 }
0x1947   : > { %1241 = vadd.xlane.f32.xlu0 %v1240_v5 }
0x19b2   : > { %v1200_v6 = vpop.xlane.xlu1 %1199 }
0x19b3   : > { %v1201_v8 = vsel %vm1189_vm9, %v1200_v6, %v1171_v45  ;;  %v2417_v45 = vld [vmem:[%s2550_s20 + $0x30] sm:$0xff] }
0x19b4   : > { %v1228_v12 = vmul.f32 %v1216_v57, %v1201_v8  ;;  %v246_v47 = vsel %vm244_vm11, %v2417_v45, 0.0 }
0x19b6   : > { %1229 = vadd.xlane.f32.xlu1 %v1228_v12  ;;  %v1192_v13 = vpop.xlane.xlu1 %1191 }
0x19b7   : > { %v1193_v15 = vsel %vm1189_vm9, %v1192_v13, %v1163_v49  ;;  %v1276_v49 = vxor.u32 2147483648, %v1275_v48 }
0x19b8   : > { %v1220_v17 = vmul.f32 %v1216_v57, %v1193_v15 }
0x19ba   : > { %1221 = vadd.xlane.f32.xlu1 %v1220_v17  ;;  %v1208_v18 = vpop.xlane.xlu1 %1207 }
0x19bb   : > { %v1209_v19 = vsel %vm1189_vm9, %v1208_v18, %v1179_v53  ;;  %vm1513_vm9 = vcmp.eq.s32.totalorder %v2544_v10, 54 }
0x19bc   : > { %v1236_v20 = vmul.f32 %v1216_v57, %v1209_v19 }
0x19be   : > { %1237 = vadd.xlane.f32.xlu1 %v1236_v20 }
0x19cc   : > { %v1226_v23 = vpop.xlane.xlu0 %1225 }
0x19cd   : > { %v1227_v24 = vsel %vm1219_vm10, %v1226_v23, %v1197_v59 }
0x19ce   : > { %v1254_v25 = vmul.f32 %v1246_v22, %v1227_v24 }
0x19d0   : > { %1255 = vadd.xlane.f32.xlu0 %v1254_v25  ;;  %v1234_v26 = vpop.xlane.xlu0 %1233 }
0x19d1   : > { %v1235_v27 = vsel %vm1219_vm10, %v1234_v26, %v1205_v63 }
0x19d2   : > { %v1262_v28 = vmul.f32 %v1246_v22, %v1235_v27 }
0x19d4   : > { %1263 = vadd.xlane.f32.xlu0 %v1262_v28  ;;  %v1242_v29 = vpop.xlane.xlu0 %1241 }
0x19d5   : > { %v1243_v30 = vsel %vm1219_vm10, %v1242_v29, %v1213_v4 }
0x19d6   : > { %v1270_v31 = vmul.f32 %v1246_v22, %v1243_v30 }
0x19d8   : > { %1271 = vadd.xlane.f32.xlu0 %v1270_v31 }
0x1a43   : > { %v1230_v32 = vpop.xlane.xlu1 %1229 }
0x1a44   : > { %v1231_v33 = vsel %vm1219_vm10, %v1230_v32, %v1201_v8 }
0x1a45   : > { %v1258_v34 = vmul.f32 %v1246_v22, %v1231_v33 }
0x1a47   : > { %1259 = vadd.xlane.f32.xlu1 %v1258_v34  ;;  %v1222_v35 = vpop.xlane.xlu1 %1221 }
0x1a48   : > { %v1223_v36 = vsel %vm1219_vm10, %v1222_v35, %v1193_v15  ;;  %v251_v15 = vsel %vm250_vm14, %v2417_v45, 0.0  ;;  %vm1581_vm14 = vcmp.eq.s32.totalorder %v2544_v10, 56 }
0x1a49   : > { %v1250_v37 = vmul.f32 %v1246_v22, %v1223_v36 }
0x1a4b   : > { %1251 = vadd.xlane.f32.xlu1 %v1250_v37  ;;  %v1238_v41 = vpop.xlane.xlu1 %1237 }
0x1a4c   : > { %v1239_v42 = vsel %vm1219_vm10, %v1238_v41, %v1209_v19 }
0x1a4d   : > { %v1266_v43 = vmul.f32 %v1246_v22, %v1239_v42 }
0x1a4f   : > { %1267 = vadd.xlane.f32.xlu1 %v1266_v43 }
0x1a53   : > { %247 = vadd.xlane.f32.xlu1 %v246_v47 }
0x1a5d   : > { %v1256_v50 = vpop.xlane.xlu0 %1255 }
0x1a5e   : > { %v1257_v51 = vsel %vm1249_vm12, %v1256_v50, %v1227_v24 }
0x1a5f   : > { %v1284_v53 = vmul.f32 %v1276_v49, %v1257_v51 }
0x1a61   : > { %v1264_v55 = vpop.xlane.xlu0 %1263  ;;  %1285 = vadd.xlane.f32.xlu1 %v1284_v53 }
0x1a62   : > { %v1265_v56 = vsel %vm1249_vm12, %v1264_v55, %v1235_v27 }
0x1a63   : > { %v1292_v57 = vmul.f32 %v1276_v49, %v1265_v56 }
0x1a65   : > { %v1272_v58 = vpop.xlane.xlu0 %1271  ;;  %1293 = vadd.xlane.f32.xlu1 %v1292_v57 }
0x1a66   : > { %v1273_v59 = vsel %vm1249_vm12, %v1272_v58, %v1243_v30 }
0x1a67   : > { %v1300_v60 = vmul.f32 %v1276_v49, %v1273_v59 }
0x1a69   : > { %1301 = vadd.xlane.f32.xlu1 %v1300_v60 }
0x1ad4   : > { %v1260_v61 = vpop.xlane.xlu1 %1259 }
0x1ad5   : > { %v1261_v63 = vsel %vm1249_vm12, %v1260_v61, %v1231_v33 }
0x1ad6   : > { %v1288_v0 = vmul.f32 %v1276_v49, %v1261_v63 }
0x1ad8   : > { %1289 = vadd.xlane.f32.xlu0 %v1288_v0  ;;  %v1252_v2 = vpop.xlane.xlu1 %1251 }
0x1ad9   : > { %v1253_v4 = vsel %vm1249_vm12, %v1252_v2, %v1223_v36 }
0x1ada   : > { %v1280_v5 = vmul.f32 %v1276_v49, %v1253_v4 }
0x1adc   : > { %1281 = vadd.xlane.f32.xlu0 %v1280_v5  ;;  %v1268_v6 = vpop.xlane.xlu1 %1267 }
0x1add   : > { %v1269_v8 = vsel %vm1249_vm12, %v1268_v6, %v1239_v42  ;;  %v339_v42 = vsel %vm338_vm0, -1.0, %v2504_v62  ;;  %vm1547_vm12 = vcmp.eq.s32.totalorder %v2544_v10, 55  ;;  %vm1657_vm0 = vcmp.eq.s32.totalorder %v2544_v10, 58 }
0x1ade   : > { %v1296_v12 = vmul.f32 %v1276_v49, %v1269_v8 }
0x1ae0   : > { %1297 = vadd.xlane.f32.xlu0 %v1296_v12  ;;  %v2878_v13 = vpop.xlane.xlu1 %247 }
0x1ae1   : > { %2473 = vrcp.f32 %v2878_v13 }
0x1aeb   : > { %v2885_v17 = vpop.eup %2473 }
0x1aec   : > { %v253_v18 = vmul.f32 %v2885_v17, %v251_v15 }
0x1aee   : > { %254 = vst [vmem:[#allocation2 + $0x30] sm:$0xff] %v253_v18  ;;  %v1286_v19 = vpop.xlane.xlu1 %1285 }
0x1aef   : > { %v1287_v23 = vsel %vm1279_vm15, %v1286_v19, %v1257_v51 }
0x1af2   : > { %v1294_v20 = vpop.xlane.xlu1 %1293 }
0x1af3   : > { %v1295_v26 = vsel %vm1279_vm15, %v1294_v20, %v1265_v56 }
0x1af5   : > { %v1305_v21 = vld [vmem:[#allocation2 + $0x30] ss:$0 sm:$0xff]  ;;  %v1339_v45 = vld [vmem:[#allocation2 + $0x31] ss:$0 sm:$0xff]  ;;  %v1373_v15 = vld [vmem:[#allocation2 + $0x32] ss:$0 sm:$0xff] }
0x1af6   : > { %v1306_v22 = vxor.u32 2147483648, %v1305_v21  ;;  %v1302_v25 = vpop.xlane.xlu1 %1301  ;;  %v1340_v47 = vxor.u32 2147483648, %v1339_v45  ;;  %v1374_v18 = vxor.u32 2147483648, %v1373_v15 }
0x1af7   : > { %v1303_v28 = vsel %vm1279_vm15, %v1302_v25, %v1273_v59 }
0x1af8   : > { %v1314_v24 = vmul.f32 %v1306_v22, %v1287_v23  ;;  %v1322_v27 = vmul.f32 %v1306_v22, %v1295_v26  ;;  %v1330_v29 = vmul.f32 %v1306_v22, %v1303_v28  ;;  %v1334_v43 = vmul.f32 %v1306_v22, %v339_v42 }
0x1afa   : > { %1315 = vadd.xlane.f32.xlu1 %v1314_v24 }
0x1afe   : > { %1323 = vadd.xlane.f32.xlu1 %v1322_v27 }
0x1b02   : > { %1331 = vadd.xlane.f32.xlu1 %v1330_v29 }
0x1b65   : > { %v1290_v30 = vpop.xlane.xlu0 %1289 }
0x1b66   : > { %v1291_v31 = vsel %vm1279_vm15, %v1290_v30, %v1261_v63 }
0x1b67   : > { %v1318_v32 = vmul.f32 %v1306_v22, %v1291_v31 }
0x1b69   : > { %v1282_v33 = vpop.xlane.xlu0 %1281  ;;  %1319 = vadd.xlane.f32.xlu0 %v1318_v32 }
0x1b6a   : > { %v1283_v37 = vsel %vm1279_vm15, %v1282_v33, %v1253_v4 }
0x1b6b   : > { %v1310_v41 = vmul.f32 %v1306_v22, %v1283_v37 }
0x1b6d   : > { %v1298_v34 = vpop.xlane.xlu0 %1297 }
0x1b6e   : > { %v1299_v35 = vsel %vm1279_vm15, %v1298_v34, %v1269_v8  ;;  %vm1619_vm15 = vcmp.eq.s32.totalorder %v2544_v10, 57 }
0x1b6f   : > { %v1326_v36 = vmul.f32 %v1306_v22, %v1299_v35 }
0x1b71   : > { %1327 = vadd.xlane.f32.xlu0 %v1326_v36 }
0x1b75   : > { %1311 = vadd.xlane.f32.xlu0 %v1310_v41 }
0x1b79   : > { %1335 = vadd.xlane.f32.xlu0 %v1334_v43  ;;  %v1407_v43 = vld [vmem:[#allocation2 + $0x33] ss:$0 sm:$0xff] }
0x1b7a   : > { %v1408_v45 = vxor.u32 2147483648, %v1407_v43 }
0x1b87   : > { %v1316_v48 = vpop.xlane.xlu1 %1315 }
0x1b88   : > { %v1317_v49 = vsel %vm1309_vm2, %v1316_v48, %v1287_v23 }
0x1b89   : > { %v1348_v50 = vmul.f32 %v1340_v47, %v1317_v49 }
0x1b8b   : > { %1349 = vadd.xlane.f32.xlu0 %v1348_v50  ;;  %v1324_v51 = vpop.xlane.xlu1 %1323 }
0x1b8c   : > { %v1325_v39 = vsel %vm1309_vm2, %v1324_v51, %v1295_v26 }
0x1b8d   : > { %v1356_v53 = vmul.f32 %v1340_v47, %v1325_v39 }
0x1b8f   : > { %1357 = vadd.xlane.f32.xlu0 %v1356_v53  ;;  %v1332_v55 = vpop.xlane.xlu1 %1331 }
0x1b90   : > { %v1333_v56 = vsel %vm1309_vm2, %v1332_v55, %v1303_v28 }
0x1b91   : > { %v1364_v57 = vmul.f32 %v1340_v47, %v1333_v56 }
0x1b93   : > { %1365 = vadd.xlane.f32.xlu0 %v1364_v57 }
0x1bf6   : > { %v1320_v58 = vpop.xlane.xlu0 %1319 }
0x1bf7   : > { %v1321_v59 = vsel %vm1309_vm2, %v1320_v58, %v1291_v31 }
0x1bf8   : > { %v1352_v60 = vmul.f32 %v1340_v47, %v1321_v59 }
0x1bfa   : > { %1353 = vadd.xlane.f32.xlu1 %v1352_v60 }
0x1bfe   : > { %v1328_v61 = vpop.xlane.xlu0 %1327 }
0x1bff   : > { %v1329_v63 = vsel %vm1309_vm2, %v1328_v61, %v1299_v35 }
0x1c00   : > { %v1360_v0 = vmul.f32 %v1340_v47, %v1329_v63 }
0x1c02   : > { %v1312_v2 = vpop.xlane.xlu0 %1311  ;;  %1361 = vadd.xlane.f32.xlu1 %v1360_v0 }
0x1c03   : > { %v1313_v4 = vsel %vm1309_vm2, %v1312_v2, %v1283_v37 }
0x1c04   : > { %v1344_v5 = vmul.f32 %v1340_v47, %v1313_v4 }
0x1c06   : > { %v1336_v6 = vpop.xlane.xlu0 %1335  ;;  %1345 = vadd.xlane.f32.xlu1 %v1344_v5 }
0x1c07   : > { %v1337_v8 = vsel %vm1309_vm2, %v1336_v6, %v339_v42  ;;  %vm1695_vm2 = vcmp.eq.s32.totalorder %v2544_v10, 59 }
0x1c08   : > { %v1368_v12 = vmul.f32 %v1340_v47, %v1337_v8 }
0x1c0a   : > { %1369 = vadd.xlane.f32.xlu1 %v1368_v12  ;;  %v1441_v12 = vld [vmem:[#allocation2 + $0x34] ss:$0 sm:$0xff] }
0x1c0b   : > { %v1442_v15 = vxor.u32 2147483648, %v1441_v12 }
0x1c18   : > { %v1350_v19 = vpop.xlane.xlu0 %1349 }
0x1c19   : > { %v1351_v20 = vsel %vm1343_vm3, %v1350_v19, %v1317_v49 }
0x1c1a   : > { %v1382_v21 = vmul.f32 %v1374_v18, %v1351_v20 }
0x1c1c   : > { %1383 = vadd.xlane.f32.xlu1 %v1382_v21  ;;  %v1358_v22 = vpop.xlane.xlu0 %1357 }
0x1c1d   : > { %v1359_v23 = vsel %vm1343_vm3, %v1358_v22, %v1325_v39 }
0x1c1e   : > { %v1390_v24 = vmul.f32 %v1374_v18, %v1359_v23 }
0x1c20   : > { %1391 = vadd.xlane.f32.xlu1 %v1390_v24  ;;  %v1366_v25 = vpop.xlane.xlu0 %1365 }
0x1c21   : > { %v1367_v26 = vsel %vm1343_vm3, %v1366_v25, %v1333_v56 }
0x1c22   : > { %v1398_v27 = vmul.f32 %v1374_v18, %v1367_v26 }
0x1c24   : > { %1399 = vadd.xlane.f32.xlu1 %v1398_v27 }
0x1c87   : > { %v1354_v28 = vpop.xlane.xlu1 %1353 }
0x1c88   : > { %v1355_v29 = vsel %vm1343_vm3, %v1354_v28, %v1321_v59 }
0x1c89   : > { %v1386_v30 = vmul.f32 %v1374_v18, %v1355_v29 }
0x1c8b   : > { %1387 = vadd.xlane.f32.xlu0 %v1386_v30 }
0x1c8f   : > { %v1362_v31 = vpop.xlane.xlu1 %1361 }
0x1c90   : > { %v1363_v32 = vsel %vm1343_vm3, %v1362_v31, %v1329_v63 }
0x1c91   : > { %v1394_v33 = vmul.f32 %v1374_v18, %v1363_v32 }
0x1c93   : > { %1395 = vadd.xlane.f32.xlu0 %v1394_v33  ;;  %v1346_v34 = vpop.xlane.xlu1 %1345 }
0x1c94   : > { %v1347_v35 = vsel %vm1343_vm3, %v1346_v34, %v1313_v4 }
0x1c95   : > { %v1378_v36 = vmul.f32 %v1374_v18, %v1347_v35 }
0x1c97   : > { %1379 = vadd.xlane.f32.xlu0 %v1378_v36  ;;  %v1370_v37 = vpop.xlane.xlu1 %1369 }
0x1c98   : > { %v1371_v41 = vsel %vm1343_vm3, %v1370_v37, %v1337_v8  ;;  %vm1733_vm3 = vcmp.eq.s32.totalorder %v2544_v10, 60 }
0x1c99   : > { %v1402_v42 = vmul.f32 %v1374_v18, %v1371_v41 }
0x1c9b   : > { %1403 = vadd.xlane.f32.xlu0 %v1402_v42  ;;  %v1475_v42 = vld [vmem:[#allocation2 + $0x35] ss:$0 sm:$0xff] }
0x1c9c   : > { %v1476_v43 = vxor.u32 2147483648, %v1475_v42 }
0x1ca9   : > { %v1384_v47 = vpop.xlane.xlu1 %1383 }
0x1caa   : > { %v1385_v48 = vsel %vm1377_vm4, %v1384_v47, %v1351_v20 }
0x1cab   : > { %v1416_v49 = vmul.f32 %v1408_v45, %v1385_v48 }
0x1cad   : > { %1417 = vadd.xlane.f32.xlu0 %v1416_v49  ;;  %v1392_v50 = vpop.xlane.xlu1 %1391 }
0x1cae   : > { %v1393_v51 = vsel %vm1377_vm4, %v1392_v50, %v1359_v23 }
0x1caf   : > { %v1424_v39 = vmul.f32 %v1408_v45, %v1393_v51 }
0x1cb1   : > { %1425 = vadd.xlane.f32.xlu0 %v1424_v39  ;;  %v1400_v53 = vpop.xlane.xlu1 %1399 }
0x1cb2   : > { %v1401_v55 = vsel %vm1377_vm4, %v1400_v53, %v1367_v26 }
0x1cb3   : > { %v1432_v56 = vmul.f32 %v1408_v45, %v1401_v55 }
0x1cb5   : > { %1433 = vadd.xlane.f32.xlu0 %v1432_v56 }
0x1d18   : > { %v1388_v57 = vpop.xlane.xlu0 %1387 }
0x1d19   : > { %v1389_v58 = vsel %vm1377_vm4, %v1388_v57, %v1355_v29 }
0x1d1a   : > { %v1420_v59 = vmul.f32 %v1408_v45, %v1389_v58 }
0x1d1c   : > { %1421 = vadd.xlane.f32.xlu1 %v1420_v59 }
0x1d20   : > { %v1396_v60 = vpop.xlane.xlu0 %1395 }
0x1d21   : > { %v1397_v61 = vsel %vm1377_vm4, %v1396_v60, %v1363_v32 }
0x1d22   : > { %v1428_v63 = vmul.f32 %v1408_v45, %v1397_v61 }
0x1d24   : > { %1429 = vadd.xlane.f32.xlu1 %v1428_v63  ;;  %v1380_v0 = vpop.xlane.xlu0 %1379 }
0x1d25   : > { %v1381_v2 = vsel %vm1377_vm4, %v1380_v0, %v1347_v35 }
0x1d26   : > { %v1412_v4 = vmul.f32 %v1408_v45, %v1381_v2 }
0x1d28   : > { %1413 = vadd.xlane.f32.xlu1 %v1412_v4  ;;  %v1404_v5 = vpop.xlane.xlu0 %1403 }
0x1d29   : > { %v1405_v6 = vsel %vm1377_vm4, %v1404_v5, %v1371_v41  ;;  %vm1771_vm4 = vcmp.eq.s32.totalorder %v2544_v10, 61 }
0x1d2a   : > { %v1436_v8 = vmul.f32 %v1408_v45, %v1405_v6 }
0x1d2c   : > { %1437 = vadd.xlane.f32.xlu1 %v1436_v8  ;;  %v1509_v8 = vld [vmem:[#allocation2 + $0x36] ss:$0 sm:$0xff] }
0x1d2d   : > { %v1510_v12 = vxor.u32 2147483648, %v1509_v8 }
0x1d3a   : > { %v1418_v18 = vpop.xlane.xlu0 %1417 }
0x1d3b   : > { %v1419_v19 = vsel %vm1411_vm5, %v1418_v18, %v1385_v48 }
0x1d3c   : > { %v1450_v20 = vmul.f32 %v1442_v15, %v1419_v19 }
0x1d3e   : > { %1451 = vadd.xlane.f32.xlu1 %v1450_v20  ;;  %v1426_v21 = vpop.xlane.xlu0 %1425 }
0x1d3f   : > { %v1427_v22 = vsel %vm1411_vm5, %v1426_v21, %v1393_v51 }
0x1d40   : > { %v1458_v23 = vmul.f32 %v1442_v15, %v1427_v22 }
0x1d42   : > { %1459 = vadd.xlane.f32.xlu1 %v1458_v23  ;;  %v1434_v24 = vpop.xlane.xlu0 %1433  ;;  %v2985_v23 = vadd.s32 56, %v2546_v11 }
0x1d43   : > { %v1435_v25 = vsel %vm1411_vm5, %v1434_v24, %v1401_v55 }
0x1d44   : > { %v1466_v26 = vmul.f32 %v1442_v15, %v1435_v25  ;;  %vm260_vm8 = vcmp.eq.s32.totalorder %v2985_v23, %v2544_v10  ;;  %vm265_vm10 = vcmp.ge.s32.totalorder %v2985_v23, %v2544_v10  ;;  %vm345_vm13 = vcmp.eq.s32.totalorder %v2544_v10, %v2985_v23 }
0x1d45   : > { %vm266_vm11 = vmand %vm265_vm10, %vm144_vm1  ;;  %vm1885_vm10 = vcmp.eq.s32.totalorder %v2544_v10, 64 }
0x1d46   : > { %1467 = vadd.xlane.f32.xlu1 %v1466_v26 }
0x1da9   : > { %v1422_v27 = vpop.xlane.xlu1 %1421 }
0x1daa   : > { %v1423_v28 = vsel %vm1411_vm5, %v1422_v27, %v1389_v58  ;;  %v2418_v27 = vld [vmem:[%s2550_s20 + $0x38] sm:$0xff] }
0x1dab   : > { %v1454_v29 = vmul.f32 %v1442_v15, %v1423_v28 }
0x1dad   : > { %1455 = vadd.xlane.f32.xlu0 %v1454_v29 }
0x1db1   : > { %v1430_v30 = vpop.xlane.xlu1 %1429 }
0x1db2   : > { %v1431_v31 = vsel %vm1411_vm5, %v1430_v30, %v1397_v61 }
0x1db3   : > { %v1462_v32 = vmul.f32 %v1442_v15, %v1431_v31 }
0x1db5   : > { %1463 = vadd.xlane.f32.xlu0 %v1462_v32  ;;  %v1414_v33 = vpop.xlane.xlu1 %1413 }
0x1db6   : > { %v1415_v34 = vsel %vm1411_vm5, %v1414_v33, %v1381_v2 }
0x1db7   : > { %v1446_v35 = vmul.f32 %v1442_v15, %v1415_v34 }
0x1db9   : > { %1447 = vadd.xlane.f32.xlu0 %v1446_v35  ;;  %v1438_v36 = vpop.xlane.xlu1 %1437 }
0x1dba   : > { %v1439_v37 = vsel %vm1411_vm5, %v1438_v36, %v1405_v6 }
0x1dbb   : > { %v1470_v41 = vmul.f32 %v1442_v15, %v1439_v37 }
0x1dbd   : > { %1471 = vadd.xlane.f32.xlu0 %v1470_v41 }
0x1dcb   : > { %v1452_v45 = vpop.xlane.xlu1 %1451 }
0x1dcc   : > { %v1453_v47 = vsel %vm1445_vm6, %v1452_v45, %v1419_v19  ;;  %v1543_v45 = vld [vmem:[#allocation2 + $0x37] ss:$0 sm:$0xff] }
0x1dcd   : > { %v1484_v48 = vmul.f32 %v1476_v43, %v1453_v47 }
0x1dcf   : > { %1485 = vadd.xlane.f32.xlu0 %v1484_v48  ;;  %v1460_v49 = vpop.xlane.xlu1 %1459 }
0x1dd0   : > { %v1461_v50 = vsel %vm1445_vm6, %v1460_v49, %v1427_v22 }
0x1dd1   : > { %v1492_v51 = vmul.f32 %v1476_v43, %v1461_v50 }
0x1dd3   : > { %1493 = vadd.xlane.f32.xlu0 %v1492_v51  ;;  %v1468_v39 = vpop.xlane.xlu1 %1467 }
0x1dd4   : > { %v1469_v53 = vsel %vm1445_vm6, %v1468_v39, %v1435_v25 }
0x1dd5   : > { %v1500_v55 = vmul.f32 %v1476_v43, %v1469_v53 }
0x1dd7   : > { %1501 = vadd.xlane.f32.xlu0 %v1500_v55 }
0x1e3a   : > { %v1456_v56 = vpop.xlane.xlu0 %1455 }
0x1e3b   : > { %v1457_v57 = vsel %vm1445_vm6, %v1456_v56, %v1423_v28  ;;  %v262_v28 = vsel %vm260_vm8, %v2418_v27, 0.0 }
0x1e3c   : > { %v1488_v58 = vmul.f32 %v1476_v43, %v1457_v57 }
0x1e3e   : > { %1489 = vadd.xlane.f32.xlu1 %v1488_v58 }
0x1e42   : > { %v1464_v59 = vpop.xlane.xlu0 %1463 }
0x1e43   : > { %v1465_v60 = vsel %vm1445_vm6, %v1464_v59, %v1431_v31  ;;  %v267_v59 = vsel %vm266_vm11, %v2418_v27, 0.0  ;;  %vm1927_vm11 = vcmp.eq.s32.totalorder %v2544_v10, 65 }
0x1e44   : > { %v1496_v61 = vmul.f32 %v1476_v43, %v1465_v60 }
0x1e46   : > { %1497 = vadd.xlane.f32.xlu1 %v1496_v61  ;;  %v1448_v63 = vpop.xlane.xlu0 %1447 }
0x1e47   : > { %v1449_v0 = vsel %vm1445_vm6, %v1448_v63, %v1415_v34 }
0x1e48   : > { %v1480_v2 = vmul.f32 %v1476_v43, %v1449_v0 }
0x1e4a   : > { %1481 = vadd.xlane.f32.xlu1 %v1480_v2  ;;  %v1472_v4 = vpop.xlane.xlu0 %1471 }
0x1e4b   : > { %v1473_v5 = vsel %vm1445_vm6, %v1472_v4, %v1439_v37  ;;  %vm1809_vm6 = vcmp.eq.s32.totalorder %v2544_v10, 62 }
0x1e4c   : > { %v1504_v6 = vmul.f32 %v1476_v43, %v1473_v5 }
0x1e4e   : > { %1505 = vadd.xlane.f32.xlu1 %v1504_v6 }
0x1e5c   : > { %v1486_v15 = vpop.xlane.xlu0 %1485 }
0x1e5d   : > { %v1487_v18 = vsel %vm1479_vm7, %v1486_v15, %v1453_v47  ;;  %v1544_v47 = vxor.u32 2147483648, %v1543_v45 }
0x1e5e   : > { %v1518_v19 = vmul.f32 %v1510_v12, %v1487_v18 }
0x1e60   : > { %1519 = vadd.xlane.f32.xlu1 %v1518_v19  ;;  %v1494_v20 = vpop.xlane.xlu0 %1493 }
0x1e61   : > { %v1495_v21 = vsel %vm1479_vm7, %v1494_v20, %v1461_v50 }
0x1e62   : > { %v1526_v22 = vmul.f32 %v1510_v12, %v1495_v21 }
0x1e64   : > { %1527 = vadd.xlane.f32.xlu1 %v1526_v22  ;;  %v1502_v24 = vpop.xlane.xlu0 %1501 }
0x1e65   : > { %v1503_v25 = vsel %vm1479_vm7, %v1502_v24, %v1469_v53 }
0x1e66   : > { %v1534_v26 = vmul.f32 %v1510_v12, %v1503_v25 }
0x1e68   : > { %1535 = vadd.xlane.f32.xlu1 %v1534_v26 }
0x1e6c   : > { %263 = vadd.xlane.f32.xlu1 %v262_v28 }
0x1ecb   : > { %v1490_v29 = vpop.xlane.xlu1 %1489 }
0x1ecc   : > { %v1491_v30 = vsel %vm1479_vm7, %v1490_v29, %v1457_v57 }
0x1ecd   : > { %v1522_v31 = vmul.f32 %v1510_v12, %v1491_v30 }
0x1ecf   : > { %1523 = vadd.xlane.f32.xlu0 %v1522_v31 }
0x1ed3   : > { %v1498_v32 = vpop.xlane.xlu1 %1497 }
0x1ed4   : > { %v1499_v33 = vsel %vm1479_vm7, %v1498_v32, %v1465_v60  ;;  %v346_v32 = vsel %vm345_vm13, -1.0, %v2504_v62  ;;  %vm2011_vm13 = vcmp.eq.s32.totalorder %v2544_v10, 67 }
0x1ed5   : > { %v1530_v34 = vmul.f32 %v1510_v12, %v1499_v33 }
0x1ed7   : > { %1531 = vadd.xlane.f32.xlu0 %v1530_v34  ;;  %v1482_v35 = vpop.xlane.xlu1 %1481 }
0x1ed8   : > { %v1483_v36 = vsel %vm1479_vm7, %v1482_v35, %v1449_v0 }
0x1ed9   : > { %v1514_v37 = vmul.f32 %v1510_v12, %v1483_v36 }
0x1edb   : > { %1515 = vadd.xlane.f32.xlu0 %v1514_v37  ;;  %v1506_v41 = vpop.xlane.xlu1 %1505 }
0x1edc   : > { %v1507_v42 = vsel %vm1479_vm7, %v1506_v41, %v1473_v5 }
0x1edd   : > { %v1538_v43 = vmul.f32 %v1510_v12, %v1507_v42 }
0x1edf   : > { %1539 = vadd.xlane.f32.xlu0 %v1538_v43 }
0x1eed   : > { %v1520_v48 = vpop.xlane.xlu1 %1519 }
0x1eee   : > { %v1521_v49 = vsel %vm1513_vm9, %v1520_v48, %v1487_v18 }
0x1eef   : > { %v1552_v50 = vmul.f32 %v1544_v47, %v1521_v49 }
0x1ef1   : > { %1553 = vadd.xlane.f32.xlu1 %v1552_v50  ;;  %v1528_v51 = vpop.xlane.xlu1 %1527 }
0x1ef2   : > { %v1529_v39 = vsel %vm1513_vm9, %v1528_v51, %v1495_v21 }
0x1ef3   : > { %v1560_v53 = vmul.f32 %v1544_v47, %v1529_v39 }
0x1ef5   : > { %1561 = vadd.xlane.f32.xlu1 %v1560_v53  ;;  %v1536_v55 = vpop.xlane.xlu1 %1535 }
0x1ef6   : > { %v1537_v56 = vsel %vm1513_vm9, %v1536_v55, %v1503_v25 }
0x1ef7   : > { %v1568_v57 = vmul.f32 %v1544_v47, %v1537_v56 }
0x1ef9   : > { %1569 = vadd.xlane.f32.xlu1 %v1568_v57  ;;  %v3007_v58 = vpop.xlane.xlu1 %263 }
0x1efa   : > { %2475 = vrcp.f32 %v3007_v58 }
0x1f04   : > { %v3014_v60 = vpop.eup %2475 }
0x1f05   : > { %v269_v61 = vmul.f32 %v3014_v60, %v267_v59 }
0x1f07   : > { %270 = vst [vmem:[#allocation2 + $0x38] sm:$0xff] %v269_v61 }
0x1f0e   : > { %v1577_v21 = vld [vmem:[#allocation2 + $0x38] ss:$0 sm:$0xff]  ;;  %v1615_v51 = vld [vmem:[#allocation2 + $0x39] ss:$0 sm:$0xff] }
0x1f0f   : > { %v1578_v22 = vxor.u32 2147483648, %v1577_v21 }
0x1f11   : > { %v1610_v34 = vmul.f32 %v1578_v22, %v346_v32 }
0x1f5c   : > { %v1524_v63 = vpop.xlane.xlu0 %1523 }
0x1f5d   : > { %v1525_v0 = vsel %vm1513_vm9, %v1524_v63, %v1491_v30 }
0x1f5e   : > { %v1556_v2 = vmul.f32 %v1544_v47, %v1525_v0 }
0x1f60   : > { %1557 = vadd.xlane.f32.xlu0 %v1556_v2 }
0x1f64   : > { %v1532_v4 = vpop.xlane.xlu0 %1531 }
0x1f65   : > { %v1533_v5 = vsel %vm1513_vm9, %v1532_v4, %v1499_v33 }
0x1f66   : > { %v1564_v6 = vmul.f32 %v1544_v47, %v1533_v5 }
0x1f68   : > { %v1516_v8 = vpop.xlane.xlu0 %1515  ;;  %1565 = vadd.xlane.f32.xlu0 %v1564_v6 }
0x1f69   : > { %v1517_v12 = vsel %vm1513_vm9, %v1516_v8, %v1483_v36 }
0x1f6a   : > { %v1548_v15 = vmul.f32 %v1544_v47, %v1517_v12 }
0x1f6c   : > { %1549 = vadd.xlane.f32.xlu0 %v1548_v15  ;;  %v1540_v18 = vpop.xlane.xlu0 %1539 }
0x1f6d   : > { %v1541_v19 = vsel %vm1513_vm9, %v1540_v18, %v1507_v42  ;;  %vm1847_vm9 = vcmp.eq.s32.totalorder %v2544_v10, 63 }
0x1f6e   : > { %v1572_v20 = vmul.f32 %v1544_v47, %v1541_v19 }
0x1f70   : > { %1573 = vadd.xlane.f32.xlu0 %v1572_v20 }
0x1f7e   : > { %v1554_v24 = vpop.xlane.xlu1 %1553 }
0x1f7f   : > { %v1555_v25 = vsel %vm1547_vm12, %v1554_v24, %v1521_v49 }
0x1f80   : > { %v1586_v26 = vmul.f32 %v1578_v22, %v1555_v25 }
0x1f82   : > { %1587 = vadd.xlane.f32.xlu0 %v1586_v26  ;;  %v1562_v27 = vpop.xlane.xlu1 %1561 }
0x1f83   : > { %v1563_v28 = vsel %vm1547_vm12, %v1562_v27, %v1529_v39  ;;  %v1616_v39 = vxor.u32 2147483648, %v1615_v51 }
0x1f84   : > { %v1594_v29 = vmul.f32 %v1578_v22, %v1563_v28 }
0x1f86   : > { %1595 = vadd.xlane.f32.xlu0 %v1594_v29  ;;  %v1570_v30 = vpop.xlane.xlu1 %1569 }
0x1f87   : > { %v1571_v31 = vsel %vm1547_vm12, %v1570_v30, %v1537_v56 }
0x1f88   : > { %v1602_v33 = vmul.f32 %v1578_v22, %v1571_v31 }
0x1f8a   : > { %1603 = vadd.xlane.f32.xlu0 %v1602_v33 }
0x1f8e   : > { %1611 = vadd.xlane.f32.xlu0 %v1610_v34 }
0x1fed   : > { %v1558_v35 = vpop.xlane.xlu0 %1557 }
0x1fee   : > { %v1559_v36 = vsel %vm1547_vm12, %v1558_v35, %v1525_v0 }
0x1fef   : > { %v1590_v37 = vmul.f32 %v1578_v22, %v1559_v36 }
0x1ff1   : > { %1591 = vadd.xlane.f32.xlu1 %v1590_v37 }
0x1ff5   : > { %v1566_v41 = vpop.xlane.xlu0 %1565 }
0x1ff6   : > { %v1567_v23 = vsel %vm1547_vm12, %v1566_v41, %v1533_v5 }
0x1ff7   : > { %v1598_v42 = vmul.f32 %v1578_v22, %v1567_v23 }
0x1ff9   : > { %v1550_v43 = vpop.xlane.xlu0 %1549  ;;  %1599 = vadd.xlane.f32.xlu1 %v1598_v42 }
0x1ffa   : > { %v1551_v45 = vsel %vm1547_vm12, %v1550_v43, %v1517_v12 }
0x1ffb   : > { %v1582_v47 = vmul.f32 %v1578_v22, %v1551_v45 }
0x1ffd   : > { %v1574_v48 = vpop.xlane.xlu0 %1573  ;;  %1583 = vadd.xlane.f32.xlu1 %v1582_v47 }
0x1ffe   : > { %v1575_v49 = vsel %vm1547_vm12, %v1574_v48, %v1541_v19  ;;  %vm1969_vm12 = vcmp.eq.s32.totalorder %v2544_v10, 66 }
0x1fff   : > { %v1606_v50 = vmul.f32 %v1578_v22, %v1575_v49 }
0x2001   : > { %1607 = vadd.xlane.f32.xlu1 %v1606_v50 }
0x200f   : > { %v1588_v53 = vpop.xlane.xlu0 %1587 }
0x2010   : > { %v1589_v55 = vsel %vm1581_vm14, %v1588_v53, %v1555_v25 }
0x2011   : > { %v1624_v56 = vmul.f32 %v1616_v39, %v1589_v55 }
0x2013   : > { %v1596_v57 = vpop.xlane.xlu0 %1595  ;;  %1625 = vadd.xlane.f32.xlu0 %v1624_v56 }
0x2014   : > { %v1597_v59 = vsel %vm1581_vm14, %v1596_v57, %v1563_v28  ;;  %v1653_v28 = vld [vmem:[#allocation2 + $0x3a] ss:$0 sm:$0xff] }
0x2015   : > { %v1632_v61 = vmul.f32 %v1616_v39, %v1597_v59  ;;  %v1654_v29 = vxor.u32 2147483648, %v1653_v28 }
0x2017   : > { %1633 = vadd.xlane.f32.xlu0 %v1632_v61  ;;  %v1604_v63 = vpop.xlane.xlu0 %1603  ;;  %v1691_v61 = vld [vmem:[#allocation2 + $0x3b] ss:$0 sm:$0xff] }
0x2018   : > { %v1605_v0 = vsel %vm1581_vm14, %v1604_v63, %v1571_v31  ;;  %v1692_v63 = vxor.u32 2147483648, %v1691_v61 }
0x2019   : > { %v1640_v2 = vmul.f32 %v1616_v39, %v1605_v0 }
0x201b   : > { %1641 = vadd.xlane.f32.xlu0 %v1640_v2  ;;  %v1612_v4 = vpop.xlane.xlu0 %1611 }
0x201c   : > { %v1613_v5 = vsel %vm1581_vm14, %v1612_v4, %v346_v32 }
0x201d   : > { %v1648_v6 = vmul.f32 %v1616_v39, %v1613_v5 }
0x201f   : > { %1649 = vadd.xlane.f32.xlu0 %v1648_v6 }
0x207e   : > { %v1592_v8 = vpop.xlane.xlu1 %1591 }
0x207f   : > { %v1593_v12 = vsel %vm1581_vm14, %v1592_v8, %v1559_v36 }
0x2080   : > { %v1628_v15 = vmul.f32 %v1616_v39, %v1593_v12 }
0x2082   : > { %1629 = vadd.xlane.f32.xlu1 %v1628_v15 }
0x2086   : > { %v1600_v18 = vpop.xlane.xlu1 %1599 }
0x2087   : > { %v1601_v19 = vsel %vm1581_vm14, %v1600_v18, %v1567_v23 }
0x2088   : > { %v1636_v20 = vmul.f32 %v1616_v39, %v1601_v19 }
0x208a   : > { %1637 = vadd.xlane.f32.xlu1 %v1636_v20  ;;  %v1584_v21 = vpop.xlane.xlu1 %1583 }
0x208b   : > { %v1585_v22 = vsel %vm1581_vm14, %v1584_v21, %v1551_v45 }
0x208c   : > { %v1620_v24 = vmul.f32 %v1616_v39, %v1585_v22 }
0x208e   : > { %1621 = vadd.xlane.f32.xlu1 %v1620_v24  ;;  %v1608_v25 = vpop.xlane.xlu1 %1607 }
0x208f   : > { %v1609_v26 = vsel %vm1581_vm14, %v1608_v25, %v1575_v49  ;;  %vm2053_vm14 = vcmp.eq.s32.totalorder %v2544_v10, 68 }
0x2090   : > { %v1644_v27 = vmul.f32 %v1616_v39, %v1609_v26 }
0x2092   : > { %1645 = vadd.xlane.f32.xlu1 %v1644_v27 }
0x20a0   : > { %v1626_v30 = vpop.xlane.xlu0 %1625 }
0x20a1   : > { %v1627_v31 = vsel %vm1619_vm15, %v1626_v30, %v1589_v55 }
0x20a2   : > { %v1662_v32 = vmul.f32 %v1654_v29, %v1627_v31 }
0x20a4   : > { %1663 = vadd.xlane.f32.xlu0 %v1662_v32  ;;  %v1634_v33 = vpop.xlane.xlu0 %1633 }
0x20a5   : > { %v1635_v34 = vsel %vm1619_vm15, %v1634_v33, %v1597_v59 }
0x20a6   : > { %v1670_v35 = vmul.f32 %v1654_v29, %v1635_v34 }
0x20a8   : > { %1671 = vadd.xlane.f32.xlu0 %v1670_v35  ;;  %v1642_v36 = vpop.xlane.xlu0 %1641  ;;  %v1729_v35 = vld [vmem:[#allocation2 + $0x3c] ss:$0 sm:$0xff] }
0x20a9   : > { %v1643_v37 = vsel %vm1619_vm15, %v1642_v36, %v1605_v0  ;;  %v1730_v36 = vxor.u32 2147483648, %v1729_v35 }
0x20aa   : > { %v1678_v41 = vmul.f32 %v1654_v29, %v1643_v37 }
0x20ac   : > { %1679 = vadd.xlane.f32.xlu0 %v1678_v41  ;;  %v1650_v23 = vpop.xlane.xlu0 %1649 }
0x20ad   : > { %v1651_v42 = vsel %vm1619_vm15, %v1650_v23, %v1613_v5 }
0x20ae   : > { %v1686_v43 = vmul.f32 %v1654_v29, %v1651_v42 }
0x20b0   : > { %1687 = vadd.xlane.f32.xlu0 %v1686_v43 }
0x210f   : > { %v1630_v45 = vpop.xlane.xlu1 %1629 }
0x2110   : > { %v1631_v47 = vsel %vm1619_vm15, %v1630_v45, %v1593_v12 }
0x2111   : > { %v1666_v48 = vmul.f32 %v1654_v29, %v1631_v47 }
0x2113   : > { %1667 = vadd.xlane.f32.xlu1 %v1666_v48 }
0x2117   : > { %v1638_v49 = vpop.xlane.xlu1 %1637 }
0x2118   : > { %v1639_v50 = vsel %vm1619_vm15, %v1638_v49, %v1601_v19 }
0x2119   : > { %v1674_v51 = vmul.f32 %v1654_v29, %v1639_v50 }
0x211b   : > { %1675 = vadd.xlane.f32.xlu1 %v1674_v51  ;;  %v1622_v39 = vpop.xlane.xlu1 %1621 }
0x211c   : > { %v1623_v53 = vsel %vm1619_vm15, %v1622_v39, %v1585_v22 }
0x211d   : > { %v1658_v55 = vmul.f32 %v1654_v29, %v1623_v53 }
0x211f   : > { %1659 = vadd.xlane.f32.xlu1 %v1658_v55  ;;  %v1646_v56 = vpop.xlane.xlu1 %1645 }
0x2120   : > { %v1647_v57 = vsel %vm1619_vm15, %v1646_v56, %v1609_v26  ;;  %vm2095_vm15 = vcmp.eq.s32.totalorder %v2544_v10, 69 }
0x2121   : > { %v1682_v59 = vmul.f32 %v1654_v29, %v1647_v57 }
0x2123   : > { %1683 = vadd.xlane.f32.xlu1 %v1682_v59 }
0x2131   : > { %v1664_v0 = vpop.xlane.xlu0 %1663 }
0x2132   : > { %v1665_v2 = vsel %vm1657_vm0, %v1664_v0, %v1627_v31 }
0x2133   : > { %v1700_v4 = vmul.f32 %v1692_v63, %v1665_v2 }
0x2135   : > { %1701 = vadd.xlane.f32.xlu0 %v1700_v4  ;;  %v1672_v5 = vpop.xlane.xlu0 %1671 }
0x2136   : > { %v1673_v6 = vsel %vm1657_vm0, %v1672_v5, %v1635_v34 }
0x2137   : > { %v1708_v8 = vmul.f32 %v1692_v63, %v1673_v6 }
0x2139   : > { %1709 = vadd.xlane.f32.xlu0 %v1708_v8  ;;  %v1680_v12 = vpop.xlane.xlu0 %1679  ;;  %v1767_v8 = vld [vmem:[#allocation2 + $0x3d] ss:$0 sm:$0xff] }
0x213a   : > { %v1681_v15 = vsel %vm1657_vm0, %v1680_v12, %v1643_v37  ;;  %v1768_v12 = vxor.u32 2147483648, %v1767_v8 }
0x213b   : > { %v1716_v18 = vmul.f32 %v1692_v63, %v1681_v15 }
0x213d   : > { %1717 = vadd.xlane.f32.xlu0 %v1716_v18  ;;  %v1688_v19 = vpop.xlane.xlu0 %1687 }
0x213e   : > { %v1689_v20 = vsel %vm1657_vm0, %v1688_v19, %v1651_v42 }
0x213f   : > { %v1724_v21 = vmul.f32 %v1692_v63, %v1689_v20 }
0x2141   : > { %1725 = vadd.xlane.f32.xlu0 %v1724_v21 }
0x21a0   : > { %v1668_v22 = vpop.xlane.xlu1 %1667 }
0x21a1   : > { %v1669_v24 = vsel %vm1657_vm0, %v1668_v22, %v1631_v47 }
0x21a2   : > { %v1704_v25 = vmul.f32 %v1692_v63, %v1669_v24 }
0x21a4   : > { %1705 = vadd.xlane.f32.xlu1 %v1704_v25 }
0x21a8   : > { %v1676_v26 = vpop.xlane.xlu1 %1675 }
0x21a9   : > { %v1677_v27 = vsel %vm1657_vm0, %v1676_v26, %v1639_v50 }
0x21aa   : > { %v1712_v28 = vmul.f32 %v1692_v63, %v1677_v27 }
0x21ac   : > { %1713 = vadd.xlane.f32.xlu1 %v1712_v28  ;;  %v1660_v29 = vpop.xlane.xlu1 %1659 }
0x21ad   : > { %v1661_v30 = vsel %vm1657_vm0, %v1660_v29, %v1623_v53 }
0x21ae   : > { %v1696_v31 = vmul.f32 %v1692_v63, %v1661_v30 }
0x21b0   : > { %1697 = vadd.xlane.f32.xlu1 %v1696_v31  ;;  %v1684_v32 = vpop.xlane.xlu1 %1683 }
0x21b1   : > { %v1685_v33 = vsel %vm1657_vm0, %v1684_v32, %v1647_v57  ;;  %vm2137_vm0 = vcmp.eq.s32.totalorder %v2544_v10, 70 }
0x21b2   : > { %v1720_v34 = vmul.f32 %v1692_v63, %v1685_v33 }
0x21b4   : > { %1721 = vadd.xlane.f32.xlu1 %v1720_v34 }
0x21c2   : > { %v1702_v37 = vpop.xlane.xlu0 %1701 }
0x21c3   : > { %v1703_v41 = vsel %vm1695_vm2, %v1702_v37, %v1665_v2 }
0x21c4   : > { %v1738_v23 = vmul.f32 %v1730_v36, %v1703_v41 }
0x21c6   : > { %1739 = vadd.xlane.f32.xlu0 %v1738_v23  ;;  %v1710_v42 = vpop.xlane.xlu0 %1709 }
0x21c7   : > { %v1711_v43 = vsel %vm1695_vm2, %v1710_v42, %v1673_v6 }
0x21c8   : > { %v1746_v45 = vmul.f32 %v1730_v36, %v1711_v43 }
0x21ca   : > { %1747 = vadd.xlane.f32.xlu0 %v1746_v45  ;;  %v1718_v47 = vpop.xlane.xlu0 %1717  ;;  %v1805_v45 = vld [vmem:[#allocation2 + $0x3e] ss:$0 sm:$0xff] }
0x21cb   : > { %v1719_v48 = vsel %vm1695_vm2, %v1718_v47, %v1681_v15  ;;  %v1806_v47 = vxor.u32 2147483648, %v1805_v45 }
0x21cc   : > { %v1754_v49 = vmul.f32 %v1730_v36, %v1719_v48 }
0x21ce   : > { %1755 = vadd.xlane.f32.xlu0 %v1754_v49  ;;  %v1726_v50 = vpop.xlane.xlu0 %1725 }
0x21cf   : > { %v1727_v51 = vsel %vm1695_vm2, %v1726_v50, %v1689_v20 }
0x21d0   : > { %v1762_v39 = vmul.f32 %v1730_v36, %v1727_v51 }
0x21d2   : > { %1763 = vadd.xlane.f32.xlu0 %v1762_v39 }
0x2231   : > { %v1706_v53 = vpop.xlane.xlu1 %1705 }
0x2232   : > { %v1707_v55 = vsel %vm1695_vm2, %v1706_v53, %v1669_v24 }
0x2233   : > { %v1742_v56 = vmul.f32 %v1730_v36, %v1707_v55 }
0x2235   : > { %1743 = vadd.xlane.f32.xlu1 %v1742_v56 }
0x2239   : > { %v1714_v57 = vpop.xlane.xlu1 %1713 }
0x223a   : > { %v1715_v59 = vsel %vm1695_vm2, %v1714_v57, %v1677_v27 }
0x223b   : > { %v1750_v61 = vmul.f32 %v1730_v36, %v1715_v59 }
0x223d   : > { %1751 = vadd.xlane.f32.xlu1 %v1750_v61  ;;  %v1698_v63 = vpop.xlane.xlu1 %1697 }
0x223e   : > { %v1699_v0 = vsel %vm1695_vm2, %v1698_v63, %v1661_v30 }
0x223f   : > { %v1734_v2 = vmul.f32 %v1730_v36, %v1699_v0 }
0x2241   : > { %1735 = vadd.xlane.f32.xlu1 %v1734_v2  ;;  %v1722_v4 = vpop.xlane.xlu1 %1721 }
0x2242   : > { %v1723_v5 = vsel %vm1695_vm2, %v1722_v4, %v1685_v33  ;;  %vm2179_vm2 = vcmp.eq.s32.totalorder %v2544_v10, 71 }
0x2243   : > { %v1758_v6 = vmul.f32 %v1730_v36, %v1723_v5 }
0x2245   : > { %1759 = vadd.xlane.f32.xlu1 %v1758_v6 }
0x2253   : > { %v1740_v15 = vpop.xlane.xlu0 %1739 }
0x2254   : > { %v1741_v18 = vsel %vm1733_vm3, %v1740_v15, %v1703_v41 }
0x2255   : > { %v1776_v19 = vmul.f32 %v1768_v12, %v1741_v18 }
0x2257   : > { %1777 = vadd.xlane.f32.xlu0 %v1776_v19  ;;  %v1748_v20 = vpop.xlane.xlu0 %1747  ;;  %v3144_v19 = vadd.s32 64, %v2546_v11 }
0x2258   : > { %v1749_v21 = vsel %vm1733_vm3, %v1748_v20, %v1711_v43 }
0x2259   : > { %v1784_v22 = vmul.f32 %v1768_v12, %v1749_v21  ;;  %vm276_vm5 = vcmp.eq.s32.totalorder %v3144_v19, %v2544_v10  ;;  %vm281_vm7 = vcmp.ge.s32.totalorder %v3144_v19, %v2544_v10 }
0x225a   : > { %vm282_vm8 = vmand %vm281_vm7, %vm144_vm1  ;;  %vm352_vm1 = vcmp.eq.s32.totalorder %v2544_v10, %v3144_v19  ;;  %vm2229_vm7 = vweird.f32 %v2598_v7 }
0x225b   : > { %1785 = vadd.xlane.f32.xlu0 %v1784_v22  ;;  %v1756_v24 = vpop.xlane.xlu0 %1755 }
0x225c   : > { %v1757_v25 = vsel %vm1733_vm3, %v1756_v24, %v1719_v48  ;;  %v2419_v24 = vld [vmem:[%s2550_s20 + $0x40] sm:$0xff] }
0x225d   : > { %v1792_v26 = vmul.f32 %v1768_v12, %v1757_v25 }
0x225f   : > { %1793 = vadd.xlane.f32.xlu0 %v1792_v26  ;;  %v1764_v27 = vpop.xlane.xlu0 %1763  ;;  %v1843_v26 = vld [vmem:[#allocation2 + $0x3f] ss:$0 sm:$0xff] }
0x2260   : > { %v1765_v28 = vsel %vm1733_vm3, %v1764_v27, %v1727_v51  ;;  %v1844_v27 = vxor.u32 2147483648, %v1843_v26 }
0x2261   : > { %v1800_v29 = vmul.f32 %v1768_v12, %v1765_v28 }
0x2263   : > { %1801 = vadd.xlane.f32.xlu0 %v1800_v29 }
0x22c2   : > { %v1744_v30 = vpop.xlane.xlu1 %1743 }
0x22c3   : > { %v1745_v31 = vsel %vm1733_vm3, %v1744_v30, %v1707_v55 }
0x22c4   : > { %v1780_v32 = vmul.f32 %v1768_v12, %v1745_v31 }
0x22c6   : > { %1781 = vadd.xlane.f32.xlu1 %v1780_v32 }
0x22ca   : > { %v1752_v33 = vpop.xlane.xlu1 %1751 }
0x22cb   : > { %v1753_v34 = vsel %vm1733_vm3, %v1752_v33, %v1715_v59 }
0x22cc   : > { %v1788_v35 = vmul.f32 %v1768_v12, %v1753_v34 }
0x22ce   : > { %1789 = vadd.xlane.f32.xlu1 %v1788_v35  ;;  %v1736_v36 = vpop.xlane.xlu1 %1735 }
0x22cf   : > { %v1737_v37 = vsel %vm1733_vm3, %v1736_v36, %v1699_v0 }
0x22d0   : > { %v1772_v41 = vmul.f32 %v1768_v12, %v1737_v37 }
0x22d2   : > { %1773 = vadd.xlane.f32.xlu1 %v1772_v41  ;;  %v1760_v23 = vpop.xlane.xlu1 %1759 }
0x22d3   : > { %v1761_v42 = vsel %vm1733_vm3, %v1760_v23, %v1723_v5  ;;  %vm2223_vm3 = vweird.f32 %v2575_v52 }
0x22d4   : > { %v1796_v43 = vmul.f32 %v1768_v12, %v1761_v42 }
0x22d6   : > { %1797 = vadd.xlane.f32.xlu1 %v1796_v43 }
0x22e4   : > { %v1778_v48 = vpop.xlane.xlu0 %1777 }
0x22e5   : > { %v1779_v49 = vsel %vm1771_vm4, %v1778_v48, %v1741_v18 }
0x22e6   : > { %v1814_v50 = vmul.f32 %v1806_v47, %v1779_v49 }
0x22e8   : > { %1815 = vadd.xlane.f32.xlu0 %v1814_v50  ;;  %v1786_v51 = vpop.xlane.xlu0 %1785 }
0x22e9   : > { %v1787_v39 = vsel %vm1771_vm4, %v1786_v51, %v1749_v21 }
0x22ea   : > { %v1822_v53 = vmul.f32 %v1806_v47, %v1787_v39 }
0x22ec   : > { %1823 = vadd.xlane.f32.xlu0 %v1822_v53  ;;  %v1794_v55 = vpop.xlane.xlu0 %1793 }
0x22ed   : > { %v1795_v56 = vsel %vm1771_vm4, %v1794_v55, %v1757_v25  ;;  %v278_v25 = vsel %vm276_vm5, %v2419_v24, 0.0  ;;  %vm2247_vm5 = vweird.f32 %v2751_v38 }
0x22ee   : > { %v1830_v57 = vmul.f32 %v1806_v47, %v1795_v56 }
0x22f0   : > { %1831 = vadd.xlane.f32.xlu0 %v1830_v57  ;;  %v1802_v59 = vpop.xlane.xlu0 %1801  ;;  %v283_v57 = vsel %vm282_vm8, %v2419_v24, 0.0  ;;  %vm2241_vm8 = vweird.f32 %v2662_v1 }
0x22f1   : > { %v1803_v61 = vsel %vm1771_vm4, %v1802_v59, %v1765_v28 }
0x22f2   : > { %v1838_v63 = vmul.f32 %v1806_v47, %v1803_v61 }
0x22f4   : > { %1839 = vadd.xlane.f32.xlu0 %v1838_v63 }
0x2353   : > { %v1782_v0 = vpop.xlane.xlu1 %1781 }
0x2354   : > { %v1783_v2 = vsel %vm1771_vm4, %v1782_v0, %v1745_v31 }
0x2355   : > { %v1818_v4 = vmul.f32 %v1806_v47, %v1783_v2 }
0x2357   : > { %1819 = vadd.xlane.f32.xlu1 %v1818_v4 }
0x235b   : > { %v1790_v5 = vpop.xlane.xlu1 %1789 }
0x235c   : > { %v1791_v6 = vsel %vm1771_vm4, %v1790_v5, %v1753_v34 }
0x235d   : > { %v1826_v8 = vmul.f32 %v1806_v47, %v1791_v6 }
0x235f   : > { %1827 = vadd.xlane.f32.xlu1 %v1826_v8  ;;  %v1774_v12 = vpop.xlane.xlu1 %1773 }
0x2360   : > { %v1775_v15 = vsel %vm1771_vm4, %v1774_v12, %v1737_v37 }
0x2361   : > { %v1810_v18 = vmul.f32 %v1806_v47, %v1775_v15 }
0x2363   : > { %1811 = vadd.xlane.f32.xlu1 %v1810_v18  ;;  %v1798_v20 = vpop.xlane.xlu1 %1797 }
0x2364   : > { %v1799_v21 = vsel %vm1771_vm4, %v1798_v20, %v1761_v42  ;;  %vm2235_vm4 = vweird.f32 %v2628_v44 }
0x2365   : > { %v1834_v22 = vmul.f32 %v1806_v47, %v1799_v21 }
0x2367   : > { %1835 = vadd.xlane.f32.xlu1 %v1834_v22 }
0x236b   : > { %279 = vadd.xlane.f32.xlu1 %v278_v25 }
0x2375   : > { %v1816_v28 = vpop.xlane.xlu0 %1815 }
0x2376   : > { %v1817_v11 = vsel %vm1809_vm6, %v1816_v28, %v1779_v49 }
0x2377   : > { %v1852_v29 = vmul.f32 %v1844_v27, %v1817_v11 }
0x2379   : > { %v1824_v30 = vpop.xlane.xlu0 %1823  ;;  %1853 = vadd.xlane.f32.xlu1 %v1852_v29 }
0x237a   : > { %v1825_v31 = vsel %vm1809_vm6, %v1824_v30, %v1787_v39 }
0x237b   : > { %v1860_v32 = vmul.f32 %v1844_v27, %v1825_v31 }
0x237d   : > { %v1832_v33 = vpop.xlane.xlu0 %1831  ;;  %1861 = vadd.xlane.f32.xlu1 %v1860_v32 }
0x237e   : > { %v1833_v34 = vsel %vm1809_vm6, %v1832_v33, %v1795_v56 }
0x237f   : > { %v1868_v35 = vmul.f32 %v1844_v27, %v1833_v34 }
0x2381   : > { %v1840_v36 = vpop.xlane.xlu0 %1839  ;;  %1869 = vadd.xlane.f32.xlu1 %v1868_v35 }
0x2382   : > { %v1841_v37 = vsel %vm1809_vm6, %v1840_v36, %v1803_v61  ;;  %v353_v36 = vsel %vm352_vm1, -1.0, %v2504_v62  ;;  %vm2218_vm1 = vweird.f32 %v2553_v14 }
0x2383   : > { %v1876_v41 = vmul.f32 %v1844_v27, %v1841_v37 }
0x2385   : > { %1877 = vadd.xlane.f32.xlu1 %v1876_v41 }
0x23e4   : > { %v1820_v23 = vpop.xlane.xlu1 %1819 }
0x23e5   : > { %v1821_v42 = vsel %vm1809_vm6, %v1820_v23, %v1783_v2 }
0x23e6   : > { %v1856_v43 = vmul.f32 %v1844_v27, %v1821_v42 }
0x23e8   : > { %1857 = vadd.xlane.f32.xlu0 %v1856_v43 }
0x23ec   : > { %v1828_v45 = vpop.xlane.xlu1 %1827 }
0x23ed   : > { %v1829_v47 = vsel %vm1809_vm6, %v1828_v45, %v1791_v6 }
0x23ee   : > { %v1864_v48 = vmul.f32 %v1844_v27, %v1829_v47 }
0x23f0   : > { %1865 = vadd.xlane.f32.xlu0 %v1864_v48  ;;  %v1812_v49 = vpop.xlane.xlu1 %1811 }
0x23f1   : > { %v1813_v50 = vsel %vm1809_vm6, %v1812_v49, %v1775_v15 }
0x23f2   : > { %v1848_v51 = vmul.f32 %v1844_v27, %v1813_v50 }
0x23f4   : > { %1849 = vadd.xlane.f32.xlu0 %v1848_v51  ;;  %v1836_v39 = vpop.xlane.xlu1 %1835 }
0x23f5   : > { %v1837_v53 = vsel %vm1809_vm6, %v1836_v39, %v1799_v21  ;;  %vm2259_vm6 = vweird.f32 %v3007_v58 }
0x23f6   : > { %v1872_v55 = vmul.f32 %v1844_v27, %v1837_v53 }
0x23f8   : > { %1873 = vadd.xlane.f32.xlu0 %v1872_v55  ;;  %v3168_v56 = vpop.xlane.xlu1 %279 }
0x23f9   : > { %2477 = vrcp.f32 %v3168_v56 }
0x2403   : > { %v3175_v59 = vpop.eup %2477 }
0x2404   : > { %v285_v61 = vmul.f32 %v3175_v59, %v283_v57 }
0x2406   : > { %286 = vst [vmem:[#allocation2 + $0x40] sm:$0xff] %v285_v61  ;;  %v1854_v63 = vpop.xlane.xlu1 %1853 }
0x2407   : > { %v1855_v5 = vsel %vm1847_vm9, %v1854_v63, %v1817_v11 }
0x240a   : > { %v1862_v0 = vpop.xlane.xlu1 %1861 }
0x240b   : > { %v1863_v12 = vsel %vm1847_vm9, %v1862_v0, %v1825_v31 }
0x240d   : > { %v1881_v2 = vld [vmem:[#allocation2 + $0x40] ss:$0 sm:$0xff]  ;;  %v1923_v41 = vld [vmem:[#allocation2 + $0x41] ss:$0 sm:$0xff] }
0x240e   : > { %v1882_v4 = vxor.u32 2147483648, %v1881_v2  ;;  %v1870_v8 = vpop.xlane.xlu1 %1869  ;;  %v1924_v23 = vxor.u32 2147483648, %v1923_v41 }
0x240f   : > { %v1871_v18 = vsel %vm1847_vm9, %v1870_v8, %v1833_v34 }
0x2410   : > { %v1890_v6 = vmul.f32 %v1882_v4, %v1855_v5  ;;  %v1898_v15 = vmul.f32 %v1882_v4, %v1863_v12  ;;  %v1906_v21 = vmul.f32 %v1882_v4, %v1871_v18 }
0x2412   : > { %1891 = vadd.xlane.f32.xlu1 %v1890_v6  ;;  %v1878_v20 = vpop.xlane.xlu1 %1877 }
0x2413   : > { %v1879_v22 = vsel %vm1847_vm9, %v1878_v20, %v1841_v37  ;;  %v1918_v37 = vmul.f32 %v1882_v4, %v353_v36 }
0x2414   : > { %v1914_v24 = vmul.f32 %v1882_v4, %v1879_v22 }
0x2416   : > { %1899 = vadd.xlane.f32.xlu1 %v1898_v15 }
0x241a   : > { %1907 = vadd.xlane.f32.xlu1 %v1906_v21 }
0x241e   : > { %1915 = vadd.xlane.f32.xlu1 %v1914_v24 }
0x2475   : > { %v1858_v25 = vpop.xlane.xlu0 %1857 }
0x2476   : > { %v1859_v26 = vsel %vm1847_vm9, %v1858_v25, %v1821_v42 }
0x2477   : > { %v1894_v27 = vmul.f32 %v1882_v4, %v1859_v26 }
0x2479   : > { %1895 = vadd.xlane.f32.xlu0 %v1894_v27 }
0x247d   : > { %v1866_v28 = vpop.xlane.xlu0 %1865 }
0x247e   : > { %v1867_v11 = vsel %vm1847_vm9, %v1866_v28, %v1829_v47 }
0x247f   : > { %v1902_v29 = vmul.f32 %v1882_v4, %v1867_v11 }
0x2481   : > { %v1850_v30 = vpop.xlane.xlu0 %1849  ;;  %1903 = vadd.xlane.f32.xlu0 %v1902_v29 }
0x2482   : > { %v1851_v34 = vsel %vm1847_vm9, %v1850_v30, %v1813_v50 }
0x2483   : > { %v1886_v35 = vmul.f32 %v1882_v4, %v1851_v34 }
0x2485   : > { %v1874_v31 = vpop.xlane.xlu0 %1873 }
0x2486   : > { %v1875_v32 = vsel %vm1847_vm9, %v1874_v31, %v1837_v53  ;;  %vm2253_vm9 = vweird.f32 %v2878_v13 }
0x2487   : > { %v1910_v33 = vmul.f32 %v1882_v4, %v1875_v32 }
0x2489   : > { %1911 = vadd.xlane.f32.xlu0 %v1910_v33 }
0x248d   : > { %1887 = vadd.xlane.f32.xlu0 %v1886_v35 }
0x2491   : > { %1919 = vadd.xlane.f32.xlu0 %v1918_v37 }
0x249f   : > { %v1892_v42 = vpop.xlane.xlu1 %1891 }
0x24a0   : > { %v1893_v43 = vsel %vm1885_vm10, %v1892_v42, %v1855_v5 }
0x24a1   : > { %v1932_v45 = vmul.f32 %v1924_v23, %v1893_v43 }
0x24a3   : > { %1933 = vadd.xlane.f32.xlu0 %v1932_v45  ;;  %v1900_v47 = vpop.xlane.xlu1 %1899 }
0x24a4   : > { %v1901_v19 = vsel %vm1885_vm10, %v1900_v47, %v1863_v12 }
0x24a5   : > { %v1940_v48 = vmul.f32 %v1924_v23, %v1901_v19 }
0x24a7   : > { %1941 = vadd.xlane.f32.xlu0 %v1940_v48  ;;  %v1908_v62 = vpop.xlane.xlu1 %1907 }
0x24a8   : > { %v1909_v49 = vsel %vm1885_vm10, %v1908_v62, %v1871_v18 }
0x24a9   : > { %v1948_v50 = vmul.f32 %v1924_v23, %v1909_v49 }
0x24ab   : > { %1949 = vadd.xlane.f32.xlu0 %v1948_v50  ;;  %v1916_v51 = vpop.xlane.xlu1 %1915 }
0x24ac   : > { %v1917_v39 = vsel %vm1885_vm10, %v1916_v51, %v1879_v22  ;;  %v1965_v22 = vld [vmem:[#allocation2 + $0x42] ss:$0 sm:$0xff] }
0x24ad   : > { %v1956_v53 = vmul.f32 %v1924_v23, %v1917_v39  ;;  %v1966_v24 = vxor.u32 2147483648, %v1965_v22 }
0x24af   : > { %1957 = vadd.xlane.f32.xlu0 %v1956_v53  ;;  %v2007_v53 = vld [vmem:[#allocation2 + $0x43] ss:$0 sm:$0xff] }
0x2506   : > { %v1896_v55 = vpop.xlane.xlu0 %1895 }
0x2507   : > { %v1897_v57 = vsel %vm1885_vm10, %v1896_v55, %v1859_v26  ;;  %v2008_v55 = vxor.u32 2147483648, %v2007_v53 }
0x2508   : > { %v1936_v61 = vmul.f32 %v1924_v23, %v1897_v57 }
0x250a   : > { %1937 = vadd.xlane.f32.xlu1 %v1936_v61 }
0x250e   : > { %v1904_v63 = vpop.xlane.xlu0 %1903 }
0x250f   : > { %v1905_v0 = vsel %vm1885_vm10, %v1904_v63, %v1867_v11 }
0x2510   : > { %v1944_v2 = vmul.f32 %v1924_v23, %v1905_v0 }
0x2512   : > { %1945 = vadd.xlane.f32.xlu1 %v1944_v2 }
0x2516   : > { %v1912_v4 = vpop.xlane.xlu0 %1911 }
0x2517   : > { %v1913_v5 = vsel %vm1885_vm10, %v1912_v4, %v1875_v32 }
0x2518   : > { %v1952_v6 = vmul.f32 %v1924_v23, %v1913_v5 }
0x251a   : > { %v1888_v8 = vpop.xlane.xlu0 %1887  ;;  %1953 = vadd.xlane.f32.xlu1 %v1952_v6 }
0x251b   : > { %v1889_v12 = vsel %vm1885_vm10, %v1888_v8, %v1851_v34 }
0x251c   : > { %v1928_v15 = vmul.f32 %v1924_v23, %v1889_v12 }
0x251e   : > { %v1920_v18 = vpop.xlane.xlu0 %1919  ;;  %1929 = vadd.xlane.f32.xlu1 %v1928_v15 }
0x251f   : > { %v1921_v20 = vsel %vm1885_vm10, %v1920_v18, %v353_v36  ;;  %vm2265_vm10 = vweird.f32 %v3168_v56 }
0x2520   : > { %v1960_v21 = vmul.f32 %v1924_v23, %v1921_v20 }
0x2522   : > { %1961 = vadd.xlane.f32.xlu1 %v1960_v21 }
0x2530   : > { %v1934_v25 = vpop.xlane.xlu0 %1933 }
0x2531   : > { %v1935_v26 = vsel %vm1927_vm11, %v1934_v25, %v1893_v43 }
0x2532   : > { %v1974_v27 = vmul.f32 %v1966_v24, %v1935_v26 }
0x2534   : > { %1975 = vadd.xlane.f32.xlu1 %v1974_v27  ;;  %v1942_v28 = vpop.xlane.xlu0 %1941 }
0x2535   : > { %v1943_v11 = vsel %vm1927_vm11, %v1942_v28, %v1901_v19 }
0x2536   : > { %v1982_v29 = vmul.f32 %v1966_v24, %v1943_v11 }
0x2538   : > { %1983 = vadd.xlane.f32.xlu1 %v1982_v29  ;;  %v1950_v30 = vpop.xlane.xlu0 %1949 }
0x2539   : > { %v1951_v31 = vsel %vm1927_vm11, %v1950_v30, %v1909_v49 }
0x253a   : > { %v1990_v32 = vmul.f32 %v1966_v24, %v1951_v31 }
0x253c   : > { %1991 = vadd.xlane.f32.xlu1 %v1990_v32  ;;  %v1958_v33 = vpop.xlane.xlu0 %1957 }
0x253d   : > { %v1959_v34 = vsel %vm1927_vm11, %v1958_v33, %v1917_v39 }
0x253e   : > { %v1998_v35 = vmul.f32 %v1966_v24, %v1959_v34 }
0x2540   : > { %1999 = vadd.xlane.f32.xlu1 %v1998_v35  ;;  %v2049_v35 = vld [vmem:[#allocation2 + $0x44] ss:$0 sm:$0xff] }
0x2597   : > { %v1938_v36 = vpop.xlane.xlu1 %1937 }
0x2598   : > { %v1939_v37 = vsel %vm1927_vm11, %v1938_v36, %v1897_v57  ;;  %v2050_v36 = vxor.u32 2147483648, %v2049_v35 }
0x2599   : > { %v1978_v41 = vmul.f32 %v1966_v24, %v1939_v37 }
0x259b   : > { %1979 = vadd.xlane.f32.xlu0 %v1978_v41 }
0x259f   : > { %v1946_v23 = vpop.xlane.xlu1 %1945 }
0x25a0   : > { %v1947_v42 = vsel %vm1927_vm11, %v1946_v23, %v1905_v0 }
0x25a1   : > { %v1986_v43 = vmul.f32 %v1966_v24, %v1947_v42 }
0x25a3   : > { %1987 = vadd.xlane.f32.xlu0 %v1986_v43 }
0x25a7   : > { %v1954_v45 = vpop.xlane.xlu1 %1953 }
0x25a8   : > { %v1955_v47 = vsel %vm1927_vm11, %v1954_v45, %v1913_v5 }
0x25a9   : > { %v1994_v19 = vmul.f32 %v1966_v24, %v1955_v47 }
0x25ab   : > { %1995 = vadd.xlane.f32.xlu0 %v1994_v19  ;;  %v1930_v48 = vpop.xlane.xlu1 %1929 }
0x25ac   : > { %v1931_v62 = vsel %vm1927_vm11, %v1930_v48, %v1889_v12 }
0x25ad   : > { %v1970_v49 = vmul.f32 %v1966_v24, %v1931_v62 }
0x25af   : > { %1971 = vadd.xlane.f32.xlu0 %v1970_v49  ;;  %v1962_v50 = vpop.xlane.xlu1 %1961 }
0x25b0   : > { %v1963_v51 = vsel %vm1927_vm11, %v1962_v50, %v1921_v20 }
0x25b1   : > { %v2002_v39 = vmul.f32 %v1966_v24, %v1963_v51 }
0x25b3   : > { %2003 = vadd.xlane.f32.xlu0 %v2002_v39 }
0x25c1   : > { %v1976_v57 = vpop.xlane.xlu1 %1975 }
0x25c2   : > { %v1977_v61 = vsel %vm1969_vm12, %v1976_v57, %v1935_v26 }
0x25c3   : > { %v2016_v63 = vmul.f32 %v2008_v55, %v1977_v61 }
0x25c5   : > { %2017 = vadd.xlane.f32.xlu0 %v2016_v63  ;;  %v1984_v0 = vpop.xlane.xlu1 %1983 }
0x25c6   : > { %v1985_v2 = vsel %vm1969_vm12, %v1984_v0, %v1943_v11 }
0x25c7   : > { %v2024_v4 = vmul.f32 %v2008_v55, %v1985_v2 }
0x25c9   : > { %2025 = vadd.xlane.f32.xlu0 %v2024_v4  ;;  %v1992_v5 = vpop.xlane.xlu1 %1991 }
0x25ca   : > { %v1993_v6 = vsel %vm1969_vm12, %v1992_v5, %v1951_v31 }
0x25cb   : > { %v2032_v8 = vmul.f32 %v2008_v55, %v1993_v6 }
0x25cd   : > { %2033 = vadd.xlane.f32.xlu0 %v2032_v8  ;;  %v2000_v12 = vpop.xlane.xlu1 %1999 }
0x25ce   : > { %v2001_v15 = vsel %vm1969_vm12, %v2000_v12, %v1959_v34 }
0x25cf   : > { %v2040_v18 = vmul.f32 %v2008_v55, %v2001_v15 }
0x25d1   : > { %2041 = vadd.xlane.f32.xlu0 %v2040_v18  ;;  %v2091_v18 = vld [vmem:[#allocation2 + $0x45] ss:$0 sm:$0xff] }
0x2628   : > { %v1980_v20 = vpop.xlane.xlu0 %1979 }
0x2629   : > { %v1981_v21 = vsel %vm1969_vm12, %v1980_v20, %v1939_v37  ;;  %v2092_v20 = vxor.u32 2147483648, %v2091_v18 }
0x262a   : > { %v2020_v22 = vmul.f32 %v2008_v55, %v1981_v21 }
0x262c   : > { %2021 = vadd.xlane.f32.xlu1 %v2020_v22 }
0x2630   : > { %v1988_v24 = vpop.xlane.xlu0 %1987 }
0x2631   : > { %v1989_v25 = vsel %vm1969_vm12, %v1988_v24, %v1947_v42 }
0x2632   : > { %v2028_v26 = vmul.f32 %v2008_v55, %v1989_v25 }
0x2634   : > { %2029 = vadd.xlane.f32.xlu1 %v2028_v26 }
0x2638   : > { %v1996_v27 = vpop.xlane.xlu0 %1995 }
0x2639   : > { %v1997_v28 = vsel %vm1969_vm12, %v1996_v27, %v1955_v47 }
0x263a   : > { %v2036_v11 = vmul.f32 %v2008_v55, %v1997_v28 }
0x263c   : > { %2037 = vadd.xlane.f32.xlu1 %v2036_v11  ;;  %v1972_v29 = vpop.xlane.xlu0 %1971 }
0x263d   : > { %v1973_v30 = vsel %vm1969_vm12, %v1972_v29, %v1931_v62 }
0x263e   : > { %v2012_v31 = vmul.f32 %v2008_v55, %v1973_v30 }
0x2640   : > { %2013 = vadd.xlane.f32.xlu1 %v2012_v31  ;;  %v2004_v32 = vpop.xlane.xlu0 %2003 }
0x2641   : > { %v2005_v33 = vsel %vm1969_vm12, %v2004_v32, %v1963_v51 }
0x2642   : > { %v2044_v34 = vmul.f32 %v2008_v55, %v2005_v33 }
0x2644   : > { %2045 = vadd.xlane.f32.xlu1 %v2044_v34 }
0x2652   : > { %v2018_v37 = vpop.xlane.xlu0 %2017 }
0x2653   : > { %v2019_v41 = vsel %vm2011_vm13, %v2018_v37, %v1977_v61 }
0x2654   : > { %v2058_v23 = vmul.f32 %v2050_v36, %v2019_v41 }
0x2656   : > { %2059 = vadd.xlane.f32.xlu1 %v2058_v23  ;;  %v2026_v42 = vpop.xlane.xlu0 %2025 }
0x2657   : > { %v2027_v43 = vsel %vm2011_vm13, %v2026_v42, %v1985_v2 }
0x2658   : > { %v2066_v45 = vmul.f32 %v2050_v36, %v2027_v43 }
0x265a   : > { %2067 = vadd.xlane.f32.xlu1 %v2066_v45  ;;  %v2034_v47 = vpop.xlane.xlu0 %2033 }
0x265b   : > { %v2035_v19 = vsel %vm2011_vm13, %v2034_v47, %v1993_v6 }
0x265c   : > { %v2074_v48 = vmul.f32 %v2050_v36, %v2035_v19 }
0x265e   : > { %2075 = vadd.xlane.f32.xlu1 %v2074_v48  ;;  %v2042_v62 = vpop.xlane.xlu0 %2041 }
0x265f   : > { %v2043_v49 = vsel %vm2011_vm13, %v2042_v62, %v2001_v15 }
0x2660   : > { %v2082_v50 = vmul.f32 %v2050_v36, %v2043_v49 }
0x2662   : > { %2083 = vadd.xlane.f32.xlu1 %v2082_v50  ;;  %v2133_v50 = vld [vmem:[#allocation2 + $0x46] ss:$0 sm:$0xff] }
0x26b9   : > { %v2022_v51 = vpop.xlane.xlu1 %2021 }
0x26ba   : > { %v2023_v39 = vsel %vm2011_vm13, %v2022_v51, %v1981_v21  ;;  %v2134_v51 = vxor.u32 2147483648, %v2133_v50 }
0x26bb   : > { %v2062_v53 = vmul.f32 %v2050_v36, %v2023_v39 }
0x26bd   : > { %2063 = vadd.xlane.f32.xlu0 %v2062_v53 }
0x26c1   : > { %v2030_v55 = vpop.xlane.xlu1 %2029 }
0x26c2   : > { %v2031_v57 = vsel %vm2011_vm13, %v2030_v55, %v1989_v25 }
0x26c3   : > { %v2070_v61 = vmul.f32 %v2050_v36, %v2031_v57 }
0x26c5   : > { %2071 = vadd.xlane.f32.xlu0 %v2070_v61 }
0x26c9   : > { %v2038_v63 = vpop.xlane.xlu1 %2037 }
0x26ca   : > { %v2039_v0 = vsel %vm2011_vm13, %v2038_v63, %v1997_v28 }
0x26cb   : > { %v2078_v2 = vmul.f32 %v2050_v36, %v2039_v0 }
0x26cd   : > { %2079 = vadd.xlane.f32.xlu0 %v2078_v2  ;;  %v2014_v4 = vpop.xlane.xlu1 %2013 }
0x26ce   : > { %v2015_v5 = vsel %vm2011_vm13, %v2014_v4, %v1973_v30 }
0x26cf   : > { %v2054_v6 = vmul.f32 %v2050_v36, %v2015_v5 }
0x26d1   : > { %2055 = vadd.xlane.f32.xlu0 %v2054_v6  ;;  %v2046_v8 = vpop.xlane.xlu1 %2045 }
0x26d2   : > { %v2047_v12 = vsel %vm2011_vm13, %v2046_v8, %v2005_v33 }
0x26d3   : > { %v2086_v15 = vmul.f32 %v2050_v36, %v2047_v12 }
0x26d5   : > { %2087 = vadd.xlane.f32.xlu0 %v2086_v15 }
0x26e3   : > { %v2060_v21 = vpop.xlane.xlu1 %2059 }
0x26e4   : > { %v2061_v22 = vsel %vm2053_vm14, %v2060_v21, %v2019_v41 }
0x26e5   : > { %v2100_v24 = vmul.f32 %v2092_v20, %v2061_v22 }
0x26e7   : > { %2101 = vadd.xlane.f32.xlu0 %v2100_v24  ;;  %v2068_v25 = vpop.xlane.xlu1 %2067 }
0x26e8   : > { %v2069_v26 = vsel %vm2053_vm14, %v2068_v25, %v2027_v43 }
0x26e9   : > { %v2108_v27 = vmul.f32 %v2092_v20, %v2069_v26 }
0x26eb   : > { %2109 = vadd.xlane.f32.xlu0 %v2108_v27  ;;  %v2076_v28 = vpop.xlane.xlu1 %2075 }
0x26ec   : > { %v2077_v11 = vsel %vm2053_vm14, %v2076_v28, %v2035_v19 }
0x26ed   : > { %v2116_v29 = vmul.f32 %v2092_v20, %v2077_v11 }
0x26ef   : > { %2117 = vadd.xlane.f32.xlu0 %v2116_v29  ;;  %v2084_v30 = vpop.xlane.xlu1 %2083 }
0x26f0   : > { %v2085_v31 = vsel %vm2053_vm14, %v2084_v30, %v2043_v49 }
0x26f1   : > { %v2124_v32 = vmul.f32 %v2092_v20, %v2085_v31 }
0x26f3   : > { %2125 = vadd.xlane.f32.xlu0 %v2124_v32  ;;  %v2175_v32 = vld [vmem:[#allocation2 + $0x47] ss:$0 sm:$0xff] }
0x274a   : > { %v2064_v33 = vpop.xlane.xlu0 %2063 }
0x274b   : > { %v2065_v34 = vsel %vm2053_vm14, %v2064_v33, %v2023_v39  ;;  %v2176_v33 = vxor.u32 2147483648, %v2175_v32 }
0x274c   : > { %v2104_v35 = vmul.f32 %v2092_v20, %v2065_v34 }
0x274e   : > { %2105 = vadd.xlane.f32.xlu1 %v2104_v35 }
0x2752   : > { %v2072_v36 = vpop.xlane.xlu0 %2071 }
0x2753   : > { %v2073_v37 = vsel %vm2053_vm14, %v2072_v36, %v2031_v57 }
0x2754   : > { %v2112_v41 = vmul.f32 %v2092_v20, %v2073_v37 }
0x2756   : > { %2113 = vadd.xlane.f32.xlu1 %v2112_v41 }
0x275a   : > { %v2080_v23 = vpop.xlane.xlu0 %2079 }
0x275b   : > { %v2081_v42 = vsel %vm2053_vm14, %v2080_v23, %v2039_v0 }
0x275c   : > { %v2120_v43 = vmul.f32 %v2092_v20, %v2081_v42 }
0x275e   : > { %2121 = vadd.xlane.f32.xlu1 %v2120_v43  ;;  %v2056_v45 = vpop.xlane.xlu0 %2055 }
0x275f   : > { %v2057_v47 = vsel %vm2053_vm14, %v2056_v45, %v2015_v5 }
0x2760   : > { %v2096_v19 = vmul.f32 %v2092_v20, %v2057_v47 }
0x2762   : > { %2097 = vadd.xlane.f32.xlu1 %v2096_v19  ;;  %v2088_v48 = vpop.xlane.xlu0 %2087 }
0x2763   : > { %v2089_v62 = vsel %vm2053_vm14, %v2088_v48, %v2047_v12 }
0x2764   : > { %v2128_v49 = vmul.f32 %v2092_v20, %v2089_v62 }
0x2766   : > { %2129 = vadd.xlane.f32.xlu1 %v2128_v49 }
0x2774   : > { %v2102_v39 = vpop.xlane.xlu0 %2101 }
0x2775   : > { %v2103_v53 = vsel %vm2095_vm15, %v2102_v39, %v2061_v22 }
0x2776   : > { %v2142_v55 = vmul.f32 %v2134_v51, %v2103_v53 }
0x2778   : > { %2143 = vadd.xlane.f32.xlu1 %v2142_v55  ;;  %v2110_v57 = vpop.xlane.xlu0 %2109 }
0x2779   : > { %v2111_v61 = vsel %vm2095_vm15, %v2110_v57, %v2069_v26 }
0x277a   : > { %v2150_v63 = vmul.f32 %v2134_v51, %v2111_v61 }
0x277c   : > { %2151 = vadd.xlane.f32.xlu1 %v2150_v63  ;;  %v2118_v0 = vpop.xlane.xlu0 %2117 }
0x277d   : > { %v2119_v2 = vsel %vm2095_vm15, %v2118_v0, %v2077_v11 }
0x277e   : > { %v2158_v4 = vmul.f32 %v2134_v51, %v2119_v2 }
0x2780   : > { %2159 = vadd.xlane.f32.xlu1 %v2158_v4  ;;  %v2126_v5 = vpop.xlane.xlu0 %2125 }
0x2781   : > { %v2127_v6 = vsel %vm2095_vm15, %v2126_v5, %v2085_v31 }
0x2782   : > { %v2166_v8 = vmul.f32 %v2134_v51, %v2127_v6 }
0x2784   : > { %2167 = vadd.xlane.f32.xlu1 %v2166_v8 }
0x27db   : > { %v2106_v12 = vpop.xlane.xlu1 %2105 }
0x27dc   : > { %v2107_v15 = vsel %vm2095_vm15, %v2106_v12, %v2065_v34 }
0x27dd   : > { %v2146_v18 = vmul.f32 %v2134_v51, %v2107_v15 }
0x27df   : > { %2147 = vadd.xlane.f32.xlu0 %v2146_v18 }
0x27e3   : > { %v2114_v20 = vpop.xlane.xlu1 %2113 }
0x27e4   : > { %v2115_v21 = vsel %vm2095_vm15, %v2114_v20, %v2073_v37 }
0x27e5   : > { %v2154_v22 = vmul.f32 %v2134_v51, %v2115_v21 }
0x27e7   : > { %2155 = vadd.xlane.f32.xlu0 %v2154_v22 }
0x27eb   : > { %v2122_v24 = vpop.xlane.xlu1 %2121 }
0x27ec   : > { %v2123_v25 = vsel %vm2095_vm15, %v2122_v24, %v2081_v42 }
0x27ed   : > { %v2162_v26 = vmul.f32 %v2134_v51, %v2123_v25 }
0x27ef   : > { %2163 = vadd.xlane.f32.xlu0 %v2162_v26  ;;  %v2098_v27 = vpop.xlane.xlu1 %2097 }
0x27f0   : > { %v2099_v28 = vsel %vm2095_vm15, %v2098_v27, %v2057_v47 }
0x27f1   : > { %v2138_v11 = vmul.f32 %v2134_v51, %v2099_v28 }
0x27f3   : > { %2139 = vadd.xlane.f32.xlu0 %v2138_v11  ;;  %v2130_v29 = vpop.xlane.xlu1 %2129 }
0x27f4   : > { %v2131_v30 = vsel %vm2095_vm15, %v2130_v29, %v2089_v62 }
0x27f5   : > { %v2170_v31 = vmul.f32 %v2134_v51, %v2131_v30 }
0x27f7   : > { %2171 = vadd.xlane.f32.xlu0 %v2170_v31 }
0x2805   : > { %v2144_v34 = vpop.xlane.xlu1 %2143 }
0x2806   : > { %v2145_v35 = vsel %vm2137_vm0, %v2144_v34, %v2103_v53 }
0x2807   : > { %v2184_v36 = vmul.f32 %v2176_v33, %v2145_v35 }
0x2809   : > { %2185 = vadd.xlane.f32.xlu0 %v2184_v36  ;;  %v2152_v37 = vpop.xlane.xlu1 %2151 }
0x280a   : > { %v2153_v41 = vsel %vm2137_vm0, %v2152_v37, %v2111_v61 }
0x280b   : > { %v2192_v23 = vmul.f32 %v2176_v33, %v2153_v41 }
0x280d   : > { %2193 = vadd.xlane.f32.xlu0 %v2192_v23  ;;  %v2160_v42 = vpop.xlane.xlu1 %2159 }
0x280e   : > { %v2161_v43 = vsel %vm2137_vm0, %v2160_v42, %v2119_v2 }
0x280f   : > { %v2200_v45 = vmul.f32 %v2176_v33, %v2161_v43 }
0x2811   : > { %2201 = vadd.xlane.f32.xlu0 %v2200_v45  ;;  %v2168_v47 = vpop.xlane.xlu1 %2167 }
0x2812   : > { %v2169_v19 = vsel %vm2137_vm0, %v2168_v47, %v2127_v6 }
0x2813   : > { %v2208_v48 = vmul.f32 %v2176_v33, %v2169_v19 }
0x2815   : > { %2209 = vadd.xlane.f32.xlu0 %v2208_v48 }
0x286c   : > { %v2148_v62 = vpop.xlane.xlu0 %2147 }
0x286d   : > { %v2149_v49 = vsel %vm2137_vm0, %v2148_v62, %v2107_v15 }
0x286e   : > { %v2188_v50 = vmul.f32 %v2176_v33, %v2149_v49 }
0x2870   : > { %2189 = vadd.xlane.f32.xlu1 %v2188_v50 }
0x2874   : > { %v2156_v51 = vpop.xlane.xlu0 %2155 }
0x2875   : > { %v2157_v39 = vsel %vm2137_vm0, %v2156_v51, %v2115_v21 }
0x2876   : > { %v2196_v53 = vmul.f32 %v2176_v33, %v2157_v39 }
0x2878   : > { %2197 = vadd.xlane.f32.xlu1 %v2196_v53 }
0x287c   : > { %v2164_v55 = vpop.xlane.xlu0 %2163 }
0x287d   : > { %v2165_v57 = vsel %vm2137_vm0, %v2164_v55, %v2123_v25 }
0x287e   : > { %v2204_v61 = vmul.f32 %v2176_v33, %v2165_v57 }
0x2880   : > { %2205 = vadd.xlane.f32.xlu1 %v2204_v61  ;;  %v2140_v63 = vpop.xlane.xlu0 %2139 }
0x2881   : > { %v2141_v0 = vsel %vm2137_vm0, %v2140_v63, %v2099_v28 }
0x2882   : > { %v2180_v2 = vmul.f32 %v2176_v33, %v2141_v0 }
0x2884   : > { %2181 = vadd.xlane.f32.xlu1 %v2180_v2  ;;  %v2172_v4 = vpop.xlane.xlu0 %2171 }
0x2885   : > { %v2173_v5 = vsel %vm2137_vm0, %v2172_v4, %v2131_v30 }
0x2886   : > { %v2212_v6 = vmul.f32 %v2176_v33, %v2173_v5 }
0x2888   : > { %2213 = vadd.xlane.f32.xlu1 %v2212_v6 }
0x2896   : > { %v2186_v8 = vpop.xlane.xlu0 %2185 }
0x2897   : > { %v2187_v12 = vsel %vm2179_vm2, %v2186_v8, %v2145_v35 }
0x2898   : > { %v2222_v15 = vmul.f32 %v2581_v54, %v2187_v12 }
0x289a   : > { %v2224_v18 = vsel %vm2223_vm3, %v2187_v12, %v2222_v15  ;;  %v2194_v20 = vpop.xlane.xlu0 %2193 }
0x289b   : > { %2326 = vst [vmem:[%s3338_s24 + $0x8] sm:$0xff] %v2224_v18  ;;  %v2195_v21 = vsel %vm2179_vm2, %v2194_v20, %v2153_v41 }
0x289c   : > { %v2234_v22 = vmul.f32 %v2634_v46, %v2195_v21 }
0x289e   : > { %v2236_v24 = vsel %vm2235_vm4, %v2195_v21, %v2234_v22  ;;  %v2202_v25 = vpop.xlane.xlu0 %2201 }
0x289f   : > { %2330 = vst [vmem:[%s3338_s24 + $0x18] sm:$0xff] %v2236_v24  ;;  %v2203_v54 = vsel %vm2179_vm2, %v2202_v25, %v2161_v43 }
0x28a0   : > { %v2246_v52 = vmul.f32 %v2758_v40, %v2203_v54 }
0x28a2   : > { %v2248_v26 = vsel %vm2247_vm5, %v2203_v54, %v2246_v52  ;;  %v2210_v27 = vpop.xlane.xlu0 %2209 }
0x28a3   : > { %2334 = vst [vmem:[%s3338_s24 + $0x28] sm:$0xff] %v2248_v26  ;;  %v2211_v28 = vsel %vm2179_vm2, %v2210_v27, %v2169_v19 }
0x28a4   : > { %v2258_v44 = vmul.f32 %v3014_v60, %v2211_v28 }
0x28a6   : > { %v2260_v46 = vsel %vm2259_vm6, %v2211_v28, %v2258_v44 }
0x28a7   : > { %2338 = vst [vmem:[%s3338_s24 + $0x38] sm:$0xff] %v2260_v46 }
0x28fd   : > { %v2190_v11 = vpop.xlane.xlu1 %2189 }
0x28fe   : > { %v2191_v29 = vsel %vm2179_vm2, %v2190_v11, %v2149_v49 }
0x28ff   : > { %v2228_v40 = vmul.f32 %v2604_v9, %v2191_v29 }
0x2901   : > { %v2230_v38 = vsel %vm2229_vm7, %v2191_v29, %v2228_v40 }
0x2902   : > { %2328 = vst [vmem:[%s3338_s24 + $0x10] sm:$0xff] %v2230_v38 }
0x2905   : > { %v2198_v30 = vpop.xlane.xlu1 %2197 }
0x2906   : > { %v2199_v31 = vsel %vm2179_vm2, %v2198_v30, %v2157_v39 }
0x2907   : > { %v2240_v60 = vmul.f32 %v2668_v3, %v2199_v31 }
0x2909   : > { %v2242_v58 = vsel %vm2241_vm8, %v2199_v31, %v2240_v60 }
0x290a   : > { %2332 = vst [vmem:[%s3338_s24 + $0x20] sm:$0xff] %v2242_v58 }
0x290d   : > { %v2206_v32 = vpop.xlane.xlu1 %2205 }
0x290e   : > { %v2207_v9 = vsel %vm2179_vm2, %v2206_v32, %v2165_v57 }
0x290f   : > { %v2252_v7 = vmul.f32 %v2885_v17, %v2207_v9 }
0x2911   : > { %v2254_v33 = vsel %vm2253_vm9, %v2207_v9, %v2252_v7  ;;  %v2182_v34 = vpop.xlane.xlu1 %2181 }
0x2912   : > { %2336 = vst [vmem:[%s3338_s24 + $0x30] sm:$0xff] %v2254_v33  ;;  %v2183_v3 = vsel %vm2179_vm2, %v2182_v34, %v2141_v0 }
0x2913   : > { %v2217_v35 = vmul.f32 %v2561_v16, %v2183_v3 }
0x2915   : > { %v2219_v1 = vsel %vm2218_vm1, %v2183_v3, %v2217_v35  ;;  %v2214_v36 = vpop.xlane.xlu1 %2213 }
0x2916   : > { %2324 = vst [vmem:[%s3338_s24] sm:$0xff] %v2219_v1  ;;  %v2215_v37 = vsel %vm2179_vm2, %v2214_v36, %v2173_v5 }
0x2917   : > { %v2264_v17 = vmul.f32 %v3175_v59, %v2215_v37 }
0x2919   : > { %v2266_v13 = vsel %vm2265_vm10, %v2215_v37, %v2264_v17 }
0x291a   : > { %2340 = vst [vmem:[%s3338_s24 + $0x40] sm:$0xff] %v2266_v13 }
0x291b PF: > { %s7_s8 = sadd.s32 1, %s2501_s8   ;;  %s3394_s6 = smov %s2497_s7 }
0x291c   : > { %p4_p5 = scmp.ge.s32.totalorder %s7_s8, 4   ;;  %s3395_s7 = smov %s3397_s10 }
0x291e   :  { %6 = sbr.rel (!%p4_p5) target bundleno = 2 (0x2), region = 213 }

// kernel: custom-call.15
= control target key start
LH: loop header
LB: loop body
LE: loop exit
PB: predicated region body
PF: predicated region fallthrough
CT: control target
= control target key end

     0   :  { %s2514_s6 = smov 0   ;;  %s2516_s7 = smov 0   ;;  %s3491_s0 = inlined_call_operand.vmem [shape: f32[2,1,72,72], index: 0, kind: input, shape index: {}]   ;;  %s3492_s1 = inlined_call_operand.vmem [shape: f32[2,1,72,72], index: 1, kind: output, shape index: {}]  }
   0x1   :  { %s2518_s8 = smov 0  }
   0x2 LB: > { %s2406_s9 = sadd.s32 4294967295, %s2500_s8   ;;  %s33_s10 = sadd.s32 1, %s2496_s7  ;;  %s2500_s8 = sphi %s2518_s8, %s7_s8   ;;  %s2496_s7 = sphi %s2516_s7, %s3494_s7   ;;  %s2492_s6 = sphi %s2514_s6, %s3493_s6  }
   0x3   : > { %p35_p0 = scmp.ge.s32.totalorder %s33_s10, 2  ;;  %p2408_p1 = scmp.ge.s32.totalorder %s2500_s8, 2 }
   0x4   : > { %s49_s11 = sand.u32 (!%p2408_p1), 1, %s2500_s8   ;;  %s2431_s12 = smul.u32 (!%p2408_p1), 72, %s2496_s7 }
   0x5   : > { %s3496_s10 = smov (%p35_p0, %s33_s10), 0  ;;  %47 = sbr.rel (%p2408_p1) target bundleno = 14 (0xe), region = 16 }
   0x6   : > { %s2430_s13 = smul.u32 (!%p2408_p1), 72, %s49_s11  ;;  %s58_s16 = scalar_lea.vmem (!%p2408_p1), %s3491_s0, %s2431_s12 }
   0x7   : > { %v102_v0 = vld [vmem:[%s58_s16] sm:$0xff] (!%p2408_p1)  ;;  %v104_v1 = vld [vmem:[%s58_s16 + $0x8] sm:$0xff] (!%p2408_p1)  ;;  %v106_v2 = vld [vmem:[%s58_s16 + $0x10] sm:$0xff] (!%p2408_p1) }
   0x8   : > { %s51_s17 = scalar_lea.vmem (!%p2408_p1), [#allocation0], %s2430_s13  ;;  %v108_v3 = vld [vmem:[%s58_s16 + $0x18] sm:$0xff] (!%p2408_p1)  ;;  %v110_v4 = vld [vmem:[%s58_s16 + $0x20] sm:$0xff] (!%p2408_p1)  ;;  %v112_v5 = vld [vmem:[%s58_s16 + $0x28] sm:$0xff] (!%p2408_p1) }
   0x9   : > { %103 = vst [vmem:[%s51_s17] sm:$0xff] (!%p2408_p1), %v102_v0  ;;  %105 = vst [vmem:[%s51_s17 + $0x8] sm:$0xff] (!%p2408_p1), %v104_v1  ;;  %v114_v6 = vld [vmem:[%s58_s16 + $0x30] sm:$0xff] (!%p2408_p1)  ;;  %v116_v7 = vld [vmem:[%s58_s16 + $0x38] sm:$0xff] (!%p2408_p1) }
   0xa   : > { %107 = vst [vmem:[%s51_s17 + $0x10] sm:$0xff] (!%p2408_p1), %v106_v2  ;;  %109 = vst [vmem:[%s51_s17 + $0x18] sm:$0xff] (!%p2408_p1), %v108_v3  ;;  %v118_v8 = vld [vmem:[%s58_s16 + $0x40] sm:$0xff] (!%p2408_p1) }
   0xb   : > { %111 = vst [vmem:[%s51_s17 + $0x20] sm:$0xff] (!%p2408_p1), %v110_v4  ;;  %113 = vst [vmem:[%s51_s17 + $0x28] sm:$0xff] (!%p2408_p1), %v112_v5 }
   0xc   : > { %115 = vst [vmem:[%s51_s17 + $0x30] sm:$0xff] %v114_v6  ;;  %117 = vst [vmem:[%s51_s17 + $0x38] sm:$0xff] %v116_v7 }
   0xd   : > { %119 = vst [vmem:[%s51_s17 + $0x40] sm:$0xff] %v118_v8 }
   0xe PF: > { %p2410_p2 = scmp.ge.s32.totalorder %s2500_s8, 1  ;;  %p124_p3 = scmp.lt.s32.totalorder %s2500_s8, 3 }
  0x10   : > { %p125_p4 = pnand %p2410_p2, %p124_p3 }
  0x12   : > { %128 = sbr.rel (%p125_p4) target bundleno = 10497 (0x2901), region = 54 }
  0x19   : > { %s131_s18 = sand.u32 1, %s2406_s9   ;;  %v142_v9 = vlaneseq  ;;  %v2502_v19 = vmov -1.0   ;;  %v2503_v57 = vmov 0.0   ;;  %s2433_s21 = smul.u32 72, %s2492_s6 }
  0x1a   : > { %s2432_s19 = smul.u32 72, %s131_s18 }
  0x1b   : > { %v2543_v10 = vand.u32 127, %v142_v9  ;;  %v2545_v11 = vshrl.u32 %v142_v9, 7  ;;  %s3435_s24 = scalar_lea.vmem %s3492_s1, %s2433_s21 }
  0x1c   : > { %s2549_s20 = scalar_lea.vmem [#allocation0], %s2432_s19 }
  0x1d   : > { %vm144_vm0 = vcmp.lt.s32.totalorder %v2543_v10, 72  ;;  %v275_v12 = vadd.s32 64, %v2545_v11  ;;  %v2418_v13 = vld [vmem:[%s2549_s20 + $0x40] sm:$0xff]  ;;  %vm351_vm4 = vcmp.eq.s32.totalorder %v2543_v10, 71  ;;  %vm359_vm6 = vcmp.eq.s32.totalorder %v2543_v10, 70  ;;  %v2417_v46 = vld [vmem:[%s2549_s20 + $0x38] sm:$0xff] }
  0x1e   : > { %v352_v20 = vsel %vm351_vm4, 1.0, %v2502_v19  ;;  %vm369_vm7 = vcmp.eq.s32.totalorder %v2543_v10, 69  ;;  %vm379_vm8 = vcmp.eq.s32.totalorder %v2543_v10, 68  ;;  %vm389_vm9 = vcmp.eq.s32.totalorder %v2543_v10, 67 }
  0x1f   : > { %vm276_vm1 = vcmp.eq.s32.totalorder %v275_v12, %v2543_v10  ;;  %vm281_vm2 = vcmp.le.s32.totalorder %v275_v12, %v2543_v10  ;;  %vm348_vm5 = vcmp.eq.s32.totalorder %v2543_v10, %v275_v12  ;;  %v259_v41 = vadd.s32 56, %v2545_v11 }
  0x20   : > { %v278_v14 = vsel %vm276_vm1, %v2418_v13, 0.0  ;;  %vm282_vm3 = vmand %vm281_vm2, %vm144_vm0  ;;  %v353_v21 = vsel %vm348_vm5, %v352_v20, 0.0  ;;  %vm399_vm11 = vcmp.eq.s32.totalorder %v2543_v10, 66  ;;  %vm409_vm15 = vcmp.eq.s32.totalorder %v2543_v10, 65 }
  0x21   : > { %v283_v15 = vsel %vm282_vm3, %v2418_v13, 0.0  ;;  %279 = vadd.xlane.f32.xlu0 %v278_v14  ;;  %vm260_vm10 = vcmp.eq.s32.totalorder %v259_v41, %v2543_v10  ;;  %vm265_vm12 = vcmp.le.s32.totalorder %v259_v41, %v2543_v10  ;;  %vm341_vm14 = vcmp.eq.s32.totalorder %v2543_v10, %v259_v41 }
  0x22   : > { %v262_v47 = vsel %vm260_vm10, %v2417_v46, 0.0  ;;  %vm266_vm13 = vmand %vm265_vm12, %vm144_vm0  ;;  %v342_v58 = vsel %vm341_vm14, -1.0, %v2503_v57  ;;  %vm429_vm1 = vcmp.eq.s32.totalorder %v2543_v10, 63  ;;  %vm419_vm2 = vcmp.eq.s32.totalorder %v2543_v10, 64 }
  0x23   : > { %v267_v54 = vsel %vm266_vm13, %v2417_v46, 0.0  ;;  %vm443_vm3 = vcmp.eq.s32.totalorder %v2543_v10, 62  ;;  %vm457_vm4 = vcmp.eq.s32.totalorder %v2543_v10, 61  ;;  %vm471_vm5 = vcmp.eq.s32.totalorder %v2543_v10, 60 }
  0x24   : > { %vm527_vm13 = vcmp.eq.s32.totalorder %v2543_v10, 56  ;;  %vm541_vm14 = vcmp.eq.s32.totalorder %v2543_v10, 55 }
  0xae   : > { %v2556_v16 = vpop.xlane.xlu0 %279 }
  0xaf   : > { %2460 = vrcp.f32 %v2556_v16 }
  0xb9   : > { %v2559_v17 = vpop.eup %2460 }
  0xba   : > { %v285_v18 = vmul.f32 %v2559_v17, %v283_v15 }
  0xbc   : > { %286 = vst [vmem:[#allocation2 + $0x40] sm:$0xff] %v285_v18 }
  0xc3   : > { %v355_v22 = vld [vmem:[#allocation2 + $0x46] ss:$0 sm:$0xff]  ;;  %v365_v25 = vld [vmem:[#allocation2 + $0x45] ss:$0 sm:$0xff]  ;;  %v375_v30 = vld [vmem:[#allocation2 + $0x44] ss:$0 sm:$0xff] }
  0xc4   : > { %v356_v23 = vxor.u32 2147483648, %v355_v22  ;;  %v366_v27 = vxor.u32 2147483648, %v365_v25  ;;  %v376_v32 = vxor.u32 2147483648, %v375_v30  ;;  %v385_v35 = vld [vmem:[#allocation2 + $0x43] ss:$0 sm:$0xff] }
  0xc5   : > { %v386_v37 = vxor.u32 2147483648, %v385_v35  ;;  %v395_v40 = vld [vmem:[#allocation2 + $0x42] ss:$0 sm:$0xff]  ;;  %v405_v48 = vld [vmem:[#allocation2 + $0x41] ss:$0 sm:$0xff] }
  0xc6   : > { %v360_v24 = vmul.f32 %v356_v23, %v353_v21  ;;  %v396_v43 = vxor.u32 2147483648, %v395_v40  ;;  %v406_v50 = vxor.u32 2147483648, %v405_v48  ;;  %v415_v62 = vld [vmem:[#allocation2 + $0x40] ss:$0 sm:$0xff]  ;;  %v243_v48 = vadd.s32 48, %v2545_v11 }
  0xc7   : > { %v416_v0 = vxor.u32 2147483648, %v415_v62 }
  0xc8   : > { %361 = vadd.xlane.f32.xlu0 %v360_v24  ;;  %vm334_vm12 = vcmp.eq.s32.totalorder %v2543_v10, %v243_v48 }
 0x155   : > { %v362_v26 = vpop.xlane.xlu0 %361 }
 0x156   : > { %v363_v28 = vsel %vm359_vm6, %v362_v26, %v353_v21  ;;  %vm485_vm6 = vcmp.eq.s32.totalorder %v2543_v10, 59 }
 0x157   : > { %v370_v29 = vmul.f32 %v366_v27, %v363_v28 }
 0x159   : > { %371 = vadd.xlane.f32.xlu1 %v370_v29 }
 0x1e6   : > { %v372_v31 = vpop.xlane.xlu1 %371 }
 0x1e7   : > { %v373_v33 = vsel %vm369_vm7, %v372_v31, %v363_v28  ;;  %vm499_vm7 = vcmp.eq.s32.totalorder %v2543_v10, 58 }
 0x1e8   : > { %v380_v34 = vmul.f32 %v376_v32, %v373_v33 }
 0x1ea   : > { %381 = vadd.xlane.f32.xlu1 %v380_v34 }
 0x277   : > { %v382_v36 = vpop.xlane.xlu1 %381 }
 0x278   : > { %v383_v38 = vsel %vm379_vm8, %v382_v36, %v373_v33  ;;  %vm244_vm8 = vcmp.eq.s32.totalorder %v243_v48, %v2543_v10 }
 0x279   : > { %v390_v39 = vmul.f32 %v386_v37, %v383_v38 }
 0x27b   : > { %391 = vadd.xlane.f32.xlu0 %v390_v39 }
 0x308   : > { %v392_v42 = vpop.xlane.xlu0 %391 }
 0x309   : > { %v393_v44 = vsel %vm389_vm9, %v392_v42, %v383_v38  ;;  %vm249_vm9 = vcmp.le.s32.totalorder %v243_v48, %v2543_v10 }
 0x30a   : > { %v400_v45 = vmul.f32 %v396_v43, %v393_v44  ;;  %vm250_vm10 = vmand %vm249_vm9, %vm144_vm0 }
 0x30c   : > { %401 = vadd.xlane.f32.xlu1 %v400_v45 }
 0x310   : > { %263 = vadd.xlane.f32.xlu1 %v262_v47 }
 0x399   : > { %v402_v49 = vpop.xlane.xlu1 %401 }
 0x39a   : > { %v403_v51 = vsel %vm399_vm11, %v402_v49, %v393_v44  ;;  %vm513_vm11 = vcmp.eq.s32.totalorder %v2543_v10, 57 }
 0x39b   : > { %v410_v52 = vmul.f32 %v406_v50, %v403_v51 }
 0x39d   : > { %411 = vadd.xlane.f32.xlu0 %v410_v52  ;;  %v2572_v53 = vpop.xlane.xlu1 %263 }
 0x39e   : > { %2462 = vrcp.f32 %v2572_v53 }
 0x3a8   : > { %v2578_v55 = vpop.eup %2462 }
 0x3a9   : > { %v269_v56 = vmul.f32 %v2578_v55, %v267_v54  ;;  %v2416_v54 = vld [vmem:[%s2549_s20 + $0x30] sm:$0xff] }
 0x3ab   : > { %270 = vst [vmem:[#allocation2 + $0x38] sm:$0xff] %v269_v56  ;;  %v246_v56 = vsel %vm244_vm8, %v2416_v54, 0.0 }
 0x3b2   : > { %v425_v59 = vld [vmem:[#allocation2 + $0x3f] ss:$0 sm:$0xff]  ;;  %v439_v3 = vld [vmem:[#allocation2 + $0x3e] ss:$0 sm:$0xff]  ;;  %v453_v13 = vld [vmem:[#allocation2 + $0x3d] ss:$0 sm:$0xff] }
 0x3b3   : > { %v426_v60 = vxor.u32 2147483648, %v425_v59  ;;  %v440_v4 = vxor.u32 2147483648, %v439_v3  ;;  %v454_v15 = vxor.u32 2147483648, %v453_v13  ;;  %v467_v23 = vld [vmem:[#allocation2 + $0x3c] ss:$0 sm:$0xff] }
 0x3b4   : > { %v468_v25 = vxor.u32 2147483648, %v467_v23  ;;  %v481_v31 = vld [vmem:[#allocation2 + $0x3b] ss:$0 sm:$0xff]  ;;  %v495_v39 = vld [vmem:[#allocation2 + $0x3a] ss:$0 sm:$0xff] }
 0x3b5   : > { %v430_v61 = vmul.f32 %v426_v60, %v342_v58  ;;  %v482_v33 = vxor.u32 2147483648, %v481_v31  ;;  %v496_v41 = vxor.u32 2147483648, %v495_v39  ;;  %v509_v47 = vld [vmem:[#allocation2 + $0x39] ss:$0 sm:$0xff] }
 0x3b6   : > { %v510_v50 = vxor.u32 2147483648, %v509_v47 }
 0x3b7   : > { %431 = vadd.xlane.f32.xlu1 %v430_v61 }
 0x42a   : > { %v412_v63 = vpop.xlane.xlu0 %411 }
 0x42b   : > { %v413_v1 = vsel %vm409_vm15, %v412_v63, %v403_v51  ;;  %v251_v63 = vsel %vm250_vm10, %v2416_v54, 0.0  ;;  %vm559_vm15 = vcmp.eq.s32.totalorder %v2543_v10, 54  ;;  %vm667_vm10 = vcmp.eq.s32.totalorder %v2543_v10, 48 }
 0x42c   : > { %v420_v2 = vmul.f32 %v416_v0, %v413_v1 }
 0x42e   : > { %421 = vadd.xlane.f32.xlu0 %v420_v2 }
 0x444   : > { %v432_v5 = vpop.xlane.xlu1 %431 }
 0x445   : > { %v433_v6 = vsel %vm429_vm1, %v432_v5, %v342_v58 }
 0x446   : > { %v444_v7 = vmul.f32 %v440_v4, %v433_v6 }
 0x448   : > { %445 = vadd.xlane.f32.xlu1 %v444_v7 }
 0x4bb   : > { %v422_v8 = vpop.xlane.xlu0 %421 }
 0x4bc   : > { %v423_v9 = vsel %vm419_vm2, %v422_v8, %v413_v1  ;;  %vm595_vm2 = vcmp.eq.s32.totalorder %v2543_v10, 52 }
 0x4bd   : > { %v434_v12 = vmul.f32 %v426_v60, %v423_v9 }
 0x4bf   : > { %435 = vadd.xlane.f32.xlu0 %v434_v12  ;;  %v335_v12 = vsel %vm334_vm12, -1.0, %v2503_v57  ;;  %vm707_vm12 = vcmp.eq.s32.totalorder %v2543_v10, 46 }
 0x4d5   : > { %v446_v14 = vpop.xlane.xlu1 %445 }
 0x4d6   : > { %v447_v18 = vsel %vm443_vm3, %v446_v14, %v433_v6 }
 0x4d7   : > { %v458_v19 = vmul.f32 %v454_v15, %v447_v18 }
 0x4d9   : > { %459 = vadd.xlane.f32.xlu1 %v458_v19 }
 0x54c   : > { %v436_v20 = vpop.xlane.xlu0 %435 }
 0x54d   : > { %v437_v21 = vsel %vm429_vm1, %v436_v20, %v423_v9  ;;  %vm577_vm1 = vcmp.eq.s32.totalorder %v2543_v10, 53 }
 0x54e   : > { %v448_v22 = vmul.f32 %v440_v4, %v437_v21  ;;  %v523_v4 = vld [vmem:[#allocation2 + $0x38] ss:$0 sm:$0xff] }
 0x54f   : > { %v524_v8 = vxor.u32 2147483648, %v523_v4 }
 0x550   : > { %449 = vadd.xlane.f32.xlu0 %v448_v22 }
 0x566   : > { %v460_v24 = vpop.xlane.xlu1 %459 }
 0x567   : > { %v461_v26 = vsel %vm457_vm4, %v460_v24, %v447_v18 }
 0x568   : > { %v472_v27 = vmul.f32 %v468_v25, %v461_v26 }
 0x56a   : > { %473 = vadd.xlane.f32.xlu1 %v472_v27 }
 0x5dd   : > { %v450_v28 = vpop.xlane.xlu0 %449 }
 0x5de   : > { %v451_v29 = vsel %vm443_vm3, %v450_v28, %v437_v21  ;;  %vm613_vm3 = vcmp.eq.s32.totalorder %v2543_v10, 51 }
 0x5df   : > { %v462_v30 = vmul.f32 %v454_v15, %v451_v29 }
 0x5e1   : > { %463 = vadd.xlane.f32.xlu0 %v462_v30 }
 0x5f7   : > { %v474_v32 = vpop.xlane.xlu1 %473 }
 0x5f8   : > { %v475_v34 = vsel %vm471_vm5, %v474_v32, %v461_v26 }
 0x5f9   : > { %v486_v35 = vmul.f32 %v482_v33, %v475_v34 }
 0x5fb   : > { %487 = vadd.xlane.f32.xlu1 %v486_v35 }
 0x66e   : > { %v464_v36 = vpop.xlane.xlu0 %463 }
 0x66f   : > { %v465_v37 = vsel %vm457_vm4, %v464_v36, %v451_v29  ;;  %vm631_vm4 = vcmp.eq.s32.totalorder %v2543_v10, 50 }
 0x670   : > { %v476_v38 = vmul.f32 %v468_v25, %v465_v37 }
 0x672   : > { %477 = vadd.xlane.f32.xlu0 %v476_v38 }
 0x688   : > { %v488_v40 = vpop.xlane.xlu1 %487 }
 0x689   : > { %v489_v42 = vsel %vm485_vm6, %v488_v40, %v475_v34 }
 0x68a   : > { %v500_v43 = vmul.f32 %v496_v41, %v489_v42 }
 0x68c   : > { %501 = vadd.xlane.f32.xlu1 %v500_v43 }
 0x6ff   : > { %v478_v44 = vpop.xlane.xlu0 %477 }
 0x700   : > { %v479_v45 = vsel %vm471_vm5, %v478_v44, %v465_v37 }
 0x701   : > { %v490_v46 = vmul.f32 %v482_v33, %v479_v45 }
 0x703   : > { %491 = vadd.xlane.f32.xlu0 %v490_v46 }
 0x719   : > { %v502_v49 = vpop.xlane.xlu1 %501 }
 0x71a   : > { %v503_v51 = vsel %vm499_vm7, %v502_v49, %v489_v42 }
 0x71b   : > { %v514_v52 = vmul.f32 %v510_v50, %v503_v51 }
 0x71d   : > { %515 = vadd.xlane.f32.xlu1 %v514_v52 }
 0x721   : > { %247 = vadd.xlane.f32.xlu1 %v246_v56 }
 0x790   : > { %v492_v58 = vpop.xlane.xlu0 %491 }
 0x791   : > { %v493_v59 = vsel %vm485_vm6, %v492_v58, %v479_v45  ;;  %vm649_vm6 = vcmp.eq.s32.totalorder %v2543_v10, 49 }
 0x792   : > { %v504_v60 = vmul.f32 %v496_v41, %v493_v59 }
 0x794   : > { %505 = vadd.xlane.f32.xlu0 %v504_v60 }
 0x7aa   : > { %v516_v61 = vpop.xlane.xlu1 %515 }
 0x7ab   : > { %v517_v7 = vsel %vm513_vm11, %v516_v61, %v503_v51 }
 0x7ac   : > { %v528_v13 = vmul.f32 %v524_v8, %v517_v7 }
 0x7ae   : > { %v2616_v62 = vpop.xlane.xlu1 %247 }
 0x7af   : > { %2464 = vrcp.f32 %v2616_v62 }
 0x7b9   : > { %v2622_v0 = vpop.eup %2464 }
 0x7ba   : > { %v253_v1 = vmul.f32 %v2622_v0, %v251_v63 }
 0x7bc   : > { %254 = vst [vmem:[#allocation2 + $0x30] sm:$0xff] %v253_v1 }
 0x7c3   : > { %v537_v5 = vld [vmem:[#allocation2 + $0x37] ss:$0 sm:$0xff]  ;;  %v555_v20 = vld [vmem:[#allocation2 + $0x36] ss:$0 sm:$0xff]  ;;  %v573_v33 = vld [vmem:[#allocation2 + $0x35] ss:$0 sm:$0xff] }
 0x7c4   : > { %v538_v9 = vxor.u32 2147483648, %v537_v5  ;;  %v556_v24 = vxor.u32 2147483648, %v555_v20  ;;  %v574_v36 = vxor.u32 2147483648, %v573_v33  ;;  %v591_v44 = vld [vmem:[#allocation2 + $0x34] ss:$0 sm:$0xff] }
 0x7c5   : > { %v592_v47 = vxor.u32 2147483648, %v591_v44  ;;  %v609_v58 = vld [vmem:[#allocation2 + $0x33] ss:$0 sm:$0xff] }
 0x7c6   : > { %v542_v14 = vmul.f32 %v538_v9, %v335_v12  ;;  %v610_v61 = vxor.u32 2147483648, %v609_v58 }
 0x821   : > { %v506_v2 = vpop.xlane.xlu0 %505 }
 0x822   : > { %v507_v3 = vsel %vm499_vm7, %v506_v2, %v493_v59 }
 0x823   : > { %v518_v6 = vmul.f32 %v510_v50, %v507_v3 }
 0x825   : > { %519 = vadd.xlane.f32.xlu0 %v518_v6 }
 0x829   : > { %529 = vadd.xlane.f32.xlu0 %v528_v13 }
 0x82d   : > { %543 = vadd.xlane.f32.xlu0 %v542_v14 }
 0x8b2   : > { %v520_v15 = vpop.xlane.xlu0 %519 }
 0x8b3   : > { %v521_v18 = vsel %vm513_vm11, %v520_v15, %v507_v3  ;;  %vm685_vm11 = vcmp.eq.s32.totalorder %v2543_v10, 47 }
 0x8b4   : > { %v532_v19 = vmul.f32 %v524_v8, %v521_v18 }
 0x8b6   : > { %v530_v21 = vpop.xlane.xlu0 %529  ;;  %533 = vadd.xlane.f32.xlu1 %v532_v19 }
 0x8b7   : > { %v531_v22 = vsel %vm527_vm13, %v530_v21, %v517_v7  ;;  %v627_v7 = vld [vmem:[#allocation2 + $0x32] ss:$0 sm:$0xff] }
 0x8b8   : > { %v546_v23 = vmul.f32 %v538_v9, %v531_v22 }
 0x8ba   : > { %547 = vadd.xlane.f32.xlu1 %v546_v23  ;;  %v544_v25 = vpop.xlane.xlu0 %543 }
 0x8bb   : > { %v545_v26 = vsel %vm541_vm14, %v544_v25, %v335_v12  ;;  %v628_v12 = vxor.u32 2147483648, %v627_v7 }
 0x8bc   : > { %v560_v27 = vmul.f32 %v556_v24, %v545_v26 }
 0x8be   : > { %561 = vadd.xlane.f32.xlu1 %v560_v27 }
 0x943   : > { %v534_v28 = vpop.xlane.xlu1 %533 }
 0x944   : > { %v535_v29 = vsel %vm527_vm13, %v534_v28, %v521_v18  ;;  %vm729_vm13 = vcmp.eq.s32.totalorder %v2543_v10, 45 }
 0x945   : > { %v550_v30 = vmul.f32 %v538_v9, %v535_v29 }
 0x947   : > { %551 = vadd.xlane.f32.xlu0 %v550_v30  ;;  %v548_v31 = vpop.xlane.xlu1 %547 }
 0x948   : > { %v549_v32 = vsel %vm541_vm14, %v548_v31, %v531_v22  ;;  %v645_v22 = vld [vmem:[#allocation2 + $0x31] ss:$0 sm:$0xff]  ;;  %v227_v31 = vadd.s32 40, %v2545_v11 }
 0x949   : > { %v564_v34 = vmul.f32 %v556_v24, %v549_v32  ;;  %v646_v25 = vxor.u32 2147483648, %v645_v22 }
 0x94a   : > { %vm228_vm5 = vcmp.eq.s32.totalorder %v227_v31, %v2543_v10  ;;  %vm233_vm7 = vcmp.le.s32.totalorder %v227_v31, %v2543_v10  ;;  %vm327_vm9 = vcmp.eq.s32.totalorder %v2543_v10, %v227_v31 }
 0x94b   : > { %565 = vadd.xlane.f32.xlu0 %v564_v34  ;;  %v562_v35 = vpop.xlane.xlu1 %561  ;;  %vm234_vm8 = vmand %vm233_vm7, %vm144_vm0  ;;  %vm839_vm7 = vcmp.eq.s32.totalorder %v2543_v10, 40 }
 0x94c   : > { %v563_v37 = vsel %vm559_vm15, %v562_v35, %v545_v26  ;;  %v2415_v35 = vld [vmem:[%s2549_s20 + $0x28] sm:$0xff] }
 0x94d   : > { %v578_v38 = vmul.f32 %v574_v36, %v563_v37 }
 0x94f   : > { %579 = vadd.xlane.f32.xlu0 %v578_v38 }
 0x9d4   : > { %v552_v39 = vpop.xlane.xlu0 %551 }
 0x9d5   : > { %v553_v40 = vsel %vm541_vm14, %v552_v39, %v535_v29  ;;  %vm751_vm14 = vcmp.eq.s32.totalorder %v2543_v10, 44 }
 0x9d6   : > { %v568_v41 = vmul.f32 %v556_v24, %v553_v40 }
 0x9d8   : > { %569 = vadd.xlane.f32.xlu1 %v568_v41  ;;  %v566_v42 = vpop.xlane.xlu0 %565 }
 0x9d9   : > { %v567_v43 = vsel %vm559_vm15, %v566_v42, %v549_v32 }
 0x9da   : > { %v582_v45 = vmul.f32 %v574_v36, %v567_v43 }
 0x9dc   : > { %583 = vadd.xlane.f32.xlu1 %v582_v45  ;;  %v580_v46 = vpop.xlane.xlu0 %579 }
 0x9dd   : > { %v581_v48 = vsel %vm577_vm1, %v580_v46, %v563_v37 }
 0x9de   : > { %v596_v49 = vmul.f32 %v592_v47, %v581_v48 }
 0x9e0   : > { %597 = vadd.xlane.f32.xlu1 %v596_v49  ;;  %v235_v49 = vsel %vm234_vm8, %v2415_v35, 0.0  ;;  %vm861_vm8 = vcmp.eq.s32.totalorder %v2543_v10, 39 }
 0xa65   : > { %v570_v50 = vpop.xlane.xlu1 %569 }
 0xa66   : > { %v571_v51 = vsel %vm559_vm15, %v570_v50, %v553_v40  ;;  %v663_v40 = vld [vmem:[#allocation2 + $0x30] ss:$0 sm:$0xff]  ;;  %vm773_vm15 = vcmp.eq.s32.totalorder %v2543_v10, 43 }
 0xa67   : > { %v586_v52 = vmul.f32 %v574_v36, %v571_v51  ;;  %v230_v36 = vsel %vm228_vm5, %v2415_v35, 0.0  ;;  %v664_v44 = vxor.u32 2147483648, %v663_v40 }
 0xa69   : > { %587 = vadd.xlane.f32.xlu0 %v586_v52  ;;  %v584_v54 = vpop.xlane.xlu1 %583  ;;  %v328_v52 = vsel %vm327_vm9, -1.0, %v2503_v57  ;;  %vm887_vm9 = vcmp.eq.s32.totalorder %v2543_v10, 38 }
 0xa6a   : > { %v585_v56 = vsel %vm577_vm1, %v584_v54, %v567_v43 }
 0xa6b   : > { %v600_v59 = vmul.f32 %v592_v47, %v585_v56 }
 0xa6d   : > { %601 = vadd.xlane.f32.xlu0 %v600_v59  ;;  %v598_v60 = vpop.xlane.xlu1 %597 }
 0xa6e   : > { %v599_v63 = vsel %vm595_vm2, %v598_v60, %v581_v48 }
 0xa6f   : > { %v614_v1 = vmul.f32 %v610_v61, %v599_v63 }
 0xa71   : > { %615 = vadd.xlane.f32.xlu0 %v614_v1 }
 0xaf6   : > { %v588_v2 = vpop.xlane.xlu0 %587 }
 0xaf7   : > { %v589_v3 = vsel %vm577_vm1, %v588_v2, %v571_v51  ;;  %vm795_vm1 = vcmp.eq.s32.totalorder %v2543_v10, 42 }
 0xaf8   : > { %v604_v4 = vmul.f32 %v592_v47, %v589_v3 }
 0xafa   : > { %605 = vadd.xlane.f32.xlu1 %v604_v4  ;;  %v602_v5 = vpop.xlane.xlu0 %601 }
 0xafb   : > { %v603_v6 = vsel %vm595_vm2, %v602_v5, %v585_v56 }
 0xafc   : > { %v618_v8 = vmul.f32 %v610_v61, %v603_v6 }
 0xafe   : > { %619 = vadd.xlane.f32.xlu1 %v618_v8  ;;  %v616_v9 = vpop.xlane.xlu0 %615 }
 0xaff   : > { %v617_v13 = vsel %vm613_vm3, %v616_v9, %v599_v63 }
 0xb00   : > { %v632_v14 = vmul.f32 %v628_v12, %v617_v13 }
 0xb02   : > { %633 = vadd.xlane.f32.xlu1 %v632_v14 }
 0xb87   : > { %v606_v15 = vpop.xlane.xlu1 %605 }
 0xb88   : > { %v607_v18 = vsel %vm595_vm2, %v606_v15, %v589_v3 }
 0xb89   : > { %v622_v19 = vmul.f32 %v610_v61, %v607_v18 }
 0xb8b   : > { %623 = vadd.xlane.f32.xlu0 %v622_v19  ;;  %v620_v20 = vpop.xlane.xlu1 %619 }
 0xb8c   : > { %v621_v21 = vsel %vm613_vm3, %v620_v20, %v603_v6 }
 0xb8d   : > { %v636_v23 = vmul.f32 %v628_v12, %v621_v21 }
 0xb8f   : > { %637 = vadd.xlane.f32.xlu0 %v636_v23  ;;  %v634_v24 = vpop.xlane.xlu1 %633 }
 0xb90   : > { %v635_v26 = vsel %vm631_vm4, %v634_v24, %v617_v13 }
 0xb91   : > { %v650_v27 = vmul.f32 %v646_v25, %v635_v26 }
 0xb93   : > { %651 = vadd.xlane.f32.xlu0 %v650_v27 }
 0xc18   : > { %v624_v28 = vpop.xlane.xlu0 %623 }
 0xc19   : > { %v625_v29 = vsel %vm613_vm3, %v624_v28, %v607_v18  ;;  %vm817_vm3 = vcmp.eq.s32.totalorder %v2543_v10, 41 }
 0xc1a   : > { %v640_v30 = vmul.f32 %v628_v12, %v625_v29 }
 0xc1c   : > { %641 = vadd.xlane.f32.xlu1 %v640_v30  ;;  %v638_v32 = vpop.xlane.xlu0 %637 }
 0xc1d   : > { %v639_v33 = vsel %vm631_vm4, %v638_v32, %v621_v21 }
 0xc1e   : > { %v654_v34 = vmul.f32 %v646_v25, %v639_v33 }
 0xc20   : > { %655 = vadd.xlane.f32.xlu1 %v654_v34  ;;  %v652_v37 = vpop.xlane.xlu0 %651 }
 0xc21   : > { %v653_v42 = vsel %vm649_vm6, %v652_v37, %v635_v26 }
 0xc22   : > { %v668_v46 = vmul.f32 %v664_v44, %v653_v42 }
 0xc24   : > { %231 = vadd.xlane.f32.xlu1 %v230_v36 }
 0xca9   : > { %v642_v38 = vpop.xlane.xlu1 %641 }
 0xcaa   : > { %v643_v39 = vsel %vm631_vm4, %v642_v38, %v625_v29 }
 0xcab   : > { %v658_v41 = vmul.f32 %v646_v25, %v643_v39 }
 0xcad   : > { %659 = vadd.xlane.f32.xlu0 %v658_v41  ;;  %v656_v43 = vpop.xlane.xlu1 %655 }
 0xcae   : > { %v657_v45 = vsel %vm649_vm6, %v656_v43, %v639_v33 }
 0xcaf   : > { %v672_v47 = vmul.f32 %v664_v44, %v657_v45 }
 0xcb1   : > { %669 = vadd.xlane.f32.xlu0 %v668_v46  ;;  %673 = vadd.xlane.f32.xlu1 %v672_v47  ;;  %v2685_v48 = vpop.xlane.xlu1 %231 }
 0xcb2   : > { %2466 = vrcp.f32 %v2685_v48 }
 0xcbc   : > { %v2691_v50 = vpop.eup %2466 }
 0xcbd   : > { %v237_v51 = vmul.f32 %v2691_v50, %v235_v49 }
 0xcbf   : > { %238 = vst [vmem:[#allocation2 + $0x28] sm:$0xff] %v237_v51 }
 0xcc6   : > { %v681_v54 = vld [vmem:[#allocation2 + $0x2f] ss:$0 sm:$0xff]  ;;  %v703_v6 = vld [vmem:[#allocation2 + $0x2e] ss:$0 sm:$0xff]  ;;  %v725_v24 = vld [vmem:[#allocation2 + $0x2d] ss:$0 sm:$0xff] }
 0xcc7   : > { %v682_v56 = vxor.u32 2147483648, %v681_v54  ;;  %v704_v7 = vxor.u32 2147483648, %v703_v6  ;;  %v726_v26 = vxor.u32 2147483648, %v725_v24  ;;  %v747_v38 = vld [vmem:[#allocation2 + $0x2c] ss:$0 sm:$0xff] }
 0xcc8   : > { %v748_v40 = vxor.u32 2147483648, %v747_v38 }
 0xcc9   : > { %v686_v58 = vmul.f32 %v682_v56, %v328_v52 }
 0xccb   : > { %687 = vadd.xlane.f32.xlu1 %v686_v58 }
 0xd3a   : > { %v660_v59 = vpop.xlane.xlu0 %659 }
 0xd3b   : > { %v661_v60 = vsel %vm649_vm6, %v660_v59, %v643_v39 }
 0xd3c   : > { %v676_v61 = vmul.f32 %v664_v44, %v661_v60 }
 0xd3e   : > { %677 = vadd.xlane.f32.xlu0 %v676_v61  ;;  %v670_v63 = vpop.xlane.xlu0 %669  ;;  %v674_v1 = vpop.xlane.xlu1 %673 }
 0xd3f   : > { %v671_v2 = vsel %vm667_vm10, %v670_v63, %v653_v42  ;;  %v675_v3 = vsel %vm667_vm10, %v674_v1, %v657_v45 }
 0xd40   : > { %v690_v4 = vmul.f32 %v682_v56, %v671_v2  ;;  %v694_v5 = vmul.f32 %v682_v56, %v675_v3 }
 0xd42   : > { %691 = vadd.xlane.f32.xlu0 %v690_v4  ;;  %695 = vadd.xlane.f32.xlu1 %v694_v5 }
 0xd58   : > { %v688_v8 = vpop.xlane.xlu1 %687 }
 0xd59   : > { %v689_v9 = vsel %vm685_vm11, %v688_v8, %v328_v52 }
 0xd5a   : > { %v708_v12 = vmul.f32 %v704_v7, %v689_v9 }
 0xd5c   : > { %709 = vadd.xlane.f32.xlu1 %v708_v12 }
 0xdcb   : > { %v678_v13 = vpop.xlane.xlu0 %677 }
 0xdcc   : > { %v679_v14 = vsel %vm667_vm10, %v678_v13, %v661_v60  ;;  %vm913_vm10 = vcmp.eq.s32.totalorder %v2543_v10, 37 }
 0xdcd   : > { %v698_v15 = vmul.f32 %v682_v56, %v679_v14  ;;  %v769_v56 = vld [vmem:[#allocation2 + $0x2b] ss:$0 sm:$0xff] }
 0xdce   : > { %v770_v59 = vxor.u32 2147483648, %v769_v56 }
 0xdcf   : > { %699 = vadd.xlane.f32.xlu0 %v698_v15  ;;  %v692_v18 = vpop.xlane.xlu0 %691  ;;  %v696_v19 = vpop.xlane.xlu1 %695 }
 0xdd0   : > { %v693_v20 = vsel %vm685_vm11, %v692_v18, %v671_v2  ;;  %v697_v21 = vsel %vm685_vm11, %v696_v19, %v675_v3 }
 0xdd1   : > { %v712_v22 = vmul.f32 %v704_v7, %v693_v20  ;;  %v716_v23 = vmul.f32 %v704_v7, %v697_v21 }
 0xdd3   : > { %713 = vadd.xlane.f32.xlu0 %v712_v22  ;;  %717 = vadd.xlane.f32.xlu1 %v716_v23 }
 0xde9   : > { %v710_v25 = vpop.xlane.xlu1 %709 }
 0xdea   : > { %v711_v27 = vsel %vm707_vm12, %v710_v25, %v689_v9  ;;  %v791_v9 = vld [vmem:[#allocation2 + $0x2a] ss:$0 sm:$0xff] }
 0xdeb   : > { %v730_v28 = vmul.f32 %v726_v26, %v711_v27  ;;  %v792_v13 = vxor.u32 2147483648, %v791_v9 }
 0xded   : > { %731 = vadd.xlane.f32.xlu1 %v730_v28 }
 0xe5c   : > { %v700_v29 = vpop.xlane.xlu0 %699 }
 0xe5d   : > { %v701_v30 = vsel %vm685_vm11, %v700_v29, %v679_v14  ;;  %vm939_vm11 = vcmp.eq.s32.totalorder %v2543_v10, 36 }
 0xe5e   : > { %v720_v31 = vmul.f32 %v704_v7, %v701_v30 }
 0xe60   : > { %721 = vadd.xlane.f32.xlu0 %v720_v31  ;;  %v714_v32 = vpop.xlane.xlu0 %713  ;;  %v718_v33 = vpop.xlane.xlu1 %717 }
 0xe61   : > { %v715_v34 = vsel %vm707_vm12, %v714_v32, %v693_v20  ;;  %v719_v35 = vsel %vm707_vm12, %v718_v33, %v697_v21 }
 0xe62   : > { %v734_v36 = vmul.f32 %v726_v26, %v715_v34  ;;  %v738_v37 = vmul.f32 %v726_v26, %v719_v35 }
 0xe64   : > { %735 = vadd.xlane.f32.xlu0 %v734_v36  ;;  %739 = vadd.xlane.f32.xlu1 %v738_v37 }
 0xe7a   : > { %v732_v39 = vpop.xlane.xlu1 %731 }
 0xe7b   : > { %v733_v41 = vsel %vm729_vm13, %v732_v39, %v711_v27  ;;  %v813_v27 = vld [vmem:[#allocation2 + $0x29] ss:$0 sm:$0xff] }
 0xe7c   : > { %v752_v42 = vmul.f32 %v748_v40, %v733_v41  ;;  %v814_v29 = vxor.u32 2147483648, %v813_v27 }
 0xe7e   : > { %753 = vadd.xlane.f32.xlu1 %v752_v42  ;;  %v2414_v42 = vld [vmem:[%s2549_s20 + $0x20] sm:$0xff] }
 0xeed   : > { %v722_v43 = vpop.xlane.xlu0 %721 }
 0xeee   : > { %v723_v44 = vsel %vm707_vm12, %v722_v43, %v701_v30  ;;  %vm965_vm12 = vcmp.eq.s32.totalorder %v2543_v10, 35 }
 0xeef   : > { %v742_v45 = vmul.f32 %v726_v26, %v723_v44 }
 0xef1   : > { %743 = vadd.xlane.f32.xlu0 %v742_v45  ;;  %v736_v46 = vpop.xlane.xlu0 %735  ;;  %v740_v47 = vpop.xlane.xlu1 %739 }
 0xef2   : > { %v737_v49 = vsel %vm729_vm13, %v736_v46, %v715_v34  ;;  %v741_v51 = vsel %vm729_vm13, %v740_v47, %v719_v35  ;;  %v211_v35 = vadd.s32 32, %v2545_v11  ;;  %v835_v47 = vld [vmem:[#allocation2 + $0x28] ss:$0 sm:$0xff] }
 0xef3   : > { %v756_v52 = vmul.f32 %v748_v40, %v737_v49  ;;  %v760_v54 = vmul.f32 %v748_v40, %v741_v51  ;;  %v836_v56 = vxor.u32 2147483648, %v835_v47 }
 0xef4   : > { %vm212_vm2 = vcmp.eq.s32.totalorder %v211_v35, %v2543_v10  ;;  %vm217_vm4 = vcmp.le.s32.totalorder %v211_v35, %v2543_v10  ;;  %vm320_vm6 = vcmp.eq.s32.totalorder %v2543_v10, %v211_v35 }
 0xef5   : > { %757 = vadd.xlane.f32.xlu0 %v756_v52  ;;  %761 = vadd.xlane.f32.xlu1 %v760_v54  ;;  %v214_v43 = vsel %vm212_vm2, %v2414_v42, 0.0  ;;  %vm218_vm5 = vmand %vm217_vm4, %vm144_vm0  ;;  %vm1043_vm4 = vcmp.eq.s32.totalorder %v2543_v10, 32 }
 0xf0b   : > { %v754_v58 = vpop.xlane.xlu1 %753 }
 0xf0c   : > { %v755_v60 = vsel %vm751_vm14, %v754_v58, %v733_v41 }
 0xf0d   : > { %v774_v61 = vmul.f32 %v770_v59, %v755_v60 }
 0xf0f   : > { %775 = vadd.xlane.f32.xlu1 %v774_v61 }
 0xf7e   : > { %v744_v63 = vpop.xlane.xlu0 %743 }
 0xf7f   : > { %v745_v1 = vsel %vm729_vm13, %v744_v63, %v723_v44  ;;  %vm991_vm13 = vcmp.eq.s32.totalorder %v2543_v10, 34 }
 0xf80   : > { %v764_v2 = vmul.f32 %v748_v40, %v745_v1 }
 0xf82   : > { %765 = vadd.xlane.f32.xlu0 %v764_v2  ;;  %v758_v3 = vpop.xlane.xlu0 %757  ;;  %v762_v4 = vpop.xlane.xlu1 %761  ;;  %v219_v2 = vsel %vm218_vm5, %v2414_v42, 0.0  ;;  %vm1069_vm5 = vcmp.eq.s32.totalorder %v2543_v10, 31 }
 0xf83   : > { %v759_v5 = vsel %vm751_vm14, %v758_v3, %v737_v49  ;;  %v763_v6 = vsel %vm751_vm14, %v762_v4, %v741_v51 }
 0xf84   : > { %v778_v7 = vmul.f32 %v770_v59, %v759_v5  ;;  %v782_v8 = vmul.f32 %v770_v59, %v763_v6 }
 0xf86   : > { %779 = vadd.xlane.f32.xlu0 %v778_v7  ;;  %783 = vadd.xlane.f32.xlu1 %v782_v8 }
 0xf9c   : > { %v776_v12 = vpop.xlane.xlu1 %775 }
 0xf9d   : > { %v777_v14 = vsel %vm773_vm15, %v776_v12, %v755_v60 }
 0xf9e   : > { %v796_v15 = vmul.f32 %v792_v13, %v777_v14 }
 0xfa0   : > { %797 = vadd.xlane.f32.xlu1 %v796_v15 }
0x100f   : > { %v766_v18 = vpop.xlane.xlu0 %765 }
0x1010   : > { %v767_v19 = vsel %vm751_vm14, %v766_v18, %v745_v1 }
0x1011   : > { %v786_v20 = vmul.f32 %v770_v59, %v767_v19 }
0x1013   : > { %787 = vadd.xlane.f32.xlu0 %v786_v20  ;;  %v780_v21 = vpop.xlane.xlu0 %779  ;;  %v784_v22 = vpop.xlane.xlu1 %783 }
0x1014   : > { %v781_v23 = vsel %vm773_vm15, %v780_v21, %v759_v5  ;;  %v785_v24 = vsel %vm773_vm15, %v784_v22, %v763_v6  ;;  %v321_v5 = vsel %vm320_vm6, -1.0, %v2503_v57  ;;  %vm1099_vm6 = vcmp.eq.s32.totalorder %v2543_v10, 30 }
0x1015   : > { %v800_v25 = vmul.f32 %v792_v13, %v781_v23  ;;  %v804_v26 = vmul.f32 %v792_v13, %v785_v24 }
0x1017   : > { %801 = vadd.xlane.f32.xlu0 %v800_v25  ;;  %805 = vadd.xlane.f32.xlu1 %v804_v26 }
0x102d   : > { %v798_v28 = vpop.xlane.xlu1 %797 }
0x102e   : > { %v799_v30 = vsel %vm795_vm1, %v798_v28, %v777_v14 }
0x102f   : > { %v818_v31 = vmul.f32 %v814_v29, %v799_v30 }
0x1031   : > { %819 = vadd.xlane.f32.xlu1 %v818_v31 }
0x10a0   : > { %v788_v32 = vpop.xlane.xlu0 %787 }
0x10a1   : > { %v789_v33 = vsel %vm773_vm15, %v788_v32, %v767_v19  ;;  %vm1017_vm15 = vcmp.eq.s32.totalorder %v2543_v10, 33 }
0x10a2   : > { %v808_v34 = vmul.f32 %v792_v13, %v789_v33 }
0x10a4   : > { %809 = vadd.xlane.f32.xlu0 %v808_v34  ;;  %v802_v36 = vpop.xlane.xlu0 %801  ;;  %v806_v37 = vpop.xlane.xlu1 %805 }
0x10a5   : > { %v803_v38 = vsel %vm795_vm1, %v802_v36, %v781_v23  ;;  %v807_v39 = vsel %vm795_vm1, %v806_v37, %v785_v24 }
0x10a6   : > { %v822_v40 = vmul.f32 %v814_v29, %v803_v38  ;;  %v826_v41 = vmul.f32 %v814_v29, %v807_v39 }
0x10a8   : > { %823 = vadd.xlane.f32.xlu0 %v822_v40  ;;  %827 = vadd.xlane.f32.xlu1 %v826_v41 }
0x10ac   : > { %215 = vadd.xlane.f32.xlu1 %v214_v43 }
0x10be   : > { %v820_v44 = vpop.xlane.xlu1 %819 }
0x10bf   : > { %v821_v51 = vsel %vm817_vm3, %v820_v44, %v799_v30 }
0x10c0   : > { %v840_v59 = vmul.f32 %v836_v56, %v821_v51 }
0x1131   : > { %v810_v45 = vpop.xlane.xlu0 %809 }
0x1132   : > { %v811_v46 = vsel %vm795_vm1, %v810_v45, %v789_v33 }
0x1133   : > { %v830_v49 = vmul.f32 %v814_v29, %v811_v46 }
0x1135   : > { %831 = vadd.xlane.f32.xlu0 %v830_v49  ;;  %v824_v52 = vpop.xlane.xlu0 %823  ;;  %v828_v54 = vpop.xlane.xlu1 %827 }
0x1136   : > { %v825_v58 = vsel %vm817_vm3, %v824_v52, %v803_v38  ;;  %v829_v61 = vsel %vm817_vm3, %v828_v54, %v807_v39 }
0x1137   : > { %v844_v60 = vmul.f32 %v836_v56, %v825_v58  ;;  %v848_v1 = vmul.f32 %v836_v56, %v829_v61 }
0x1139   : > { %841 = vadd.xlane.f32.xlu0 %v840_v59  ;;  %845 = vadd.xlane.f32.xlu1 %v844_v60  ;;  %v2769_v63 = vpop.xlane.xlu1 %215 }
0x113a   : > { %2468 = vrcp.f32 %v2769_v63 }
0x113d   : > { %849 = vadd.xlane.f32.xlu0 %v848_v1 }
0x1144   : > { %v2775_v3 = vpop.eup %2468 }
0x1145   : > { %v221_v4 = vmul.f32 %v2775_v3, %v219_v2 }
0x1147   : > { %222 = vst [vmem:[#allocation2 + $0x20] sm:$0xff] %v221_v4 }
0x114e   : > { %v857_v6 = vld [vmem:[#allocation2 + $0x27] ss:$0 sm:$0xff]  ;;  %v883_v25 = vld [vmem:[#allocation2 + $0x26] ss:$0 sm:$0xff]  ;;  %v909_v42 = vld [vmem:[#allocation2 + $0x25] ss:$0 sm:$0xff] }
0x114f   : > { %v858_v7 = vxor.u32 2147483648, %v857_v6  ;;  %v884_v26 = vxor.u32 2147483648, %v883_v25  ;;  %v910_v44 = vxor.u32 2147483648, %v909_v42  ;;  %v935_v4 = vld [vmem:[#allocation2 + $0x24] ss:$0 sm:$0xff] }
0x1150   : > { %v961_v25 = vld [vmem:[#allocation2 + $0x23] ss:$0 sm:$0xff]  ;;  %v987_v42 = vld [vmem:[#allocation2 + $0x22] ss:$0 sm:$0xff] }
0x1151   : > { %v862_v8 = vmul.f32 %v858_v7, %v321_v5 }
0x1153   : > { %863 = vadd.xlane.f32.xlu0 %v862_v8 }
0x11c2   : > { %v832_v9 = vpop.xlane.xlu0 %831 }
0x11c3   : > { %v833_v12 = vsel %vm817_vm3, %v832_v9, %v811_v46 }
0x11c4   : > { %v852_v13 = vmul.f32 %v836_v56, %v833_v12 }
0x11c6   : > { %v842_v14 = vpop.xlane.xlu0 %841  ;;  %853 = vadd.xlane.f32.xlu1 %v852_v13  ;;  %v846_v15 = vpop.xlane.xlu1 %845 }
0x11c7   : > { %v843_v18 = vsel %vm839_vm7, %v842_v14, %v821_v51  ;;  %v847_v19 = vsel %vm839_vm7, %v846_v15, %v825_v58 }
0x11c8   : > { %v866_v20 = vmul.f32 %v858_v7, %v843_v18  ;;  %v870_v21 = vmul.f32 %v858_v7, %v847_v19 }
0x11ca   : > { %v850_v22 = vpop.xlane.xlu0 %849  ;;  %867 = vadd.xlane.f32.xlu1 %v866_v20  ;;  %871 = vadd.xlane.f32.xlu0 %v870_v21 }
0x11cb   : > { %v851_v23 = vsel %vm839_vm7, %v850_v22, %v829_v61 }
0x11cc   : > { %v874_v24 = vmul.f32 %v858_v7, %v851_v23 }
0x11ce   : > { %875 = vadd.xlane.f32.xlu1 %v874_v24 }
0x11e0   : > { %v864_v27 = vpop.xlane.xlu0 %863 }
0x11e1   : > { %v865_v28 = vsel %vm861_vm8, %v864_v27, %v321_v5  ;;  %v936_v5 = vxor.u32 2147483648, %v935_v4  ;;  %v1013_v4 = vld [vmem:[#allocation2 + $0x21] ss:$0 sm:$0xff] }
0x11e2   : > { %v888_v29 = vmul.f32 %v884_v26, %v865_v28 }
0x11e4   : > { %889 = vadd.xlane.f32.xlu1 %v888_v29 }
0x1253   : > { %v854_v30 = vpop.xlane.xlu1 %853 }
0x1254   : > { %v855_v31 = vsel %vm839_vm7, %v854_v30, %v833_v12  ;;  %vm1129_vm7 = vcmp.eq.s32.totalorder %v2543_v10, 29 }
0x1255   : > { %v878_v32 = vmul.f32 %v858_v7, %v855_v31 }
0x1257   : > { %v872_v33 = vpop.xlane.xlu0 %871  ;;  %879 = vadd.xlane.f32.xlu0 %v878_v32  ;;  %v868_v34 = vpop.xlane.xlu1 %867 }
0x1258   : > { %v873_v35 = vsel %vm861_vm8, %v872_v33, %v847_v19  ;;  %v869_v36 = vsel %vm861_vm8, %v868_v34, %v843_v18 }
0x1259   : > { %v896_v37 = vmul.f32 %v884_v26, %v873_v35  ;;  %v892_v38 = vmul.f32 %v884_v26, %v869_v36 }
0x125b   : > { %897 = vadd.xlane.f32.xlu1 %v896_v37  ;;  %893 = vadd.xlane.f32.xlu0 %v892_v38  ;;  %v876_v39 = vpop.xlane.xlu1 %875 }
0x125c   : > { %v877_v40 = vsel %vm861_vm8, %v876_v39, %v851_v23 }
0x125d   : > { %v900_v41 = vmul.f32 %v884_v26, %v877_v40 }
0x125f   : > { %901 = vadd.xlane.f32.xlu0 %v900_v41 }
0x1271   : > { %v890_v43 = vpop.xlane.xlu1 %889 }
0x1272   : > { %v891_v45 = vsel %vm887_vm9, %v890_v43, %v865_v28  ;;  %v988_v43 = vxor.u32 2147483648, %v987_v42 }
0x1273   : > { %v914_v46 = vmul.f32 %v910_v44, %v891_v45 }
0x1275   : > { %915 = vadd.xlane.f32.xlu0 %v914_v46 }
0x12e4   : > { %v880_v47 = vpop.xlane.xlu0 %879 }
0x12e5   : > { %v881_v49 = vsel %vm861_vm8, %v880_v47, %v855_v31  ;;  %vm1159_vm8 = vcmp.eq.s32.totalorder %v2543_v10, 28 }
0x12e6   : > { %v904_v51 = vmul.f32 %v884_v26, %v881_v49  ;;  %v962_v26 = vxor.u32 2147483648, %v961_v25 }
0x12e8   : > { %905 = vadd.xlane.f32.xlu1 %v904_v51  ;;  %v894_v52 = vpop.xlane.xlu0 %893  ;;  %v898_v54 = vpop.xlane.xlu1 %897 }
0x12e9   : > { %v895_v56 = vsel %vm887_vm9, %v894_v52, %v869_v36  ;;  %v899_v58 = vsel %vm887_vm9, %v898_v54, %v873_v35 }
0x12ea   : > { %v918_v59 = vmul.f32 %v910_v44, %v895_v56  ;;  %v922_v60 = vmul.f32 %v910_v44, %v899_v58 }
0x12ec   : > { %919 = vadd.xlane.f32.xlu1 %v918_v59  ;;  %v902_v61 = vpop.xlane.xlu0 %901  ;;  %923 = vadd.xlane.f32.xlu0 %v922_v60 }
0x12ed   : > { %v903_v1 = vsel %vm887_vm9, %v902_v61, %v877_v40 }
0x12ee   : > { %v926_v2 = vmul.f32 %v910_v44, %v903_v1 }
0x12f0   : > { %927 = vadd.xlane.f32.xlu1 %v926_v2 }
0x1302   : > { %v916_v6 = vpop.xlane.xlu0 %915 }
0x1303   : > { %v917_v7 = vsel %vm913_vm10, %v916_v6, %v891_v45 }
0x1304   : > { %v940_v8 = vmul.f32 %v936_v5, %v917_v7 }
0x1306   : > { %941 = vadd.xlane.f32.xlu1 %v940_v8 }
0x1375   : > { %v906_v9 = vpop.xlane.xlu1 %905 }
0x1376   : > { %v907_v12 = vsel %vm887_vm9, %v906_v9, %v881_v49  ;;  %vm1189_vm9 = vcmp.eq.s32.totalorder %v2543_v10, 27 }
0x1377   : > { %v930_v13 = vmul.f32 %v910_v44, %v907_v12 }
0x1379   : > { %v924_v14 = vpop.xlane.xlu0 %923  ;;  %931 = vadd.xlane.f32.xlu0 %v930_v13  ;;  %v920_v15 = vpop.xlane.xlu1 %919 }
0x137a   : > { %v925_v18 = vsel %vm913_vm10, %v924_v14, %v899_v58  ;;  %v921_v19 = vsel %vm913_vm10, %v920_v15, %v895_v56 }
0x137b   : > { %v948_v20 = vmul.f32 %v936_v5, %v925_v18  ;;  %v944_v21 = vmul.f32 %v936_v5, %v921_v19 }
0x137d   : > { %949 = vadd.xlane.f32.xlu1 %v948_v20  ;;  %945 = vadd.xlane.f32.xlu0 %v944_v21  ;;  %v928_v22 = vpop.xlane.xlu1 %927 }
0x137e   : > { %v929_v23 = vsel %vm913_vm10, %v928_v22, %v903_v1  ;;  %v195_v22 = vadd.s32 24, %v2545_v11 }
0x137f   : > { %v952_v24 = vmul.f32 %v936_v5, %v929_v23 }
0x1380   : > { %vm196_vm14 = vcmp.eq.s32.totalorder %v195_v22, %v2543_v10  ;;  %vm201_vm1 = vcmp.le.s32.totalorder %v195_v22, %v2543_v10  ;;  %vm313_vm3 = vcmp.eq.s32.totalorder %v2543_v10, %v195_v22 }
0x1381   : > { %953 = vadd.xlane.f32.xlu0 %v952_v24  ;;  %vm202_vm2 = vmand %vm201_vm1, %vm144_vm0  ;;  %vm1279_vm1 = vcmp.eq.s32.totalorder %v2543_v10, 24 }
0x1393   : > { %v942_v27 = vpop.xlane.xlu1 %941 }
0x1394   : > { %v943_v28 = vsel %vm939_vm11, %v942_v27, %v917_v7 }
0x1395   : > { %v966_v29 = vmul.f32 %v962_v26, %v943_v28 }
0x1397   : > { %967 = vadd.xlane.f32.xlu0 %v966_v29 }
0x1406   : > { %v932_v30 = vpop.xlane.xlu0 %931 }
0x1407   : > { %v933_v31 = vsel %vm913_vm10, %v932_v30, %v907_v12  ;;  %v1039_v30 = vld [vmem:[#allocation2 + $0x20] ss:$0 sm:$0xff]  ;;  %vm1219_vm10 = vcmp.eq.s32.totalorder %v2543_v10, 26 }
0x1408   : > { %v956_v32 = vmul.f32 %v936_v5, %v933_v31  ;;  %v1014_v5 = vxor.u32 2147483648, %v1013_v4 }
0x140a   : > { %957 = vadd.xlane.f32.xlu1 %v956_v32  ;;  %v946_v33 = vpop.xlane.xlu0 %945  ;;  %v950_v34 = vpop.xlane.xlu1 %949 }
0x140b   : > { %v947_v35 = vsel %vm939_vm11, %v946_v33, %v921_v19  ;;  %v951_v36 = vsel %vm939_vm11, %v950_v34, %v925_v18  ;;  %v1040_v34 = vxor.u32 2147483648, %v1039_v30 }
0x140c   : > { %v970_v37 = vmul.f32 %v962_v26, %v947_v35  ;;  %v974_v38 = vmul.f32 %v962_v26, %v951_v36 }
0x140e   : > { %971 = vadd.xlane.f32.xlu1 %v970_v37  ;;  %v954_v39 = vpop.xlane.xlu0 %953  ;;  %975 = vadd.xlane.f32.xlu0 %v974_v38 }
0x140f   : > { %v955_v40 = vsel %vm939_vm11, %v954_v39, %v929_v23 }
0x1410   : > { %v978_v41 = vmul.f32 %v962_v26, %v955_v40 }
0x1412   : > { %979 = vadd.xlane.f32.xlu1 %v978_v41 }
0x1424   : > { %v968_v44 = vpop.xlane.xlu0 %967 }
0x1425   : > { %v969_v45 = vsel %vm965_vm12, %v968_v44, %v943_v28 }
0x1426   : > { %v992_v46 = vmul.f32 %v988_v43, %v969_v45 }
0x1428   : > { %993 = vadd.xlane.f32.xlu1 %v992_v46 }
0x1497   : > { %v958_v47 = vpop.xlane.xlu1 %957 }
0x1498   : > { %v959_v49 = vsel %vm939_vm11, %v958_v47, %v933_v31 }
0x1499   : > { %v982_v51 = vmul.f32 %v962_v26, %v959_v49  ;;  %v2413_v26 = vld [vmem:[%s2549_s20 + $0x18] sm:$0xff] }
0x149a   : > { %v198_v27 = vsel %vm196_vm14, %v2413_v26, 0.0  ;;  %v203_v46 = vsel %vm202_vm2, %v2413_v26, 0.0  ;;  %vm1309_vm2 = vcmp.eq.s32.totalorder %v2543_v10, 23 }
0x149b   : > { %v976_v52 = vpop.xlane.xlu0 %975  ;;  %983 = vadd.xlane.f32.xlu0 %v982_v51  ;;  %v972_v54 = vpop.xlane.xlu1 %971  ;;  %v314_v51 = vsel %vm313_vm3, -1.0, %v2503_v57  ;;  %vm1343_vm3 = vcmp.eq.s32.totalorder %v2543_v10, 22 }
0x149c   : > { %v977_v56 = vsel %vm965_vm12, %v976_v52, %v951_v36  ;;  %v973_v58 = vsel %vm965_vm12, %v972_v54, %v947_v35 }
0x149d   : > { %v1000_v59 = vmul.f32 %v988_v43, %v977_v56  ;;  %v996_v60 = vmul.f32 %v988_v43, %v973_v58 }
0x149f   : > { %1001 = vadd.xlane.f32.xlu1 %v1000_v59  ;;  %997 = vadd.xlane.f32.xlu0 %v996_v60  ;;  %v980_v61 = vpop.xlane.xlu1 %979 }
0x14a0   : > { %v981_v1 = vsel %vm965_vm12, %v980_v61, %v955_v40 }
0x14a1   : > { %v1004_v2 = vmul.f32 %v988_v43, %v981_v1 }
0x14a3   : > { %1005 = vadd.xlane.f32.xlu0 %v1004_v2 }
0x14b5   : > { %v994_v6 = vpop.xlane.xlu1 %993 }
0x14b6   : > { %v995_v7 = vsel %vm991_vm13, %v994_v6, %v969_v45 }
0x14b7   : > { %v1018_v8 = vmul.f32 %v1014_v5, %v995_v7 }
0x14b9   : > { %1019 = vadd.xlane.f32.xlu0 %v1018_v8 }
0x1528   : > { %v984_v9 = vpop.xlane.xlu0 %983 }
0x1529   : > { %v985_v12 = vsel %vm965_vm12, %v984_v9, %v959_v49  ;;  %vm1249_vm12 = vcmp.eq.s32.totalorder %v2543_v10, 25 }
0x152a   : > { %v1008_v13 = vmul.f32 %v988_v43, %v985_v12 }
0x152c   : > { %1009 = vadd.xlane.f32.xlu1 %v1008_v13  ;;  %v998_v14 = vpop.xlane.xlu0 %997  ;;  %v1002_v15 = vpop.xlane.xlu1 %1001 }
0x152d   : > { %v999_v18 = vsel %vm991_vm13, %v998_v14, %v973_v58  ;;  %v1003_v19 = vsel %vm991_vm13, %v1002_v15, %v977_v56 }
0x152e   : > { %v1022_v20 = vmul.f32 %v1014_v5, %v999_v18  ;;  %v1026_v21 = vmul.f32 %v1014_v5, %v1003_v19 }
0x1530   : > { %1023 = vadd.xlane.f32.xlu1 %v1022_v20  ;;  %v1006_v23 = vpop.xlane.xlu0 %1005  ;;  %1027 = vadd.xlane.f32.xlu0 %v1026_v21 }
0x1531   : > { %v1007_v24 = vsel %vm991_vm13, %v1006_v23, %v981_v1 }
0x1532   : > { %v1030_v25 = vmul.f32 %v1014_v5, %v1007_v24 }
0x1534   : > { %1031 = vadd.xlane.f32.xlu1 %v1030_v25 }
0x1538   : > { %199 = vadd.xlane.f32.xlu1 %v198_v27 }
0x1546   : > { %v1020_v28 = vpop.xlane.xlu0 %1019 }
0x1547   : > { %v1021_v33 = vsel %vm1017_vm15, %v1020_v28, %v995_v7 }
0x1548   : > { %v1044_v38 = vmul.f32 %v1040_v34, %v1021_v33 }
0x15b9   : > { %v1010_v29 = vpop.xlane.xlu1 %1009 }
0x15ba   : > { %v1011_v31 = vsel %vm991_vm13, %v1010_v29, %v985_v12 }
0x15bb   : > { %v1034_v32 = vmul.f32 %v1014_v5, %v1011_v31 }
0x15bd   : > { %v1028_v35 = vpop.xlane.xlu0 %1027  ;;  %1035 = vadd.xlane.f32.xlu0 %v1034_v32  ;;  %v1024_v36 = vpop.xlane.xlu1 %1023 }
0x15be   : > { %v1025_v37 = vsel %vm1017_vm15, %v1024_v36, %v999_v18  ;;  %v1029_v40 = vsel %vm1017_vm15, %v1028_v35, %v1003_v19 }
0x15bf   : > { %v1048_v39 = vmul.f32 %v1040_v34, %v1025_v37  ;;  %v1052_v43 = vmul.f32 %v1040_v34, %v1029_v40 }
0x15c1   : > { %1045 = vadd.xlane.f32.xlu0 %v1044_v38  ;;  %v1032_v41 = vpop.xlane.xlu1 %1031  ;;  %1049 = vadd.xlane.f32.xlu1 %v1048_v39 }
0x15c2   : > { %v1033_v42 = vsel %vm1017_vm15, %v1032_v41, %v1007_v24 }
0x15c3   : > { %v1056_v44 = vmul.f32 %v1040_v34, %v1033_v42 }
0x15c5   : > { %1053 = vadd.xlane.f32.xlu0 %v1052_v43  ;;  %1057 = vadd.xlane.f32.xlu1 %v1056_v44  ;;  %v2869_v45 = vpop.xlane.xlu1 %199 }
0x15c6   : > { %2470 = vrcp.f32 %v2869_v45 }
0x15d0   : > { %v2875_v47 = vpop.eup %2470 }
0x15d1   : > { %v205_v49 = vmul.f32 %v2875_v47, %v203_v46 }
0x15d3   : > { %206 = vst [vmem:[#allocation2 + $0x18] sm:$0xff] %v205_v49 }
0x15da   : > { %v1065_v52 = vld [vmem:[#allocation2 + $0x1f] ss:$0 sm:$0xff]  ;;  %v1095_v15 = vld [vmem:[#allocation2 + $0x1e] ss:$0 sm:$0xff] }
0x15db   : > { %v1066_v54 = vxor.u32 2147483648, %v1065_v52  ;;  %v1096_v18 = vxor.u32 2147483648, %v1095_v15 }
0x15dd   : > { %v1070_v56 = vmul.f32 %v1066_v54, %v314_v51 }
0x15df   : > { %1071 = vadd.xlane.f32.xlu1 %v1070_v56 }
0x164a   : > { %v1036_v58 = vpop.xlane.xlu0 %1035 }
0x164b   : > { %v1037_v59 = vsel %vm1017_vm15, %v1036_v58, %v1011_v31 }
0x164c   : > { %v1060_v60 = vmul.f32 %v1040_v34, %v1037_v59 }
0x164e   : > { %1061 = vadd.xlane.f32.xlu0 %v1060_v60  ;;  %v1046_v61 = vpop.xlane.xlu0 %1045  ;;  %v1050_v1 = vpop.xlane.xlu1 %1049 }
0x164f   : > { %v1047_v2 = vsel %vm1043_vm4, %v1046_v61, %v1021_v33  ;;  %v1051_v4 = vsel %vm1043_vm4, %v1050_v1, %v1025_v37  ;;  %v1125_v37 = vld [vmem:[#allocation2 + $0x1d] ss:$0 sm:$0xff] }
0x1650   : > { %v1074_v5 = vmul.f32 %v1066_v54, %v1047_v2  ;;  %v1078_v6 = vmul.f32 %v1066_v54, %v1051_v4  ;;  %v1126_v38 = vxor.u32 2147483648, %v1125_v37 }
0x1652   : > { %v1054_v7 = vpop.xlane.xlu0 %1053  ;;  %1075 = vadd.xlane.f32.xlu0 %v1074_v5  ;;  %1079 = vadd.xlane.f32.xlu1 %v1078_v6  ;;  %v1058_v8 = vpop.xlane.xlu1 %1057 }
0x1653   : > { %v1055_v9 = vsel %vm1043_vm4, %v1054_v7, %v1029_v40  ;;  %v1059_v12 = vsel %vm1043_vm4, %v1058_v8, %v1033_v42 }
0x1654   : > { %v1082_v13 = vmul.f32 %v1066_v54, %v1055_v9  ;;  %v1086_v14 = vmul.f32 %v1066_v54, %v1059_v12 }
0x1656   : > { %1083 = vadd.xlane.f32.xlu0 %v1082_v13  ;;  %1087 = vadd.xlane.f32.xlu1 %v1086_v14 }
0x166c   : > { %v1072_v19 = vpop.xlane.xlu1 %1071 }
0x166d   : > { %v1073_v20 = vsel %vm1069_vm5, %v1072_v19, %v314_v51 }
0x166e   : > { %v1100_v21 = vmul.f32 %v1096_v18, %v1073_v20 }
0x1670   : > { %1101 = vadd.xlane.f32.xlu1 %v1100_v21 }
0x16db   : > { %v1062_v22 = vpop.xlane.xlu0 %1061 }
0x16dc   : > { %v1063_v23 = vsel %vm1043_vm4, %v1062_v22, %v1037_v59  ;;  %vm1377_vm4 = vcmp.eq.s32.totalorder %v2543_v10, 21 }
0x16dd   : > { %v1090_v24 = vmul.f32 %v1066_v54, %v1063_v23 }
0x16df   : > { %1091 = vadd.xlane.f32.xlu0 %v1090_v24  ;;  %v1076_v25 = vpop.xlane.xlu0 %1075  ;;  %v1080_v26 = vpop.xlane.xlu1 %1079 }
0x16e0   : > { %v1077_v27 = vsel %vm1069_vm5, %v1076_v25, %v1047_v2  ;;  %v1081_v28 = vsel %vm1069_vm5, %v1080_v26, %v1051_v4  ;;  %v1155_v4 = vld [vmem:[#allocation2 + $0x1c] ss:$0 sm:$0xff] }
0x16e1   : > { %v1104_v29 = vmul.f32 %v1096_v18, %v1077_v27  ;;  %v1108_v30 = vmul.f32 %v1096_v18, %v1081_v28  ;;  %v1156_v5 = vxor.u32 2147483648, %v1155_v4 }
0x16e3   : > { %1105 = vadd.xlane.f32.xlu0 %v1104_v29  ;;  %v1084_v31 = vpop.xlane.xlu0 %1083  ;;  %1109 = vadd.xlane.f32.xlu1 %v1108_v30  ;;  %v1088_v32 = vpop.xlane.xlu1 %1087 }
0x16e4   : > { %v1085_v33 = vsel %vm1069_vm5, %v1084_v31, %v1055_v9  ;;  %v1089_v34 = vsel %vm1069_vm5, %v1088_v32, %v1059_v12 }
0x16e5   : > { %v1112_v35 = vmul.f32 %v1096_v18, %v1085_v33  ;;  %v1116_v36 = vmul.f32 %v1096_v18, %v1089_v34 }
0x16e7   : > { %1113 = vadd.xlane.f32.xlu0 %v1112_v35  ;;  %1117 = vadd.xlane.f32.xlu1 %v1116_v36 }
0x16fd   : > { %v1102_v39 = vpop.xlane.xlu1 %1101 }
0x16fe   : > { %v1103_v40 = vsel %vm1099_vm6, %v1102_v39, %v1073_v20 }
0x16ff   : > { %v1130_v41 = vmul.f32 %v1126_v38, %v1103_v40 }
0x1701   : > { %1131 = vadd.xlane.f32.xlu1 %v1130_v41 }
0x176c   : > { %v1092_v42 = vpop.xlane.xlu0 %1091 }
0x176d   : > { %v1093_v43 = vsel %vm1069_vm5, %v1092_v42, %v1063_v23  ;;  %vm1411_vm5 = vcmp.eq.s32.totalorder %v2543_v10, 20 }
0x176e   : > { %v1120_v44 = vmul.f32 %v1096_v18, %v1093_v43 }
0x1770   : > { %1121 = vadd.xlane.f32.xlu0 %v1120_v44  ;;  %v1106_v46 = vpop.xlane.xlu0 %1105  ;;  %v1110_v49 = vpop.xlane.xlu1 %1109 }
0x1771   : > { %v1107_v51 = vsel %vm1099_vm6, %v1106_v46, %v1077_v27  ;;  %v1111_v52 = vsel %vm1099_vm6, %v1110_v49, %v1081_v28  ;;  %v1185_v28 = vld [vmem:[#allocation2 + $0x1b] ss:$0 sm:$0xff] }
0x1772   : > { %v1134_v54 = vmul.f32 %v1126_v38, %v1107_v51  ;;  %v1138_v56 = vmul.f32 %v1126_v38, %v1111_v52  ;;  %v1186_v29 = vxor.u32 2147483648, %v1185_v28 }
0x1774   : > { %1135 = vadd.xlane.f32.xlu0 %v1134_v54  ;;  %v1114_v58 = vpop.xlane.xlu0 %1113  ;;  %1139 = vadd.xlane.f32.xlu1 %v1138_v56  ;;  %v1118_v59 = vpop.xlane.xlu1 %1117 }
0x1775   : > { %v1115_v60 = vsel %vm1099_vm6, %v1114_v58, %v1085_v33  ;;  %v1119_v61 = vsel %vm1099_vm6, %v1118_v59, %v1089_v34 }
0x1776   : > { %v1142_v1 = vmul.f32 %v1126_v38, %v1115_v60  ;;  %v1146_v2 = vmul.f32 %v1126_v38, %v1119_v61 }
0x1778   : > { %1143 = vadd.xlane.f32.xlu0 %v1142_v1  ;;  %1147 = vadd.xlane.f32.xlu1 %v1146_v2 }
0x178e   : > { %v1132_v6 = vpop.xlane.xlu1 %1131 }
0x178f   : > { %v1133_v7 = vsel %vm1129_vm7, %v1132_v6, %v1103_v40 }
0x1790   : > { %v1160_v8 = vmul.f32 %v1156_v5, %v1133_v7 }
0x1792   : > { %1161 = vadd.xlane.f32.xlu1 %v1160_v8 }
0x17fd   : > { %v1122_v9 = vpop.xlane.xlu0 %1121 }
0x17fe   : > { %v1123_v12 = vsel %vm1099_vm6, %v1122_v9, %v1093_v43  ;;  %vm1445_vm6 = vcmp.eq.s32.totalorder %v2543_v10, 19 }
0x17ff   : > { %v1150_v13 = vmul.f32 %v1126_v38, %v1123_v12 }
0x1801   : > { %1151 = vadd.xlane.f32.xlu0 %v1150_v13  ;;  %v1136_v14 = vpop.xlane.xlu0 %1135  ;;  %v1140_v15 = vpop.xlane.xlu1 %1139 }
0x1802   : > { %v1137_v18 = vsel %vm1129_vm7, %v1136_v14, %v1107_v51  ;;  %v1141_v19 = vsel %vm1129_vm7, %v1140_v15, %v1111_v52  ;;  %v1215_v52 = vld [vmem:[#allocation2 + $0x1a] ss:$0 sm:$0xff] }
0x1803   : > { %v1164_v20 = vmul.f32 %v1156_v5, %v1137_v18  ;;  %v1168_v21 = vmul.f32 %v1156_v5, %v1141_v19  ;;  %v1216_v54 = vxor.u32 2147483648, %v1215_v52 }
0x1805   : > { %1165 = vadd.xlane.f32.xlu0 %v1164_v20  ;;  %v1144_v22 = vpop.xlane.xlu0 %1143  ;;  %1169 = vadd.xlane.f32.xlu1 %v1168_v21  ;;  %v1148_v23 = vpop.xlane.xlu1 %1147 }
0x1806   : > { %v1145_v24 = vsel %vm1129_vm7, %v1144_v22, %v1115_v60  ;;  %v1149_v25 = vsel %vm1129_vm7, %v1148_v23, %v1119_v61 }
0x1807   : > { %v1172_v26 = vmul.f32 %v1156_v5, %v1145_v24  ;;  %v1176_v27 = vmul.f32 %v1156_v5, %v1149_v25 }
0x1809   : > { %1173 = vadd.xlane.f32.xlu0 %v1172_v26  ;;  %1177 = vadd.xlane.f32.xlu1 %v1176_v27 }
0x181f   : > { %v1162_v30 = vpop.xlane.xlu1 %1161 }
0x1820   : > { %v1163_v31 = vsel %vm1159_vm8, %v1162_v30, %v1133_v7 }
0x1821   : > { %v1190_v32 = vmul.f32 %v1186_v29, %v1163_v31 }
0x1823   : > { %1191 = vadd.xlane.f32.xlu1 %v1190_v32 }
0x188e   : > { %v1152_v33 = vpop.xlane.xlu0 %1151 }
0x188f   : > { %v1153_v34 = vsel %vm1129_vm7, %v1152_v33, %v1123_v12  ;;  %v179_v33 = vadd.s32 16, %v2545_v11  ;;  %vm1479_vm7 = vcmp.eq.s32.totalorder %v2543_v10, 18 }
0x1890   : > { %v1180_v35 = vmul.f32 %v1156_v5, %v1153_v34 }
0x1891   : > { %vm180_vm11 = vcmp.eq.s32.totalorder %v179_v33, %v2543_v10  ;;  %vm185_vm13 = vcmp.le.s32.totalorder %v179_v33, %v2543_v10  ;;  %vm306_vm15 = vcmp.eq.s32.totalorder %v2543_v10, %v179_v33 }
0x1892   : > { %1181 = vadd.xlane.f32.xlu0 %v1180_v35  ;;  %v1166_v36 = vpop.xlane.xlu0 %1165  ;;  %v1170_v37 = vpop.xlane.xlu1 %1169  ;;  %vm186_vm14 = vmand %vm185_vm13, %vm144_vm0  ;;  %vm1547_vm13 = vcmp.eq.s32.totalorder %v2543_v10, 16 }
0x1893   : > { %v1167_v38 = vsel %vm1159_vm8, %v1166_v36, %v1137_v18  ;;  %v1171_v39 = vsel %vm1159_vm8, %v1170_v37, %v1141_v19  ;;  %v1245_v19 = vld [vmem:[#allocation2 + $0x19] ss:$0 sm:$0xff] }
0x1894   : > { %v1194_v40 = vmul.f32 %v1186_v29, %v1167_v38  ;;  %v1198_v41 = vmul.f32 %v1186_v29, %v1171_v39  ;;  %v1246_v20 = vxor.u32 2147483648, %v1245_v19 }
0x1896   : > { %1195 = vadd.xlane.f32.xlu0 %v1194_v40  ;;  %v1174_v42 = vpop.xlane.xlu0 %1173  ;;  %1199 = vadd.xlane.f32.xlu1 %v1198_v41  ;;  %v1178_v43 = vpop.xlane.xlu1 %1177  ;;  %v2412_v40 = vld [vmem:[%s2549_s20 + $0x10] sm:$0xff] }
0x1897   : > { %v1175_v44 = vsel %vm1159_vm8, %v1174_v42, %v1145_v24  ;;  %v1179_v46 = vsel %vm1159_vm8, %v1178_v43, %v1149_v25  ;;  %v182_v41 = vsel %vm180_vm11, %v2412_v40, 0.0 }
0x1898   : > { %v1202_v49 = vmul.f32 %v1186_v29, %v1175_v44  ;;  %v1206_v51 = vmul.f32 %v1186_v29, %v1179_v46 }
0x189a   : > { %1203 = vadd.xlane.f32.xlu0 %v1202_v49  ;;  %1207 = vadd.xlane.f32.xlu1 %v1206_v51 }
0x18b0   : > { %v1192_v56 = vpop.xlane.xlu1 %1191 }
0x18b1   : > { %v1193_v58 = vsel %vm1189_vm9, %v1192_v56, %v1163_v31 }
0x18b2   : > { %v1220_v59 = vmul.f32 %v1216_v54, %v1193_v58 }
0x18b4   : > { %1221 = vadd.xlane.f32.xlu1 %v1220_v59 }
0x191f   : > { %v1182_v60 = vpop.xlane.xlu0 %1181 }
0x1920   : > { %v1183_v61 = vsel %vm1159_vm8, %v1182_v60, %v1153_v34 }
0x1921   : > { %v1210_v1 = vmul.f32 %v1186_v29, %v1183_v61 }
0x1923   : > { %1211 = vadd.xlane.f32.xlu0 %v1210_v1  ;;  %v1196_v2 = vpop.xlane.xlu0 %1195  ;;  %v1200_v4 = vpop.xlane.xlu1 %1199 }
0x1924   : > { %v1197_v5 = vsel %vm1189_vm9, %v1196_v2, %v1167_v38  ;;  %v1201_v6 = vsel %vm1189_vm9, %v1200_v4, %v1171_v39 }
0x1925   : > { %v1224_v7 = vmul.f32 %v1216_v54, %v1197_v5  ;;  %v1228_v8 = vmul.f32 %v1216_v54, %v1201_v6 }
0x1927   : > { %1225 = vadd.xlane.f32.xlu0 %v1224_v7  ;;  %v1204_v9 = vpop.xlane.xlu0 %1203  ;;  %1229 = vadd.xlane.f32.xlu1 %v1228_v8  ;;  %v1208_v12 = vpop.xlane.xlu1 %1207 }
0x1928   : > { %v1205_v13 = vsel %vm1189_vm9, %v1204_v9, %v1175_v44  ;;  %v1209_v14 = vsel %vm1189_vm9, %v1208_v12, %v1179_v46  ;;  %v1275_v44 = vld [vmem:[#allocation2 + $0x18] ss:$0 sm:$0xff]  ;;  %v187_v12 = vsel %vm186_vm14, %v2412_v40, 0.0  ;;  %vm1581_vm14 = vcmp.eq.s32.totalorder %v2543_v10, 15 }
0x1929   : > { %v1232_v15 = vmul.f32 %v1216_v54, %v1205_v13  ;;  %v1236_v18 = vmul.f32 %v1216_v54, %v1209_v14  ;;  %v1276_v52 = vxor.u32 2147483648, %v1275_v44 }
0x192b   : > { %1233 = vadd.xlane.f32.xlu0 %v1232_v15  ;;  %1237 = vadd.xlane.f32.xlu1 %v1236_v18  ;;  %v307_v15 = vsel %vm306_vm15, -1.0, %v2503_v57  ;;  %vm1619_vm15 = vcmp.eq.s32.totalorder %v2543_v10, 14 }
0x1941   : > { %v1222_v21 = vpop.xlane.xlu1 %1221 }
0x1942   : > { %v1223_v22 = vsel %vm1219_vm10, %v1222_v21, %v1193_v58 }
0x1943   : > { %v1250_v23 = vmul.f32 %v1246_v20, %v1223_v22 }
0x1945   : > { %1251 = vadd.xlane.f32.xlu1 %v1250_v23 }
0x19b0   : > { %v1212_v24 = vpop.xlane.xlu0 %1211 }
0x19b1   : > { %v1213_v25 = vsel %vm1189_vm9, %v1212_v24, %v1183_v61  ;;  %vm1513_vm9 = vcmp.eq.s32.totalorder %v2543_v10, 17 }
0x19b2   : > { %v1240_v26 = vmul.f32 %v1216_v54, %v1213_v25 }
0x19b4   : > { %1241 = vadd.xlane.f32.xlu0 %v1240_v26  ;;  %v1226_v27 = vpop.xlane.xlu0 %1225  ;;  %v1230_v28 = vpop.xlane.xlu1 %1229 }
0x19b5   : > { %v1227_v29 = vsel %vm1219_vm10, %v1226_v27, %v1197_v5  ;;  %v1231_v30 = vsel %vm1219_vm10, %v1230_v28, %v1201_v6 }
0x19b6   : > { %v1254_v31 = vmul.f32 %v1246_v20, %v1227_v29  ;;  %v1258_v32 = vmul.f32 %v1246_v20, %v1231_v30 }
0x19b8   : > { %1255 = vadd.xlane.f32.xlu0 %v1254_v31  ;;  %v1234_v34 = vpop.xlane.xlu0 %1233  ;;  %1259 = vadd.xlane.f32.xlu1 %v1258_v32  ;;  %v1238_v35 = vpop.xlane.xlu1 %1237 }
0x19b9   : > { %v1235_v36 = vsel %vm1219_vm10, %v1234_v34, %v1205_v13  ;;  %v1239_v37 = vsel %vm1219_vm10, %v1238_v35, %v1209_v14 }
0x19ba   : > { %v1262_v38 = vmul.f32 %v1246_v20, %v1235_v36  ;;  %v1266_v39 = vmul.f32 %v1246_v20, %v1239_v37 }
0x19bc   : > { %1263 = vadd.xlane.f32.xlu0 %v1262_v38  ;;  %1267 = vadd.xlane.f32.xlu1 %v1266_v39 }
0x19c0   : > { %183 = vadd.xlane.f32.xlu1 %v182_v41 }
0x19d2   : > { %v1252_v42 = vpop.xlane.xlu1 %1251 }
0x19d3   : > { %v1253_v51 = vsel %vm1249_vm12, %v1252_v42, %v1223_v22 }
0x19d4   : > { %v1280_v59 = vmul.f32 %v1276_v52, %v1253_v51 }
0x1a41   : > { %v1242_v43 = vpop.xlane.xlu0 %1241 }
0x1a42   : > { %v1243_v46 = vsel %vm1219_vm10, %v1242_v43, %v1213_v25 }
0x1a43   : > { %v1270_v49 = vmul.f32 %v1246_v20, %v1243_v46 }
0x1a45   : > { %1271 = vadd.xlane.f32.xlu0 %v1270_v49  ;;  %v1256_v54 = vpop.xlane.xlu0 %1255  ;;  %v1260_v56 = vpop.xlane.xlu1 %1259 }
0x1a46   : > { %v1257_v58 = vsel %vm1249_vm12, %v1256_v54, %v1227_v29  ;;  %v1261_v61 = vsel %vm1249_vm12, %v1260_v56, %v1231_v30 }
0x1a47   : > { %v1284_v60 = vmul.f32 %v1276_v52, %v1257_v58  ;;  %v1288_v5 = vmul.f32 %v1276_v52, %v1261_v61 }
0x1a49   : > { %v1264_v1 = vpop.xlane.xlu0 %1263  ;;  %1281 = vadd.xlane.f32.xlu0 %v1280_v59  ;;  %v1268_v2 = vpop.xlane.xlu1 %1267  ;;  %1285 = vadd.xlane.f32.xlu1 %v1284_v60 }
0x1a4a   : > { %v1265_v4 = vsel %vm1249_vm12, %v1264_v1, %v1235_v36  ;;  %v1269_v7 = vsel %vm1249_vm12, %v1268_v2, %v1239_v37 }
0x1a4b   : > { %v1292_v6 = vmul.f32 %v1276_v52, %v1265_v4  ;;  %v1296_v9 = vmul.f32 %v1276_v52, %v1269_v7 }
0x1a4d   : > { %1289 = vadd.xlane.f32.xlu0 %v1288_v5  ;;  %1293 = vadd.xlane.f32.xlu1 %v1292_v6  ;;  %v2985_v8 = vpop.xlane.xlu1 %183 }
0x1a4e   : > { %2472 = vrcp.f32 %v2985_v8 }
0x1a51   : > { %1297 = vadd.xlane.f32.xlu0 %v1296_v9 }
0x1a58   : > { %v2991_v13 = vpop.eup %2472 }
0x1a59   : > { %v189_v14 = vmul.f32 %v2991_v13, %v187_v12 }
0x1a5b   : > { %190 = vst [vmem:[#allocation2 + $0x10] sm:$0xff] %v189_v14 }
0x1a62   : > { %v1305_v18 = vld [vmem:[#allocation2 + $0x17] ss:$0 sm:$0xff]  ;;  %v1339_v39 = vld [vmem:[#allocation2 + $0x16] ss:$0 sm:$0xff]  ;;  %v1373_v12 = vld [vmem:[#allocation2 + $0x15] ss:$0 sm:$0xff] }
0x1a63   : > { %v1306_v19 = vxor.u32 2147483648, %v1305_v18  ;;  %v1340_v40 = vxor.u32 2147483648, %v1339_v39  ;;  %v1374_v14 = vxor.u32 2147483648, %v1373_v12 }
0x1a65   : > { %v1310_v20 = vmul.f32 %v1306_v19, %v307_v15 }
0x1a67   : > { %1311 = vadd.xlane.f32.xlu0 %v1310_v20 }
0x1ad2   : > { %v1272_v21 = vpop.xlane.xlu0 %1271 }
0x1ad3   : > { %v1273_v22 = vsel %vm1249_vm12, %v1272_v21, %v1243_v46 }
0x1ad4   : > { %v1300_v23 = vmul.f32 %v1276_v52, %v1273_v22 }
0x1ad6   : > { %v1282_v24 = vpop.xlane.xlu0 %1281  ;;  %1301 = vadd.xlane.f32.xlu1 %v1300_v23  ;;  %v1286_v25 = vpop.xlane.xlu1 %1285 }
0x1ad7   : > { %v1283_v26 = vsel %vm1279_vm1, %v1282_v24, %v1253_v51  ;;  %v1287_v27 = vsel %vm1279_vm1, %v1286_v25, %v1257_v58 }
0x1ad8   : > { %v1314_v28 = vmul.f32 %v1306_v19, %v1283_v26  ;;  %v1318_v29 = vmul.f32 %v1306_v19, %v1287_v27 }
0x1ada   : > { %v1290_v30 = vpop.xlane.xlu0 %1289  ;;  %1315 = vadd.xlane.f32.xlu1 %v1314_v28  ;;  %1319 = vadd.xlane.f32.xlu0 %v1318_v29  ;;  %v1294_v31 = vpop.xlane.xlu1 %1293 }
0x1adb   : > { %v1291_v32 = vsel %vm1279_vm1, %v1290_v30, %v1261_v61  ;;  %v1295_v33 = vsel %vm1279_vm1, %v1294_v31, %v1265_v4 }
0x1adc   : > { %v1322_v34 = vmul.f32 %v1306_v19, %v1291_v32  ;;  %v1326_v35 = vmul.f32 %v1306_v19, %v1295_v33 }
0x1ade   : > { %v1298_v36 = vpop.xlane.xlu0 %1297  ;;  %1323 = vadd.xlane.f32.xlu1 %v1322_v34  ;;  %1327 = vadd.xlane.f32.xlu0 %v1326_v35 }
0x1adf   : > { %v1299_v37 = vsel %vm1279_vm1, %v1298_v36, %v1269_v7 }
0x1ae0   : > { %v1330_v38 = vmul.f32 %v1306_v19, %v1299_v37 }
0x1ae2   : > { %1331 = vadd.xlane.f32.xlu1 %v1330_v38  ;;  %v1407_v38 = vld [vmem:[#allocation2 + $0x14] ss:$0 sm:$0xff] }
0x1ae3   : > { %v1408_v39 = vxor.u32 2147483648, %v1407_v38 }
0x1af4   : > { %v1312_v41 = vpop.xlane.xlu0 %1311 }
0x1af5   : > { %v1313_v42 = vsel %vm1309_vm2, %v1312_v41, %v307_v15 }
0x1af6   : > { %v1344_v43 = vmul.f32 %v1340_v40, %v1313_v42 }
0x1af8   : > { %1345 = vadd.xlane.f32.xlu1 %v1344_v43 }
0x1b63   : > { %v1302_v44 = vpop.xlane.xlu1 %1301 }
0x1b64   : > { %v1303_v46 = vsel %vm1279_vm1, %v1302_v44, %v1273_v22  ;;  %vm1657_vm1 = vcmp.eq.s32.totalorder %v2543_v10, 13 }
0x1b65   : > { %v1334_v49 = vmul.f32 %v1306_v19, %v1303_v46 }
0x1b67   : > { %v1320_v51 = vpop.xlane.xlu0 %1319  ;;  %1335 = vadd.xlane.f32.xlu0 %v1334_v49  ;;  %v1316_v52 = vpop.xlane.xlu1 %1315 }
0x1b68   : > { %v1321_v54 = vsel %vm1309_vm2, %v1320_v51, %v1287_v27  ;;  %v1317_v56 = vsel %vm1309_vm2, %v1316_v52, %v1283_v26 }
0x1b69   : > { %v1352_v58 = vmul.f32 %v1340_v40, %v1321_v54  ;;  %v1348_v59 = vmul.f32 %v1340_v40, %v1317_v56 }
0x1b6b   : > { %1353 = vadd.xlane.f32.xlu1 %v1352_v58  ;;  %v1328_v60 = vpop.xlane.xlu0 %1327  ;;  %1349 = vadd.xlane.f32.xlu0 %v1348_v59  ;;  %v1324_v61 = vpop.xlane.xlu1 %1323 }
0x1b6c   : > { %v1329_v1 = vsel %vm1309_vm2, %v1328_v60, %v1295_v33  ;;  %v1325_v2 = vsel %vm1309_vm2, %v1324_v61, %v1291_v32 }
0x1b6d   : > { %v1360_v4 = vmul.f32 %v1340_v40, %v1329_v1  ;;  %v1356_v5 = vmul.f32 %v1340_v40, %v1325_v2 }
0x1b6f   : > { %1361 = vadd.xlane.f32.xlu1 %v1360_v4  ;;  %1357 = vadd.xlane.f32.xlu0 %v1356_v5  ;;  %v1332_v6 = vpop.xlane.xlu1 %1331 }
0x1b70   : > { %v1333_v7 = vsel %vm1309_vm2, %v1332_v6, %v1299_v37 }
0x1b71   : > { %v1364_v9 = vmul.f32 %v1340_v40, %v1333_v7 }
0x1b73   : > { %1365 = vadd.xlane.f32.xlu0 %v1364_v9  ;;  %v1441_v9 = vld [vmem:[#allocation2 + $0x13] ss:$0 sm:$0xff] }
0x1b74   : > { %v1442_v12 = vxor.u32 2147483648, %v1441_v9 }
0x1b85   : > { %v1346_v15 = vpop.xlane.xlu1 %1345 }
0x1b86   : > { %v1347_v18 = vsel %vm1343_vm3, %v1346_v15, %v1313_v42 }
0x1b87   : > { %v1378_v19 = vmul.f32 %v1374_v14, %v1347_v18 }
0x1b89   : > { %1379 = vadd.xlane.f32.xlu0 %v1378_v19 }
0x1bf4   : > { %v1336_v20 = vpop.xlane.xlu0 %1335 }
0x1bf5   : > { %v1337_v21 = vsel %vm1309_vm2, %v1336_v20, %v1303_v46  ;;  %vm1695_vm2 = vcmp.eq.s32.totalorder %v2543_v10, 12 }
0x1bf6   : > { %v1368_v22 = vmul.f32 %v1340_v40, %v1337_v21 }
0x1bf8   : > { %1369 = vadd.xlane.f32.xlu1 %v1368_v22  ;;  %v1350_v23 = vpop.xlane.xlu0 %1349  ;;  %v1354_v24 = vpop.xlane.xlu1 %1353 }
0x1bf9   : > { %v1351_v25 = vsel %vm1343_vm3, %v1350_v23, %v1317_v56  ;;  %v1355_v26 = vsel %vm1343_vm3, %v1354_v24, %v1321_v54 }
0x1bfa   : > { %v1382_v27 = vmul.f32 %v1374_v14, %v1351_v25  ;;  %v1386_v28 = vmul.f32 %v1374_v14, %v1355_v26 }
0x1bfc   : > { %1383 = vadd.xlane.f32.xlu1 %v1382_v27  ;;  %v1358_v29 = vpop.xlane.xlu0 %1357  ;;  %1387 = vadd.xlane.f32.xlu0 %v1386_v28  ;;  %v1362_v30 = vpop.xlane.xlu1 %1361 }
0x1bfd   : > { %v1359_v31 = vsel %vm1343_vm3, %v1358_v29, %v1325_v2  ;;  %v1363_v32 = vsel %vm1343_vm3, %v1362_v30, %v1329_v1 }
0x1bfe   : > { %v1390_v33 = vmul.f32 %v1374_v14, %v1359_v31  ;;  %v1394_v34 = vmul.f32 %v1374_v14, %v1363_v32 }
0x1c00   : > { %1391 = vadd.xlane.f32.xlu1 %v1390_v33  ;;  %v1366_v35 = vpop.xlane.xlu0 %1365  ;;  %1395 = vadd.xlane.f32.xlu0 %v1394_v34 }
0x1c01   : > { %v1367_v36 = vsel %vm1343_vm3, %v1366_v35, %v1333_v7 }
0x1c02   : > { %v1398_v37 = vmul.f32 %v1374_v14, %v1367_v36 }
0x1c04   : > { %1399 = vadd.xlane.f32.xlu1 %v1398_v37  ;;  %v1475_v37 = vld [vmem:[#allocation2 + $0x12] ss:$0 sm:$0xff] }
0x1c05   : > { %v1476_v38 = vxor.u32 2147483648, %v1475_v37  ;;  %v2411_v37 = vld [vmem:[%s2549_s20 + $0x8] sm:$0xff] }
0x1c16   : > { %v1380_v40 = vpop.xlane.xlu0 %1379 }
0x1c17   : > { %v1381_v41 = vsel %vm1377_vm4, %v1380_v40, %v1347_v18 }
0x1c18   : > { %v1412_v42 = vmul.f32 %v1408_v39, %v1381_v41 }
0x1c1a   : > { %1413 = vadd.xlane.f32.xlu1 %v1412_v42 }
0x1c85   : > { %v1370_v43 = vpop.xlane.xlu1 %1369 }
0x1c86   : > { %v1371_v44 = vsel %vm1343_vm3, %v1370_v43, %v1337_v21  ;;  %vm1733_vm3 = vcmp.eq.s32.totalorder %v2543_v10, 11 }
0x1c87   : > { %v1402_v46 = vmul.f32 %v1374_v14, %v1371_v44 }
0x1c89   : > { %v1388_v49 = vpop.xlane.xlu0 %1387  ;;  %1403 = vadd.xlane.f32.xlu0 %v1402_v46  ;;  %v1384_v51 = vpop.xlane.xlu1 %1383 }
0x1c8a   : > { %v1389_v52 = vsel %vm1377_vm4, %v1388_v49, %v1355_v26  ;;  %v1385_v54 = vsel %vm1377_vm4, %v1384_v51, %v1351_v25 }
0x1c8b   : > { %v1420_v56 = vmul.f32 %v1408_v39, %v1389_v52  ;;  %v1416_v58 = vmul.f32 %v1408_v39, %v1385_v54 }
0x1c8d   : > { %1421 = vadd.xlane.f32.xlu1 %v1420_v56  ;;  %v1396_v59 = vpop.xlane.xlu0 %1395  ;;  %1417 = vadd.xlane.f32.xlu0 %v1416_v58  ;;  %v1392_v60 = vpop.xlane.xlu1 %1391 }
0x1c8e   : > { %v1397_v61 = vsel %vm1377_vm4, %v1396_v59, %v1363_v32  ;;  %v1393_v1 = vsel %vm1377_vm4, %v1392_v60, %v1359_v31 }
0x1c8f   : > { %v1428_v2 = vmul.f32 %v1408_v39, %v1397_v61  ;;  %v1424_v4 = vmul.f32 %v1408_v39, %v1393_v1 }
0x1c91   : > { %1429 = vadd.xlane.f32.xlu1 %v1428_v2  ;;  %1425 = vadd.xlane.f32.xlu0 %v1424_v4  ;;  %v1400_v5 = vpop.xlane.xlu1 %1399 }
0x1c92   : > { %v1401_v6 = vsel %vm1377_vm4, %v1400_v5, %v1367_v36 }
0x1c93   : > { %v1432_v7 = vmul.f32 %v1408_v39, %v1401_v6 }
0x1c95   : > { %1433 = vadd.xlane.f32.xlu0 %v1432_v7  ;;  %v1509_v7 = vld [vmem:[#allocation2 + $0x11] ss:$0 sm:$0xff] }
0x1c96   : > { %v1510_v9 = vxor.u32 2147483648, %v1509_v7 }
0x1ca7   : > { %v1414_v14 = vpop.xlane.xlu1 %1413 }
0x1ca8   : > { %v1415_v15 = vsel %vm1411_vm5, %v1414_v14, %v1381_v41 }
0x1ca9   : > { %v1446_v18 = vmul.f32 %v1442_v12, %v1415_v15 }
0x1cab   : > { %1447 = vadd.xlane.f32.xlu0 %v1446_v18 }
0x1d16   : > { %v1404_v19 = vpop.xlane.xlu0 %1403 }
0x1d17   : > { %v1405_v20 = vsel %vm1377_vm4, %v1404_v19, %v1371_v44  ;;  %vm1771_vm4 = vcmp.eq.s32.totalorder %v2543_v10, 10 }
0x1d18   : > { %v1436_v21 = vmul.f32 %v1408_v39, %v1405_v20 }
0x1d1a   : > { %1437 = vadd.xlane.f32.xlu1 %v1436_v21  ;;  %v1418_v22 = vpop.xlane.xlu0 %1417  ;;  %v1422_v23 = vpop.xlane.xlu1 %1421 }
0x1d1b   : > { %v1419_v24 = vsel %vm1411_vm5, %v1418_v22, %v1385_v54  ;;  %v1423_v25 = vsel %vm1411_vm5, %v1422_v23, %v1389_v52 }
0x1d1c   : > { %v1450_v26 = vmul.f32 %v1442_v12, %v1419_v24  ;;  %v1454_v27 = vmul.f32 %v1442_v12, %v1423_v25 }
0x1d1e   : > { %1451 = vadd.xlane.f32.xlu1 %v1450_v26  ;;  %v1426_v28 = vpop.xlane.xlu0 %1425  ;;  %1455 = vadd.xlane.f32.xlu0 %v1454_v27  ;;  %v1430_v29 = vpop.xlane.xlu1 %1429 }
0x1d1f   : > { %v1427_v30 = vsel %vm1411_vm5, %v1426_v28, %v1393_v1  ;;  %v1431_v31 = vsel %vm1411_vm5, %v1430_v29, %v1397_v61 }
0x1d20   : > { %v1458_v32 = vmul.f32 %v1442_v12, %v1427_v30  ;;  %v1462_v33 = vmul.f32 %v1442_v12, %v1431_v31 }
0x1d22   : > { %1459 = vadd.xlane.f32.xlu1 %v1458_v32  ;;  %v1434_v34 = vpop.xlane.xlu0 %1433  ;;  %1463 = vadd.xlane.f32.xlu0 %v1462_v33  ;;  %v163_v33 = vadd.s32 8, %v2545_v11 }
0x1d23   : > { %v1435_v35 = vsel %vm1411_vm5, %v1434_v34, %v1401_v6 }
0x1d24   : > { %v1466_v36 = vmul.f32 %v1442_v12, %v1435_v35  ;;  %vm164_vm8 = vcmp.eq.s32.totalorder %v163_v33, %v2543_v10  ;;  %vm169_vm10 = vcmp.le.s32.totalorder %v163_v33, %v2543_v10  ;;  %vm299_vm12 = vcmp.eq.s32.totalorder %v2543_v10, %v163_v33 }
0x1d25   : > { %vm170_vm11 = vmand %vm169_vm10, %vm144_vm0  ;;  %vm1885_vm10 = vcmp.eq.s32.totalorder %v2543_v10, 7 }
0x1d26   : > { %1467 = vadd.xlane.f32.xlu1 %v1466_v36 }
0x1d38   : > { %v1448_v39 = vpop.xlane.xlu0 %1447 }
0x1d39   : > { %v1449_v40 = vsel %vm1445_vm6, %v1448_v39, %v1415_v15 }
0x1d3a   : > { %v1480_v41 = vmul.f32 %v1476_v38, %v1449_v40 }
0x1d3c   : > { %1481 = vadd.xlane.f32.xlu1 %v1480_v41  ;;  %v1543_v41 = vld [vmem:[#allocation2 + $0x10] ss:$0 sm:$0xff] }
0x1da7   : > { %v1438_v42 = vpop.xlane.xlu1 %1437 }
0x1da8   : > { %v1439_v43 = vsel %vm1411_vm5, %v1438_v42, %v1405_v20  ;;  %vm148_vm5 = vcmp.eq.s32.totalorder %v2545_v11, %v2543_v10 }
0x1da9   : > { %v1470_v44 = vmul.f32 %v1442_v12, %v1439_v43 }
0x1dab   : > { %v1456_v46 = vpop.xlane.xlu0 %1455  ;;  %1471 = vadd.xlane.f32.xlu0 %v1470_v44  ;;  %v1452_v49 = vpop.xlane.xlu1 %1451 }
0x1dac   : > { %v1457_v51 = vsel %vm1445_vm6, %v1456_v46, %v1423_v25  ;;  %v1453_v52 = vsel %vm1445_vm6, %v1452_v49, %v1419_v24  ;;  %v1544_v46 = vxor.u32 2147483648, %v1543_v41 }
0x1dad   : > { %v1488_v54 = vmul.f32 %v1476_v38, %v1457_v51  ;;  %v1484_v56 = vmul.f32 %v1476_v38, %v1453_v52 }
0x1daf   : > { %1489 = vadd.xlane.f32.xlu1 %v1488_v54  ;;  %v1464_v58 = vpop.xlane.xlu0 %1463  ;;  %1485 = vadd.xlane.f32.xlu0 %v1484_v56  ;;  %v1460_v59 = vpop.xlane.xlu1 %1459 }
0x1db0   : > { %v1465_v60 = vsel %vm1445_vm6, %v1464_v58, %v1431_v31  ;;  %v1461_v61 = vsel %vm1445_vm6, %v1460_v59, %v1427_v30 }
0x1db1   : > { %v1496_v1 = vmul.f32 %v1476_v38, %v1465_v60  ;;  %v1492_v2 = vmul.f32 %v1476_v38, %v1461_v61 }
0x1db3   : > { %1497 = vadd.xlane.f32.xlu1 %v1496_v1  ;;  %1493 = vadd.xlane.f32.xlu0 %v1492_v2  ;;  %v1468_v4 = vpop.xlane.xlu1 %1467 }
0x1db4   : > { %v1469_v5 = vsel %vm1445_vm6, %v1468_v4, %v1435_v35 }
0x1db5   : > { %v1500_v6 = vmul.f32 %v1476_v38, %v1469_v5 }
0x1db7   : > { %1501 = vadd.xlane.f32.xlu0 %v1500_v6 }
0x1dc9   : > { %v1482_v12 = vpop.xlane.xlu1 %1481 }
0x1dca   : > { %v1483_v14 = vsel %vm1479_vm7, %v1482_v12, %v1449_v40 }
0x1dcb   : > { %v1514_v15 = vmul.f32 %v1510_v9, %v1483_v14 }
0x1dcd   : > { %1515 = vadd.xlane.f32.xlu0 %v1514_v15 }
0x1e38   : > { %v1472_v18 = vpop.xlane.xlu0 %1471 }
0x1e39   : > { %v1473_v19 = vsel %vm1445_vm6, %v1472_v18, %v1439_v43  ;;  %vm1809_vm6 = vcmp.eq.s32.totalorder %v2543_v10, 9 }
0x1e3a   : > { %v1504_v20 = vmul.f32 %v1476_v38, %v1473_v19  ;;  %v166_v38 = vsel %vm164_vm8, %v2411_v37, 0.0 }
0x1e3c   : > { %1505 = vadd.xlane.f32.xlu1 %v1504_v20  ;;  %v1486_v21 = vpop.xlane.xlu0 %1485  ;;  %v1490_v22 = vpop.xlane.xlu1 %1489 }
0x1e3d   : > { %v1487_v23 = vsel %vm1479_vm7, %v1486_v21, %v1453_v52  ;;  %v1491_v24 = vsel %vm1479_vm7, %v1490_v22, %v1457_v51 }
0x1e3e   : > { %v1518_v25 = vmul.f32 %v1510_v9, %v1487_v23  ;;  %v1522_v26 = vmul.f32 %v1510_v9, %v1491_v24 }
0x1e40   : > { %1519 = vadd.xlane.f32.xlu1 %v1518_v25  ;;  %v1494_v27 = vpop.xlane.xlu0 %1493  ;;  %1523 = vadd.xlane.f32.xlu0 %v1522_v26  ;;  %v1498_v28 = vpop.xlane.xlu1 %1497 }
0x1e41   : > { %v1495_v29 = vsel %vm1479_vm7, %v1494_v27, %v1461_v61  ;;  %v1499_v30 = vsel %vm1479_vm7, %v1498_v28, %v1465_v60 }
0x1e42   : > { %v1526_v31 = vmul.f32 %v1510_v9, %v1495_v29  ;;  %v1530_v32 = vmul.f32 %v1510_v9, %v1499_v30 }
0x1e44   : > { %1527 = vadd.xlane.f32.xlu1 %v1526_v31  ;;  %v1502_v34 = vpop.xlane.xlu0 %1501  ;;  %1531 = vadd.xlane.f32.xlu0 %v1530_v32 }
0x1e45   : > { %v1503_v35 = vsel %vm1479_vm7, %v1502_v34, %v1469_v5 }
0x1e46   : > { %v1534_v36 = vmul.f32 %v1510_v9, %v1503_v35 }
0x1e48   : > { %1535 = vadd.xlane.f32.xlu1 %v1534_v36 }
0x1e4c   : > { %167 = vadd.xlane.f32.xlu1 %v166_v38 }
0x1e5a   : > { %v1516_v39 = vpop.xlane.xlu0 %1515 }
0x1e5b   : > { %v1517_v44 = vsel %vm1513_vm9, %v1516_v39, %v1483_v14  ;;  %v171_v14 = vsel %vm170_vm11, %v2411_v37, 0.0  ;;  %vm1927_vm11 = vcmp.eq.s32.totalorder %v2543_v10, 6 }
0x1e5c   : > { %v1548_v54 = vmul.f32 %v1544_v46, %v1517_v44 }
0x1ec9   : > { %v1506_v40 = vpop.xlane.xlu1 %1505 }
0x1eca   : > { %v1507_v42 = vsel %vm1479_vm7, %v1506_v40, %v1473_v19  ;;  %v300_v19 = vsel %vm299_vm12, -1.0, %v2503_v57  ;;  %vm153_vm7 = vcmp.le.s32.totalorder %v2545_v11, %v2543_v10  ;;  %vm1969_vm12 = vcmp.eq.s32.totalorder %v2543_v10, 5 }
0x1ecb   : > { %v1538_v43 = vmul.f32 %v1510_v9, %v1507_v42  ;;  %vm154_vm8 = vmand %vm153_vm7, %vm144_vm0  ;;  %vm1847_vm0 = vcmp.eq.s32.totalorder %v2543_v10, 8  ;;  %vm2234_vm7 = vweird.f32 %v2869_v45 }
0x1ecd   : > { %v1524_v49 = vpop.xlane.xlu0 %1523  ;;  %1539 = vadd.xlane.f32.xlu0 %v1538_v43  ;;  %v1520_v51 = vpop.xlane.xlu1 %1519 }
0x1ece   : > { %v1521_v52 = vsel %vm1513_vm9, %v1520_v51, %v1487_v23  ;;  %v1525_v58 = vsel %vm1513_vm9, %v1524_v49, %v1491_v24 }
0x1ecf   : > { %v1552_v56 = vmul.f32 %v1544_v46, %v1521_v52  ;;  %v1556_v1 = vmul.f32 %v1544_v46, %v1525_v58 }
0x1ed1   : > { %v1532_v59 = vpop.xlane.xlu0 %1531  ;;  %1549 = vadd.xlane.f32.xlu0 %v1548_v54  ;;  %v1528_v60 = vpop.xlane.xlu1 %1527  ;;  %1553 = vadd.xlane.f32.xlu1 %v1552_v56 }
0x1ed2   : > { %v1529_v61 = vsel %vm1513_vm9, %v1528_v60, %v1495_v29  ;;  %v1533_v4 = vsel %vm1513_vm9, %v1532_v59, %v1499_v30 }
0x1ed3   : > { %v1560_v2 = vmul.f32 %v1544_v46, %v1529_v61  ;;  %v1564_v7 = vmul.f32 %v1544_v46, %v1533_v4 }
0x1ed5   : > { %1557 = vadd.xlane.f32.xlu0 %v1556_v1  ;;  %v1536_v5 = vpop.xlane.xlu1 %1535  ;;  %1561 = vadd.xlane.f32.xlu1 %v1560_v2 }
0x1ed6   : > { %v1537_v6 = vsel %vm1513_vm9, %v1536_v5, %v1503_v35 }
0x1ed7   : > { %v1568_v9 = vmul.f32 %v1544_v46, %v1537_v6 }
0x1ed9   : > { %1565 = vadd.xlane.f32.xlu0 %v1564_v7  ;;  %1569 = vadd.xlane.f32.xlu1 %v1568_v9  ;;  %v3117_v12 = vpop.xlane.xlu1 %167 }
0x1eda   : > { %2474 = vrcp.f32 %v3117_v12 }
0x1ee4   : > { %v3123_v15 = vpop.eup %2474 }
0x1ee5   : > { %v173_v18 = vmul.f32 %v3123_v15, %v171_v14 }
0x1ee7   : > { %174 = vst [vmem:[#allocation2 + $0x8] sm:$0xff] %v173_v18 }
0x1eee   : > { %v1577_v20 = vld [vmem:[#allocation2 + $0xf] ss:$0 sm:$0xff] }
0x1eef   : > { %v1578_v21 = vxor.u32 2147483648, %v1577_v20 }
0x1ef1   : > { %v1582_v22 = vmul.f32 %v1578_v21, %v300_v19 }
0x1ef3   : > { %1583 = vadd.xlane.f32.xlu1 %v1582_v22 }
0x1f5a   : > { %v1540_v23 = vpop.xlane.xlu0 %1539 }
0x1f5b   : > { %v1541_v24 = vsel %vm1513_vm9, %v1540_v23, %v1507_v42  ;;  %vm292_vm9 = vcmp.eq.s32.totalorder %v2543_v10, %v2545_v11 }
0x1f5c   : > { %v1572_v25 = vmul.f32 %v1544_v46, %v1541_v24 }
0x1f5e   : > { %1573 = vadd.xlane.f32.xlu0 %v1572_v25  ;;  %v1550_v26 = vpop.xlane.xlu0 %1549  ;;  %v1554_v27 = vpop.xlane.xlu1 %1553  ;;  %v1653_v25 = vld [vmem:[#allocation2 + $0xd] ss:$0 sm:$0xff] }
0x1f5f   : > { %v1551_v28 = vsel %vm1547_vm13, %v1550_v26, %v1517_v44  ;;  %v1555_v29 = vsel %vm1547_vm13, %v1554_v27, %v1521_v52  ;;  %v1615_v44 = vld [vmem:[#allocation2 + $0xe] ss:$0 sm:$0xff]  ;;  %v1654_v26 = vxor.u32 2147483648, %v1653_v25 }
0x1f60   : > { %v1586_v30 = vmul.f32 %v1578_v21, %v1551_v28  ;;  %v1590_v31 = vmul.f32 %v1578_v21, %v1555_v29  ;;  %v1616_v46 = vxor.u32 2147483648, %v1615_v44 }
0x1f62   : > { %v1558_v32 = vpop.xlane.xlu0 %1557  ;;  %1587 = vadd.xlane.f32.xlu0 %v1586_v30  ;;  %1591 = vadd.xlane.f32.xlu1 %v1590_v31  ;;  %v1562_v33 = vpop.xlane.xlu1 %1561 }
0x1f63   : > { %v1559_v34 = vsel %vm1547_vm13, %v1558_v32, %v1525_v58  ;;  %v1563_v35 = vsel %vm1547_vm13, %v1562_v33, %v1529_v61 }
0x1f64   : > { %v1594_v36 = vmul.f32 %v1578_v21, %v1559_v34  ;;  %v1598_v37 = vmul.f32 %v1578_v21, %v1563_v35 }
0x1f66   : > { %v1566_v38 = vpop.xlane.xlu0 %1565  ;;  %1595 = vadd.xlane.f32.xlu0 %v1594_v36  ;;  %1599 = vadd.xlane.f32.xlu1 %v1598_v37  ;;  %v1570_v39 = vpop.xlane.xlu1 %1569 }
0x1f67   : > { %v1567_v40 = vsel %vm1547_vm13, %v1566_v38, %v1533_v4  ;;  %v1571_v41 = vsel %vm1547_vm13, %v1570_v39, %v1537_v6 }
0x1f68   : > { %v1602_v42 = vmul.f32 %v1578_v21, %v1567_v40  ;;  %v1606_v43 = vmul.f32 %v1578_v21, %v1571_v41 }
0x1f6a   : > { %1603 = vadd.xlane.f32.xlu0 %v1602_v42  ;;  %1607 = vadd.xlane.f32.xlu1 %v1606_v43 }
0x1f80   : > { %v1584_v49 = vpop.xlane.xlu1 %1583 }
0x1f81   : > { %v1585_v51 = vsel %vm1581_vm14, %v1584_v49, %v300_v19 }
0x1f82   : > { %v1620_v52 = vmul.f32 %v1616_v46, %v1585_v51 }
0x1f84   : > { %1621 = vadd.xlane.f32.xlu1 %v1620_v52 }
0x1feb   : > { %v1574_v54 = vpop.xlane.xlu0 %1573 }
0x1fec   : > { %v1575_v56 = vsel %vm1547_vm13, %v1574_v54, %v1541_v24  ;;  %vm2011_vm13 = vcmp.eq.s32.totalorder %v2543_v10, 4 }
0x1fed   : > { %v1610_v58 = vmul.f32 %v1578_v21, %v1575_v56 }
0x1fef   : > { %1611 = vadd.xlane.f32.xlu0 %v1610_v58  ;;  %v1588_v59 = vpop.xlane.xlu0 %1587  ;;  %v1592_v60 = vpop.xlane.xlu1 %1591  ;;  %v1691_v58 = vld [vmem:[#allocation2 + $0xc] ss:$0 sm:$0xff] }
0x1ff0   : > { %v1589_v61 = vsel %vm1581_vm14, %v1588_v59, %v1551_v28  ;;  %v1593_v1 = vsel %vm1581_vm14, %v1592_v60, %v1555_v29  ;;  %v1692_v59 = vxor.u32 2147483648, %v1691_v58 }
0x1ff1   : > { %v1624_v2 = vmul.f32 %v1616_v46, %v1589_v61  ;;  %v1628_v4 = vmul.f32 %v1616_v46, %v1593_v1 }
0x1ff3   : > { %1625 = vadd.xlane.f32.xlu0 %v1624_v2  ;;  %v1596_v5 = vpop.xlane.xlu0 %1595  ;;  %1629 = vadd.xlane.f32.xlu1 %v1628_v4  ;;  %v1600_v6 = vpop.xlane.xlu1 %1599 }
0x1ff4   : > { %v1597_v7 = vsel %vm1581_vm14, %v1596_v5, %v1559_v34  ;;  %v1601_v9 = vsel %vm1581_vm14, %v1600_v6, %v1563_v35 }
0x1ff5   : > { %v1632_v14 = vmul.f32 %v1616_v46, %v1597_v7  ;;  %v1636_v18 = vmul.f32 %v1616_v46, %v1601_v9 }
0x1ff7   : > { %1633 = vadd.xlane.f32.xlu0 %v1632_v14  ;;  %v1604_v19 = vpop.xlane.xlu0 %1603  ;;  %1637 = vadd.xlane.f32.xlu1 %v1636_v18  ;;  %v1608_v20 = vpop.xlane.xlu1 %1607 }
0x1ff8   : > { %v1605_v21 = vsel %vm1581_vm14, %v1604_v19, %v1567_v40  ;;  %v1609_v22 = vsel %vm1581_vm14, %v1608_v20, %v1571_v41 }
0x1ff9   : > { %v1640_v23 = vmul.f32 %v1616_v46, %v1605_v21  ;;  %v1644_v24 = vmul.f32 %v1616_v46, %v1609_v22 }
0x1ffb   : > { %1641 = vadd.xlane.f32.xlu0 %v1640_v23  ;;  %1645 = vadd.xlane.f32.xlu1 %v1644_v24 }
0x2011   : > { %v1622_v27 = vpop.xlane.xlu1 %1621 }
0x2012   : > { %v1623_v28 = vsel %vm1619_vm15, %v1622_v27, %v1585_v51 }
0x2013   : > { %v1658_v29 = vmul.f32 %v1654_v26, %v1623_v28 }
0x2015   : > { %1659 = vadd.xlane.f32.xlu1 %v1658_v29 }
0x207c   : > { %v1612_v30 = vpop.xlane.xlu0 %1611 }
0x207d   : > { %v1613_v31 = vsel %vm1581_vm14, %v1612_v30, %v1575_v56  ;;  %vm2053_vm14 = vcmp.eq.s32.totalorder %v2543_v10, 3 }
0x207e   : > { %v1648_v32 = vmul.f32 %v1616_v46, %v1613_v31 }
0x2080   : > { %1649 = vadd.xlane.f32.xlu0 %v1648_v32  ;;  %v1626_v33 = vpop.xlane.xlu0 %1625  ;;  %v1630_v34 = vpop.xlane.xlu1 %1629  ;;  %v1729_v32 = vld [vmem:[#allocation2 + $0xb] ss:$0 sm:$0xff] }
0x2081   : > { %v1627_v35 = vsel %vm1619_vm15, %v1626_v33, %v1589_v61  ;;  %v1631_v36 = vsel %vm1619_vm15, %v1630_v34, %v1593_v1  ;;  %v1730_v33 = vxor.u32 2147483648, %v1729_v32 }
0x2082   : > { %v1662_v37 = vmul.f32 %v1654_v26, %v1627_v35  ;;  %v1666_v38 = vmul.f32 %v1654_v26, %v1631_v36 }
0x2084   : > { %1663 = vadd.xlane.f32.xlu0 %v1662_v37  ;;  %v1634_v39 = vpop.xlane.xlu0 %1633  ;;  %1667 = vadd.xlane.f32.xlu1 %v1666_v38  ;;  %v1638_v40 = vpop.xlane.xlu1 %1637 }
0x2085   : > { %v1635_v41 = vsel %vm1619_vm15, %v1634_v39, %v1597_v7  ;;  %v1639_v42 = vsel %vm1619_vm15, %v1638_v40, %v1601_v9 }
0x2086   : > { %v1670_v43 = vmul.f32 %v1654_v26, %v1635_v41  ;;  %v1674_v44 = vmul.f32 %v1654_v26, %v1639_v42 }
0x2088   : > { %1671 = vadd.xlane.f32.xlu0 %v1670_v43  ;;  %v1642_v46 = vpop.xlane.xlu0 %1641  ;;  %1675 = vadd.xlane.f32.xlu1 %v1674_v44  ;;  %v1646_v49 = vpop.xlane.xlu1 %1645 }
0x2089   : > { %v1643_v51 = vsel %vm1619_vm15, %v1642_v46, %v1605_v21  ;;  %v1647_v52 = vsel %vm1619_vm15, %v1646_v49, %v1609_v22 }
0x208a   : > { %v1678_v54 = vmul.f32 %v1654_v26, %v1643_v51  ;;  %v1682_v56 = vmul.f32 %v1654_v26, %v1647_v52 }
0x208c   : > { %1679 = vadd.xlane.f32.xlu0 %v1678_v54  ;;  %1683 = vadd.xlane.f32.xlu1 %v1682_v56 }
0x20a2   : > { %v1660_v60 = vpop.xlane.xlu1 %1659 }
0x20a3   : > { %v1661_v61 = vsel %vm1657_vm1, %v1660_v60, %v1623_v28 }
0x20a4   : > { %v1696_v1 = vmul.f32 %v1692_v59, %v1661_v61 }
0x20a6   : > { %1697 = vadd.xlane.f32.xlu1 %v1696_v1 }
0x210d   : > { %v1650_v2 = vpop.xlane.xlu0 %1649 }
0x210e   : > { %v1651_v4 = vsel %vm1619_vm15, %v1650_v2, %v1613_v31  ;;  %vm2095_vm15 = vcmp.eq.s32.totalorder %v2543_v10, 2 }
0x210f   : > { %v1686_v5 = vmul.f32 %v1654_v26, %v1651_v4 }
0x2111   : > { %1687 = vadd.xlane.f32.xlu0 %v1686_v5  ;;  %v1664_v6 = vpop.xlane.xlu0 %1663  ;;  %v1668_v7 = vpop.xlane.xlu1 %1667  ;;  %v1767_v5 = vld [vmem:[#allocation2 + $0xa] ss:$0 sm:$0xff] }
0x2112   : > { %v1665_v9 = vsel %vm1657_vm1, %v1664_v6, %v1627_v35  ;;  %v1669_v14 = vsel %vm1657_vm1, %v1668_v7, %v1631_v36  ;;  %v1768_v6 = vxor.u32 2147483648, %v1767_v5 }
0x2113   : > { %v1700_v18 = vmul.f32 %v1692_v59, %v1665_v9  ;;  %v1704_v19 = vmul.f32 %v1692_v59, %v1669_v14 }
0x2115   : > { %1701 = vadd.xlane.f32.xlu0 %v1700_v18  ;;  %v1672_v20 = vpop.xlane.xlu0 %1671  ;;  %1705 = vadd.xlane.f32.xlu1 %v1704_v19  ;;  %v1676_v21 = vpop.xlane.xlu1 %1675 }
0x2116   : > { %v1673_v22 = vsel %vm1657_vm1, %v1672_v20, %v1635_v41  ;;  %v1677_v23 = vsel %vm1657_vm1, %v1676_v21, %v1639_v42 }
0x2117   : > { %v1708_v24 = vmul.f32 %v1692_v59, %v1673_v22  ;;  %v1712_v25 = vmul.f32 %v1692_v59, %v1677_v23 }
0x2119   : > { %1709 = vadd.xlane.f32.xlu0 %v1708_v24  ;;  %v1680_v26 = vpop.xlane.xlu0 %1679  ;;  %1713 = vadd.xlane.f32.xlu1 %v1712_v25  ;;  %v1684_v27 = vpop.xlane.xlu1 %1683 }
0x211a   : > { %v1681_v28 = vsel %vm1657_vm1, %v1680_v26, %v1643_v51  ;;  %v1685_v29 = vsel %vm1657_vm1, %v1684_v27, %v1647_v52 }
0x211b   : > { %v1716_v30 = vmul.f32 %v1692_v59, %v1681_v28  ;;  %v1720_v31 = vmul.f32 %v1692_v59, %v1685_v29 }
0x211d   : > { %1717 = vadd.xlane.f32.xlu0 %v1716_v30  ;;  %1721 = vadd.xlane.f32.xlu1 %v1720_v31 }
0x2133   : > { %v1698_v34 = vpop.xlane.xlu1 %1697 }
0x2134   : > { %v1699_v35 = vsel %vm1695_vm2, %v1698_v34, %v1661_v61 }
0x2135   : > { %v1734_v36 = vmul.f32 %v1730_v33, %v1699_v35 }
0x2137   : > { %1735 = vadd.xlane.f32.xlu1 %v1734_v36 }
0x219e   : > { %v1688_v37 = vpop.xlane.xlu0 %1687 }
0x219f   : > { %v1689_v38 = vsel %vm1657_vm1, %v1688_v37, %v1651_v4  ;;  %vm2137_vm1 = vcmp.eq.s32.totalorder %v2543_v10, 1 }
0x21a0   : > { %v1724_v39 = vmul.f32 %v1692_v59, %v1689_v38 }
0x21a2   : > { %1725 = vadd.xlane.f32.xlu0 %v1724_v39  ;;  %v1702_v40 = vpop.xlane.xlu0 %1701  ;;  %v1706_v41 = vpop.xlane.xlu1 %1705  ;;  %v1805_v39 = vld [vmem:[#allocation2 + $0x9] ss:$0 sm:$0xff] }
0x21a3   : > { %v1703_v42 = vsel %vm1695_vm2, %v1702_v40, %v1665_v9  ;;  %v1707_v43 = vsel %vm1695_vm2, %v1706_v41, %v1669_v14  ;;  %v1806_v40 = vxor.u32 2147483648, %v1805_v39 }
0x21a4   : > { %v1738_v44 = vmul.f32 %v1730_v33, %v1703_v42  ;;  %v1742_v46 = vmul.f32 %v1730_v33, %v1707_v43 }
0x21a6   : > { %1739 = vadd.xlane.f32.xlu0 %v1738_v44  ;;  %v1710_v49 = vpop.xlane.xlu0 %1709  ;;  %1743 = vadd.xlane.f32.xlu1 %v1742_v46  ;;  %v1714_v51 = vpop.xlane.xlu1 %1713 }
0x21a7   : > { %v1711_v52 = vsel %vm1695_vm2, %v1710_v49, %v1673_v22  ;;  %v1715_v54 = vsel %vm1695_vm2, %v1714_v51, %v1677_v23 }
0x21a8   : > { %v1746_v56 = vmul.f32 %v1730_v33, %v1711_v52  ;;  %v1750_v58 = vmul.f32 %v1730_v33, %v1715_v54 }
0x21aa   : > { %1747 = vadd.xlane.f32.xlu0 %v1746_v56  ;;  %v1718_v59 = vpop.xlane.xlu0 %1717  ;;  %1751 = vadd.xlane.f32.xlu1 %v1750_v58  ;;  %v1722_v60 = vpop.xlane.xlu1 %1721 }
0x21ab   : > { %v1719_v61 = vsel %vm1695_vm2, %v1718_v59, %v1681_v28  ;;  %v1723_v1 = vsel %vm1695_vm2, %v1722_v60, %v1685_v29 }
0x21ac   : > { %v1754_v2 = vmul.f32 %v1730_v33, %v1719_v61  ;;  %v1758_v4 = vmul.f32 %v1730_v33, %v1723_v1 }
0x21ae   : > { %1755 = vadd.xlane.f32.xlu0 %v1754_v2  ;;  %1759 = vadd.xlane.f32.xlu1 %v1758_v4 }
0x21c4   : > { %v1736_v7 = vpop.xlane.xlu1 %1735 }
0x21c5   : > { %v1737_v9 = vsel %vm1733_vm3, %v1736_v7, %v1699_v35 }
0x21c6   : > { %v1772_v14 = vmul.f32 %v1768_v6, %v1737_v9 }
0x21c8   : > { %1773 = vadd.xlane.f32.xlu1 %v1772_v14 }
0x222f   : > { %v1726_v18 = vpop.xlane.xlu0 %1725 }
0x2230   : > { %v1727_v19 = vsel %vm1695_vm2, %v1726_v18, %v1689_v38  ;;  %vm2178_vm2 = vcmp.eq.s32.totalorder %v2543_v10, 0 }
0x2231   : > { %v1762_v20 = vmul.f32 %v1730_v33, %v1727_v19 }
0x2233   : > { %1763 = vadd.xlane.f32.xlu0 %v1762_v20  ;;  %v1740_v21 = vpop.xlane.xlu0 %1739  ;;  %v1744_v22 = vpop.xlane.xlu1 %1743  ;;  %v149_v20 = vld [vmem:[%s2549_s20] sm:$0xff] }
0x2234   : > { %v1741_v23 = vsel %vm1733_vm3, %v1740_v21, %v1703_v42  ;;  %v1745_v24 = vsel %vm1733_vm3, %v1744_v22, %v1707_v43  ;;  %v150_v21 = vsel %vm148_vm5, %v149_v20, 0.0  ;;  %vm2222_vm5 = vweird.f32 %v3117_v12 }
0x2235   : > { %v1776_v25 = vmul.f32 %v1768_v6, %v1741_v23  ;;  %v1780_v26 = vmul.f32 %v1768_v6, %v1745_v24 }
0x2237   : > { %1777 = vadd.xlane.f32.xlu0 %v1776_v25  ;;  %v1748_v27 = vpop.xlane.xlu0 %1747  ;;  %1781 = vadd.xlane.f32.xlu1 %v1780_v26  ;;  %v1752_v28 = vpop.xlane.xlu1 %1751 }
0x2238   : > { %v1749_v29 = vsel %vm1733_vm3, %v1748_v27, %v1711_v52  ;;  %v1753_v30 = vsel %vm1733_vm3, %v1752_v28, %v1715_v54 }
0x2239   : > { %v1784_v31 = vmul.f32 %v1768_v6, %v1749_v29  ;;  %v1788_v32 = vmul.f32 %v1768_v6, %v1753_v30 }
0x223b   : > { %1785 = vadd.xlane.f32.xlu0 %v1784_v31  ;;  %v1756_v33 = vpop.xlane.xlu0 %1755  ;;  %1789 = vadd.xlane.f32.xlu1 %v1788_v32  ;;  %v1760_v34 = vpop.xlane.xlu1 %1759 }
0x223c   : > { %v1757_v35 = vsel %vm1733_vm3, %v1756_v33, %v1719_v61  ;;  %v1761_v36 = vsel %vm1733_vm3, %v1760_v34, %v1723_v1 }
0x223d   : > { %v1792_v37 = vmul.f32 %v1768_v6, %v1757_v35  ;;  %v1796_v38 = vmul.f32 %v1768_v6, %v1761_v36 }
0x223f   : > { %1793 = vadd.xlane.f32.xlu0 %v1792_v37  ;;  %1797 = vadd.xlane.f32.xlu1 %v1796_v38 }
0x2255   : > { %v1774_v41 = vpop.xlane.xlu1 %1773 }
0x2256   : > { %v1775_v42 = vsel %vm1771_vm4, %v1774_v41, %v1737_v9 }
0x2257   : > { %v1810_v43 = vmul.f32 %v1806_v40, %v1775_v42 }
0x2259   : > { %1811 = vadd.xlane.f32.xlu1 %v1810_v43 }
0x22c0   : > { %v1764_v44 = vpop.xlane.xlu0 %1763 }
0x22c1   : > { %v1765_v46 = vsel %vm1733_vm3, %v1764_v44, %v1727_v19 }
0x22c2   : > { %v1800_v49 = vmul.f32 %v1768_v6, %v1765_v46 }
0x22c4   : > { %1801 = vadd.xlane.f32.xlu0 %v1800_v49  ;;  %v1778_v51 = vpop.xlane.xlu0 %1777  ;;  %v1782_v52 = vpop.xlane.xlu1 %1781 }
0x22c5   : > { %v1779_v54 = vsel %vm1771_vm4, %v1778_v51, %v1741_v23  ;;  %v1783_v56 = vsel %vm1771_vm4, %v1782_v52, %v1745_v24  ;;  %v1843_v24 = vld [vmem:[#allocation2 + $0x8] ss:$0 sm:$0xff] }
0x22c6   : > { %v1814_v58 = vmul.f32 %v1806_v40, %v1779_v54  ;;  %v1818_v59 = vmul.f32 %v1806_v40, %v1783_v56  ;;  %v1844_v28 = vxor.u32 2147483648, %v1843_v24 }
0x22c8   : > { %1815 = vadd.xlane.f32.xlu0 %v1814_v58  ;;  %v1786_v60 = vpop.xlane.xlu0 %1785  ;;  %1819 = vadd.xlane.f32.xlu1 %v1818_v59  ;;  %v1790_v61 = vpop.xlane.xlu1 %1789  ;;  %v293_v59 = vsel %vm292_vm9, -1.0, %v2503_v57  ;;  %vm2246_vm9 = vweird.f32 %v2685_v48 }
0x22c9   : > { %v1787_v1 = vsel %vm1771_vm4, %v1786_v60, %v1749_v29  ;;  %v1791_v2 = vsel %vm1771_vm4, %v1790_v61, %v1753_v30 }
0x22ca   : > { %v1822_v4 = vmul.f32 %v1806_v40, %v1787_v1  ;;  %v1826_v5 = vmul.f32 %v1806_v40, %v1791_v2 }
0x22cc   : > { %1823 = vadd.xlane.f32.xlu0 %v1822_v4  ;;  %v1794_v6 = vpop.xlane.xlu0 %1793  ;;  %1827 = vadd.xlane.f32.xlu1 %v1826_v5  ;;  %v1798_v7 = vpop.xlane.xlu1 %1797 }
0x22cd   : > { %v1795_v9 = vsel %vm1771_vm4, %v1794_v6, %v1757_v35  ;;  %v1799_v14 = vsel %vm1771_vm4, %v1798_v7, %v1761_v36 }
0x22ce   : > { %v1830_v18 = vmul.f32 %v1806_v40, %v1795_v9  ;;  %v1834_v19 = vmul.f32 %v1806_v40, %v1799_v14 }
0x22d0   : > { %1831 = vadd.xlane.f32.xlu0 %v1830_v18  ;;  %1835 = vadd.xlane.f32.xlu1 %v1834_v19 }
0x22d4   : > { %151 = vadd.xlane.f32.xlu1 %v150_v21 }
0x22e6   : > { %v1812_v22 = vpop.xlane.xlu1 %1811 }
0x22e7   : > { %v1813_v27 = vsel %vm1809_vm6, %v1812_v22, %v1775_v42 }
0x22e8   : > { %v1848_v32 = vmul.f32 %v1844_v28, %v1813_v27 }
0x2351   : > { %v1802_v23 = vpop.xlane.xlu0 %1801 }
0x2352   : > { %v1803_v25 = vsel %vm1771_vm4, %v1802_v23, %v1765_v46  ;;  %vm2228_vm4 = vweird.f32 %v2985_v8 }
0x2353   : > { %v1838_v26 = vmul.f32 %v1806_v40, %v1803_v25 }
0x2355   : > { %1839 = vadd.xlane.f32.xlu0 %v1838_v26  ;;  %v1816_v29 = vpop.xlane.xlu0 %1815  ;;  %v1820_v30 = vpop.xlane.xlu1 %1819 }
0x2356   : > { %v1817_v31 = vsel %vm1809_vm6, %v1816_v29, %v1779_v54  ;;  %v1821_v34 = vsel %vm1809_vm6, %v1820_v30, %v1783_v56  ;;  %v155_v54 = vsel %vm154_vm8, %v149_v20, 0.0  ;;  %vm2252_vm8 = vweird.f32 %v2616_v62 }
0x2357   : > { %v1852_v33 = vmul.f32 %v1844_v28, %v1817_v31  ;;  %v1856_v38 = vmul.f32 %v1844_v28, %v1821_v34 }
0x2359   : > { %v1824_v35 = vpop.xlane.xlu0 %1823  ;;  %1849 = vadd.xlane.f32.xlu0 %v1848_v32  ;;  %v1828_v36 = vpop.xlane.xlu1 %1827  ;;  %1853 = vadd.xlane.f32.xlu1 %v1852_v33 }
0x235a   : > { %v1825_v37 = vsel %vm1809_vm6, %v1824_v35, %v1787_v1  ;;  %v1829_v40 = vsel %vm1809_vm6, %v1828_v36, %v1791_v2 }
0x235b   : > { %v1860_v39 = vmul.f32 %v1844_v28, %v1825_v37  ;;  %v1864_v44 = vmul.f32 %v1844_v28, %v1829_v40 }
0x235d   : > { %v1832_v41 = vpop.xlane.xlu0 %1831  ;;  %1857 = vadd.xlane.f32.xlu0 %v1856_v38  ;;  %v1836_v42 = vpop.xlane.xlu1 %1835  ;;  %1861 = vadd.xlane.f32.xlu1 %v1860_v39 }
0x235e   : > { %v1833_v43 = vsel %vm1809_vm6, %v1832_v41, %v1795_v9  ;;  %v1837_v49 = vsel %vm1809_vm6, %v1836_v42, %v1799_v14 }
0x235f   : > { %v1868_v46 = vmul.f32 %v1844_v28, %v1833_v43  ;;  %v1872_v52 = vmul.f32 %v1844_v28, %v1837_v49 }
0x2361   : > { %1865 = vadd.xlane.f32.xlu0 %v1864_v44  ;;  %1869 = vadd.xlane.f32.xlu1 %v1868_v46  ;;  %v3265_v51 = vpop.xlane.xlu1 %151 }
0x2362   : > { %2476 = vrcp.f32 %v3265_v51  ;;  %vm2217_vm3 = vweird.f32 %v3265_v51 }
0x2365   : > { %1873 = vadd.xlane.f32.xlu0 %v1872_v52 }
0x236c   : > { %v3272_v56 = vpop.eup %2476 }
0x236d   : > { %v157_v58 = vmul.f32 %v3272_v56, %v155_v54 }
0x236f   : > { %158 = vst [vmem:[#allocation2] sm:$0xff] %v157_v58 }
0x2376   : > { %v1881_v60 = vld [vmem:[#allocation2 + $0x7] ss:$0 sm:$0xff]  ;;  %v1923_v33 = vld [vmem:[#allocation2 + $0x6] ss:$0 sm:$0xff] }
0x2377   : > { %v1882_v61 = vxor.u32 2147483648, %v1881_v60 }
0x2379   : > { %v1886_v1 = vmul.f32 %v1882_v61, %v293_v59 }
0x237b   : > { %1887 = vadd.xlane.f32.xlu0 %v1886_v1 }
0x23e2   : > { %v1840_v2 = vpop.xlane.xlu0 %1839 }
0x23e3   : > { %v1841_v4 = vsel %vm1809_vm6, %v1840_v2, %v1803_v25  ;;  %vm2240_vm6 = vweird.f32 %v2769_v63 }
0x23e4   : > { %v1876_v5 = vmul.f32 %v1844_v28, %v1841_v4 }
0x23e6   : > { %v1850_v6 = vpop.xlane.xlu0 %1849  ;;  %1877 = vadd.xlane.f32.xlu1 %v1876_v5  ;;  %v1854_v7 = vpop.xlane.xlu1 %1853 }
0x23e7   : > { %v1851_v9 = vsel %vm1847_vm0, %v1850_v6, %v1813_v27  ;;  %v1855_v11 = vsel %vm1847_vm0, %v1854_v7, %v1817_v31 }
0x23e8   : > { %v1890_v57 = vmul.f32 %v1882_v61, %v1851_v9  ;;  %v1894_v14 = vmul.f32 %v1882_v61, %v1855_v11 }
0x23ea   : > { %v1858_v18 = vpop.xlane.xlu0 %1857  ;;  %1891 = vadd.xlane.f32.xlu1 %v1890_v57  ;;  %1895 = vadd.xlane.f32.xlu0 %v1894_v14  ;;  %v1862_v19 = vpop.xlane.xlu1 %1861  ;;  %v1965_v14 = vld [vmem:[#allocation2 + $0x5] ss:$0 sm:$0xff] }
0x23eb   : > { %v1859_v20 = vsel %vm1847_vm0, %v1858_v18, %v1821_v34  ;;  %v1863_v21 = vsel %vm1847_vm0, %v1862_v19, %v1825_v37  ;;  %v1924_v34 = vxor.u32 2147483648, %v1923_v33  ;;  %v1966_v18 = vxor.u32 2147483648, %v1965_v14 }
0x23ec   : > { %v1898_v22 = vmul.f32 %v1882_v61, %v1859_v20  ;;  %v1902_v23 = vmul.f32 %v1882_v61, %v1863_v21 }
0x23ee   : > { %v1866_v24 = vpop.xlane.xlu0 %1865  ;;  %1899 = vadd.xlane.f32.xlu1 %v1898_v22  ;;  %1903 = vadd.xlane.f32.xlu0 %v1902_v23  ;;  %v1870_v25 = vpop.xlane.xlu1 %1869 }
0x23ef   : > { %v1867_v26 = vsel %vm1847_vm0, %v1866_v24, %v1829_v40  ;;  %v1871_v27 = vsel %vm1847_vm0, %v1870_v25, %v1833_v43 }
0x23f0   : > { %v1906_v28 = vmul.f32 %v1882_v61, %v1867_v26  ;;  %v1910_v29 = vmul.f32 %v1882_v61, %v1871_v27 }
0x23f2   : > { %v1874_v30 = vpop.xlane.xlu0 %1873  ;;  %1907 = vadd.xlane.f32.xlu1 %v1906_v28  ;;  %1911 = vadd.xlane.f32.xlu0 %v1910_v29 }
0x23f3   : > { %v1875_v31 = vsel %vm1847_vm0, %v1874_v30, %v1837_v49 }
0x23f4   : > { %v1914_v32 = vmul.f32 %v1882_v61, %v1875_v31 }
0x23f6   : > { %1915 = vadd.xlane.f32.xlu1 %v1914_v32 }
0x2408   : > { %v1888_v35 = vpop.xlane.xlu0 %1887 }
0x2409   : > { %v1889_v36 = vsel %vm1885_vm10, %v1888_v35, %v293_v59 }
0x240a   : > { %v1928_v37 = vmul.f32 %v1924_v34, %v1889_v36 }
0x240c   : > { %1929 = vadd.xlane.f32.xlu1 %v1928_v37 }
0x2473   : > { %v1878_v38 = vpop.xlane.xlu1 %1877 }
0x2474   : > { %v1879_v39 = vsel %vm1847_vm0, %v1878_v38, %v1841_v4  ;;  %vm2258_vm0 = vweird.f32 %v2572_v53 }
0x2475   : > { %v1918_v40 = vmul.f32 %v1882_v61, %v1879_v39 }
0x2477   : > { %v1896_v41 = vpop.xlane.xlu0 %1895  ;;  %1919 = vadd.xlane.f32.xlu0 %v1918_v40  ;;  %v1892_v42 = vpop.xlane.xlu1 %1891 }
0x2478   : > { %v1897_v43 = vsel %vm1885_vm10, %v1896_v41, %v1855_v11  ;;  %v1893_v44 = vsel %vm1885_vm10, %v1892_v42, %v1851_v9 }
0x2479   : > { %v1936_v46 = vmul.f32 %v1924_v34, %v1897_v43  ;;  %v1932_v49 = vmul.f32 %v1924_v34, %v1893_v44 }
0x247b   : > { %1937 = vadd.xlane.f32.xlu1 %v1936_v46  ;;  %v1904_v52 = vpop.xlane.xlu0 %1903  ;;  %1933 = vadd.xlane.f32.xlu0 %v1932_v49  ;;  %v1900_v54 = vpop.xlane.xlu1 %1899  ;;  %v2007_v49 = vld [vmem:[#allocation2 + $0x4] ss:$0 sm:$0xff] }
0x247c   : > { %v1905_v58 = vsel %vm1885_vm10, %v1904_v52, %v1863_v21  ;;  %v1901_v59 = vsel %vm1885_vm10, %v1900_v54, %v1859_v20  ;;  %v2008_v52 = vxor.u32 2147483648, %v2007_v49 }
0x247d   : > { %v1944_v60 = vmul.f32 %v1924_v34, %v1905_v58  ;;  %v1940_v61 = vmul.f32 %v1924_v34, %v1901_v59 }
0x247f   : > { %1945 = vadd.xlane.f32.xlu1 %v1944_v60  ;;  %v1912_v1 = vpop.xlane.xlu0 %1911  ;;  %1941 = vadd.xlane.f32.xlu0 %v1940_v61  ;;  %v1908_v2 = vpop.xlane.xlu1 %1907 }
0x2480   : > { %v1913_v4 = vsel %vm1885_vm10, %v1912_v1, %v1871_v27  ;;  %v1909_v5 = vsel %vm1885_vm10, %v1908_v2, %v1867_v26 }
0x2481   : > { %v1952_v6 = vmul.f32 %v1924_v34, %v1913_v4  ;;  %v1948_v7 = vmul.f32 %v1924_v34, %v1909_v5 }
0x2483   : > { %1953 = vadd.xlane.f32.xlu1 %v1952_v6  ;;  %1949 = vadd.xlane.f32.xlu0 %v1948_v7  ;;  %v1916_v9 = vpop.xlane.xlu1 %1915 }
0x2484   : > { %v1917_v11 = vsel %vm1885_vm10, %v1916_v9, %v1875_v31 }
0x2485   : > { %v1956_v57 = vmul.f32 %v1924_v34, %v1917_v11 }
0x2487   : > { %1957 = vadd.xlane.f32.xlu0 %v1956_v57 }
0x2499   : > { %v1930_v19 = vpop.xlane.xlu1 %1929 }
0x249a   : > { %v1931_v20 = vsel %vm1927_vm11, %v1930_v19, %v1889_v36 }
0x249b   : > { %v1970_v21 = vmul.f32 %v1966_v18, %v1931_v20 }
0x249d   : > { %1971 = vadd.xlane.f32.xlu0 %v1970_v21 }
0x2504   : > { %v1920_v22 = vpop.xlane.xlu0 %1919 }
0x2505   : > { %v1921_v23 = vsel %vm1885_vm10, %v1920_v22, %v1879_v39  ;;  %vm2264_vm10 = vweird.f32 %v2556_v16 }
0x2506   : > { %v1960_v24 = vmul.f32 %v1924_v34, %v1921_v23 }
0x2508   : > { %1961 = vadd.xlane.f32.xlu1 %v1960_v24  ;;  %v1934_v25 = vpop.xlane.xlu0 %1933  ;;  %v1938_v26 = vpop.xlane.xlu1 %1937 }
0x2509   : > { %v1935_v27 = vsel %vm1927_vm11, %v1934_v25, %v1893_v44  ;;  %v1939_v28 = vsel %vm1927_vm11, %v1938_v26, %v1897_v43 }
0x250a   : > { %v1974_v29 = vmul.f32 %v1966_v18, %v1935_v27  ;;  %v1978_v30 = vmul.f32 %v1966_v18, %v1939_v28 }
0x250c   : > { %1975 = vadd.xlane.f32.xlu1 %v1974_v29  ;;  %v1942_v31 = vpop.xlane.xlu0 %1941  ;;  %1979 = vadd.xlane.f32.xlu0 %v1978_v30  ;;  %v1946_v32 = vpop.xlane.xlu1 %1945  ;;  %v2049_v30 = vld [vmem:[#allocation2 + $0x3] ss:$0 sm:$0xff] }
0x250d   : > { %v1943_v33 = vsel %vm1927_vm11, %v1942_v31, %v1901_v59  ;;  %v1947_v34 = vsel %vm1927_vm11, %v1946_v32, %v1905_v58  ;;  %v2050_v31 = vxor.u32 2147483648, %v2049_v30 }
0x250e   : > { %v1982_v35 = vmul.f32 %v1966_v18, %v1943_v33  ;;  %v1986_v36 = vmul.f32 %v1966_v18, %v1947_v34 }
0x2510   : > { %1983 = vadd.xlane.f32.xlu1 %v1982_v35  ;;  %v1950_v37 = vpop.xlane.xlu0 %1949  ;;  %1987 = vadd.xlane.f32.xlu0 %v1986_v36  ;;  %v1954_v38 = vpop.xlane.xlu1 %1953 }
0x2511   : > { %v1951_v39 = vsel %vm1927_vm11, %v1950_v37, %v1909_v5  ;;  %v1955_v40 = vsel %vm1927_vm11, %v1954_v38, %v1913_v4 }
0x2512   : > { %v1990_v41 = vmul.f32 %v1966_v18, %v1951_v39  ;;  %v1994_v42 = vmul.f32 %v1966_v18, %v1955_v40 }
0x2514   : > { %1991 = vadd.xlane.f32.xlu1 %v1990_v41  ;;  %v1958_v43 = vpop.xlane.xlu0 %1957  ;;  %1995 = vadd.xlane.f32.xlu0 %v1994_v42 }
0x2515   : > { %v1959_v44 = vsel %vm1927_vm11, %v1958_v43, %v1917_v11 }
0x2516   : > { %v1998_v46 = vmul.f32 %v1966_v18, %v1959_v44 }
0x2518   : > { %1999 = vadd.xlane.f32.xlu1 %v1998_v46 }
0x252a   : > { %v1972_v54 = vpop.xlane.xlu0 %1971 }
0x252b   : > { %v1973_v58 = vsel %vm1969_vm12, %v1972_v54, %v1931_v20 }
0x252c   : > { %v2012_v59 = vmul.f32 %v2008_v52, %v1973_v58 }
0x252e   : > { %2013 = vadd.xlane.f32.xlu1 %v2012_v59 }
0x2595   : > { %v1962_v60 = vpop.xlane.xlu1 %1961 }
0x2596   : > { %v1963_v61 = vsel %vm1927_vm11, %v1962_v60, %v1921_v23 }
0x2597   : > { %v2002_v1 = vmul.f32 %v1966_v18, %v1963_v61 }
0x2599   : > { %v1980_v2 = vpop.xlane.xlu0 %1979  ;;  %2003 = vadd.xlane.f32.xlu0 %v2002_v1  ;;  %v1976_v4 = vpop.xlane.xlu1 %1975 }
0x259a   : > { %v1981_v5 = vsel %vm1969_vm12, %v1980_v2, %v1939_v28  ;;  %v1977_v6 = vsel %vm1969_vm12, %v1976_v4, %v1935_v27 }
0x259b   : > { %v2020_v7 = vmul.f32 %v2008_v52, %v1981_v5  ;;  %v2016_v9 = vmul.f32 %v2008_v52, %v1977_v6 }
0x259d   : > { %2021 = vadd.xlane.f32.xlu1 %v2020_v7  ;;  %v1988_v11 = vpop.xlane.xlu0 %1987  ;;  %2017 = vadd.xlane.f32.xlu0 %v2016_v9  ;;  %v1984_v57 = vpop.xlane.xlu1 %1983  ;;  %v2091_v9 = vld [vmem:[#allocation2 + $0x2] ss:$0 sm:$0xff] }
0x259e   : > { %v1989_v14 = vsel %vm1969_vm12, %v1988_v11, %v1947_v34  ;;  %v1985_v18 = vsel %vm1969_vm12, %v1984_v57, %v1943_v33  ;;  %v2092_v11 = vxor.u32 2147483648, %v2091_v9 }
0x259f   : > { %v2028_v19 = vmul.f32 %v2008_v52, %v1989_v14  ;;  %v2024_v20 = vmul.f32 %v2008_v52, %v1985_v18 }
0x25a1   : > { %2029 = vadd.xlane.f32.xlu1 %v2028_v19  ;;  %v1996_v21 = vpop.xlane.xlu0 %1995  ;;  %2025 = vadd.xlane.f32.xlu0 %v2024_v20  ;;  %v1992_v22 = vpop.xlane.xlu1 %1991 }
0x25a2   : > { %v1997_v23 = vsel %vm1969_vm12, %v1996_v21, %v1955_v40  ;;  %v1993_v24 = vsel %vm1969_vm12, %v1992_v22, %v1951_v39 }
0x25a3   : > { %v2036_v25 = vmul.f32 %v2008_v52, %v1997_v23  ;;  %v2032_v26 = vmul.f32 %v2008_v52, %v1993_v24 }
0x25a5   : > { %2037 = vadd.xlane.f32.xlu1 %v2036_v25  ;;  %2033 = vadd.xlane.f32.xlu0 %v2032_v26  ;;  %v2000_v27 = vpop.xlane.xlu1 %1999 }
0x25a6   : > { %v2001_v28 = vsel %vm1969_vm12, %v2000_v27, %v1959_v44 }
0x25a7   : > { %v2040_v29 = vmul.f32 %v2008_v52, %v2001_v28 }
0x25a9   : > { %2041 = vadd.xlane.f32.xlu0 %v2040_v29 }
0x25bb   : > { %v2014_v32 = vpop.xlane.xlu1 %2013 }
0x25bc   : > { %v2015_v33 = vsel %vm2011_vm13, %v2014_v32, %v1973_v58 }
0x25bd   : > { %v2054_v34 = vmul.f32 %v2050_v31, %v2015_v33 }
0x25bf   : > { %2055 = vadd.xlane.f32.xlu0 %v2054_v34 }
0x2626   : > { %v2004_v35 = vpop.xlane.xlu0 %2003 }
0x2627   : > { %v2005_v36 = vsel %vm1969_vm12, %v2004_v35, %v1963_v61 }
0x2628   : > { %v2044_v37 = vmul.f32 %v2008_v52, %v2005_v36 }
0x262a   : > { %2045 = vadd.xlane.f32.xlu1 %v2044_v37  ;;  %v2018_v38 = vpop.xlane.xlu0 %2017  ;;  %v2022_v39 = vpop.xlane.xlu1 %2021 }
0x262b   : > { %v2019_v40 = vsel %vm2011_vm13, %v2018_v38, %v1977_v6  ;;  %v2023_v41 = vsel %vm2011_vm13, %v2022_v39, %v1981_v5 }
0x262c   : > { %v2058_v42 = vmul.f32 %v2050_v31, %v2019_v40  ;;  %v2062_v43 = vmul.f32 %v2050_v31, %v2023_v41 }
0x262e   : > { %2059 = vadd.xlane.f32.xlu1 %v2058_v42  ;;  %v2026_v44 = vpop.xlane.xlu0 %2025  ;;  %2063 = vadd.xlane.f32.xlu0 %v2062_v43  ;;  %v2030_v46 = vpop.xlane.xlu1 %2029  ;;  %v2133_v43 = vld [vmem:[#allocation2 + $0x1] ss:$0 sm:$0xff] }
0x262f   : > { %v2027_v49 = vsel %vm2011_vm13, %v2026_v44, %v1985_v18  ;;  %v2031_v52 = vsel %vm2011_vm13, %v2030_v46, %v1989_v14  ;;  %v2134_v44 = vxor.u32 2147483648, %v2133_v43 }
0x2630   : > { %v2066_v54 = vmul.f32 %v2050_v31, %v2027_v49  ;;  %v2070_v58 = vmul.f32 %v2050_v31, %v2031_v52 }
0x2632   : > { %2067 = vadd.xlane.f32.xlu1 %v2066_v54  ;;  %v2034_v59 = vpop.xlane.xlu0 %2033  ;;  %2071 = vadd.xlane.f32.xlu0 %v2070_v58  ;;  %v2038_v60 = vpop.xlane.xlu1 %2037 }
0x2633   : > { %v2035_v61 = vsel %vm2011_vm13, %v2034_v59, %v1993_v24  ;;  %v2039_v1 = vsel %vm2011_vm13, %v2038_v60, %v1997_v23 }
0x2634   : > { %v2074_v2 = vmul.f32 %v2050_v31, %v2035_v61  ;;  %v2078_v4 = vmul.f32 %v2050_v31, %v2039_v1 }
0x2636   : > { %2075 = vadd.xlane.f32.xlu1 %v2074_v2  ;;  %v2042_v5 = vpop.xlane.xlu0 %2041  ;;  %2079 = vadd.xlane.f32.xlu0 %v2078_v4 }
0x2637   : > { %v2043_v6 = vsel %vm2011_vm13, %v2042_v5, %v2001_v28 }
0x2638   : > { %v2082_v7 = vmul.f32 %v2050_v31, %v2043_v6 }
0x263a   : > { %2083 = vadd.xlane.f32.xlu1 %v2082_v7 }
0x264c   : > { %v2056_v57 = vpop.xlane.xlu0 %2055 }
0x264d   : > { %v2057_v14 = vsel %vm2053_vm14, %v2056_v57, %v2015_v33 }
0x264e   : > { %v2096_v18 = vmul.f32 %v2092_v11, %v2057_v14 }
0x2650   : > { %2097 = vadd.xlane.f32.xlu1 %v2096_v18 }
0x26b7   : > { %v2046_v19 = vpop.xlane.xlu1 %2045 }
0x26b8   : > { %v2047_v20 = vsel %vm2011_vm13, %v2046_v19, %v2005_v36 }
0x26b9   : > { %v2086_v21 = vmul.f32 %v2050_v31, %v2047_v20 }
0x26bb   : > { %v2064_v22 = vpop.xlane.xlu0 %2063  ;;  %2087 = vadd.xlane.f32.xlu0 %v2086_v21  ;;  %v2060_v23 = vpop.xlane.xlu1 %2059 }
0x26bc   : > { %v2065_v24 = vsel %vm2053_vm14, %v2064_v22, %v2023_v41  ;;  %v2061_v25 = vsel %vm2053_vm14, %v2060_v23, %v2019_v40 }
0x26bd   : > { %v2104_v26 = vmul.f32 %v2092_v11, %v2065_v24  ;;  %v2100_v27 = vmul.f32 %v2092_v11, %v2061_v25 }
0x26bf   : > { %2105 = vadd.xlane.f32.xlu1 %v2104_v26  ;;  %v2072_v28 = vpop.xlane.xlu0 %2071  ;;  %2101 = vadd.xlane.f32.xlu0 %v2100_v27  ;;  %v2068_v29 = vpop.xlane.xlu1 %2067  ;;  %v2174_v27 = vld [vmem:[#allocation2] ss:$0 sm:$0xff] }
0x26c0   : > { %v2073_v30 = vsel %vm2053_vm14, %v2072_v28, %v2031_v52  ;;  %v2069_v31 = vsel %vm2053_vm14, %v2068_v29, %v2027_v49  ;;  %v2175_v28 = vxor.u32 2147483648, %v2174_v27 }
0x26c1   : > { %v2112_v32 = vmul.f32 %v2092_v11, %v2073_v30  ;;  %v2108_v33 = vmul.f32 %v2092_v11, %v2069_v31 }
0x26c3   : > { %2113 = vadd.xlane.f32.xlu1 %v2112_v32  ;;  %v2080_v34 = vpop.xlane.xlu0 %2079  ;;  %2109 = vadd.xlane.f32.xlu0 %v2108_v33  ;;  %v2076_v35 = vpop.xlane.xlu1 %2075 }
0x26c4   : > { %v2081_v36 = vsel %vm2053_vm14, %v2080_v34, %v2039_v1  ;;  %v2077_v37 = vsel %vm2053_vm14, %v2076_v35, %v2035_v61 }
0x26c5   : > { %v2120_v38 = vmul.f32 %v2092_v11, %v2081_v36  ;;  %v2116_v39 = vmul.f32 %v2092_v11, %v2077_v37 }
0x26c7   : > { %2121 = vadd.xlane.f32.xlu1 %v2120_v38  ;;  %2117 = vadd.xlane.f32.xlu0 %v2116_v39  ;;  %v2084_v40 = vpop.xlane.xlu1 %2083 }
0x26c8   : > { %v2085_v41 = vsel %vm2053_vm14, %v2084_v40, %v2043_v6 }
0x26c9   : > { %v2124_v42 = vmul.f32 %v2092_v11, %v2085_v41 }
0x26cb   : > { %2125 = vadd.xlane.f32.xlu0 %v2124_v42 }
0x26dd   : > { %v2098_v46 = vpop.xlane.xlu1 %2097 }
0x26de   : > { %v2099_v49 = vsel %vm2095_vm15, %v2098_v46, %v2057_v14 }
0x26df   : > { %v2138_v52 = vmul.f32 %v2134_v44, %v2099_v49 }
0x26e1   : > { %2139 = vadd.xlane.f32.xlu0 %v2138_v52 }
0x2748   : > { %v2088_v54 = vpop.xlane.xlu0 %2087 }
0x2749   : > { %v2089_v58 = vsel %vm2053_vm14, %v2088_v54, %v2047_v20 }
0x274a   : > { %v2128_v59 = vmul.f32 %v2092_v11, %v2089_v58 }
0x274c   : > { %2129 = vadd.xlane.f32.xlu1 %v2128_v59  ;;  %v2102_v60 = vpop.xlane.xlu0 %2101  ;;  %v2106_v61 = vpop.xlane.xlu1 %2105 }
0x274d   : > { %v2103_v1 = vsel %vm2095_vm15, %v2102_v60, %v2061_v25  ;;  %v2107_v2 = vsel %vm2095_vm15, %v2106_v61, %v2065_v24 }
0x274e   : > { %v2142_v4 = vmul.f32 %v2134_v44, %v2103_v1  ;;  %v2146_v5 = vmul.f32 %v2134_v44, %v2107_v2 }
0x2750   : > { %2143 = vadd.xlane.f32.xlu1 %v2142_v4  ;;  %v2110_v6 = vpop.xlane.xlu0 %2109  ;;  %2147 = vadd.xlane.f32.xlu0 %v2146_v5  ;;  %v2114_v7 = vpop.xlane.xlu1 %2113 }
0x2751   : > { %v2111_v9 = vsel %vm2095_vm15, %v2110_v6, %v2069_v31  ;;  %v2115_v11 = vsel %vm2095_vm15, %v2114_v7, %v2073_v30 }
0x2752   : > { %v2150_v57 = vmul.f32 %v2134_v44, %v2111_v9  ;;  %v2154_v14 = vmul.f32 %v2134_v44, %v2115_v11 }
0x2754   : > { %2151 = vadd.xlane.f32.xlu1 %v2150_v57  ;;  %v2118_v18 = vpop.xlane.xlu0 %2117  ;;  %2155 = vadd.xlane.f32.xlu0 %v2154_v14  ;;  %v2122_v19 = vpop.xlane.xlu1 %2121 }
0x2755   : > { %v2119_v20 = vsel %vm2095_vm15, %v2118_v18, %v2077_v37  ;;  %v2123_v21 = vsel %vm2095_vm15, %v2122_v19, %v2081_v36 }
0x2756   : > { %v2158_v22 = vmul.f32 %v2134_v44, %v2119_v20  ;;  %v2162_v23 = vmul.f32 %v2134_v44, %v2123_v21 }
0x2758   : > { %2159 = vadd.xlane.f32.xlu1 %v2158_v22  ;;  %v2126_v24 = vpop.xlane.xlu0 %2125  ;;  %2163 = vadd.xlane.f32.xlu0 %v2162_v23 }
0x2759   : > { %v2127_v25 = vsel %vm2095_vm15, %v2126_v24, %v2085_v41 }
0x275a   : > { %v2166_v26 = vmul.f32 %v2134_v44, %v2127_v25 }
0x275c   : > { %2167 = vadd.xlane.f32.xlu1 %v2166_v26 }
0x276e   : > { %v2140_v29 = vpop.xlane.xlu0 %2139 }
0x276f   : > { %v2141_v30 = vsel %vm2137_vm1, %v2140_v29, %v2099_v49 }
0x2770   : > { %v2179_v31 = vmul.f32 %v2175_v28, %v2141_v30 }
0x2772   : > { %2180 = vadd.xlane.f32.xlu1 %v2179_v31 }
0x27d9   : > { %v2130_v32 = vpop.xlane.xlu1 %2129 }
0x27da   : > { %v2131_v33 = vsel %vm2095_vm15, %v2130_v32, %v2089_v58 }
0x27db   : > { %v2170_v34 = vmul.f32 %v2134_v44, %v2131_v33 }
0x27dd   : > { %v2148_v35 = vpop.xlane.xlu0 %2147  ;;  %2171 = vadd.xlane.f32.xlu0 %v2170_v34  ;;  %v2144_v36 = vpop.xlane.xlu1 %2143 }
0x27de   : > { %v2149_v37 = vsel %vm2137_vm1, %v2148_v35, %v2107_v2  ;;  %v2145_v38 = vsel %vm2137_vm1, %v2144_v36, %v2103_v1 }
0x27df   : > { %v2187_v39 = vmul.f32 %v2175_v28, %v2149_v37  ;;  %v2183_v40 = vmul.f32 %v2175_v28, %v2145_v38 }
0x27e1   : > { %2188 = vadd.xlane.f32.xlu1 %v2187_v39  ;;  %v2156_v41 = vpop.xlane.xlu0 %2155  ;;  %2184 = vadd.xlane.f32.xlu0 %v2183_v40  ;;  %v2152_v42 = vpop.xlane.xlu1 %2151 }
0x27e2   : > { %v2157_v43 = vsel %vm2137_vm1, %v2156_v41, %v2115_v11  ;;  %v2153_v44 = vsel %vm2137_vm1, %v2152_v42, %v2111_v9 }
0x27e3   : > { %v2195_v46 = vmul.f32 %v2175_v28, %v2157_v43  ;;  %v2191_v49 = vmul.f32 %v2175_v28, %v2153_v44 }
0x27e5   : > { %2196 = vadd.xlane.f32.xlu1 %v2195_v46  ;;  %v2164_v52 = vpop.xlane.xlu0 %2163  ;;  %2192 = vadd.xlane.f32.xlu0 %v2191_v49  ;;  %v2160_v54 = vpop.xlane.xlu1 %2159 }
0x27e6   : > { %v2165_v58 = vsel %vm2137_vm1, %v2164_v52, %v2123_v21  ;;  %v2161_v59 = vsel %vm2137_vm1, %v2160_v54, %v2119_v20 }
0x27e7   : > { %v2203_v60 = vmul.f32 %v2175_v28, %v2165_v58  ;;  %v2199_v61 = vmul.f32 %v2175_v28, %v2161_v59 }
0x27e9   : > { %2204 = vadd.xlane.f32.xlu1 %v2203_v60  ;;  %2200 = vadd.xlane.f32.xlu0 %v2199_v61  ;;  %v2168_v1 = vpop.xlane.xlu1 %2167 }
0x27ea   : > { %v2169_v2 = vsel %vm2137_vm1, %v2168_v1, %v2127_v25 }
0x27eb   : > { %v2207_v4 = vmul.f32 %v2175_v28, %v2169_v2 }
0x27ed   : > { %2208 = vadd.xlane.f32.xlu0 %v2207_v4 }
0x27ff   : > { %v2181_v5 = vpop.xlane.xlu1 %2180 }
0x2800   : > { %v2182_v6 = vsel %vm2178_vm2, %v2181_v5, %v2141_v30 }
0x2801   : > { %v2216_v7 = vmul.f32 %v3272_v56, %v2182_v6 }
0x2803   : > { %v2218_v9 = vsel %vm2217_vm3, %v2182_v6, %v2216_v7 }
0x2804   : > { %2323 = vst [vmem:[%s3435_s24] sm:$0xff] %v2218_v9 }
0x286a   : > { %v2172_v11 = vpop.xlane.xlu0 %2171 }
0x286b   : > { %v2173_v57 = vsel %vm2137_vm1, %v2172_v11, %v2131_v33 }
0x286c   : > { %v2211_v14 = vmul.f32 %v2175_v28, %v2173_v57 }
0x286e   : > { %2212 = vadd.xlane.f32.xlu1 %v2211_v14  ;;  %v2185_v18 = vpop.xlane.xlu0 %2184  ;;  %v2189_v19 = vpop.xlane.xlu1 %2188 }
0x286f   : > { %v2186_v20 = vsel %vm2178_vm2, %v2185_v18, %v2145_v38  ;;  %v2190_v56 = vsel %vm2178_vm2, %v2189_v19, %v2149_v37 }
0x2870   : > { %v2221_v51 = vmul.f32 %v3123_v15, %v2186_v20  ;;  %v2227_v21 = vmul.f32 %v2991_v13, %v2190_v56 }
0x2872   : > { %v2223_v22 = vsel %vm2222_vm5, %v2186_v20, %v2221_v51  ;;  %v2229_v23 = vsel %vm2228_vm4, %v2190_v56, %v2227_v21  ;;  %v2193_v24 = vpop.xlane.xlu0 %2192  ;;  %v2197_v25 = vpop.xlane.xlu1 %2196 }
0x2873   : > { %2325 = vst [vmem:[%s3435_s24 + $0x8] sm:$0xff] %v2223_v22  ;;  %2327 = vst [vmem:[%s3435_s24 + $0x10] sm:$0xff] %v2229_v23  ;;  %v2194_v26 = vsel %vm2178_vm2, %v2193_v24, %v2153_v44  ;;  %v2198_v15 = vsel %vm2178_vm2, %v2197_v25, %v2157_v43 }
0x2874   : > { %v2233_v13 = vmul.f32 %v2875_v47, %v2194_v26  ;;  %v2239_v8 = vmul.f32 %v2775_v3, %v2198_v15 }
0x2876   : > { %v2235_v12 = vsel %vm2234_vm7, %v2194_v26, %v2233_v13  ;;  %v2241_v27 = vsel %vm2240_vm6, %v2198_v15, %v2239_v8  ;;  %v2201_v28 = vpop.xlane.xlu0 %2200  ;;  %v2205_v29 = vpop.xlane.xlu1 %2204 }
0x2877   : > { %2329 = vst [vmem:[%s3435_s24 + $0x18] sm:$0xff] %v2235_v12  ;;  %2331 = vst [vmem:[%s3435_s24 + $0x20] sm:$0xff] %v2241_v27  ;;  %v2202_v30 = vsel %vm2178_vm2, %v2201_v28, %v2161_v59  ;;  %v2206_v47 = vsel %vm2178_vm2, %v2205_v29, %v2165_v58 }
0x2878   : > { %v2245_v3 = vmul.f32 %v2691_v50, %v2202_v30  ;;  %v2251_v63 = vmul.f32 %v2622_v0, %v2206_v47 }
0x287a   : > { %v2247_v45 = vsel %vm2246_vm9, %v2202_v30, %v2245_v3  ;;  %v2253_v31 = vsel %vm2252_vm8, %v2206_v47, %v2251_v63  ;;  %v2209_v32 = vpop.xlane.xlu0 %2208 }
0x287b   : > { %2333 = vst [vmem:[%s3435_s24 + $0x28] sm:$0xff] %v2247_v45  ;;  %2335 = vst [vmem:[%s3435_s24 + $0x30] sm:$0xff] %v2253_v31  ;;  %v2210_v33 = vsel %vm2178_vm2, %v2209_v32, %v2169_v2 }
0x287c   : > { %v2257_v34 = vmul.f32 %v2578_v55, %v2210_v33 }
0x287e   : > { %v2259_v50 = vsel %vm2258_vm0, %v2210_v33, %v2257_v34 }
0x287f   : > { %2337 = vst [vmem:[%s3435_s24 + $0x38] sm:$0xff] %v2259_v50 }
0x28fb   : > { %v2213_v0 = vpop.xlane.xlu1 %2212 }
0x28fc   : > { %v2214_v62 = vsel %vm2178_vm2, %v2213_v0, %v2173_v57 }
0x28fd   : > { %v2263_v48 = vmul.f32 %v2559_v17, %v2214_v62 }
0x28ff   : > { %v2265_v35 = vsel %vm2264_vm10, %v2214_v62, %v2263_v48 }
0x2900   : > { %2339 = vst [vmem:[%s3435_s24 + $0x40] sm:$0xff] %v2265_v35 }
0x2901 PF: > { %s7_s8 = sadd.s32 1, %s2500_s8   ;;  %s3493_s6 = smov %s2496_s7 }
0x2902   : > { %p4_p5 = scmp.ge.s32.totalorder %s7_s8, 4   ;;  %s3494_s7 = smov %s3496_s10 }
0x2904   :  { %6 = sbr.rel (!%p4_p5) target bundleno = 2 (0x2), region = 212 }

// kernel: _lambda_.60
= control target key start
LH: loop header
LB: loop body
LE: loop exit
PB: predicated region body
PF: predicated region fallthrough
CT: control target
= control target key end

     0   :  { %s683_s9 = smov 0   ;;  %s685_s10 = smov 0   ;;  %s795_s0 = inlined_call_operand.vmem [shape: bf16[2,8,128], index: 0, kind: input, shape index: {}]   ;;  %s796_s1 = inlined_call_operand.vmem [shape: bf16[2,128,256], index: 1, kind: input, shape index: {}]   ;;  %s797_s2 = inlined_call_operand.vmem [shape: f32[2,8,256], index: 2, kind: output, shape index: {}]  }
   0x1   :  { %s687_s11 = smov 0   ;;  %s689_s12 = smov 0  }
   0x2   :  { %s691_s13 = smov 0   ;;  %s693_s14 = smov 0  }
   0x3   :  { %s695_s15 = smov 0  }
   0x4 LB: > { %s21_s16 = sadd.s32 1, %s656_s13  ;;  %s24_s17 = sadd.s32 1, %s660_s14  ;;  %s664_s15 = sphi %s695_s15, %s12_s15   ;;  %s660_s14 = sphi %s693_s14, %s803_s14   ;;  %s656_s13 = sphi %s691_s13, %s802_s13   ;;  %s652_s12 = sphi %s689_s12, %s801_s12   ;;  %s648_s11 = sphi %s687_s11, %s800_s11   ;;  %s644_s10 = sphi %s685_s10, %s799_s10   ;;  %s640_s9 = sphi %s683_s9, %s798_s9  }
   0x5   : > { %p22_p0 = scmp.ge.s32.totalorder %s21_s16, 2  ;;  %p66_p1 = scmp.ne.s32.totalorder %s644_s10, %s640_s9 }
   0x6   : > { %p67_p2 = scmp.eq.s32.totalorder %s664_s15, 0  ;;  %s59_s21 = sadd.s32 1, %s644_s10 }
   0x7   : > { %s805_s16 = smov (%p22_p0, %s21_s16), 0  ;;  %s807_s17 = smov (!%p22_p0, %s24_s17), %s660_s14 }
   0x8   : > { %p68_p3 = por %p67_p2, %p66_p1  ;;  %p26_p4 = scmp.ge.s32.totalorder %s807_s17, 2 }
   0x9   : > { %s55_s18 = ssub.s32 %s656_s13, %s805_s16  ;;  %p496_p6 = scmp.ge.s32.totalorder %s664_s15, 4 }
   0xa   : > { %s809_s17 = smov (%p26_p4, %s807_s17), 0 }
   0xb   : > { %s54_s19 = ssub.s32 %s660_s14, %s809_s17  ;;  %120 = sbr.rel (%p496_p6) target bundleno = 34 (0x22), region = 16 }
   0xc   : > { %s56_s20 = sor.u32 %s55_s18, %s54_s19 }
   0xd   : > { %p57_p5 = scmp.eq.s32.totalorder %s56_s20, 0 }
   0xf   : > { %s734_s22 = scalar_select %p57_p5, %s644_s10, %s59_s21  }
  0x12   : > { %130 = sbr.rel (!%p68_p3) target bundleno = 34 (0x22), region = 24  ;;  %s132_s23 = sand.u32 (%p68_p3), 1, %s644_s10  }
  0x13   : > { %s498_s24 = sshll.u32 (%p68_p3), %s660_s14, 5  ;;  %s497_s25 = sshll.u32 (%p68_p3), %s132_s23, 6 }
  0x14   : > { %s136_s26 = sadd.s32 (%p68_p3), %s656_s13, %s498_s24  ;;  %s134_s3 = scalar_lea.vmem (%p68_p3), [#allocation2], %s497_s25 }
  0x15   : > { %s499_s27 = sshll.u32 (%p68_p3), %s136_s26, 2 }
  0x16   : > { %s743_s30 = scalar_lea.vmem (%p68_p3), %s796_s1, %s499_s27 }
  0x17   : > { %v154_v0 = vld [vmem:[%s743_s30] sm:$0xf] (%p68_p3)  ;;  %v156_v1 = vld [vmem:[%s743_s30 + $0x8] sm:$0xf] (%p68_p3)  ;;  %v158_v2 = vld [vmem:[%s743_s30 + $0x10] sm:$0xf] (%p68_p3) }
  0x18   : > { %155 = vst [vmem:[%s134_s3] sm:$0xf] (%p68_p3), %v154_v0  ;;  %157 = vst [vmem:[%s134_s3 + $0x4] sm:$0xf] (%p68_p3), %v156_v1  ;;  %v160_v3 = vld [vmem:[%s743_s30 + $0x18] sm:$0xf] (%p68_p3) }
  0x19   : > { %159 = vst [vmem:[%s134_s3 + $0x8] sm:$0xf] %v158_v2  ;;  %v162_v4 = vld [vmem:[%s743_s30 + $0x20] sm:$0xf]  ;;  %v164_v5 = vld [vmem:[%s743_s30 + $0x28] sm:$0xf] }
  0x1a   : > { %161 = vst [vmem:[%s134_s3 + $0xc] sm:$0xf] %v160_v3  ;;  %163 = vst [vmem:[%s134_s3 + $0x10] sm:$0xf] %v162_v4  ;;  %v166_v6 = vld [vmem:[%s743_s30 + $0x30] sm:$0xf] }
  0x1b   : > { %165 = vst [vmem:[%s134_s3 + $0x14] sm:$0xf] %v164_v5  ;;  %v168_v7 = vld [vmem:[%s743_s30 + $0x38] sm:$0xf]  ;;  %v170_v8 = vld [vmem:[%s743_s30 + $0x40] sm:$0xf] }
  0x1c   : > { %167 = vst [vmem:[%s134_s3 + $0x18] sm:$0xf] %v166_v6  ;;  %169 = vst [vmem:[%s134_s3 + $0x1c] sm:$0xf] %v168_v7  ;;  %v172_v9 = vld [vmem:[%s743_s30 + $0x48] sm:$0xf] }
  0x1d   : > { %171 = vst [vmem:[%s134_s3 + $0x20] sm:$0xf] %v170_v8  ;;  %v174_v10 = vld [vmem:[%s743_s30 + $0x50] sm:$0xf]  ;;  %v176_v11 = vld [vmem:[%s743_s30 + $0x58] sm:$0xf] }
  0x1e   : > { %173 = vst [vmem:[%s134_s3 + $0x24] sm:$0xf] %v172_v9  ;;  %175 = vst [vmem:[%s134_s3 + $0x28] sm:$0xf] %v174_v10  ;;  %v178_v12 = vld [vmem:[%s743_s30 + $0x60] sm:$0xf] }
  0x1f   : > { %177 = vst [vmem:[%s134_s3 + $0x2c] sm:$0xf] %v176_v11  ;;  %v180_v13 = vld [vmem:[%s743_s30 + $0x68] sm:$0xf]  ;;  %v182_v14 = vld [vmem:[%s743_s30 + $0x70] sm:$0xf] }
  0x20   : > { %179 = vst [vmem:[%s134_s3 + $0x30] sm:$0xf] %v178_v12  ;;  %181 = vst [vmem:[%s134_s3 + $0x34] sm:$0xf] %v180_v13  ;;  %v184_v15 = vld [vmem:[%s743_s30 + $0x78] sm:$0xf] }
  0x21   : > { %183 = vst [vmem:[%s134_s3 + $0x38] sm:$0xf] %v182_v14  ;;  %185 = vst [vmem:[%s134_s3 + $0x3c] sm:$0xf] %v184_v15 }
  0x22 PF: > { %p500_p7 = scmp.ge.s32.totalorder %s664_s15, 1  ;;  %p239_p8 = scmp.lt.s32.totalorder %s664_s15, 5 }
  0x24   : > { %p240_p9 = pnand %p500_p7, %p239_p8 }
  0x25   : > { %s246_s4 = sand.u32 (!%p240_p9), 1, %s640_s9   ;;  %v666_v16 = vmov (!%p240_p9), 0.0   ;;  %vm667_vm0 = vmmov (!%p240_p9), 0   ;;  %p274_p10 = scmp.lt.s32.totalorder (!%p240_p9), %s652_s12, 1 }
  0x26   : > { %243 = sbr.rel (%p240_p9) target bundleno = 287 (0x11f), region = 65  ;;  %524 = vmatprep.subr.bf16.mxu0 (!%p240_p9), %v666_v16  ;;  %s501_s5 = sshll.u32 (!%p240_p9), %s246_s4, 6  ;;  %540 = vmatprep.mubr.msk.bf16.mxu0 (!%p240_p9), %vm667_vm0, %v666_v16 }
  0x27   : > { %s248_s6 = scalar_lea.vmem (!%p240_p9), [#allocation2], %s501_s5  ;;  %p280_p11 = scmp.lt.s32.totalorder (!%p240_p9), %s648_s11, 1 }
  0x28   : > { %v602_v17 = vld [vmem:[%s248_s6] sm:$0xff] (!%p240_p9)   ;;  %v603_v18 = vld [vmem:[%s248_s6 + $0x8] sm:$0xff] (!%p240_p9)   ;;  %v604_v19 = vld [vmem:[%s248_s6 + $0x10] sm:$0xff] (!%p240_p9)  }
  0x29   : > { %525 = vmatpush3.bf16.msra.mxu0 (!%p240_p9), %v602_v17  ;;  %v605_v20 = vld [vmem:[%s248_s6 + $0x18] sm:$0xff] (!%p240_p9)   ;;  %v606_v21 = vld [vmem:[%s248_s6 + $0x20] sm:$0xff] (!%p240_p9)   ;;  %v607_v22 = vld [vmem:[%s248_s6 + $0x28] sm:$0xff] (!%p240_p9)  }
  0x2a   : > { %526 = vmatprep.subr.bf16.mxu0 (!%p240_p9), %v666_v16  ;;  %v608_v23 = vld [vmem:[%s248_s6 + $0x30] sm:$0xff] (!%p240_p9)   ;;  %v609_v24 = vld [vmem:[%s248_s6 + $0x38] sm:$0xff] (!%p240_p9)  }
  0x2d   : > { %527 = vmatpush3.bf16.msra.mxu0 %v603_v18  ;;  %s811_s12 = smov (!%p274_p10, %s652_s12), 1  ;;  %s813_s11 = smov (!%p280_p11, %s648_s11), 1 }
  0x2e   : > { %528 = vmatprep.subr.bf16.mxu0 %v666_v16  ;;  %s502_s7 = sshll.u32 %s811_s12, 2  ;;  %s503_s19 = sshll.u32 %s811_s12, 1 }
  0x2f   : > { %s277_s18 = scalar_lea.vmem %s795_s0, %s502_s7  ;;  %s283_s20 = sadd.s32 %s503_s19, %s813_s11 }
  0x30   : > { %v287_v25 = vld [vmem:[%s277_s18] sm:$0xf]  ;;  %s504_s21 = sshll.u32 %s283_s20, 3 }
  0x31   : > { %529 = vmatpush3.bf16.msra.mxu0 %v604_v19  ;;  %s285_s25 = scalar_lea.vmem %s797_s2, %s504_s21 }
  0x32   : > { %530 = vmatprep.subr.bf16.mxu0 %v666_v16 }
  0x35   : > { %531 = vmatpush3.bf16.msra.mxu0 %v605_v20 }
  0x36   : > { %532 = vmatprep.subr.bf16.mxu0 %v666_v16 }
  0x39   : > { %533 = vmatpush3.bf16.msra.mxu0 %v606_v21 }
  0x3a   : > { %534 = vmatprep.subr.bf16.mxu0 %v666_v16 }
  0x3d   : > { %535 = vmatpush3.bf16.msra.mxu0 %v607_v22 }
  0x3e   : > { %536 = vmatprep.subr.bf16.mxu0 %v666_v16 }
  0x41   : > { %537 = vmatpush3.bf16.msra.mxu0 %v608_v23 }
  0x42   : > { %538 = vmatprep.subr.bf16.mxu0 %v666_v16 }
  0x45   : > { %539 = vmatpush3.bf16.msra.mxu0 %v609_v24 }
  0x48   : > { %541 = vmatmul.mubr.bf16.vlgmr.msra.gmra.mrb[0].mxu0 %v287_v25 }
 0x11b   : > { %v386_v26 = vpop.f32.mrb[0].mxu0 }
 0x11c   : > { %392 = vst [vmem:[%s285_s25] sm:$0xff] %v386_v26  ;;  %v542_v27 = vpop.f32.mrb[1].mxu0 }
 0x11d   : > { %v389_v28 = vpop.f32.mrb[2].mxu0 }
 0x11e   : > { %v543_v29 = vpop.f32.mrb[3].mxu0 }
 0x11f PF: > { %s12_s15 = sadd.s32 1, %s664_s15   ;;  %s798_s9 = smov %s644_s10 }
 0x120   : > { %p9_p12 = scmp.ge.s32.totalorder %s12_s15, 6   ;;  %s799_s10 = smov %s734_s22 }
 0x121   : > { %s800_s11 = smov %s656_s13  ;;  %s801_s12 = smov %s660_s14 }
 0x122   : > { %s802_s13 = smov %s805_s16  ;;  %s803_s14 = smov %s809_s17 }
 0x123   :  { %11 = sbr.rel (!%p9_p12) target bundleno = 4 (0x4), region = 107 }

</bundles_post_ra>
